<compile_context>
chip_gen: v7x
topology: tpu7x:2x2x1
jax: 0.10.0
libtpu: 0.0.40
codegen_flags: <defaults>
</compile_context>

<pallas_src>
import math
from functools import partial

import jax
import jax.numpy as jnp
from jax.experimental import pallas as pl
from jax.experimental.pallas import tpu as pltpu

CNUM = 64
# TODO(synk): CRFill's dis_conv uses a bare F.leaky_relu (PyTorch default slope 0.01);
# verify against the actual repo if exact numerics matter (some DeepFill variants use 0.2).
LEAKY_SLOPE = 0.01


def _leaky(x):
    return jnp.where(x >= 0.0, x, LEAKY_SLOPE * x)


# --------------------------------------------------------------------------------- kernels
def _gemm_bias_act_kernel(a_ref, w_ref, b_ref, o_ref, *, apply_act):
    """Plain GEMM + bias + LeakyReLU (used for conv1's im2col path).

    a_ref: (M, K) bf16    w_ref: (K, TC) bf16    b_ref: (1, TC) f32    o_ref: (M, TC) bf16
    """
    out = jnp.dot(a_ref[...], w_ref[...], preferred_element_type=jnp.float32)
    out = out + b_ref[...]
    if apply_act:
        out = _leaky(out)
    o_ref[...] = out.astype(o_ref.dtype)


def _s2d_conv_kernel(y_ref, w_ref, b_ref, o_ref, *, wop2, apply_act):
    """5x5/stride-2 conv as a VALID 3x3 conv over the 2x2 space-to-depth input, with the
    batch and padded spatial dims folded into M and each tap a contiguous row slice.

    y_ref: (Lin, 4*Cin) bf16   flattened (B, Ho+2, Wo+2, 4Cin) + tail zero rows
    w_ref: (3, 3, 4*Cin, TC) bf16
    b_ref: (1, TC) f32
    o_ref: (L, TC) bf16        L = B*(Ho+2)*(Wo+2); rows with ow>=Wo or oh>=Ho are junk
    """
    m, _tc = o_ref.shape
    acc = None
    for dh in range(3):
        for dw in range(3):
            t = dh * wop2 + dw                       # static contiguous offset
            tap = y_ref[pl.ds(t, m), :]              # (m, 4Cin) bf16, unit stride
            d = jnp.dot(tap, w_ref[dh, dw], preferred_element_type=jnp.float32)
            acc = d if acc is None else acc + d      # init from first dot (no zeros pass)
    out = acc + b_ref[...]
    if apply_act:
        out = _leaky(out)
    o_ref[...] = out.astype(o_ref.dtype)


# -------------------------------------------------------------------------------- wrappers
def _pad_s2d(x_nhwc):
    """(B, H, W, C) -> (B, Ho+2, Wo+2, 4C) bf16 space-to-depth of the zero-padded input."""
    B, H, W, C = x_nhwc.shape
    Ho, Wo = (H + 1) // 2, (W + 1) // 2
    Hp, Wp = 2 * (Ho + 2), 2 * (Wo + 2)
    xp = jnp.pad(x_nhwc, ((0, 0), (2, Hp - H - 2), (2, Wp - W - 2), (0, 0)))
    y = xp.reshape(B, Ho + 2, 2, Wo + 2, 2, C).transpose(0, 1, 3, 2, 4, 5)
    return y.reshape(B, Ho + 2, Wo + 2, 4 * C).astype(jnp.bfloat16), Ho, Wo


def sn_conv_first(x_nhwc, w_s2d, bias, *, apply_act=True):
    """conv1: Cin=4 -> C4=16 is too narrow for the MXU per tap, so build a full (tiny)
    im2col and run one GEMM with K = 9*16 = 144."""
    B = x_nhwc.shape[0]
    Cout = w_s2d.shape[-1]
    y, Ho, Wo = _pad_s2d(x_nhwc)
    C4 = y.shape[-1]
    taps = [y[:, dh:dh + Ho, dw:dw + Wo, :] for dh in range(3) for dw in range(3)]
    a = jnp.concatenate(taps, axis=-1).reshape(B * Ho * Wo, 9 * C4)     # bf16, a few KiB
    w = w_s2d.reshape(9 * C4, Cout)
    b2d = bias.reshape(1, Cout).astype(jnp.float32)
    M = B * Ho * Wo

    out = pl.pallas_call(
        partial(_gemm_bias_act_kernel, apply_act=apply_act),
        out_shape=jax.ShapeDtypeStruct((M, Cout), jnp.bfloat16),
        grid=(1,),
        in_specs=[
            pl.BlockSpec((M, 9 * C4), lambda ct: (0, 0)),
            pl.BlockSpec((9 * C4, Cout), lambda ct: (0, 0)),
            pl.BlockSpec((1, Cout), lambda ct: (0, 0)),
        ],
        out_specs=pl.BlockSpec((M, Cout), lambda ct: (0, 0)),
        compiler_params=pltpu.CompilerParams(dimension_semantics=("arbitrary",)),
    )(a, w, b2d)

    return out.reshape(B, Ho, Wo, Cout)


def sn_conv_s2d(x_nhwc, w_s2d, bias, *, apply_act=True, cout_tile=256):
    """Conv2d(Cin, Cout, 5, stride=2, padding=2) + LeakyReLU, batch folded into M.

    x_nhwc: (B, H, W, Cin) (any float dtype).  w_s2d: (3, 3, 4*Cin, Cout) bf16.
    bias: (Cout,) f32.  Returns (B, Ho, Wo, Cout) bf16.
    """
    B, H, W, Cin = x_nhwc.shape
    Cout = w_s2d.shape[-1]
    y, Ho, Wo = _pad_s2d(x_nhwc)                  # (B, Ho+2, Wo+2, 4Cin) bf16
    C4 = 4 * Cin
    hp2, wp2 = Ho + 2, Wo + 2

    # Flatten batch + padded spatial into rows; add a zero tail so every contiguous tap
    # slice (offset up to 2*wp2 + 2) stays in bounds for every output row.
    L = B * hp2 * wp2
    tail = 2 * wp2 + 2
    Lin = -(-(L + tail) // 8) * 8
    y_flat = jnp.pad(y.reshape(L, C4), ((0, Lin - L), (0, 0)))

    tc = min(Cout, cout_tile)
    assert Cout % tc == 0
    nct = Cout // tc                              # cout_tile=128 on v7x -> 2-way parallel
    b2d = bias.reshape(1, Cout).astype(jnp.float32)

    out = pl.pallas_call(
        partial(_s2d_conv_kernel, wop2=wp2, apply_act=apply_act),
        out_shape=jax.ShapeDtypeStruct((L, Cout), jnp.bfloat16),
        grid=(nct,),
        in_specs=[
            pl.BlockSpec((Lin, C4), lambda ct: (0, 0)),          # activation resident ∀ ct
            pl.BlockSpec((3, 3, C4, tc), lambda ct: (0, 0, 0, ct)),
            pl.BlockSpec((1, tc), lambda ct: (0, ct)),
        ],
        out_specs=pl.BlockSpec((L, tc), lambda ct: (0, ct)),
        compiler_params=pltpu.CompilerParams(dimension_semantics=("parallel",)),
    )(y_flat, w_s2d, b2d)

    # Drop the padded-width / padded-height junk rows.
    return out.reshape(B, hp2, wp2, Cout)[:, :Ho, :Wo, :]


# ------------------------------------------------------------------------ weight preparation
def _spectral_normalize(w_hwio, u, eps=1e-12):
    """PyTorch-style spectral_norm forward (one power iteration): W / sigma_max(W)."""
    kh, kw, cin, cout = w_hwio.shape
    wmat = w_hwio.reshape(kh * kw * cin, cout).T          # (Cout, K)
    v = wmat.T @ u
    v = v / (jnp.linalg.norm(v) + eps)
    u2 = wmat @ v
    u2 = u2 / (jnp.linalg.norm(u2) + eps)
    sigma = jnp.dot(u2, wmat @ v)
    return w_hwio / sigma


def _space_to_depth_weight(w_hwio):
    """(5,5,Cin,Cout) -> (3,3,4*Cin,Cout) matching the 2x2 space-to-depth channel order."""
    k = w_hwio.shape[0]
    cin, cout = w_hwio.shape[2], w_hwio.shape[3]
    assert k == 5
    wq = jnp.zeros((3, 3, 2, 2, cin, cout), w_hwio.dtype)
    for dh in range(3):
        for rh in range(2):
            kh = 2 * dh + rh
            if kh >= k:
                continue
            for dw in range(3):
                for rw in range(2):
                    kw = 2 * dw + rw
                    if kw >= k:
                        continue
                    wq = wq.at[dh, dw, rh, rw].set(w_hwio[kh, kw])
    return wq.reshape(3, 3, 4 * cin, cout)


def init_params(seed=0):
    cfgs = [("conv1", 4, CNUM), ("conv2", CNUM, 2 * CNUM), ("conv3", 2 * CNUM, 4 * CNUM),
            ("conv4", 4 * CNUM, 4 * CNUM), ("conv5", 4 * CNUM, 4 * CNUM),
            ("conv6", 4 * CNUM, 4 * CNUM)]
    base = jax.random.PRNGKey(seed)
    params = {}
    for i, (name, cin, cout) in enumerate(cfgs):
        kw_, kb_, ku_ = jax.random.split(jax.random.fold_in(base, i), 3)
        fan_in = 5 * 5 * cin
        params[name] = dict(
            w=jax.random.normal(kw_, (5, 5, cin, cout), jnp.float32) / math.sqrt(fan_in),
            b=0.1 * jax.random.normal(kb_, (cout,), jnp.float32),
            u=jax.random.normal(ku_, (cout,), jnp.float32))
    return params, [c[0] for c in cfgs]


def prepare_params(params):
    """Spectral-normalize + rearrange each 5x5 stride-2 weight to its (3,3,4Cin,Cout) bf16 form.
    Note: the updated power-iteration vector u is not persisted (single-forward use)."""
    prepped = {}
    for name, p in params.items():
        w_sn = _spectral_normalize(p["w"], p["u"])
        prepped[name] = (_space_to_depth_weight(w_sn).astype(jnp.bfloat16),
                         p["b"].astype(jnp.float32))
    return prepped


# ------------------------------------------------------------------------------------ forward
def forward(prepped, layer_names, x_nchw, mask_nchw=None):
    B, _, H, W = x_nchw.shape
    ones_x = jnp.ones((B, 1, H, W), x_nchw.dtype) if mask_nchw is None else mask_nchw
    h = jnp.concatenate([x_nchw, ones_x], axis=1)             # NCHW concat (glue)
    h = jnp.transpose(h, (0, 2, 3, 1)).astype(jnp.float32)    # -> NHWC
    for i, name in enumerate(layer_names):
        w_s2d, b = prepped[name]
        if i == 0:
            h = sn_conv_first(h, w_s2d, b, apply_act=True)
        else:
            h = sn_conv_s2d(h, w_s2d, b, apply_act=True)      # bf16 activations between layers
    return jnp.transpose(h, (0, 3, 1, 2)).astype(jnp.float32)  # -> NCHW, f32 final


# --------------------------------------------------------------------------------------- main
if __name__ == "__main__":
    B, H, W = 2, 16, 16
    key = jax.random.PRNGKey(0)
    kx, km = jax.random.split(key)
    x = jax.random.normal(kx, (B, 3, H, W), jnp.float32)
    mask = (jax.random.uniform(km, (B, 1, H, W)) > 0.5).astype(jnp.float32)

    params, layer_names = init_params(seed=0)
    prepped = prepare_params(params)

    fwd = jax.jit(partial(forward, prepped, layer_names))
    out = fwd(x, mask)
    jax.block_until_ready(out)

    # 6 stride-2 convs: 16 -> 8 -> 4 -> 2 -> 1 -> 1 -> 1
    assert out.shape == (B, 4 * CNUM, 1, 1), out.shape
    assert bool(jnp.isfinite(out).all())

    # Pure-JAX reference with identical dtype flow (bf16 GEMM operands, f32 bias+LeakyReLU,
    # bf16 layer outputs) — validates the conv decomposition, fusion and layer plumbing.
    def reference(xr, mr):
        h = jnp.concatenate([xr, mr], axis=1)
        h = jnp.transpose(h, (0, 2, 3, 1)).astype(jnp.float32)
        for name in layer_names:
            w_sn = _spectral_normalize(params[name]["w"], params[name]["u"])
            z = jax.lax.conv_general_dilated(
                h.astype(jnp.bfloat16), w_sn.astype(jnp.bfloat16),
                window_strides=(2, 2), padding=((2, 2), (2, 2)),
                dimension_numbers=("NHWC", "HWIO", "NHWC"),
                preferred_element_type=jnp.float32)
            z = z + params[name]["b"]
            z = jnp.where(z >= 0.0, z, LEAKY_SLOPE * z)
            h = z.astype(jnp.bfloat16)            # mirror the kernels' bf16 layer outputs
        return jnp.transpose(h, (0, 3, 1, 2)).astype(jnp.float32)

    ref = jax.jit(reference)(x, mask)
    jax.block_until_ready(ref)
    rel_err = float(jnp.max(jnp.abs(out - ref)) / (jnp.max(jnp.abs(ref)) + 1e-8))
    assert rel_err < 1e-2, f"mismatch vs reference: rel_err={rel_err}"

    print("KERNEL_OK")
</pallas_src>

<mosaic_0001>
module attributes {stable_mosaic.version = 11 : i64} {
  func.func @_gemm_bias_act_kernel(%arg0: i32, %arg1: memref<128x144xbf16, #tpu.memory_space<vmem>>, %arg2: memref<144x64xbf16, #tpu.memory_space<vmem>>, %arg3: memref<1x64xf32, #tpu.memory_space<vmem>>, %arg4: memref<128x64xbf16, #tpu.memory_space<vmem>>) attributes {dimension_semantics = [#tpu.dimension_semantics<arbitrary>], iteration_bounds = array<i64: 1>, scalar_prefetch = 0 : i64, scratch_operands = 0 : i64, tpu.core_type = #tpu.core_type<tc>, window_params = [{pipeline_mode = #tpu.pipeline_mode<synchronous>, transform_indices = @transform_0, window_bounds = array<i64: 128, 144>}, {pipeline_mode = #tpu.pipeline_mode<synchronous>, transform_indices = @transform_1, window_bounds = array<i64: 144, 64>}, {pipeline_mode = #tpu.pipeline_mode<synchronous>, transform_indices = @transform_2, window_bounds = array<i64: 1, 64>}, {pipeline_mode = #tpu.pipeline_mode<synchronous>, transform_indices = @transform_3, window_bounds = array<i64: 128, 64>}]} {
    %c0 = arith.constant 0 : index
    %c0_0 = arith.constant 0 : index
    %0 = vector.load %arg1[%c0, %c0_0] : memref<128x144xbf16, #tpu.memory_space<vmem>>, vector<128x144xbf16>
    %c0_1 = arith.constant 0 : index
    %c0_2 = arith.constant 0 : index
    %1 = vector.load %arg2[%c0_1, %c0_2] : memref<144x64xbf16, #tpu.memory_space<vmem>>, vector<144x64xbf16>
    %cst = arith.constant dense<0.000000e+00> : vector<128x64xf32>
    %2 = tpu.matmul %0, %1, %cst {dimension_numbers = #tpu.dot_dimension_numbers<[1], [0], [0], [1], [0, 0, 1, 1], [], []>} : vector<128x144xbf16>, vector<144x64xbf16>, vector<128x64xf32> -> vector<128x64xf32>
    %c0_3 = arith.constant 0 : index
    %c0_4 = arith.constant 0 : index
    %3 = vector.load %arg3[%c0_3, %c0_4] : memref<1x64xf32, #tpu.memory_space<vmem>>, vector<1x64xf32>
    %4 = vector.broadcast %3 : vector<1x64xf32> to vector<128x64xf32>
    %5 = arith.addf %2, %4 : vector<128x64xf32>
    %cst_5 = arith.constant 0.000000e+00 : f32
    %6 = vector.broadcast %cst_5 : f32 to vector<128x64xf32>
    %7 = arith.cmpf oge, %5, %6 : vector<128x64xf32>
    %cst_6 = arith.constant 0.00999999977 : f32
    %8 = vector.broadcast %cst_6 : f32 to vector<128x64xf32>
    %9 = arith.mulf %8, %5 : vector<128x64xf32>
    %10 = arith.select %7, %5, %9 : vector<128x64xi1>, vector<128x64xf32>
    %11 = arith.truncf %10 : vector<128x64xf32> to vector<128x64xbf16>
    %c0_7 = arith.constant 0 : index
    %c0_8 = arith.constant 0 : index
    %12 = vector.load %arg4[%c0_7, %c0_8] : memref<128x64xbf16, #tpu.memory_space<vmem>>, vector<128x64xbf16>
    tpu.vector_store %arg4[%c0_7, %c0_8], %11 {strides = array<i32>} : memref<128x64xbf16, #tpu.memory_space<vmem>>, vector<128x64xbf16>,
    return
  }
  func.func @transform_0(%arg0: i32) -> (i32, i32) {
    %c0_i32 = arith.constant 0 : i32
    %c0_i32_0 = arith.constant 0 : i32
    %c0_i32_1 = arith.constant 0 : i32
    return %c0_i32, %c0_i32_0 : i32, i32
  }
  func.func @transform_1(%arg0: i32) -> (i32, i32) {
    %c0_i32 = arith.constant 0 : i32
    %c0_i32_0 = arith.constant 0 : i32
    %c0_i32_1 = arith.constant 0 : i32
    return %c0_i32, %c0_i32_0 : i32, i32
  }
  func.func @transform_2(%arg0: i32) -> (i32, i32) {
    %c0_i32 = arith.constant 0 : i32
    %c0_i32_0 = arith.constant 0 : i32
    %c0_i32_1 = arith.constant 0 : i32
    return %c0_i32, %c0_i32_0 : i32, i32
  }
  func.func @transform_3(%arg0: i32) -> (i32, i32) {
    %c0_i32 = arith.constant 0 : i32
    %c0_i32_0 = arith.constant 0 : i32
    %c0_i32_1 = arith.constant 0 : i32
    return %c0_i32, %c0_i32_0 : i32, i32
  }
}

module attributes {stable_mosaic.version = 11 : i64} {
  func.func @_s2d_conv_kernel(%arg0: i32, %arg1: memref<88x256xbf16, #tpu.memory_space<vmem>>, %arg2: memref<3x3x256x128xbf16, #tpu.memory_space<vmem>>, %arg3: memref<1x128xf32, #tpu.memory_space<vmem>>, %arg4: memref<72x128xbf16, #tpu.memory_space<vmem>>) attributes {dimension_semantics = [#tpu.dimension_semantics<parallel>], iteration_bounds = array<i64: 1>, scalar_prefetch = 0 : i64, scratch_operands = 0 : i64, tpu.core_type = #tpu.core_type<tc>, window_params = [{pipeline_mode = #tpu.pipeline_mode<synchronous>, transform_indices = @transform_0, window_bounds = array<i64: 88, 256>}, {transform_indices = @transform_1, window_bounds = array<i64: 3, 3, 256, 128>}, {transform_indices = @transform_2, window_bounds = array<i64: 1, 128>}, {transform_indices = @transform_3, window_bounds = array<i64: 72, 128>}]} {
    %c0 = arith.constant 0 : index
    %c0_0 = arith.constant 0 : index
    %0 = vector.load %arg1[%c0, %c0_0] : memref<88x256xbf16, #tpu.memory_space<vmem>>, vector<72x256xbf16>
    %c0_1 = arith.constant 0 : index
    %c0_2 = arith.constant 0 : index
    %c0_3 = arith.constant 0 : index
    %c0_4 = arith.constant 0 : index
    %1 = vector.load %arg2[%c0_1, %c0_2, %c0_3, %c0_4] : memref<3x3x256x128xbf16, #tpu.memory_space<vmem>>, vector<1x1x256x128xbf16>
    %2 = vector.shape_cast %1 : vector<1x1x256x128xbf16> to vector<256x128xbf16>
    %cst = arith.constant dense<0.000000e+00> : vector<72x128xf32>
    %3 = tpu.matmul %0, %2, %cst {dimension_numbers = #tpu.dot_dimension_numbers<[1], [0], [0], [1], [0, 0, 1, 1], [], []>} : vector<72x256xbf16>, vector<256x128xbf16>, vector<72x128xf32> -> vector<72x128xf32>
    %c1 = arith.constant 1 : index
    %c0_5 = arith.constant 0 : index
    %4 = vector.load %arg1[%c1, %c0_5] : memref<88x256xbf16, #tpu.memory_space<vmem>>, vector<72x256xbf16>
    %c0_6 = arith.constant 0 : index
    %c1_7 = arith.constant 1 : index
    %c0_8 = arith.constant 0 : index
    %c0_9 = arith.constant 0 : index
    %5 = vector.load %arg2[%c0_6, %c1_7, %c0_8, %c0_9] : memref<3x3x256x128xbf16, #tpu.memory_space<vmem>>, vector<1x1x256x128xbf16>
    %6 = vector.shape_cast %5 : vector<1x1x256x128xbf16> to vector<256x128xbf16>
    %cst_10 = arith.constant dense<0.000000e+00> : vector<72x128xf32>
    %7 = tpu.matmul %4, %6, %cst_10 {dimension_numbers = #tpu.dot_dimension_numbers<[1], [0], [0], [1], [0, 0, 1, 1], [], []>} : vector<72x256xbf16>, vector<256x128xbf16>, vector<72x128xf32> -> vector<72x128xf32>
    %8 = arith.addf %3, %7 : vector<72x128xf32>
    %c2 = arith.constant 2 : index
    %c0_11 = arith.constant 0 : index
    %9 = vector.load %arg1[%c2, %c0_11] : memref<88x256xbf16, #tpu.memory_space<vmem>>, vector<72x256xbf16>
    %c0_12 = arith.constant 0 : index
    %c2_13 = arith.constant 2 : index
    %c0_14 = arith.constant 0 : index
    %c0_15 = arith.constant 0 : index
    %10 = vector.load %arg2[%c0_12, %c2_13, %c0_14, %c0_15] : memref<3x3x256x128xbf16, #tpu.memory_space<vmem>>, vector<1x1x256x128xbf16>
    %11 = vector.shape_cast %10 : vector<1x1x256x128xbf16> to vector<256x128xbf16>
    %cst_16 = arith.constant dense<0.000000e+00> : vector<72x128xf32>
    %12 = tpu.matmul %9, %11, %cst_16 {dimension_numbers = #tpu.dot_dimension_numbers<[1], [0], [0], [1], [0, 0, 1, 1], [], []>} : vector<72x256xbf16>, vector<256x128xbf16>, vector<72x128xf32> -> vector<72x128xf32>
    %13 = arith.addf %8, %12 : vector<72x128xf32>
    %c6 = arith.constant 6 : index
    %c0_17 = arith.constant 0 : index
    %14 = vector.load %arg1[%c6, %c0_17] : memref<88x256xbf16, #tpu.memory_space<vmem>>, vector<72x256xbf16>
    %c1_18 = arith.constant 1 : index
    %c0_19 = arith.constant 0 : index
    %c0_20 = arith.constant 0 : index
    %c0_21 = arith.constant 0 : index
    %15 = vector.load %arg2[%c1_18, %c0_19, %c0_20, %c0_21] : memref<3x3x256x128xbf16, #tpu.memory_space<vmem>>, vector<1x1x256x128xbf16>
    %16 = vector.shape_cast %15 : vector<1x1x256x128xbf16> to vector<256x128xbf16>
    %cst_22 = arith.constant dense<0.000000e+00> : vector<72x128xf32>
    %17 = tpu.matmul %14, %16, %cst_22 {dimension_numbers = #tpu.dot_dimension_numbers<[1], [0], [0], [1], [0, 0, 1, 1], [], []>} : vector<72x256xbf16>, vector<256x128xbf16>, vector<72x128xf32> -> vector<72x128xf32>
    %18 = arith.addf %13, %17 : vector<72x128xf32>
    %c7 = arith.constant 7 : index
    %c0_23 = arith.constant 0 : index
    %19 = vector.load %arg1[%c7, %c0_23] : memref<88x256xbf16, #tpu.memory_space<vmem>>, vector<72x256xbf16>
    %c1_24 = arith.constant 1 : index
    %c1_25 = arith.constant 1 : index
    %c0_26 = arith.constant 0 : index
    %c0_27 = arith.constant 0 : index
    %20 = vector.load %arg2[%c1_24, %c1_25, %c0_26, %c0_27] : memref<3x3x256x128xbf16, #tpu.memory_space<vmem>>, vector<1x1x256x128xbf16>
    %21 = vector.shape_cast %20 : vector<1x1x256x128xbf16> to vector<256x128xbf16>
    %cst_28 = arith.constant dense<0.000000e+00> : vector<72x128xf32>
    %22 = tpu.matmul %19, %21, %cst_28 {dimension_numbers = #tpu.dot_dimension_numbers<[1], [0], [0], [1], [0, 0, 1, 1], [], []>} : vector<72x256xbf16>, vector<256x128xbf16>, vector<72x128xf32> -> vector<72x128xf32>
    %23 = arith.addf %18, %22 : vector<72x128xf32>
    %c8 = arith.constant 8 : index
    %c0_29 = arith.constant 0 : index
    %24 = vector.load %arg1[%c8, %c0_29] : memref<88x256xbf16, #tpu.memory_space<vmem>>, vector<72x256xbf16>
    %c1_30 = arith.constant 1 : index
    %c2_31 = arith.constant 2 : index
    %c0_32 = arith.constant 0 : index
    %c0_33 = arith.constant 0 : index
    %25 = vector.load %arg2[%c1_30, %c2_31, %c0_32, %c0_33] : memref<3x3x256x128xbf16, #tpu.memory_space<vmem>>, vector<1x1x256x128xbf16>
    %26 = vector.shape_cast %25 : vector<1x1x256x128xbf16> to vector<256x128xbf16>
    %cst_34 = arith.constant dense<0.000000e+00> : vector<72x128xf32>
    %27 = tpu.matmul %24, %26, %cst_34 {dimension_numbers = #tpu.dot_dimension_numbers<[1], [0], [0], [1], [0, 0, 1, 1], [], []>} : vector<72x256xbf16>, vector<256x128xbf16>, vector<72x128xf32> -> vector<72x128xf32>
    %28 = arith.addf %23, %27 : vector<72x128xf32>
    %c12 = arith.constant 12 : index
    %c0_35 = arith.constant 0 : index
    %29 = vector.load %arg1[%c12, %c0_35] : memref<88x256xbf16, #tpu.memory_space<vmem>>, vector<72x256xbf16>
    %c2_36 = arith.constant 2 : index
    %c0_37 = arith.constant 0 : index
    %c0_38 = arith.constant 0 : index
    %c0_39 = arith.constant 0 : index
    %30 = vector.load %arg2[%c2_36, %c0_37, %c0_38, %c0_39] : memref<3x3x256x128xbf16, #tpu.memory_space<vmem>>, vector<1x1x256x128xbf16>
    %31 = vector.shape_cast %30 : vector<1x1x256x128xbf16> to vector<256x128xbf16>
    %cst_40 = arith.constant dense<0.000000e+00> : vector<72x128xf32>
    %32 = tpu.matmul %29, %31, %cst_40 {dimension_numbers = #tpu.dot_dimension_numbers<[1], [0], [0], [1], [0, 0, 1, 1], [], []>} : vector<72x256xbf16>, vector<256x128xbf16>, vector<72x128xf32> -> vector<72x128xf32>
    %33 = arith.addf %28, %32 : vector<72x128xf32>
    %c13 = arith.constant 13 : index
    %c0_41 = arith.constant 0 : index
    %34 = vector.load %arg1[%c13, %c0_41] : memref<88x256xbf16, #tpu.memory_space<vmem>>, vector<72x256xbf16>
    %c2_42 = arith.constant 2 : index
    %c1_43 = arith.constant 1 : index
    %c0_44 = arith.constant 0 : index
    %c0_45 = arith.constant 0 : index
    %35 = vector.load %arg2[%c2_42, %c1_43, %c0_44, %c0_45] : memref<3x3x256x128xbf16, #tpu.memory_space<vmem>>, vector<1x1x256x128xbf16>
    %36 = vector.shape_cast %35 : vector<1x1x256x128xbf16> to vector<256x128xbf16>
    %cst_46 = arith.constant dense<0.000000e+00> : vector<72x128xf32>
    %37 = tpu.matmul %34, %36, %cst_46 {dimension_numbers = #tpu.dot_dimension_numbers<[1], [0], [0], [1], [0, 0, 1, 1], [], []>} : vector<72x256xbf16>, vector<256x128xbf16>, vector<72x128xf32> -> vector<72x128xf32>
    %38 = arith.addf %33, %37 : vector<72x128xf32>
    %c14 = arith.constant 14 : index
    %c0_47 = arith.constant 0 : index
    %39 = vector.load %arg1[%c14, %c0_47] : memref<88x256xbf16, #tpu.memory_space<vmem>>, vector<72x256xbf16>
    %c2_48 = arith.constant 2 : index
    %c2_49 = arith.constant 2 : index
    %c0_50 = arith.constant 0 : index
    %c0_51 = arith.constant 0 : index
    %40 = vector.load %arg2[%c2_48, %c2_49, %c0_50, %c0_51] : memref<3x3x256x128xbf16, #tpu.memory_space<vmem>>, vector<1x1x256x128xbf16>
    %41 = vector.shape_cast %40 : vector<1x1x256x128xbf16> to vector<256x128xbf16>
    %cst_52 = arith.constant dense<0.000000e+00> : vector<72x128xf32>
    %42 = tpu.matmul %39, %41, %cst_52 {dimension_numbers = #tpu.dot_dimension_numbers<[1], [0], [0], [1], [0, 0, 1, 1], [], []>} : vector<72x256xbf16>, vector<256x128xbf16>, vector<72x128xf32> -> vector<72x128xf32>
    %43 = arith.addf %38, %42 : vector<72x128xf32>
    %c0_53 = arith.constant 0 : index
    %c0_54 = arith.constant 0 : index
    %44 = vector.load %arg3[%c0_53, %c0_54] : memref<1x128xf32, #tpu.memory_space<vmem>>, vector<1x128xf32>
    %45 = vector.broadcast %44 : vector<1x128xf32> to vector<72x128xf32>
    %46 = arith.addf %43, %45 : vector<72x128xf32>
    %cst_55 = arith.constant 0.000000e+00 : f32
    %47 = vector.broadcast %cst_55 : f32 to vector<72x128xf32>
    %48 = arith.cmpf oge, %46, %47 : vector<72x128xf32>
    %cst_56 = arith.constant 0.00999999977 : f32
    %49 = vector.broadcast %cst_56 : f32 to vector<72x128xf32>
    %50 = arith.mulf %49, %46 : vector<72x128xf32>
    %51 = arith.select %48, %46, %50 : vector<72x128xi1>, vector<72x128xf32>
    %52 = arith.truncf %51 : vector<72x128xf32> to vector<72x128xbf16>
    %c0_57 = arith.constant 0 : index
    %c0_58 = arith.constant 0 : index
    %53 = vector.load %arg4[%c0_57, %c0_58] : memref<72x128xbf16, #tpu.memory_space<vmem>>, vector<72x128xbf16>
    tpu.vector_store %arg4[%c0_57, %c0_58], %52 {strides = array<i32>} : memref<72x128xbf16, #tpu.memory_space<vmem>>, vector<72x128xbf16>,
    return
  }
  func.func @transform_0(%arg0: i32) -> (i32, i32) {
    %c0_i32 = arith.constant 0 : i32
    %c0_i32_0 = arith.constant 0 : i32
    %c0_i32_1 = arith.constant 0 : i32
    return %c0_i32, %c0_i32_0 : i32, i32
  }
  func.func @transform_1(%arg0: i32) -> (i32, i32, i32, i32) {
    %c0_i32 = arith.constant 0 : i32
    %c0_i32_0 = arith.constant 0 : i32
    %c0_i32_1 = arith.constant 0 : i32
    %c0_i32_2 = arith.constant 0 : i32
    return %c0_i32, %c0_i32_0, %c0_i32_1, %arg0 : i32, i32, i32, i32
  }
  func.func @transform_2(%arg0: i32) -> (i32, i32) {
    %c0_i32 = arith.constant 0 : i32
    %c0_i32_0 = arith.constant 0 : i32
    return %c0_i32, %arg0 : i32, i32
  }
  func.func @transform_3(%arg0: i32) -> (i32, i32) {
    %c0_i32 = arith.constant 0 : i32
    %c0_i32_0 = arith.constant 0 : i32
    return %c0_i32, %arg0 : i32, i32
  }
}

module attributes {stable_mosaic.version = 11 : i64} {
  func.func @_s2d_conv_kernel(%arg0: i32, %arg1: memref<48x512xbf16, #tpu.memory_space<vmem>>, %arg2: memref<3x3x512x256xbf16, #tpu.memory_space<vmem>>, %arg3: memref<1x256xf32, #tpu.memory_space<vmem>>, %arg4: memref<32x256xbf16, #tpu.memory_space<vmem>>) attributes {dimension_semantics = [#tpu.dimension_semantics<parallel>], iteration_bounds = array<i64: 1>, scalar_prefetch = 0 : i64, scratch_operands = 0 : i64, tpu.core_type = #tpu.core_type<tc>, window_params = [{pipeline_mode = #tpu.pipeline_mode<synchronous>, transform_indices = @transform_0, window_bounds = array<i64: 48, 512>}, {transform_indices = @transform_1, window_bounds = array<i64: 3, 3, 512, 256>}, {transform_indices = @transform_2, window_bounds = array<i64: 1, 256>}, {transform_indices = @transform_3, window_bounds = array<i64: 32, 256>}]} {
    %c0 = arith.constant 0 : index
    %c0_0 = arith.constant 0 : index
    %0 = vector.load %arg1[%c0, %c0_0] : memref<48x512xbf16, #tpu.memory_space<vmem>>, vector<32x512xbf16>
    %c0_1 = arith.constant 0 : index
    %c0_2 = arith.constant 0 : index
    %c0_3 = arith.constant 0 : index
    %c0_4 = arith.constant 0 : index
    %1 = vector.load %arg2[%c0_1, %c0_2, %c0_3, %c0_4] : memref<3x3x512x256xbf16, #tpu.memory_space<vmem>>, vector<1x1x512x256xbf16>
    %2 = vector.shape_cast %1 : vector<1x1x512x256xbf16> to vector<512x256xbf16>
    %cst = arith.constant dense<0.000000e+00> : vector<32x256xf32>
    %3 = tpu.matmul %0, %2, %cst {dimension_numbers = #tpu.dot_dimension_numbers<[1], [0], [0], [1], [0, 0, 1, 1], [], []>} : vector<32x512xbf16>, vector<512x256xbf16>, vector<32x256xf32> -> vector<32x256xf32>
    %c1 = arith.constant 1 : index
    %c0_5 = arith.constant 0 : index
    %4 = vector.load %arg1[%c1, %c0_5] : memref<48x512xbf16, #tpu.memory_space<vmem>>, vector<32x512xbf16>
    %c0_6 = arith.constant 0 : index
    %c1_7 = arith.constant 1 : index
    %c0_8 = arith.constant 0 : index
    %c0_9 = arith.constant 0 : index
    %5 = vector.load %arg2[%c0_6, %c1_7, %c0_8, %c0_9] : memref<3x3x512x256xbf16, #tpu.memory_space<vmem>>, vector<1x1x512x256xbf16>
    %6 = vector.shape_cast %5 : vector<1x1x512x256xbf16> to vector<512x256xbf16>
    %cst_10 = arith.constant dense<0.000000e+00> : vector<32x256xf32>
    %7 = tpu.matmul %4, %6, %cst_10 {dimension_numbers = #tpu.dot_dimension_numbers<[1], [0], [0], [1], [0, 0, 1, 1], [], []>} : vector<32x512xbf16>, vector<512x256xbf16>, vector<32x256xf32> -> vector<32x256xf32>
    %8 = arith.addf %3, %7 : vector<32x256xf32>
    %c2 = arith.constant 2 : index
    %c0_11 = arith.constant 0 : index
    %9 = vector.load %arg1[%c2, %c0_11] : memref<48x512xbf16, #tpu.memory_space<vmem>>, vector<32x512xbf16>
    %c0_12 = arith.constant 0 : index
    %c2_13 = arith.constant 2 : index
    %c0_14 = arith.constant 0 : index
    %c0_15 = arith.constant 0 : index
    %10 = vector.load %arg2[%c0_12, %c2_13, %c0_14, %c0_15] : memref<3x3x512x256xbf16, #tpu.memory_space<vmem>>, vector<1x1x512x256xbf16>
    %11 = vector.shape_cast %10 : vector<1x1x512x256xbf16> to vector<512x256xbf16>
    %cst_16 = arith.constant dense<0.000000e+00> : vector<32x256xf32>
    %12 = tpu.matmul %9, %11, %cst_16 {dimension_numbers = #tpu.dot_dimension_numbers<[1], [0], [0], [1], [0, 0, 1, 1], [], []>} : vector<32x512xbf16>, vector<512x256xbf16>, vector<32x256xf32> -> vector<32x256xf32>
    %13 = arith.addf %8, %12 : vector<32x256xf32>
    %c4 = arith.constant 4 : index
    %c0_17 = arith.constant 0 : index
    %14 = vector.load %arg1[%c4, %c0_17] : memref<48x512xbf16, #tpu.memory_space<vmem>>, vector<32x512xbf16>
    %c1_18 = arith.constant 1 : index
    %c0_19 = arith.constant 0 : index
    %c0_20 = arith.constant 0 : index
    %c0_21 = arith.constant 0 : index
    %15 = vector.load %arg2[%c1_18, %c0_19, %c0_20, %c0_21] : memref<3x3x512x256xbf16, #tpu.memory_space<vmem>>, vector<1x1x512x256xbf16>
    %16 = vector.shape_cast %15 : vector<1x1x512x256xbf16> to vector<512x256xbf16>
    %cst_22 = arith.constant dense<0.000000e+00> : vector<32x256xf32>
    %17 = tpu.matmul %14, %16, %cst_22 {dimension_numbers = #tpu.dot_dimension_numbers<[1], [0], [0], [1], [0, 0, 1, 1], [], []>} : vector<32x512xbf16>, vector<512x256xbf16>, vector<32x256xf32> -> vector<32x256xf32>
    %18 = arith.addf %13, %17 : vector<32x256xf32>
    %c5 = arith.constant 5 : index
    %c0_23 = arith.constant 0 : index
    %19 = vector.load %arg1[%c5, %c0_23] : memref<48x512xbf16, #tpu.memory_space<vmem>>, vector<32x512xbf16>
    %c1_24 = arith.constant 1 : index
    %c1_25 = arith.constant 1 : index
    %c0_26 = arith.constant 0 : index
    %c0_27 = arith.constant 0 : index
    %20 = vector.load %arg2[%c1_24, %c1_25, %c0_26, %c0_27] : memref<3x3x512x256xbf16, #tpu.memory_space<vmem>>, vector<1x1x512x256xbf16>
    %21 = vector.shape_cast %20 : vector<1x1x512x256xbf16> to vector<512x256xbf16>
    %cst_28 = arith.constant dense<0.000000e+00> : vector<32x256xf32>
    %22 = tpu.matmul %19, %21, %cst_28 {dimension_numbers = #tpu.dot_dimension_numbers<[1], [0], [0], [1], [0, 0, 1, 1], [], []>} : vector<32x512xbf16>, vector<512x256xbf16>, vector<32x256xf32> -> vector<32x256xf32>
    %23 = arith.addf %18, %22 : vector<32x256xf32>
    %c6 = arith.constant 6 : index
    %c0_29 = arith.constant 0 : index
    %24 = vector.load %arg1[%c6, %c0_29] : memref<48x512xbf16, #tpu.memory_space<vmem>>, vector<32x512xbf16>
    %c1_30 = arith.constant 1 : index
    %c2_31 = arith.constant 2 : index
    %c0_32 = arith.constant 0 : index
    %c0_33 = arith.constant 0 : index
    %25 = vector.load %arg2[%c1_30, %c2_31, %c0_32, %c0_33] : memref<3x3x512x256xbf16, #tpu.memory_space<vmem>>, vector<1x1x512x256xbf16>
    %26 = vector.shape_cast %25 : vector<1x1x512x256xbf16> to vector<512x256xbf16>
    %cst_34 = arith.constant dense<0.000000e+00> : vector<32x256xf32>
    %27 = tpu.matmul %24, %26, %cst_34 {dimension_numbers = #tpu.dot_dimension_numbers<[1], [0], [0], [1], [0, 0, 1, 1], [], []>} : vector<32x512xbf16>, vector<512x256xbf16>, vector<32x256xf32> -> vector<32x256xf32>
    %28 = arith.addf %23, %27 : vector<32x256xf32>
    %c8 = arith.constant 8 : index
    %c0_35 = arith.constant 0 : index
    %29 = vector.load %arg1[%c8, %c0_35] : memref<48x512xbf16, #tpu.memory_space<vmem>>, vector<32x512xbf16>
    %c2_36 = arith.constant 2 : index
    %c0_37 = arith.constant 0 : index
    %c0_38 = arith.constant 0 : index
    %c0_39 = arith.constant 0 : index
    %30 = vector.load %arg2[%c2_36, %c0_37, %c0_38, %c0_39] : memref<3x3x512x256xbf16, #tpu.memory_space<vmem>>, vector<1x1x512x256xbf16>
    %31 = vector.shape_cast %30 : vector<1x1x512x256xbf16> to vector<512x256xbf16>
    %cst_40 = arith.constant dense<0.000000e+00> : vector<32x256xf32>
    %32 = tpu.matmul %29, %31, %cst_40 {dimension_numbers = #tpu.dot_dimension_numbers<[1], [0], [0], [1], [0, 0, 1, 1], [], []>} : vector<32x512xbf16>, vector<512x256xbf16>, vector<32x256xf32> -> vector<32x256xf32>
    %33 = arith.addf %28, %32 : vector<32x256xf32>
    %c9 = arith.constant 9 : index
    %c0_41 = arith.constant 0 : index
    %34 = vector.load %arg1[%c9, %c0_41] : memref<48x512xbf16, #tpu.memory_space<vmem>>, vector<32x512xbf16>
    %c2_42 = arith.constant 2 : index
    %c1_43 = arith.constant 1 : index
    %c0_44 = arith.constant 0 : index
    %c0_45 = arith.constant 0 : index
    %35 = vector.load %arg2[%c2_42, %c1_43, %c0_44, %c0_45] : memref<3x3x512x256xbf16, #tpu.memory_space<vmem>>, vector<1x1x512x256xbf16>
    %36 = vector.shape_cast %35 : vector<1x1x512x256xbf16> to vector<512x256xbf16>
    %cst_46 = arith.constant dense<0.000000e+00> : vector<32x256xf32>
    %37 = tpu.matmul %34, %36, %cst_46 {dimension_numbers = #tpu.dot_dimension_numbers<[1], [0], [0], [1], [0, 0, 1, 1], [], []>} : vector<32x512xbf16>, vector<512x256xbf16>, vector<32x256xf32> -> vector<32x256xf32>
    %38 = arith.addf %33, %37 : vector<32x256xf32>
    %c10 = arith.constant 10 : index
    %c0_47 = arith.constant 0 : index
    %39 = vector.load %arg1[%c10, %c0_47] : memref<48x512xbf16, #tpu.memory_space<vmem>>, vector<32x512xbf16>
    %c2_48 = arith.constant 2 : index
    %c2_49 = arith.constant 2 : index
    %c0_50 = arith.constant 0 : index
    %c0_51 = arith.constant 0 : index
    %40 = vector.load %arg2[%c2_48, %c2_49, %c0_50, %c0_51] : memref<3x3x512x256xbf16, #tpu.memory_space<vmem>>, vector<1x1x512x256xbf16>
    %41 = vector.shape_cast %40 : vector<1x1x512x256xbf16> to vector<512x256xbf16>
    %cst_52 = arith.constant dense<0.000000e+00> : vector<32x256xf32>
    %42 = tpu.matmul %39, %41, %cst_52 {dimension_numbers = #tpu.dot_dimension_numbers<[1], [0], [0], [1], [0, 0, 1, 1], [], []>} : vector<32x512xbf16>, vector<512x256xbf16>, vector<32x256xf32> -> vector<32x256xf32>
    %43 = arith.addf %38, %42 : vector<32x256xf32>
    %c0_53 = arith.constant 0 : index
    %c0_54 = arith.constant 0 : index
    %44 = vector.load %arg3[%c0_53, %c0_54] : memref<1x256xf32, #tpu.memory_space<vmem>>, vector<1x256xf32>
    %45 = vector.broadcast %44 : vector<1x256xf32> to vector<32x256xf32>
    %46 = arith.addf %43, %45 : vector<32x256xf32>
    %cst_55 = arith.constant 0.000000e+00 : f32
    %47 = vector.broadcast %cst_55 : f32 to vector<32x256xf32>
    %48 = arith.cmpf oge, %46, %47 : vector<32x256xf32>
    %cst_56 = arith.constant 0.00999999977 : f32
    %49 = vector.broadcast %cst_56 : f32 to vector<32x256xf32>
    %50 = arith.mulf %49, %46 : vector<32x256xf32>
    %51 = arith.select %48, %46, %50 : vector<32x256xi1>, vector<32x256xf32>
    %52 = arith.truncf %51 : vector<32x256xf32> to vector<32x256xbf16>
    %c0_57 = arith.constant 0 : index
    %c0_58 = arith.constant 0 : index
    %53 = vector.load %arg4[%c0_57, %c0_58] : memref<32x256xbf16, #tpu.memory_space<vmem>>, vector<32x256xbf16>
    tpu.vector_store %arg4[%c0_57, %c0_58], %52 {strides = array<i32>} : memref<32x256xbf16, #tpu.memory_space<vmem>>, vector<32x256xbf16>,
    return
  }
  func.func @transform_0(%arg0: i32) -> (i32, i32) {
    %c0_i32 = arith.constant 0 : i32
    %c0_i32_0 = arith.constant 0 : i32
    %c0_i32_1 = arith.constant 0 : i32
    return %c0_i32, %c0_i32_0 : i32, i32
  }
  func.func @transform_1(%arg0: i32) -> (i32, i32, i32, i32) {
    %c0_i32 = arith.constant 0 : i32
    %c0_i32_0 = arith.constant 0 : i32
    %c0_i32_1 = arith.constant 0 : i32
    %c0_i32_2 = arith.constant 0 : i32
    return %c0_i32, %c0_i32_0, %c0_i32_1, %arg0 : i32, i32, i32, i32
  }
  func.func @transform_2(%arg0: i32) -> (i32, i32) {
    %c0_i32 = arith.constant 0 : i32
    %c0_i32_0 = arith.constant 0 : i32
    return %c0_i32, %arg0 : i32, i32
  }
  func.func @transform_3(%arg0: i32) -> (i32, i32) {
    %c0_i32 = arith.constant 0 : i32
    %c0_i32_0 = arith.constant 0 : i32
    return %c0_i32, %arg0 : i32, i32
  }
}

module attributes {stable_mosaic.version = 11 : i64} {
  func.func @_s2d_conv_kernel(%arg0: i32, %arg1: memref<32x1024xbf16, #tpu.memory_space<vmem>>, %arg2: memref<3x3x1024x256xbf16, #tpu.memory_space<vmem>>, %arg3: memref<1x256xf32, #tpu.memory_space<vmem>>, %arg4: memref<18x256xbf16, #tpu.memory_space<vmem>>) attributes {dimension_semantics = [#tpu.dimension_semantics<parallel>], iteration_bounds = array<i64: 1>, scalar_prefetch = 0 : i64, scratch_operands = 0 : i64, tpu.core_type = #tpu.core_type<tc>, window_params = [{pipeline_mode = #tpu.pipeline_mode<synchronous>, transform_indices = @transform_0, window_bounds = array<i64: 32, 1024>}, {transform_indices = @transform_1, window_bounds = array<i64: 3, 3, 1024, 256>}, {transform_indices = @transform_2, window_bounds = array<i64: 1, 256>}, {transform_indices = @transform_3, window_bounds = array<i64: 18, 256>}]} {
    %c0 = arith.constant 0 : index
    %c0_0 = arith.constant 0 : index
    %0 = vector.load %arg1[%c0, %c0_0] : memref<32x1024xbf16, #tpu.memory_space<vmem>>, vector<18x1024xbf16>
    %c0_1 = arith.constant 0 : index
    %c0_2 = arith.constant 0 : index
    %c0_3 = arith.constant 0 : index
    %c0_4 = arith.constant 0 : index
    %1 = vector.load %arg2[%c0_1, %c0_2, %c0_3, %c0_4] : memref<3x3x1024x256xbf16, #tpu.memory_space<vmem>>, vector<1x1x1024x256xbf16>
    %2 = vector.shape_cast %1 : vector<1x1x1024x256xbf16> to vector<1024x256xbf16>
    %cst = arith.constant dense<0.000000e+00> : vector<18x256xf32>
    %3 = tpu.matmul %0, %2, %cst {dimension_numbers = #tpu.dot_dimension_numbers<[1], [0], [0], [1], [0, 0, 1, 1], [], []>} : vector<18x1024xbf16>, vector<1024x256xbf16>, vector<18x256xf32> -> vector<18x256xf32>
    %c1 = arith.constant 1 : index
    %c0_5 = arith.constant 0 : index
    %4 = vector.load %arg1[%c1, %c0_5] : memref<32x1024xbf16, #tpu.memory_space<vmem>>, vector<18x1024xbf16>
    %c0_6 = arith.constant 0 : index
    %c1_7 = arith.constant 1 : index
    %c0_8 = arith.constant 0 : index
    %c0_9 = arith.constant 0 : index
    %5 = vector.load %arg2[%c0_6, %c1_7, %c0_8, %c0_9] : memref<3x3x1024x256xbf16, #tpu.memory_space<vmem>>, vector<1x1x1024x256xbf16>
    %6 = vector.shape_cast %5 : vector<1x1x1024x256xbf16> to vector<1024x256xbf16>
    %cst_10 = arith.constant dense<0.000000e+00> : vector<18x256xf32>
    %7 = tpu.matmul %4, %6, %cst_10 {dimension_numbers = #tpu.dot_dimension_numbers<[1], [0], [0], [1], [0, 0, 1, 1], [], []>} : vector<18x1024xbf16>, vector<1024x256xbf16>, vector<18x256xf32> -> vector<18x256xf32>
    %8 = arith.addf %3, %7 : vector<18x256xf32>
    %c2 = arith.constant 2 : index
    %c0_11 = arith.constant 0 : index
    %9 = vector.load %arg1[%c2, %c0_11] : memref<32x1024xbf16, #tpu.memory_space<vmem>>, vector<18x1024xbf16>
    %c0_12 = arith.constant 0 : index
    %c2_13 = arith.constant 2 : index
    %c0_14 = arith.constant 0 : index
    %c0_15 = arith.constant 0 : index
    %10 = vector.load %arg2[%c0_12, %c2_13, %c0_14, %c0_15] : memref<3x3x1024x256xbf16, #tpu.memory_space<vmem>>, vector<1x1x1024x256xbf16>
    %11 = vector.shape_cast %10 : vector<1x1x1024x256xbf16> to vector<1024x256xbf16>
    %cst_16 = arith.constant dense<0.000000e+00> : vector<18x256xf32>
    %12 = tpu.matmul %9, %11, %cst_16 {dimension_numbers = #tpu.dot_dimension_numbers<[1], [0], [0], [1], [0, 0, 1, 1], [], []>} : vector<18x1024xbf16>, vector<1024x256xbf16>, vector<18x256xf32> -> vector<18x256xf32>
    %13 = arith.addf %8, %12 : vector<18x256xf32>
    %c3 = arith.constant 3 : index
    %c0_17 = arith.constant 0 : index
    %14 = vector.load %arg1[%c3, %c0_17] : memref<32x1024xbf16, #tpu.memory_space<vmem>>, vector<18x1024xbf16>
    %c1_18 = arith.constant 1 : index
    %c0_19 = arith.constant 0 : index
    %c0_20 = arith.constant 0 : index
    %c0_21 = arith.constant 0 : index
    %15 = vector.load %arg2[%c1_18, %c0_19, %c0_20, %c0_21] : memref<3x3x1024x256xbf16, #tpu.memory_space<vmem>>, vector<1x1x1024x256xbf16>
    %16 = vector.shape_cast %15 : vector<1x1x1024x256xbf16> to vector<1024x256xbf16>
    %cst_22 = arith.constant dense<0.000000e+00> : vector<18x256xf32>
    %17 = tpu.matmul %14, %16, %cst_22 {dimension_numbers = #tpu.dot_dimension_numbers<[1], [0], [0], [1], [0, 0, 1, 1], [], []>} : vector<18x1024xbf16>, vector<1024x256xbf16>, vector<18x256xf32> -> vector<18x256xf32>
    %18 = arith.addf %13, %17 : vector<18x256xf32>
    %c4 = arith.constant 4 : index
    %c0_23 = arith.constant 0 : index
    %19 = vector.load %arg1[%c4, %c0_23] : memref<32x1024xbf16, #tpu.memory_space<vmem>>, vector<18x1024xbf16>
    %c1_24 = arith.constant 1 : index
    %c1_25 = arith.constant 1 : index
    %c0_26 = arith.constant 0 : index
    %c0_27 = arith.constant 0 : index
    %20 = vector.load %arg2[%c1_24, %c1_25, %c0_26, %c0_27] : memref<3x3x1024x256xbf16, #tpu.memory_space<vmem>>, vector<1x1x1024x256xbf16>
    %21 = vector.shape_cast %20 : vector<1x1x1024x256xbf16> to vector<1024x256xbf16>
    %cst_28 = arith.constant dense<0.000000e+00> : vector<18x256xf32>
    %22 = tpu.matmul %19, %21, %cst_28 {dimension_numbers = #tpu.dot_dimension_numbers<[1], [0], [0], [1], [0, 0, 1, 1], [], []>} : vector<18x1024xbf16>, vector<1024x256xbf16>, vector<18x256xf32> -> vector<18x256xf32>
    %23 = arith.addf %18, %22 : vector<18x256xf32>
    %c5 = arith.constant 5 : index
    %c0_29 = arith.constant 0 : index
    %24 = vector.load %arg1[%c5, %c0_29] : memref<32x1024xbf16, #tpu.memory_space<vmem>>, vector<18x1024xbf16>
    %c1_30 = arith.constant 1 : index
    %c2_31 = arith.constant 2 : index
    %c0_32 = arith.constant 0 : index
    %c0_33 = arith.constant 0 : index
    %25 = vector.load %arg2[%c1_30, %c2_31, %c0_32, %c0_33] : memref<3x3x1024x256xbf16, #tpu.memory_space<vmem>>, vector<1x1x1024x256xbf16>
    %26 = vector.shape_cast %25 : vector<1x1x1024x256xbf16> to vector<1024x256xbf16>
    %cst_34 = arith.constant dense<0.000000e+00> : vector<18x256xf32>
    %27 = tpu.matmul %24, %26, %cst_34 {dimension_numbers = #tpu.dot_dimension_numbers<[1], [0], [0], [1], [0, 0, 1, 1], [], []>} : vector<18x1024xbf16>, vector<1024x256xbf16>, vector<18x256xf32> -> vector<18x256xf32>
    %28 = arith.addf %23, %27 : vector<18x256xf32>
    %c6 = arith.constant 6 : index
    %c0_35 = arith.constant 0 : index
    %29 = vector.load %arg1[%c6, %c0_35] : memref<32x1024xbf16, #tpu.memory_space<vmem>>, vector<18x1024xbf16>
    %c2_36 = arith.constant 2 : index
    %c0_37 = arith.constant 0 : index
    %c0_38 = arith.constant 0 : index
    %c0_39 = arith.constant 0 : index
    %30 = vector.load %arg2[%c2_36, %c0_37, %c0_38, %c0_39] : memref<3x3x1024x256xbf16, #tpu.memory_space<vmem>>, vector<1x1x1024x256xbf16>
    %31 = vector.shape_cast %30 : vector<1x1x1024x256xbf16> to vector<1024x256xbf16>
    %cst_40 = arith.constant dense<0.000000e+00> : vector<18x256xf32>
    %32 = tpu.matmul %29, %31, %cst_40 {dimension_numbers = #tpu.dot_dimension_numbers<[1], [0], [0], [1], [0, 0, 1, 1], [], []>} : vector<18x1024xbf16>, vector<1024x256xbf16>, vector<18x256xf32> -> vector<18x256xf32>
    %33 = arith.addf %28, %32 : vector<18x256xf32>
    %c7 = arith.constant 7 : index
    %c0_41 = arith.constant 0 : index
    %34 = vector.load %arg1[%c7, %c0_41] : memref<32x1024xbf16, #tpu.memory_space<vmem>>, vector<18x1024xbf16>
    %c2_42 = arith.constant 2 : index
    %c1_43 = arith.constant 1 : index
    %c0_44 = arith.constant 0 : index
    %c0_45 = arith.constant 0 : index
    %35 = vector.load %arg2[%c2_42, %c1_43, %c0_44, %c0_45] : memref<3x3x1024x256xbf16, #tpu.memory_space<vmem>>, vector<1x1x1024x256xbf16>
    %36 = vector.shape_cast %35 : vector<1x1x1024x256xbf16> to vector<1024x256xbf16>
    %cst_46 = arith.constant dense<0.000000e+00> : vector<18x256xf32>
    %37 = tpu.matmul %34, %36, %cst_46 {dimension_numbers = #tpu.dot_dimension_numbers<[1], [0], [0], [1], [0, 0, 1, 1], [], []>} : vector<18x1024xbf16>, vector<1024x256xbf16>, vector<18x256xf32> -> vector<18x256xf32>
    %38 = arith.addf %33, %37 : vector<18x256xf32>
    %c8 = arith.constant 8 : index
    %c0_47 = arith.constant 0 : index
    %39 = vector.load %arg1[%c8, %c0_47] : memref<32x1024xbf16, #tpu.memory_space<vmem>>, vector<18x1024xbf16>
    %c2_48 = arith.constant 2 : index
    %c2_49 = arith.constant 2 : index
    %c0_50 = arith.constant 0 : index
    %c0_51 = arith.constant 0 : index
    %40 = vector.load %arg2[%c2_48, %c2_49, %c0_50, %c0_51] : memref<3x3x1024x256xbf16, #tpu.memory_space<vmem>>, vector<1x1x1024x256xbf16>
    %41 = vector.shape_cast %40 : vector<1x1x1024x256xbf16> to vector<1024x256xbf16>
    %cst_52 = arith.constant dense<0.000000e+00> : vector<18x256xf32>
    %42 = tpu.matmul %39, %41, %cst_52 {dimension_numbers = #tpu.dot_dimension_numbers<[1], [0], [0], [1], [0, 0, 1, 1], [], []>} : vector<18x1024xbf16>, vector<1024x256xbf16>, vector<18x256xf32> -> vector<18x256xf32>
    %43 = arith.addf %38, %42 : vector<18x256xf32>
    %c0_53 = arith.constant 0 : index
    %c0_54 = arith.constant 0 : index
    %44 = vector.load %arg3[%c0_53, %c0_54] : memref<1x256xf32, #tpu.memory_space<vmem>>, vector<1x256xf32>
    %45 = vector.broadcast %44 : vector<1x256xf32> to vector<18x256xf32>
    %46 = arith.addf %43, %45 : vector<18x256xf32>
    %cst_55 = arith.constant 0.000000e+00 : f32
    %47 = vector.broadcast %cst_55 : f32 to vector<18x256xf32>
    %48 = arith.cmpf oge, %46, %47 : vector<18x256xf32>
    %cst_56 = arith.constant 0.00999999977 : f32
    %49 = vector.broadcast %cst_56 : f32 to vector<18x256xf32>
    %50 = arith.mulf %49, %46 : vector<18x256xf32>
    %51 = arith.select %48, %46, %50 : vector<18x256xi1>, vector<18x256xf32>
    %52 = arith.truncf %51 : vector<18x256xf32> to vector<18x256xbf16>
    %c0_57 = arith.constant 0 : index
    %c0_58 = arith.constant 0 : index
    %53 = vector.load %arg4[%c0_57, %c0_58] : memref<18x256xbf16, #tpu.memory_space<vmem>>, vector<18x256xbf16>
    tpu.vector_store %arg4[%c0_57, %c0_58], %52 {strides = array<i32>} : memref<18x256xbf16, #tpu.memory_space<vmem>>, vector<18x256xbf16>,
    return
  }
  func.func @transform_0(%arg0: i32) -> (i32, i32) {
    %c0_i32 = arith.constant 0 : i32
    %c0_i32_0 = arith.constant 0 : i32
    %c0_i32_1 = arith.constant 0 : i32
    return %c0_i32, %c0_i32_0 : i32, i32
  }
  func.func @transform_1(%arg0: i32) -> (i32, i32, i32, i32) {
    %c0_i32 = arith.constant 0 : i32
    %c0_i32_0 = arith.constant 0 : i32
    %c0_i32_1 = arith.constant 0 : i32
    %c0_i32_2 = arith.constant 0 : i32
    return %c0_i32, %c0_i32_0, %c0_i32_1, %arg0 : i32, i32, i32, i32
  }
  func.func @transform_2(%arg0: i32) -> (i32, i32) {
    %c0_i32 = arith.constant 0 : i32
    %c0_i32_0 = arith.constant 0 : i32
    return %c0_i32, %arg0 : i32, i32
  }
  func.func @transform_3(%arg0: i32) -> (i32, i32) {
    %c0_i32 = arith.constant 0 : i32
    %c0_i32_0 = arith.constant 0 : i32
    return %c0_i32, %arg0 : i32, i32
  }
}

</mosaic_0001>

<bundles_post_ra>
// kernel: forward.6
= control target key start
LH: loop header
LB: loop body
LE: loop exit
PB: predicated region body
PF: predicated region fallthrough
CT: control target
= control target key end

     0   :  { %8 = vsyncpa [#allocation3], 0  ;;  %s822_s0 = inlined_call_operand.vmem [shape: bf16[128,144], index: 0, kind: input, shape index: {}]   ;;  %s823_s1 = inlined_call_operand.hbm [shape: bf16[144,64], index: 1, kind: input, shape index: {}]   ;;  %s824_s2 = inlined_call_operand.hbm [shape: f32[1,64], index: 2, kind: input, shape index: {}]   ;;  %s825_s3 = inlined_call_operand.vmem [shape: bf16[128,64], index: 3, kind: output, shape index: {}]  }
   0x1   :  { %9 = vsyncpa [#allocation5], 0  ;;  %s635_s12 = smov [#allocation2]   ;;  %s587_s16 = scalar_lea.hbm %s823_s1, 1152 }
   0x2   :  { %s17_s13 = sshll.u32 %s635_s12, 4  ;;  %p588_p0 = scmp.ne.s32.totalorder %s823_s1, %s587_s16  ;;  %s18_s13 = int_to_ptr.vmem [resolvable:$true] %s17_s13 }
   0x3   :  { %p591_p1 = scmp.lt.u32.totalorder %s587_s16, %s823_s1 }
   0x5   :  { %p593_p2 = pnand %p591_p1, %p588_p0 }
   0x7   :  { %596 = shalt.err (!%p593_p2)
}
   0x8   :  { %s597_s21 = scalar_lea.vmem %s18_s13, 1152  ;;  %p602_p4 = scmp.lt.s32.totalorder %s18_s13, %s18_s13 }
   0x9   :  { %p598_p3 = scmp.ne.s32.totalorder %s18_s13, %s597_s21  ;;  %p603_p5 = scmp.lt.s32.totalorder %s597_s21, %s597_s21 }
   0xb   :  { %p604_p6 = por %p603_p5, %p602_p4 }
   0xd   :  { %p605_p7 = pnand %p604_p6, %p598_p3 }
   0xf   :  { %608 = shalt.err (!%p605_p7)
}
  0x10   :  { %s636_s22 = smov 64   ;;  %s637_s23 = smov 4  }
  0x11   :  { %23 = dma.hbm_to_vmem [thread:$0]  %s823_s1, 1152, %s18_s13, [#allocation3], %s636_s22, %s636_s22, %s637_s23  }
  0x12   :  { %s638_s26 = smov [#allocation4]   ;;  %s609_s30 = scalar_lea.hbm %s824_s2, 16 }
  0x13   :  { %s30_s27 = sshll.u32 %s638_s26, 4  ;;  %p610_p8 = scmp.ne.s32.totalorder %s824_s2, %s609_s30  ;;  %s31_s27 = int_to_ptr.vmem [resolvable:$true] %s30_s27 }
  0x14   :  { %p613_p9 = scmp.lt.u32.totalorder %s609_s30, %s824_s2 }
  0x16   :  { %p615_p10 = pnand %p613_p9, %p610_p8 }
  0x18   :  { %618 = shalt.err (!%p615_p10)
}
  0x19   :  { %s619_s8 = scalar_lea.vmem %s31_s27, 16  ;;  %s623_s1 = scalar_lea.vmem %s31_s27, 32 }
  0x1a   :  { %p620_p11 = scmp.ne.s32.totalorder %s31_s27, %s619_s8  ;;  %p624_p12 = scmp.lt.s32.totalorder %s31_s27, %s31_s27 }
  0x1b   :  { %p625_p13 = scmp.lt.s32.totalorder %s623_s1, %s619_s8 }
  0x1d   :  { %p626_p0 = por %p625_p13, %p624_p12 }
  0x1f   :  { %p627_p1 = pnand %p626_p0, %p620_p11 }
  0x21   :  { %630 = shalt.err (!%p627_p1)
}
  0x22   :  { %33 = dma.hbm_to_vmem [thread:$0]  %s824_s2, 16, %s31_s27, [#allocation5]  }
  0x23   :  { %631 = dma.done.wait [#allocation3], 1152  }
  0x24   :  { %632 = vsyncadd [#allocation3], 4294966144 }
  0x25   :  { %633 = dma.done.wait [#allocation5], 16  }
  0x26   :  { %634 = vsyncadd [#allocation5], 4294967280  ;;  %v639_v0 = vmov 0   ;;  %v554_v1 = vld [vmem:[#allocation2] sm:$0xff]   ;;  %v555_v2 = vld [vmem:[#allocation2 + $0x8] sm:$0xff]   ;;  %vm208_vm0 = vcmask 130048  }
  0x27   :  { %233 = vmatprep.subr.bf16.mxu0 %v639_v0  ;;  %531 = vmatprep.subr.bf16.mxu1 %v639_v0  ;;  %v556_v3 = vld [vmem:[#allocation2 + $0x10] sm:$0xff]   ;;  %v557_v4 = vld [vmem:[#allocation2 + $0x18] sm:$0xff]   ;;  %v565_v5 = vld [vmem:[%s822_s0 + $0x4] ss:$8 sps:$4 sm:$0xff]   ;;  %vm442_vm3 = vcmask 519168  }
  0x28   :  { %234 = vmatpush1.bf16.msra.mxu0 %v554_v1  ;;  %540 = vmatpush1.bf16.msra.mxu1 %v554_v1  ;;  %v568_v6 = vld [vmem:[%s822_s0 + $0x44] ss:$8 sps:$4 sm:$0xff]   ;;  %v560_v9 = vld [vmem:[#allocation2 + $0x30] sm:$0xff]   ;;  %v561_v10 = vld [vmem:[#allocation2 + $0x38] sm:$0xff]  }
  0x29   :  { %235 = vmatprep.subr.bf16.mxu0 %v639_v0  ;;  %532 = vmatprep.subr.bf16.mxu1 %v639_v0  ;;  %v558_v7 = vld [vmem:[#allocation2 + $0x20] sm:$0xff]   ;;  %v559_v8 = vld [vmem:[#allocation2 + $0x28] sm:$0xff]   ;;  %v569_v14 = vld [vmem:[%s822_s0 + $0x14] ss:$8 sps:$4 sm:$0xff]  }
  0x2a   :  { %491 = vmatprep.mubr.msk.bf16.mxu0 %vm208_vm0, %v565_v5  ;;  %495 = vmatprep.mubr.msk.bf16.mxu1 %vm208_vm0, %v568_v6  ;;  %v562_v11 = vld [vmem:[#allocation2 + $0x40] sm:$0xff]   ;;  %v571_v15 = vld [vmem:[%s822_s0 + $0x54] ss:$8 sps:$4 sm:$0xff]   ;;  %v573_v16 = vld [vmem:[%s822_s0 + $0x10] ss:$8 sps:$4 sm:$0xff]  }
  0x2b   :  { %v563_v12 = vld [vmem:[%s822_s0] ss:$8 sps:$4 sm:$0xff]   ;;  %v574_v17 = vld [vmem:[%s822_s0 + $0x50] ss:$8 sps:$4 sm:$0xff]   ;;  %v575_v18 = vld [vmem:[%s822_s0 + $0x24] ss:$8 sps:$4 sm:$0xff]  }
  0x2c   :  { %236 = vmatpush1.bf16.msra.mxu0 %v555_v2  ;;  %541 = vmatpush1.bf16.msra.mxu1 %v555_v2  ;;  %v566_v13 = vld [vmem:[%s822_s0 + $0x40] ss:$8 sps:$4 sm:$0xff]   ;;  %v577_v19 = vld [vmem:[%s822_s0 + $0x64] ss:$8 sps:$4 sm:$0xff]   ;;  %v581_v22 = vld [vmem:[%s822_s0 + $0x34] ss:$8 sps:$4 sm:$0xff]  }
  0x2d   :  { %237 = vmatprep.subr.bf16.mxu0 %v639_v0  ;;  %533 = vmatprep.subr.bf16.mxu1 %v639_v0  ;;  %v579_v20 = vld [vmem:[%s822_s0 + $0x20] ss:$8 sps:$4 sm:$0xff]   ;;  %v583_v23 = vld [vmem:[%s822_s0 + $0x74] ss:$8 sps:$4 sm:$0xff]   ;;  %v585_v24 = vld [vmem:[%s822_s0 + $0x30] ss:$8 sps:$4 sm:$0xff]  }
  0x2e   :  { %v580_v21 = vld [vmem:[%s822_s0 + $0x60] ss:$8 sps:$4 sm:$0xff]   ;;  %v586_v25 = vld [vmem:[%s822_s0 + $0x70] ss:$8 sps:$4 sm:$0xff]  }
  0x2f   :  { %v740_v26 = vld [vmem:[#allocation4] ss:$0 sm:$0xff] }
  0x30   :  { %238 = vmatpush1.bf16.msra.mxu0 %v556_v3  ;;  %542 = vmatpush1.bf16.msra.mxu1 %v556_v3 }
  0x31   :  { %239 = vmatprep.subr.bf16.mxu0 %v639_v0  ;;  %534 = vmatprep.subr.bf16.mxu1 %v639_v0 }
  0x34   :  { %240 = vmatpush1.bf16.msra.mxu0 %v557_v4  ;;  %543 = vmatpush1.bf16.msra.mxu1 %v557_v4 }
  0x35   :  { %241 = vmatprep.subr.bf16.mxu0 %v639_v0  ;;  %535 = vmatprep.subr.bf16.mxu1 %v639_v0 }
  0x38   :  { %242 = vmatpush1.bf16.msra.mxu0 %v558_v7  ;;  %544 = vmatpush1.bf16.msra.mxu1 %v558_v7 }
  0x39   :  { %243 = vmatprep.subr.bf16.mxu0 %v639_v0  ;;  %536 = vmatprep.subr.bf16.mxu1 %v639_v0 }
  0x3c   :  { %244 = vmatpush1.bf16.msra.mxu0 %v559_v8  ;;  %545 = vmatpush1.bf16.msra.mxu1 %v559_v8 }
  0x3d   :  { %245 = vmatprep.subr.bf16.mxu0 %v639_v0  ;;  %537 = vmatprep.subr.bf16.mxu1 %v639_v0 }
  0x40   :  { %246 = vmatpush1.bf16.msra.mxu0 %v560_v9  ;;  %546 = vmatpush1.bf16.msra.mxu1 %v560_v9 }
  0x41   :  { %247 = vmatprep.subr.bf16.mxu0 %v639_v0  ;;  %538 = vmatprep.subr.bf16.mxu1 %v639_v0 }
  0x44   :  { %248 = vmatpush1.bf16.msra.mxu0 %v561_v10  ;;  %547 = vmatpush1.bf16.msra.mxu1 %v561_v10 }
  0x45   :  { %249 = vmatprep.subr.bf16.mxu0 %v639_v0  ;;  %539 = vmatprep.subr.bf16.mxu1 %v639_v0 }
  0x48   :  { %250 = vmatpush1.bf16.msra.mxu0 %v562_v11  ;;  %548 = vmatpush1.bf16.msra.mxu1 %v562_v11 }
  0x4b   :  { %266 = vmatmul.mubr.bf16.vlgmr.msra.gmra.mrb[0].mxu0 %v563_v12  ;;  %298 = vmatmul.mubr.bf16.vlgmr.msra.gmra.mrb[0].mxu1 %v566_v13 }
  0x4c   :  { %492 = vmatprep.mubr.msk.bf16.mxu0 %vm208_vm0, %v569_v14  ;;  %496 = vmatprep.mubr.msk.bf16.mxu1 %vm208_vm0, %v571_v15 }
  0x53   :  { %274 = vmatmul.mubr.bf16.gmra.mrb[4].mxu0 %v573_v16  ;;  %306 = vmatmul.mubr.bf16.gmra.mrb[4].mxu1 %v574_v17 }
  0x54   :  { %493 = vmatprep.mubr.msk.bf16.mxu0 %vm208_vm0, %v575_v18  ;;  %497 = vmatprep.mubr.msk.bf16.mxu1 %vm208_vm0, %v577_v19 }
  0x5b   :  { %282 = vmatmul.mubr.bf16.gmra.mrb[8].mxu0 %v579_v20  ;;  %314 = vmatmul.mubr.bf16.gmra.mrb[8].mxu1 %v580_v21 }
  0x5c   :  { %494 = vmatprep.mubr.msk.bf16.mxu0 %vm208_vm0, %v581_v22  ;;  %498 = vmatprep.mubr.msk.bf16.mxu1 %vm208_vm0, %v583_v23 }
  0x63   :  { %290 = vmatmul.mubr.bf16.gmra.mrb[12].mxu0 %v585_v24  ;;  %322 = vmatmul.mubr.bf16.gmra.mrb[12].mxu1 %v586_v25 }
 0x11e   :  { %v267_v27 = vpop.f32.mrb[0].mxu0  ;;  %v299_v28 = vpop.f32.mrb[0].mxu1 }
 0x11f   :  { %v268_v29 = vadd.f32 %v740_v26, %v267_v27  ;;  %v300_v30 = vadd.f32 %v740_v26, %v299_v28  ;;  %v269_v31 = vpop.f32.mrb[1].mxu0  ;;  %v301_v32 = vpop.f32.mrb[1].mxu1 }
 0x120   :  { %v270_v33 = vpop.f32.mrb[2].mxu0  ;;  %v302_v34 = vpop.f32.mrb[2].mxu1 }
 0x121   :  { %vm330_vm1 = vcmp.ge.f32.partialorder %v268_v29, 0.0  ;;  %v346_v35 = vmul.f32 0.01, %v268_v29  ;;  %vm338_vm2 = vcmp.ge.f32.partialorder %v300_v30, 0.0  ;;  %v354_v36 = vmul.f32 0.01, %v300_v30 }
 0x122   :  { %v271_v37 = vadd.f32 %v740_v26, %v270_v33  ;;  %v303_v38 = vadd.f32 %v740_v26, %v302_v34  ;;  %v272_v39 = vpop.f32.mrb[3].mxu0  ;;  %v304_v40 = vpop.f32.mrb[3].mxu1 }
 0x123   :  { %v362_v41 = vsel %vm330_vm1, %v268_v29, %v346_v35  ;;  %v370_v42 = vsel %vm338_vm2, %v300_v30, %v354_v36 }
 0x124   :  { %v515_v43 = vpack.c.bf16 %v362_v41, %v362_v41  ;;  %v523_v44 = vpack.c.bf16 %v370_v42, %v370_v42  ;;  %vm331_vm4 = vcmp.ge.f32.partialorder %v271_v37, 0.0  ;;  %v347_v45 = vmul.f32 0.01, %v271_v37 }
 0x125   :  { %vm339_vm5 = vcmp.ge.f32.partialorder %v303_v38, 0.0  ;;  %v355_v46 = vmul.f32 0.01, %v303_v38 }
 0x126   :  { %443 = vst.msk [vmem:[%s825_s3] sm:$0xf] %vm442_vm3, %v515_v43  ;;  %451 = vst.msk [vmem:[%s825_s3 + $0x20] sm:$0xf] %vm442_vm3, %v523_v44  ;;  %v363_v47 = vsel %vm331_vm4, %v271_v37, %v347_v45  ;;  %v275_v48 = vpop.f32.mrb[4].mxu0  ;;  %v307_v49 = vpop.f32.mrb[4].mxu1 }
 0x127   :  { %v516_v50 = vpack.c.bf16 %v363_v47, %v363_v47  ;;  %v371_v51 = vsel %vm339_vm5, %v303_v38, %v355_v46  ;;  %v276_v52 = vadd.f32 %v740_v26, %v275_v48  ;;  %v308_v53 = vadd.f32 %v740_v26, %v307_v49  ;;  %v277_v54 = vpop.f32.mrb[5].mxu0  ;;  %v309_v55 = vpop.f32.mrb[5].mxu1 }
 0x128   :  { %v524_v56 = vpack.c.bf16 %v371_v51, %v371_v51  ;;  %v278_v57 = vpop.f32.mrb[6].mxu0  ;;  %v310_v58 = vpop.f32.mrb[6].mxu1 }
 0x129   :  { %444 = vst.msk [vmem:[%s825_s3 + $0x4] sm:$0xf] %vm442_vm3, %v516_v50  ;;  %vm332_vm6 = vcmp.ge.f32.partialorder %v276_v52, 0.0  ;;  %v348_v59 = vmul.f32 0.01, %v276_v52  ;;  %vm340_vm7 = vcmp.ge.f32.partialorder %v308_v53, 0.0  ;;  %v279_v61 = vadd.f32 %v740_v26, %v278_v57 }
 0x12a   :  { %v356_v60 = vmul.f32 0.01, %v308_v53  ;;  %452 = vst.msk [vmem:[%s825_s3 + $0x24] sm:$0xf] %vm442_vm3, %v524_v56  ;;  %v311_v62 = vadd.f32 %v740_v26, %v310_v58  ;;  %v280_v63 = vpop.f32.mrb[7].mxu0  ;;  %v312_v0 = vpop.f32.mrb[7].mxu1 }
 0x12b   :  { %v364_v1 = vsel %vm332_vm6, %v276_v52, %v348_v59  ;;  %vm333_vm8 = vcmp.ge.f32.partialorder %v279_v61, 0.0  ;;  %v349_v5 = vmul.f32 0.01, %v279_v61 }
 0x12c   :  { %v372_v2 = vsel %vm340_vm7, %v308_v53, %v356_v60  ;;  %v517_v3 = vpack.c.bf16 %v364_v1, %v364_v1  ;;  %vm341_vm9 = vcmp.ge.f32.partialorder %v311_v62, 0.0  ;;  %v357_v6 = vmul.f32 0.01, %v311_v62 }
 0x12d   :  { %v525_v4 = vpack.c.bf16 %v372_v2, %v372_v2  ;;  %v365_v7 = vsel %vm333_vm8, %v279_v61, %v349_v5 }
 0x12e   :  { %445 = vst.msk [vmem:[%s825_s3 + $0x8] sm:$0xf] %vm442_vm3, %v517_v3  ;;  %v283_v8 = vpop.f32.mrb[8].mxu0  ;;  %v315_v9 = vpop.f32.mrb[8].mxu1  ;;  %v518_v10 = vpack.c.bf16 %v365_v7, %v365_v7  ;;  %v373_v11 = vsel %vm341_vm9, %v311_v62, %v357_v6 }
 0x12f   :  { %453 = vst.msk [vmem:[%s825_s3 + $0x28] sm:$0xf] %vm442_vm3, %v525_v4  ;;  %v284_v12 = vadd.f32 %v740_v26, %v283_v8  ;;  %v316_v13 = vadd.f32 %v740_v26, %v315_v9  ;;  %v285_v14 = vpop.f32.mrb[9].mxu0  ;;  %v317_v15 = vpop.f32.mrb[9].mxu1  ;;  %v526_v16 = vpack.c.bf16 %v373_v11, %v373_v11 }
 0x130   :  { %v286_v17 = vpop.f32.mrb[10].mxu0  ;;  %v318_v18 = vpop.f32.mrb[10].mxu1  ;;  %446 = vst.msk [vmem:[%s825_s3 + $0xc] sm:$0xf] %vm442_vm3, %v518_v10 }
 0x131   :  { %vm334_vm10 = vcmp.ge.f32.partialorder %v284_v12, 0.0  ;;  %v350_v19 = vmul.f32 0.01, %v284_v12  ;;  %vm342_vm11 = vcmp.ge.f32.partialorder %v316_v13, 0.0  ;;  %v358_v20 = vmul.f32 0.01, %v316_v13 }
 0x132   :  { %454 = vst.msk [vmem:[%s825_s3 + $0x2c] sm:$0xf] %vm442_vm3, %v526_v16  ;;  %v287_v21 = vadd.f32 %v740_v26, %v286_v17  ;;  %v319_v22 = vadd.f32 %v740_v26, %v318_v18  ;;  %v288_v23 = vpop.f32.mrb[11].mxu0  ;;  %v320_v24 = vpop.f32.mrb[11].mxu1 }
 0x133   :  { %v366_v25 = vsel %vm334_vm10, %v284_v12, %v350_v19  ;;  %v374_v27 = vsel %vm342_vm11, %v316_v13, %v358_v20 }
 0x134   :  { %v519_v28 = vpack.c.bf16 %v366_v25, %v366_v25  ;;  %v527_v29 = vpack.c.bf16 %v374_v27, %v374_v27  ;;  %vm335_vm12 = vcmp.ge.f32.partialorder %v287_v21, 0.0  ;;  %v351_v30 = vmul.f32 0.01, %v287_v21 }
 0x135   :  { %vm343_vm13 = vcmp.ge.f32.partialorder %v319_v22, 0.0  ;;  %v359_v31 = vmul.f32 0.01, %v319_v22 }
 0x136   :  { %447 = vst.msk [vmem:[%s825_s3 + $0x10] sm:$0xf] %vm442_vm3, %v519_v28  ;;  %455 = vst.msk [vmem:[%s825_s3 + $0x30] sm:$0xf] %vm442_vm3, %v527_v29  ;;  %v367_v32 = vsel %vm335_vm12, %v287_v21, %v351_v30  ;;  %v291_v33 = vpop.f32.mrb[12].mxu0  ;;  %v323_v34 = vpop.f32.mrb[12].mxu1 }
 0x137   :  { %v520_v35 = vpack.c.bf16 %v367_v32, %v367_v32  ;;  %v375_v36 = vsel %vm343_vm13, %v319_v22, %v359_v31  ;;  %v292_v37 = vadd.f32 %v740_v26, %v291_v33  ;;  %v324_v38 = vadd.f32 %v740_v26, %v323_v34  ;;  %v293_v39 = vpop.f32.mrb[13].mxu0  ;;  %v325_v40 = vpop.f32.mrb[13].mxu1 }
 0x138   :  { %v528_v41 = vpack.c.bf16 %v375_v36, %v375_v36  ;;  %v294_v42 = vpop.f32.mrb[14].mxu0  ;;  %v326_v43 = vpop.f32.mrb[14].mxu1 }
 0x139   :  { %448 = vst.msk [vmem:[%s825_s3 + $0x14] sm:$0xf] %vm442_vm3, %v520_v35  ;;  %vm336_vm14 = vcmp.ge.f32.partialorder %v292_v37, 0.0  ;;  %v352_v44 = vmul.f32 0.01, %v292_v37  ;;  %vm344_vm15 = vcmp.ge.f32.partialorder %v324_v38, 0.0  ;;  %v295_v46 = vadd.f32 %v740_v26, %v294_v42 }
 0x13a   :  { %v360_v45 = vmul.f32 0.01, %v324_v38  ;;  %456 = vst.msk [vmem:[%s825_s3 + $0x34] sm:$0xf] %vm442_vm3, %v528_v41  ;;  %v327_v47 = vadd.f32 %v740_v26, %v326_v43  ;;  %v296_v48 = vpop.f32.mrb[15].mxu0  ;;  %v328_v49 = vpop.f32.mrb[15].mxu1 }
 0x13b   :  { %v368_v50 = vsel %vm336_vm14, %v292_v37, %v352_v44  ;;  %vm337_vm0 = vcmp.ge.f32.partialorder %v295_v46, 0.0  ;;  %v353_v54 = vmul.f32 0.01, %v295_v46 }
 0x13c   :  { %v376_v51 = vsel %vm344_vm15, %v324_v38, %v360_v45  ;;  %v521_v52 = vpack.c.bf16 %v368_v50, %v368_v50  ;;  %vm345_vm1 = vcmp.ge.f32.partialorder %v327_v47, 0.0  ;;  %v361_v55 = vmul.f32 0.01, %v327_v47 }
 0x13d   :  { %v529_v53 = vpack.c.bf16 %v376_v51, %v376_v51  ;;  %v369_v26 = vsel %vm337_vm0, %v295_v46, %v353_v54 }
 0x13e   :  { %449 = vst.msk [vmem:[%s825_s3 + $0x18] sm:$0xf] %vm442_vm3, %v521_v52  ;;  %v522_v56 = vpack.c.bf16 %v369_v26, %v369_v26  ;;  %v377_v57 = vsel %vm345_vm1, %v327_v47, %v361_v55 }
 0x13f   :  { %457 = vst.msk [vmem:[%s825_s3 + $0x38] sm:$0xf] %vm442_vm3, %v529_v53  ;;  %v530_v58 = vpack.c.bf16 %v377_v57, %v377_v57 }
 0x140   :  { %450 = vst.msk [vmem:[%s825_s3 + $0x1c] sm:$0xf] %vm442_vm3, %v522_v56 }
 0x141   :  { %458 = vst.msk [vmem:[%s825_s3 + $0x3c] sm:$0xf] %vm442_vm3, %v530_v58 }
 0x142   :  { %463 = vsyncpa [#allocation3], 1 }
 0x143   :  { %464 = vsyncpa [#allocation5], 1 }

// kernel: forward.7
= control target key start
LH: loop header
LB: loop body
LE: loop exit
PB: predicated region body
PF: predicated region fallthrough
CT: control target
= control target key end

     0   :  { %8 = vsyncpa [#allocation3], 0  ;;  %s4060_s0 = inlined_call_operand.vmem [shape: bf16[88,256], index: 0, kind: input, shape index: {}]   ;;  %s4061_s1 = inlined_call_operand.hbm [shape: bf16[3,3,256,128], index: 1, kind: input, shape index: {}]   ;;  %s4062_s2 = inlined_call_operand.hbm [shape: f32[1,128], index: 2, kind: input, shape index: {}]   ;;  %s4063_s3 = inlined_call_operand.vmem [shape: bf16[72,128], index: 3, kind: output, shape index: {}]  }
   0x1   :  { %9 = vsyncpa [#allocation5], 0  ;;  %s3450_s12 = smov [#allocation2]   ;;  %s3402_s16 = scalar_lea.hbm %s4061_s1, 18432 }
   0x2   :  { %s17_s13 = sshll.u32 %s3450_s12, 4  ;;  %p3403_p0 = scmp.ne.s32.totalorder %s4061_s1, %s3402_s16  ;;  %s18_s13 = int_to_ptr.vmem [resolvable:$true] %s17_s13 }
   0x3   :  { %p3406_p1 = scmp.lt.u32.totalorder %s3402_s16, %s4061_s1 }
   0x5   :  { %p3408_p2 = pnand %p3406_p1, %p3403_p0 }
   0x7   :  { %3411 = shalt.err (!%p3408_p2)
}
   0x8   :  { %s3412_s21 = scalar_lea.vmem %s18_s13, 18432  ;;  %p3417_p4 = scmp.lt.s32.totalorder %s18_s13, %s18_s13 }
   0x9   :  { %p3413_p3 = scmp.ne.s32.totalorder %s18_s13, %s3412_s21  ;;  %p3418_p5 = scmp.lt.s32.totalorder %s3412_s21, %s3412_s21 }
   0xb   :  { %p3419_p6 = por %p3418_p5, %p3417_p4 }
   0xd   :  { %p3420_p7 = pnand %p3419_p6, %p3413_p3 }
   0xf   :  { %3423 = shalt.err (!%p3420_p7)
}
  0x10   :  { %s3451_s22 = smov 64   ;;  %s3452_s23 = smov 4  }
  0x11   :  { %23 = dma.hbm_to_vmem [thread:$0]  %s4061_s1, 18432, %s18_s13, [#allocation3], %s3451_s22, %s3451_s22, %s3452_s23  }
  0x12   :  { %s3453_s26 = smov [#allocation4]   ;;  %s3424_s30 = scalar_lea.hbm %s4062_s2, 16 }
  0x13   :  { %s30_s27 = sshll.u32 %s3453_s26, 4  ;;  %p3425_p8 = scmp.ne.s32.totalorder %s4062_s2, %s3424_s30  ;;  %s31_s27 = int_to_ptr.vmem [resolvable:$true] %s30_s27 }
  0x14   :  { %p3428_p9 = scmp.lt.u32.totalorder %s3424_s30, %s4062_s2 }
  0x16   :  { %p3430_p10 = pnand %p3428_p9, %p3425_p8 }
  0x18   :  { %3433 = shalt.err (!%p3430_p10)
}
  0x19   :  { %s3434_s8 = scalar_lea.vmem %s31_s27, 16  ;;  %s3438_s1 = scalar_lea.vmem %s31_s27, 32 }
  0x1a   :  { %p3435_p11 = scmp.ne.s32.totalorder %s31_s27, %s3434_s8  ;;  %p3439_p12 = scmp.lt.s32.totalorder %s31_s27, %s31_s27 }
  0x1b   :  { %p3440_p13 = scmp.lt.s32.totalorder %s3438_s1, %s3434_s8 }
  0x1d   :  { %p3441_p0 = por %p3440_p13, %p3439_p12 }
  0x1f   :  { %p3442_p1 = pnand %p3441_p0, %p3435_p11 }
  0x21   :  { %3445 = shalt.err (!%p3442_p1)
}
  0x22   :  { %33 = dma.hbm_to_vmem [thread:$0]  %s4062_s2, 16, %s31_s27, [#allocation5]  }
  0x23   :  { %3446 = dma.done.wait [#allocation3], 18432  }
  0x24   :  { %3447 = vsyncadd [#allocation3], 4294948864 }
  0x25   :  { %3448 = dma.done.wait [#allocation5], 16  }
  0x26   :  { %3449 = vsyncadd [#allocation5], 4294967280  ;;  %v3211_v0 = vld [vmem:[#allocation2 + $0xc0] sm:$0xff]   ;;  %v3215_v4 = vld [vmem:[#allocation2 + $0xc8] sm:$0xff]   ;;  %vm156_vm0 = vsmask.f32 7424 }
  0x27   :  { %v3212_v1 = vld [vmem:[#allocation2 + $0x40] sm:$0xff]   ;;  %2777 = vmatprep.subr.bf16.mxu0 %v3211_v0  ;;  %v3216_v5 = vld [vmem:[#allocation2 + $0x48] sm:$0xff]   ;;  %v3219_v8 = vld [vmem:[#allocation2 + $0xd0] sm:$0xff]   ;;  %vm632_vm1 = vcmask 1046528   ;;  %vm883_vm2 = vcmask 1044480   ;;  %vm1687_vm5 = vcmask 1045504  }
  0x28   :  { %v3213_v2 = vld [vmem:[#allocation2 + $0x80] sm:$0xff]   ;;  %2823 = vmatprep.subr.bf16.mxu1 %v3212_v1  ;;  %v3217_v6 = vld [vmem:[#allocation2 + $0x88] sm:$0xff]   ;;  %v3220_v9 = vld [vmem:[#allocation2 + $0x50] sm:$0xff]   ;;  %vm1128_vm3 = vsmask.f32 4352 }
  0x29   :  { %v3214_v3 = vld [vmem:[#allocation2] sm:$0xff]   ;;  %2778 = vmatpush3.bf16.msra.mxu0 %v3213_v2  ;;  %v3218_v7 = vld [vmem:[#allocation2 + $0x8] sm:$0xff]   ;;  %v3221_v10 = vld [vmem:[#allocation2 + $0x90] sm:$0xff]   ;;  %vm1932_vm4 = vsmask.f32 5376 }
  0x2a   :  { %2824 = vmatpush3.bf16.msra.mxu1 %v3214_v3  ;;  %2779 = vmatprep.subr.bf16.mxu0 %v3215_v4  ;;  %v3222_v11 = vld [vmem:[#allocation2 + $0x10] sm:$0xff]   ;;  %v3223_v12 = vld [vmem:[#allocation2 + $0xd8] sm:$0xff]   ;;  %v3227_v16 = vld [vmem:[#allocation2 + $0xe0] sm:$0xff]  }
  0x2b   :  { %2825 = vmatprep.subr.bf16.mxu1 %v3216_v5  ;;  %v3224_v13 = vld [vmem:[#allocation2 + $0x58] sm:$0xff]   ;;  %v3228_v17 = vld [vmem:[#allocation2 + $0x60] sm:$0xff]   ;;  %v3231_v20 = vld [vmem:[#allocation2 + $0xe8] sm:$0xff]  }
  0x2c   :  { %v3225_v14 = vld [vmem:[#allocation2 + $0x98] sm:$0xff]   ;;  %v3229_v18 = vld [vmem:[#allocation2 + $0xa0] sm:$0xff]   ;;  %v3232_v21 = vld [vmem:[#allocation2 + $0x68] sm:$0xff]  }
  0x2d   :  { %2780 = vmatpush3.bf16.msra.mxu0 %v3217_v6  ;;  %v3226_v15 = vld [vmem:[#allocation2 + $0x18] sm:$0xff]   ;;  %v3230_v19 = vld [vmem:[#allocation2 + $0x20] sm:$0xff]   ;;  %v3233_v22 = vld [vmem:[#allocation2 + $0xa8] sm:$0xff]  }
  0x2e   :  { %2826 = vmatpush3.bf16.msra.mxu1 %v3218_v7  ;;  %2781 = vmatprep.subr.bf16.mxu0 %v3219_v8  ;;  %v3234_v23 = vld [vmem:[#allocation2 + $0x28] sm:$0xff]   ;;  %v3235_v24 = vld [vmem:[#allocation2 + $0xf0] sm:$0xff]   ;;  %v3239_v28 = vld [vmem:[#allocation2 + $0xf8] sm:$0xff]  }
  0x2f   :  { %2827 = vmatprep.subr.bf16.mxu1 %v3220_v9  ;;  %v3236_v25 = vld [vmem:[#allocation2 + $0x70] sm:$0xff]   ;;  %v3240_v29 = vld [vmem:[#allocation2 + $0x78] sm:$0xff]   ;;  %v41_v32 = vld [vmem:[%s4060_s0] sm:$0xff] }
  0x30   :  { %v3237_v26 = vld [vmem:[#allocation2 + $0xb0] sm:$0xff]   ;;  %v3241_v30 = vld [vmem:[#allocation2 + $0xb8] sm:$0xff]   ;;  %v3504_v33 = vld [vmem:[%s4060_s0 + $0x8] sm:$0xff] }
  0x31   :  { %2782 = vmatpush3.bf16.msra.mxu0 %v3221_v10  ;;  %v3238_v27 = vld [vmem:[#allocation2 + $0x30] sm:$0xff]   ;;  %v3242_v31 = vld [vmem:[#allocation2 + $0x38] sm:$0xff]   ;;  %v2548_v36 = vcombine.high %v41_v32, %v3504_v33  ;;  %v2547_v37 = vcombine.low %v41_v32, %v3504_v33  ;;  %v3247_v42 = vld [vmem:[#allocation2 + $0x140] sm:$0xff]  }
  0x32   :  { %2828 = vmatpush3.bf16.msra.mxu1 %v3222_v11  ;;  %2783 = vmatprep.subr.bf16.mxu0 %v3223_v12  ;;  %v3509_v34 = vld [vmem:[%s4060_s0 + $0x10] sm:$0xff]  ;;  %v3514_v35 = vld [vmem:[%s4060_s0 + $0x18] sm:$0xff]  ;;  %v3248_v54 = vld [vmem:[#allocation2 + $0x100] sm:$0xff]  }
  0x33   :  { %2829 = vmatprep.subr.bf16.mxu1 %v3224_v13  ;;  %v2648_v38 = vcombine.high %v3504_v33, %v3509_v34  ;;  %v2647_v39 = vcombine.low %v3504_v33, %v3509_v34  ;;  %v3524_v40 = vcombine.high %v3509_v34, %v3514_v35  ;;  %v3528_v41 = vcombine.low %v3509_v34, %v3514_v35  ;;  %v3538_v55 = vld [vmem:[%s4060_s0 + $0x20] sm:$0xff]  ;;  %v3543_v56 = vld [vmem:[%s4060_s0 + $0x28] sm:$0xff]  ;;  %v3255_v13 = vld [vmem:[#allocation2 + $0x150] sm:$0xff]  }
  0x34   :  { %v170_v43 = vshrl.u32 %v2548_v36, 16  ;;  %v172_v44 = vshll.u32 %v2548_v36, 16  ;;  %553 = vmatprep.mubr.bf16.mxu1 %v2548_v36  ;;  %v158_v45 = vshrl.u32 %v2547_v37, 16  ;;  %v160_v46 = vshll.u32 %v2547_v37, 16  ;;  %v3253_v61 = vld [vmem:[#allocation2 + $0x1c0] sm:$0xff]   ;;  %v3249_v5 = vld [vmem:[#allocation2 + $0x148] sm:$0xff]  }
  0x35   :  { %2784 = vmatpush3.bf16.msra.mxu0 %v3225_v14  ;;  %v177_v47 = vshll.u32 %v3524_v40, 16  ;;  %v165_v48 = vshll.u32 %v3528_v41, 16  ;;  %v3547_v59 = vcombine.high %v3538_v55, %v3543_v56  ;;  %v189_v60 = vshrl.u32 %v3524_v40, 16  ;;  %v3254_v0 = vld [vmem:[#allocation2 + $0x180] sm:$0xff]   ;;  %v3250_v8 = vld [vmem:[#allocation2 + $0x108] sm:$0xff]   ;;  %v3263_v36 = vld [vmem:[#allocation2 + $0x1d0] sm:$0xff]  }
  0x36   :  { %2830 = vmatpush3.bf16.msra.mxu1 %v3226_v15  ;;  %2785 = vmatprep.subr.bf16.mxu0 %v3227_v16  ;;  %v174_v49 = vrot.slane %v172_v44, 1  ;;  %v162_v50 = vrot.slane %v160_v46, 1  ;;  %v3552_v62 = vcombine.low %v3538_v55, %v3543_v56  ;;  %v181_v63 = vshrl.u32 %v3528_v41, 16  ;;  %v3257_v15 = vld [vmem:[#allocation2 + $0x1c8] sm:$0xff]  }
  0x37   :  { %2831 = vmatprep.subr.bf16.mxu1 %v3228_v17  ;;  %v179_v51 = vrot.slane %v177_v47, 1  ;;  %v167_v52 = vrot.slane %v165_v48, 1  ;;  %v1138_v53 = vrot.slane %v165_v48, 4  ;;  %v2650_v1 = vcombine.high %v3514_v35, %v3538_v55  ;;  %v3266_v48 = vld [vmem:[#allocation2 + $0x1d8] sm:$0xff]  }
  0x38   :  { %v175_v57 = vor.u32 %v174_v49, %v170_v43  ;;  %v163_v58 = vor.u32 %v162_v50, %v158_v45  ;;  %v2649_v2 = vcombine.low %v3514_v35, %v3538_v55  ;;  %v193_v7 = vshll.u32 %v3547_v59, 16  ;;  %v3264_v43 = vld [vmem:[#allocation2 + $0x190] sm:$0xff]   ;;  %v3265_v49 = vld [vmem:[#allocation2 + $0x160] sm:$0xff]   ;;  %v3342_v55 = vld [vmem:[#allocation2 + $0x318] sm:$0xff]  }
  0x39   :  { %2786 = vmatpush3.bf16.msra.mxu0 %v3229_v18  ;;  %v191_v6 = vor.u32 %v189_v60, %v179_v51  ;;  %v185_v9 = vshll.u32 %v3552_v62, 16  ;;  %v1137_v10 = vrot.slane %v181_v63, 3  ;;  %v183_v12 = vor.u32 %v181_v63, %v167_v52  ;;  %v3258_v18 = vld [vmem:[#allocation2 + $0x188] sm:$0xff]  }
  0x3a   :  { %2832 = vmatpush3.bf16.msra.mxu1 %v3230_v19  ;;  %2787 = vmatprep.subr.bf16.mxu0 %v3231_v20  ;;  %v180_v3 = vsel %vm156_vm0, %v175_v57, %v179_v51  ;;  %v168_v4 = vsel %vm156_vm0, %v163_v58, %v167_v52  ;;  %v195_v11 = vrot.slane %v193_v7, 1  ;;  %v3576_v19 = vld [vmem:[%s4060_s0 + $0x30] sm:$0xff]  ;;  %v3581_v20 = vld [vmem:[%s4060_s0 + $0x38] sm:$0xff]  ;;  %v3267_v51 = vld [vmem:[#allocation2 + $0x120] sm:$0xff]  }
  0x3b   :  { %2833 = vmatprep.subr.bf16.mxu1 %v3232_v21  ;;  %373 = vmatprep.mubr.bf16.mxu0 %v180_v3  ;;  %v187_v14 = vrot.slane %v185_v9, 1  ;;  %v3570_v16 = vor.u32 %v1138_v53, %v1137_v10  ;;  %v205_v21 = vshrl.u32 %v3547_v59, 16  ;;  %v2651_v32 = vcombine.low %v3543_v56, %v3576_v19  ;;  %v3268_v52 = vld [vmem:[#allocation2 + $0x198] sm:$0xff]   ;;  %v3615_v53 = vld [vmem:[%s4060_s0 + $0x40] sm:$0xff]  ;;  %v3272_v3 = vld [vmem:[#allocation2 + $0x168] sm:$0xff]  }
  0x3c   :  { %v196_v17 = vsel %vm156_vm0, %v191_v6, %v195_v11  ;;  %v3273_v10 = vld [vmem:[#allocation2 + $0x1a0] sm:$0xff]  }
  0x3d   :  { %2788 = vmatpush3.bf16.msra.mxu0 %v3233_v22  ;;  %v3256_v22 = vld [vmem:[#allocation2 + $0x110] sm:$0xff]  }
  0x3e   :  { %2834 = vmatpush3.bf16.msra.mxu1 %v3234_v23  ;;  %2789 = vmatprep.subr.bf16.mxu0 %v3235_v24  ;;  %v3587_v23 = vcombine.high %v3576_v19, %v3581_v20  ;;  %v3591_v24 = vcombine.low %v3576_v19, %v3581_v20 }
  0x3f   :  { %2835 = vmatprep.subr.bf16.mxu1 %v3236_v25  ;;  %v188_v25 = vsel %vm156_vm0, %v183_v12, %v187_v14 }
  0x40   :  { %v221_v50 = vshrl.u32 %v3587_v23, 16 }
  0x41   :  { %2790 = vmatpush3.bf16.msra.mxu0 %v3237_v26  ;;  %v3260_v26 = vld [vmem:[#allocation2 + $0x158] sm:$0xff]  }
  0x42   :  { %2836 = vmatpush3.bf16.msra.mxu1 %v3238_v27  ;;  %2791 = vmatprep.subr.bf16.mxu0 %v3239_v28  ;;  %v197_v27 = vshrl.u32 %v3552_v62, 16  ;;  %v2652_v28 = vcombine.high %v3543_v56, %v3576_v19  ;;  %v2653_v19 = vcombine.low %v3581_v20, %v3615_v53 }
  0x43   :  { %2837 = vmatprep.subr.bf16.mxu1 %v3240_v29  ;;  %v207_v29 = vor.u32 %v205_v21, %v195_v11 }
  0x44   :  { %v199_v45 = vor.u32 %v197_v27, %v187_v14  ;;  %v3274_v14 = vld [vmem:[#allocation2 + $0x128] sm:$0xff]  }
  0x45   :  { %2792 = vmatpush3.bf16.msra.mxu0 %v3241_v30  ;;  %v209_v30 = vshll.u32 %v3587_v23, 16 }
  0x46   :  { %2838 = vmatpush3.bf16.msra.mxu1 %v3242_v31  ;;  %2869 = vmatprep.subr.bf16.mxu0 %v3247_v42  ;;  %v201_v31 = vshll.u32 %v3591_v24, 16  ;;  %v3262_v42 = vld [vmem:[#allocation2 + $0x118] sm:$0xff]  }
  0x47   :  { %2915 = vmatprep.subr.bf16.mxu1 %v3253_v61  ;;  %v3271_v61 = vld [vmem:[#allocation2 + $0x1e0] sm:$0xff]  }
  0x48   :  { %374 = vmatmul.mubr.bf16.vlgmr.msra.gmra.mrb[0].mxu0 %v168_v4  ;;  %v203_v46 = vrot.slane %v201_v31, 1 }
  0x49   :  { %554 = vmatmul.mubr.bf16.vlgmr.msra.gmra.mrb[0].mxu1 %v2547_v37  ;;  %2870 = vmatpush3.bf16.msra.mxu0 %v3248_v54  ;;  %v211_v37 = vrot.slane %v209_v30, 1  ;;  %v82_v54 = vld [vmem:[%s4060_s0 + $0x48] sm:$0x11] }
  0x4a   :  { %561 = vmatprep.mubr.bf16.mxu1 %v3524_v40  ;;  %2916 = vmatpush3.bf16.msra.mxu1 %v3254_v0  ;;  %v3622_v57 = vcombine.high %v3615_v53, %v82_v54  ;;  %v3625_v58 = vcombine.low %v3615_v53, %v82_v54  ;;  %v204_v63 = vsel %vm156_vm0, %v199_v45, %v203_v46  ;;  %v213_v0 = vshrl.u32 %v3591_v24, 16  ;;  %v593_v54 = vld [vmem:[%s4060_s0] sm:$0xee] }
  0x4b   :  { %2871 = vmatprep.subr.bf16.mxu0 %v3249_v5  ;;  %381 = vmatprep.mubr.bf16.mxu0 %v196_v17  ;;  %v212_v44 = vsel %vm156_vm0, %v207_v29, %v211_v37  ;;  %v223_v4 = vor.u32 %v221_v50, %v211_v37  ;;  %v3281_v37 = vld [vmem:[#allocation2 + $0x1f0] sm:$0xff]   ;;  %v637_v45 = vrot.slane %v3524_v40, 1 }
  0x4c   :  { %2917 = vmatprep.subr.bf16.mxu1 %v3257_v15  ;;  %v225_v5 = vshll.u32 %v3622_v57, 16  ;;  %v217_v6 = vshll.u32 %v3625_v58, 16  ;;  %v232_v11 = vshrl.u32 %v3622_v57, 16  ;;  %v3275_v15 = vld [vmem:[#allocation2 + $0x1e8] sm:$0xff]   ;;  %v215_v17 = vor.u32 %v213_v0, %v203_v46 }
  0x4d   :  { %2872 = vmatpush3.bf16.msra.mxu0 %v3250_v8  ;;  %v2574_v8 = vcombine.high %v3615_v53, %v3615_v53  ;;  %v229_v46 = vshrl.u32 %v3625_v58, 16 }
  0x4e   :  { %2918 = vmatpush3.bf16.msra.mxu1 %v3258_v18  ;;  %2873 = vmatprep.subr.bf16.mxu0 %v3255_v13  ;;  %v227_v12 = vrot.slane %v225_v5, 1  ;;  %v219_v13 = vrot.slane %v217_v6, 1  ;;  %v885_v6 = vrot.slane %v3528_v41, 3 }
  0x4f   :  { %2919 = vmatprep.subr.bf16.mxu1 %v3263_v36 }
  0x50   :  { %382 = vmatmul.mubr.bf16.gmra.mrb[4].mxu0 %v188_v25  ;;  %v228_v18 = vsel %vm156_vm0, %v223_v4, %v227_v12  ;;  %v3277_v25 = vld [vmem:[#allocation2 + $0x170] sm:$0xff]   ;;  %v220_v29 = vsel %vm156_vm0, %v215_v17, %v219_v13  ;;  %v234_v36 = vor.u32 %v232_v11, %v227_v12  ;;  %v892_v11 = vrot.slane %v3547_v59, 3 }
  0x51   :  { %562 = vmatmul.mubr.bf16.gmra.mrb[4].mxu1 %v3528_v41  ;;  %2874 = vmatpush3.bf16.msra.mxu0 %v3256_v22  ;;  %v3276_v22 = vld [vmem:[#allocation2 + $0x1a8] sm:$0xff]   ;;  %v1150_v12 = vrot.slane %v177_v47, 4 }
  0x52   :  { %569 = vmatprep.mubr.bf16.mxu1 %v3547_v59  ;;  %389 = vmatprep.mubr.bf16.mxu0 %v212_v44  ;;  %v3283_v44 = vld [vmem:[#allocation2 + $0x178] sm:$0xff]  }
  0x53   :  { %2875 = vmatprep.subr.bf16.mxu0 %v3260_v26  ;;  %2920 = vmatpush3.bf16.msra.mxu1 %v3264_v43  ;;  %v3279_v26 = vld [vmem:[#allocation2 + $0x130] sm:$0xff]  }
  0x54   :  { %2921 = vmatprep.subr.bf16.mxu1 %v3266_v48  ;;  %v3282_v43 = vld [vmem:[#allocation2 + $0x1b0] sm:$0xff]   ;;  %v3284_v48 = vld [vmem:[#allocation2 + $0x138] sm:$0xff]  }
  0x55   :  { %2876 = vmatpush3.bf16.msra.mxu0 %v3262_v42  ;;  %v2573_v42 = vcombine.low %v3615_v53, %v3615_v53 }
  0x56   :  { %2877 = vmatprep.subr.bf16.mxu0 %v3265_v49  ;;  %v3285_v49 = vld [vmem:[#allocation2 + $0x1f8] sm:$0xff]  }
  0x57   :  { %2922 = vmatpush3.bf16.msra.mxu1 %v3268_v52  ;;  %v3286_v52 = vld [vmem:[#allocation2 + $0x1b8] sm:$0xff]  }
  0x58   :  { %390 = vmatmul.mubr.bf16.gmra.mrb[8].mxu0 %v204_v63  ;;  %2923 = vmatprep.subr.bf16.mxu1 %v3271_v61  ;;  %v838_v61 = vld [vmem:[%s4060_s0] sm:$0x88]  ;;  %v1149_v63 = vrot.slane %v189_v60, 3  ;;  %v2591_v60 = vcombine.low %v593_v54, %v3504_v33 }
  0x59   :  { %570 = vmatmul.mubr.bf16.gmra.mrb[8].mxu1 %v3552_v62  ;;  %2878 = vmatpush3.bf16.msra.mxu0 %v3267_v51  ;;  %v888_v51 = vrot.slane %v3524_v40, 3  ;;  %v3656_v4 = vcombine.low %v838_v61, %v3504_v33  ;;  %v3659_v5 = vcombine.high %v838_v61, %v3504_v33  ;;  %v634_v40 = vrot.slane %v3528_v41, 1 }
  0x5a   :  { %577 = vmatprep.mubr.bf16.mxu1 %v3587_v23  ;;  %2879 = vmatprep.subr.bf16.mxu0 %v3272_v3  ;;  %v2592_v3 = vcombine.high %v593_v54, %v3504_v33  ;;  %v896_v41 = vrot.slane %v3587_v23, 3  ;;  %v1157_v61 = vrot.slane %v205_v21, 3  ;;  %v1153_v21 = vrot.slane %v197_v27, 3  ;;  %v3344_v33 = vld [vmem:[#allocation2 + $0x390] sm:$0xff]  }
  0x5b   :  { %397 = vmatprep.mubr.bf16.mxu0 %v228_v18  ;;  %2924 = vmatpush3.bf16.msra.mxu1 %v3273_v10  ;;  %v231_v10 = vor.u32 %v229_v46, %v219_v13  ;;  %v884_v17 = vrot.slane %v3656_v4, 3  ;;  %v3668_v18 = vor.u32 %v1150_v12, %v1149_v63  ;;  %v893_v47 = vsel %vm883_vm2, %v888_v51, %v892_v11  ;;  %v3299_v46 = vld [vmem:[#allocation2 + $0x2c8] sm:$0xff]   ;;  %v3303_v12 = vld [vmem:[#allocation2 + $0x2d0] sm:$0xff]  }
  0x5c   :  { %2925 = vmatprep.subr.bf16.mxu1 %v3275_v15  ;;  %v887_v15 = vrot.slane %v3659_v5, 3  ;;  %v3294_v63 = vld [vmem:[#allocation2 + $0x208] sm:$0xff]  }
  0x5d   :  { %2880 = vmatpush3.bf16.msra.mxu0 %v3274_v14  ;;  %v636_v14 = vrot.slane %v2592_v3, 1 }
  0x5e   :  { %2881 = vmatprep.subr.bf16.mxu0 %v3277_v25  ;;  %v886_v25 = vsel %vm883_vm2, %v884_v17, %v885_v6 }
  0x5f   :  { %2926 = vmatpush3.bf16.msra.mxu1 %v3276_v22  ;;  %v638_v13 = vsel %vm632_vm1, %v636_v14, %v637_v45  ;;  %v889_v22 = vsel %vm883_vm2, %v887_v15, %v888_v51  ;;  %v645_v51 = vrot.slane %v3587_v23, 1  ;;  %v1154_v15 = vrot.slane %v185_v9, 4  ;;  %v3317_v23 = vld [vmem:[#allocation2 + $0x270] sm:$0xff]  }
  0x60   :  { %398 = vmatmul.mubr.bf16.gmra.mrb[12].mxu0 %v220_v29  ;;  %2927 = vmatprep.subr.bf16.mxu1 %v3281_v37  ;;  %v633_v29 = vrot.slane %v2591_v60, 1  ;;  %v641_v37 = vrot.slane %v3547_v59, 1  ;;  %v1158_v60 = vrot.slane %v193_v7, 4  ;;  %v1165_v59 = vrot.slane %v221_v50, 3  ;;  %v3298_v7 = vld [vmem:[#allocation2 + $0x210] sm:$0xff]  }
  0x61   :  { %578 = vmatmul.mubr.bf16.gmra.mrb[12].mxu1 %v3591_v24  ;;  %405 = vmatprep.mubr.bf16.mxu0 %v234_v36  ;;  %v3296_v36 = vld [vmem:[#allocation2 + $0x280] sm:$0xff]   ;;  %v1155_v27 = vor.u32 %v1154_v15, %v1153_v21  ;;  %v839_v50 = vld [vmem:[%s4060_s0 + $0x48] sm:$0x77]  ;;  %v647_v15 = vrot.slane %v3625_v58, 1  ;;  %v3318_v58 = vld [vmem:[#allocation2 + $0x230] sm:$0xff]  }
  0x62   :  { %585 = vmatprep.mubr.bf16.mxu1 %v2574_v8  ;;  %2882 = vmatpush3.bf16.msra.mxu0 %v3279_v26  ;;  %v3291_v8 = vld [vmem:[#allocation2 + $0x240] sm:$0xff]   ;;  %v642_v54 = vsel %vm632_vm1, %v637_v45, %v641_v37  ;;  %v3304_v45 = vld [vmem:[#allocation2 + $0x290] sm:$0xff]   ;;  %v1159_v14 = vor.u32 %v1158_v60, %v1157_v61  ;;  %v3316_v60 = vld [vmem:[#allocation2 + $0x2a8] sm:$0xff]  }
  0x63   :  { %2883 = vmatprep.subr.bf16.mxu0 %v3283_v44  ;;  %2928 = vmatpush3.bf16.msra.mxu1 %v3282_v43  ;;  %v3295_v26 = vld [vmem:[#allocation2 + $0x2c0] sm:$0xff]   ;;  %v890_v44 = vrot.slane %v3552_v62, 3  ;;  %v3312_v21 = vld [vmem:[#allocation2 + $0x268] sm:$0xff]  }
  0x64   :  { %2929 = vmatprep.subr.bf16.mxu1 %v3285_v49  ;;  %v3292_v43 = vld [vmem:[#allocation2 + $0x200] sm:$0xff]   ;;  %v3300_v49 = vld [vmem:[#allocation2 + $0x288] sm:$0xff]   ;;  %v3699_v17 = vsel %vm1128_vm3, %v3668_v18, %v1159_v14 }
  0x65   :  { %v891_v3 = vsel %vm883_vm2, %v885_v6, %v890_v44  ;;  %v3297_v6 = vld [vmem:[#allocation2 + $0x250] sm:$0xff]   ;;  %v3305_v61 = vld [vmem:[#allocation2 + $0x260] sm:$0xff]  }
  0x66   :  { %2884 = vmatpush3.bf16.msra.mxu0 %v3284_v48  ;;  %v635_v48 = vsel %vm632_vm1, %v633_v29, %v634_v40 }
  0x67   :  { %2961 = vmatprep.subr.bf16.mxu0 %v3291_v8  ;;  %2930 = vmatpush3.bf16.msra.mxu1 %v3286_v52  ;;  %v3293_v52 = vld [vmem:[#allocation2 + $0x248] sm:$0xff]   ;;  %v894_v8 = vrot.slane %v3591_v24, 3 }
  0x68   :  { %406 = vmatmul.mubr.bf16.gmra.mrb[16].mxu0 %v231_v10  ;;  %3007 = vmatprep.subr.bf16.mxu1 %v3295_v26  ;;  %v897_v10 = vsel %vm883_vm2, %v892_v11, %v896_v41  ;;  %v3306_v11 = vld [vmem:[#allocation2 + $0x2d8] sm:$0xff]   ;;  %v2612_v26 = vcombine.high %v3615_v53, %v839_v50 }
  0x69   :  { %586 = vmatmul.mubr.bf16.gmra.mrb[16].mxu1 %v2573_v42  ;;  %789 = vmatprep.mubr.bf16.mxu0 %v638_v13  ;;  %v639_v42 = vrot.slane %v3552_v62, 1  ;;  %v1166_v13 = vrot.slane %v209_v30, 4  ;;  %v3301_v30 = vld [vmem:[#allocation2 + $0x258] sm:$0xff]   ;;  %v3320_v62 = vld [vmem:[#allocation2 + $0x2b0] sm:$0xff]  }
  0x6a   :  { %1040 = vmatprep.mubr.bf16.mxu1 %v889_v22  ;;  %v3308_v22 = vld [vmem:[#allocation2 + $0x298] sm:$0xff]  }
  0x6b   :  { %v640_v9 = vsel %vm632_vm1, %v634_v40, %v639_v42  ;;  %v3717_v40 = vsel %vm1128_vm3, %v3570_v16, %v1155_v27  ;;  %v3719_v29 = vor.u32 %v1166_v13, %v1165_v59 }
  0x70   :  { %790 = vmatmul.mubr.bf16.vlgmr.msra.gmra.mrb[20].mxu0 %v635_v48  ;;  %v900_v48 = vrot.slane %v2612_v26, 3 }
  0x71   :  { %1041 = vmatmul.mubr.bf16.vlgmr.msra.gmra.mrb[20].mxu1 %v886_v25  ;;  %2962 = vmatpush3.bf16.msra.mxu0 %v3292_v43  ;;  %v1161_v25 = vrot.slane %v213_v0, 3  ;;  %v2611_v0 = vcombine.low %v3615_v53, %v839_v50  ;;  %v3311_v43 = vld [vmem:[#allocation2 + $0x2e0] sm:$0xff]  }
  0x72   :  { %1048 = vmatprep.mubr.bf16.mxu1 %v893_v47  ;;  %3008 = vmatpush3.bf16.msra.mxu1 %v3296_v36  ;;  %v646_v47 = vsel %vm632_vm1, %v641_v37, %v645_v51  ;;  %v895_v36 = vsel %vm883_vm2, %v890_v44, %v894_v8  ;;  %v3302_v37 = vld [vmem:[#allocation2 + $0x218] sm:$0xff]   ;;  %v3333_v50 = vld [vmem:[#allocation2 + $0x3c0] sm:$0xff]  }
  0x73   :  { %3009 = vmatprep.subr.bf16.mxu1 %v3299_v46  ;;  %797 = vmatprep.mubr.bf16.mxu0 %v642_v54  ;;  %v1162_v46 = vrot.slane %v201_v31, 4  ;;  %v3313_v54 = vld [vmem:[#allocation2 + $0x2a0] sm:$0xff]   ;;  %v649_v31 = vrot.slane %v3622_v57, 1 }
  0x74   :  { %2963 = vmatprep.subr.bf16.mxu0 %v3293_v52  ;;  %v643_v52 = vrot.slane %v3591_v24, 1  ;;  %v3307_v57 = vld [vmem:[#allocation2 + $0x220] sm:$0xff]   ;;  %v3323_v24 = vld [vmem:[#allocation2 + $0x2f8] sm:$0xff]  }
  0x75   :  { %2964 = vmatpush3.bf16.msra.mxu0 %v3294_v63  ;;  %v3732_v44 = vor.u32 %v1162_v46, %v1161_v25  ;;  %v901_v63 = vsel %vm883_vm2, %v896_v41, %v900_v48  ;;  %v650_v41 = vsel %vm632_vm1, %v645_v51, %v649_v31  ;;  %v1145_v51 = vshll.u32 %v3659_v5, 16  ;;  %v3343_v46 = vld [vmem:[#allocation2 + $0x3d0] sm:$0xff]  }
  0x76   :  { %3010 = vmatpush3.bf16.msra.mxu1 %v3300_v49  ;;  %2965 = vmatprep.subr.bf16.mxu0 %v3297_v6  ;;  %v3729_v49 = vsel %vm1128_vm3, %v1159_v14, %v3719_v29  ;;  %v3319_v14 = vld [vmem:[#allocation2 + $0x2f0] sm:$0xff]   ;;  %v648_v59 = vsel %vm632_vm1, %v643_v52, %v647_v15 }
  0x77   :  { %3011 = vmatprep.subr.bf16.mxu1 %v3303_v12  ;;  %v3740_v12 = vsel %vm1128_vm3, %v1155_v27, %v3732_v44  ;;  %v3321_v27 = vld [vmem:[#allocation2 + $0x278] sm:$0xff]   ;;  %v1147_v13 = vrot.slane %v1145_v51, 4 }
  0x78   :  { %798 = vmatmul.mubr.bf16.gmra.mrb[24].mxu0 %v640_v9  ;;  %v3322_v9 = vld [vmem:[#allocation2 + $0x238] sm:$0xff]  }
  0x79   :  { %1049 = vmatmul.mubr.bf16.gmra.mrb[24].mxu1 %v891_v3  ;;  %2966 = vmatpush3.bf16.msra.mxu0 %v3298_v7  ;;  %v898_v3 = vrot.slane %v2611_v0, 3  ;;  %v3334_v0 = vld [vmem:[#allocation2 + $0x380] sm:$0xff]  }
  0x7a   :  { %1056 = vmatprep.mubr.bf16.mxu1 %v897_v10  ;;  %3012 = vmatpush3.bf16.msra.mxu1 %v3304_v45  ;;  %v3315_v10 = vld [vmem:[#allocation2 + $0x2e8] sm:$0xff]   ;;  %v644_v45 = vsel %vm632_vm1, %v639_v42, %v643_v52 }
  0x7b   :  { %3013 = vmatprep.subr.bf16.mxu1 %v3306_v11  ;;  %805 = vmatprep.mubr.bf16.mxu0 %v646_v47  ;;  %v899_v6 = vsel %vm883_vm2, %v894_v8, %v898_v3  ;;  %v3314_v42 = vld [vmem:[#allocation2 + $0x228] sm:$0xff]   ;;  %v1142_v11 = vshrl.u32 %v3659_v5, 16  ;;  %v3324_v8 = vld [vmem:[#allocation2 + $0x2b8] sm:$0xff]   ;;  %v1133_v5 = vshll.u32 %v3656_v4, 16  ;;  %v3327_v47 = vld [vmem:[#allocation2 + $0x340] sm:$0xff]  }
  0x7c   :  { %2967 = vmatprep.subr.bf16.mxu0 %v3301_v30  ;;  %v3773_v52 = vld [vmem:[%s4060_s0 + $0x48] sm:$0xff] }
  0x7d   :  { %2968 = vmatpush3.bf16.msra.mxu0 %v3302_v37  ;;  %v1144_v7 = vrot.slane %v1142_v11, 3  ;;  %v1135_v26 = vrot.slane %v1133_v5, 4  ;;  %v3328_v37 = vld [vmem:[#allocation2 + $0x300] sm:$0xff]   ;;  %v2630_v34 = vcombine.high %v3615_v53, %v3773_v52  ;;  %v1604_v11 = vld [vmem:[%s4060_s0 + $0x8] sm:$0xcc]  ;;  %v2656_v51 = vcombine.high %v3773_v52, %v3773_v52  ;;  %v3361_v5 = vld [vmem:[#allocation2 + $0x330] sm:$0xff]  }
  0x7e   :  { %3014 = vmatpush3.bf16.msra.mxu1 %v3308_v22  ;;  %2969 = vmatprep.subr.bf16.mxu0 %v3305_v61  ;;  %v1130_v22 = vshrl.u32 %v3656_v4, 16  ;;  %v3337_v4 = vld [vmem:[#allocation2 + $0x3c8] sm:$0xff]  }
  0x7f   :  { %3015 = vmatprep.subr.bf16.mxu1 %v3311_v43  ;;  %v1148_v25 = vor.u32 %v1147_v13, %v1144_v7  ;;  %v1182_v61 = vshll.u32 %v2630_v34, 16  ;;  %v3359_v13 = vld [vmem:[#allocation2 + $0x370] sm:$0xff]  }
  0x80   :  { %806 = vmatmul.mubr.bf16.gmra.mrb[28].mxu0 %v644_v45  ;;  %v1132_v30 = vrot.slane %v1130_v22, 3  ;;  %v3355_v45 = vld [vmem:[#allocation2 + $0x3a0] sm:$0xff]  }
  0x81   :  { %1057 = vmatmul.mubr.bf16.gmra.mrb[28].mxu1 %v895_v36  ;;  %2970 = vmatpush3.bf16.msra.mxu0 %v3307_v57  ;;  %v1152_v36 = vsel %vm1128_vm3, %v1148_v25, %v3668_v18  ;;  %v1184_v35 = vrot.slane %v1182_v61, 4 }
  0x82   :  { %1064 = vmatprep.mubr.bf16.mxu1 %v901_v63  ;;  %3016 = vmatpush3.bf16.msra.mxu1 %v3313_v54  ;;  %v1136_v43 = vor.u32 %v1135_v26, %v1132_v30  ;;  %v1179_v54 = vshrl.u32 %v2630_v34, 16  ;;  %v3348_v63 = vld [vmem:[#allocation2 + $0x398] sm:$0xff]   ;;  %v3374_v30 = vld [vmem:[#allocation2 + $0x440] sm:$0xff]  }
  0x83   :  { %3017 = vmatprep.subr.bf16.mxu1 %v3315_v10  ;;  %813 = vmatprep.mubr.bf16.mxu0 %v650_v41  ;;  %v3340_v10 = vld [vmem:[#allocation2 + $0x358] sm:$0xff]  }
  0x84   :  { %2971 = vmatprep.subr.bf16.mxu0 %v3312_v21  ;;  %v1140_v18 = vsel %vm1128_vm3, %v1136_v43, %v3570_v16  ;;  %v3335_v16 = vld [vmem:[#allocation2 + $0x350] sm:$0xff]   ;;  %v3345_v21 = vld [vmem:[#allocation2 + $0x360] sm:$0xff]   ;;  %v3365_v43 = vld [vmem:[#allocation2 + $0x378] sm:$0xff]  }
  0x85   :  { %2972 = vmatpush3.bf16.msra.mxu0 %v3314_v42 }
  0x86   :  { %3018 = vmatpush3.bf16.msra.mxu1 %v3316_v60  ;;  %2973 = vmatprep.subr.bf16.mxu0 %v3317_v23  ;;  %v1181_v60 = vrot.slane %v1179_v54, 3  ;;  %v3356_v23 = vld [vmem:[#allocation2 + $0x328] sm:$0xff]  }
  0x87   :  { %3019 = vmatprep.subr.bf16.mxu1 %v3319_v14  ;;  %v3347_v14 = vld [vmem:[#allocation2 + $0x320] sm:$0xff]  }
  0x88   :  { %814 = vmatmul.mubr.bf16.gmra.mrb[32].mxu0 %v648_v59 }
  0x89   :  { %1065 = vmatmul.mubr.bf16.gmra.mrb[32].mxu1 %v899_v6  ;;  %821 = vmatprep.mubr.bf16.mxu0 %v649_v31  ;;  %v3336_v31 = vld [vmem:[#allocation2 + $0x310] sm:$0xff]   ;;  %v3793_v6 = vor.u32 %v1184_v35, %v1181_v60  ;;  %v3862_v35 = vld [vmem:[%s4060_s0 + $0x3c] ss:$8 sps:$4 sm:$0xff]  }
  0x8a   :  { %1072 = vmatprep.mubr.bf16.mxu1 %v900_v48  ;;  %3020 = vmatpush3.bf16.msra.mxu1 %v3320_v62  ;;  %v3329_v48 = vld [vmem:[#allocation2 + $0x348] sm:$0xff]   ;;  %v3363_v62 = vld [vmem:[#allocation2 + $0x3f0] sm:$0xff]  }
  0x8b   :  { %3021 = vmatprep.subr.bf16.mxu1 %v3323_v24  ;;  %2974 = vmatpush3.bf16.msra.mxu0 %v3318_v58  ;;  %v1186_v56 = vsel %vm1128_vm3, %v3719_v29, %v3793_v6  ;;  %v3364_v24 = vld [vmem:[#allocation2 + $0x3b0] sm:$0xff]   ;;  %v3827_v58 = vld [vmem:[%s4060_s0 + $0x18] ss:$8 sps:$4 sm:$0xff]  }
  0x8c   :  { %2975 = vmatprep.subr.bf16.mxu0 %v3321_v27 }
  0x8e   :  { %3022 = vmatpush3.bf16.msra.mxu1 %v3324_v8 }
  0x8f   :  { %3099 = vmatprep.subr.bf16.mxu1 %v3333_v50  ;;  %2976 = vmatpush3.bf16.msra.mxu0 %v3322_v9  ;;  %v3368_v9 = vld [vmem:[#allocation2 + $0x3b8] sm:$0xff]  }
  0x90   :  { %3053 = vmatprep.subr.bf16.mxu0 %v3327_v47  ;;  %822 = vmatmul.mubr.bf16.gmra.mrb[36].mxu0 %v647_v15  ;;  %v3358_v15 = vld [vmem:[#allocation2 + $0x3a8] sm:$0xff]  }
  0x91   :  { %1073 = vmatmul.mubr.bf16.gmra.mrb[36].mxu1 %v898_v3  ;;  %1325 = vmatprep.mubr.bf16.mxu0 %v1152_v36  ;;  %v3353_v3 = vld [vmem:[#allocation2 + $0x3e0] sm:$0xff]  }
  0x92   :  { %1555 = vmatprep.mubr.bf16.mxu1 %v2648_v38  ;;  %v3338_v38 = vld [vmem:[#allocation2 + $0x388] sm:$0xff]  }
  0x98   :  { %1326 = vmatmul.mubr.bf16.vlgmr.msra.gmra.mrb[40].mxu0 %v1140_v18  ;;  %v1945_v18 = vshll.u32 %v3827_v58, 16 }
  0x99   :  { %1556 = vmatmul.mubr.bf16.vlgmr.msra.gmra.mrb[40].mxu1 %v2647_v39  ;;  %v3346_v39 = vld [vmem:[#allocation2 + $0x3d8] sm:$0xff]   ;;  %3054 = vmatpush3.bf16.msra.mxu0 %v3328_v37  ;;  %v2655_v37 = vcombine.low %v3773_v52, %v3773_v52 }
  0x9a   :  { %1563 = vmatprep.mubr.bf16.mxu1 %v2650_v1  ;;  %3100 = vmatpush3.bf16.msra.mxu1 %v3334_v0  ;;  %v3330_v1 = vld [vmem:[#allocation2 + $0x308] sm:$0xff]  }
  0x9b   :  { %3101 = vmatprep.subr.bf16.mxu1 %v3337_v4  ;;  %1333 = vmatprep.mubr.bf16.mxu0 %v3699_v17  ;;  %v2629_v17 = vcombine.low %v3615_v53, %v3773_v52 }
  0x9c   :  { %3055 = vmatprep.subr.bf16.mxu0 %v3329_v48 }
  0x9d   :  { %3056 = vmatpush3.bf16.msra.mxu0 %v3330_v1  ;;  %v1170_v57 = vshrl.u32 %v2629_v17, 16  ;;  %v1173_v41 = vshll.u32 %v2629_v17, 16  ;;  %v1947_v1 = vrot.slane %v1945_v18, 3  ;;  %v1700_v18 = vrot.slane %v3862_v35, 2 }
  0x9e   :  { %3102 = vmatpush3.bf16.msra.mxu1 %v3338_v38  ;;  %3057 = vmatprep.subr.bf16.mxu0 %v3335_v16  ;;  %v3850_v16 = vld [vmem:[%s4060_s0 + $0x28] ss:$8 sps:$4 sm:$0xff]  }
  0x9f   :  { %3103 = vmatprep.subr.bf16.mxu1 %v3343_v46  ;;  %v1172_v42 = vrot.slane %v1170_v57, 3  ;;  %v1942_v46 = vshrl.u32 %v3827_v58, 16  ;;  %v1968_v60 = vshrl.u32 %v3850_v16, 16  ;;  %v1995_v57 = vshrl.u32 %v3862_v35, 16 }
  0xa0   :  { %1334 = vmatmul.mubr.bf16.gmra.mrb[44].mxu0 %v3717_v40  ;;  %v3354_v40 = vld [vmem:[#allocation2 + $0x368] sm:$0xff]  }
  0xa1   :  { %1564 = vmatmul.mubr.bf16.gmra.mrb[44].mxu1 %v2649_v2  ;;  %v2654_v2 = vcombine.high %v3581_v20, %v3615_v53  ;;  %3058 = vmatpush3.bf16.msra.mxu0 %v3336_v31  ;;  %v3819_v20 = vld [vmem:[%s4060_s0 + $0x1c] ss:$8 sps:$4 sm:$0xff]  }
  0xa2   :  { %1571 = vmatprep.mubr.bf16.mxu1 %v2652_v28  ;;  %3104 = vmatpush3.bf16.msra.mxu1 %v3344_v33  ;;  %v3357_v28 = vld [vmem:[#allocation2 + $0x3e8] sm:$0xff]   ;;  %v3367_v53 = vld [vmem:[#allocation2 + $0x3f8] sm:$0xff]   ;;  %v1962_v22 = vshll.u32 %v3819_v20, 16 }
  0xa3   :  { %3105 = vmatprep.subr.bf16.mxu1 %v3346_v39  ;;  %1341 = vmatprep.mubr.bf16.mxu0 %v3729_v49  ;;  %v1175_v49 = vrot.slane %v1173_v41, 4  ;;  %v3845_v39 = vld [vmem:[%s4060_s0 + $0x2c] ss:$8 sps:$4 sm:$0xff]   ;;  %v3366_v31 = vld [vmem:[#allocation2 + $0x338] sm:$0xff]   ;;  %v1998_v41 = vshll.u32 %v3862_v35, 16 }
  0xa4   :  { %3059 = vmatprep.subr.bf16.mxu0 %v3340_v10  ;;  %v1964_v36 = vrot.slane %v1962_v22, 3  ;;  %v1977_v61 = vshrl.u32 %v3845_v39, 16  ;;  %v1980_v10 = vshll.u32 %v3845_v39, 16 }
  0xa5   :  { %3060 = vmatpush3.bf16.msra.mxu0 %v3342_v55  ;;  %v3822_v29 = vor.u32 %v1175_v49, %v1172_v42  ;;  %v3872_v42 = vld [vmem:[%s4060_s0 + $0x38] ss:$8 sps:$4 sm:$0xff]   ;;  %v3376_v49 = vld [vmem:[#allocation2 + $0x448] sm:$0xff]  }
  0xa6   :  { %3106 = vmatpush3.bf16.msra.mxu1 %v3348_v63  ;;  %3061 = vmatprep.subr.bf16.mxu0 %v3345_v21  ;;  %v1979_v17 = vrot.slane %v1977_v61, 2 }
  0xa7   :  { %3107 = vmatprep.subr.bf16.mxu1 %v3353_v3  ;;  %v1177_v4 = vsel %vm1128_vm3, %v3732_v44, %v3822_v29  ;;  %v1944_v44 = vrot.slane %v1942_v46, 2  ;;  %v1692_v3 = vrot.slane %v3819_v20, 2  ;;  %v1694_v46 = vrot.slane %v3850_v16, 2 }
  0xa8   :  { %1342 = vmatmul.mubr.bf16.gmra.mrb[48].mxu0 %v3740_v12  ;;  %v1959_v12 = vshrl.u32 %v3819_v20, 16 }
  0xa9   :  { %1572 = vmatmul.mubr.bf16.gmra.mrb[48].mxu1 %v2651_v32  ;;  %v3806_v32 = vld [vmem:[%s4060_s0 + $0x10] sm:$0xff]  ;;  %3062 = vmatpush3.bf16.msra.mxu0 %v3347_v14  ;;  %v3375_v14 = vld [vmem:[#allocation2 + $0x400] sm:$0xff]  }
  0xaa   :  { %1579 = vmatprep.mubr.bf16.mxu1 %v2654_v2  ;;  %3108 = vmatpush3.bf16.msra.mxu1 %v3355_v45  ;;  %v3811_v8 = vcombine.low %v1604_v11, %v3806_v32  ;;  %v3814_v59 = vcombine.high %v1604_v11, %v3806_v32  ;;  %v1961_v26 = vrot.slane %v1959_v12, 2  ;;  %v1948_v2 = vor.u32 %v1947_v1, %v1944_v44  ;;  %v3388_v1 = vld [vmem:[#allocation2 + $0x460] sm:$0xff]  }
  0xab   :  { %3109 = vmatprep.subr.bf16.mxu1 %v3357_v28  ;;  %1349 = vmatprep.mubr.bf16.mxu0 %v1186_v56  ;;  %v1982_v45 = vrot.slane %v1980_v10, 3  ;;  %v1971_v28 = vshll.u32 %v3850_v16, 16  ;;  %v1997_v56 = vrot.slane %v1995_v57, 2  ;;  %v3389_v10 = vld [vmem:[#allocation2 + $0x420] sm:$0xff]  }
  0xac   :  { %v1951_v7 = vshrl.u32 %v3814_v59, 16  ;;  %v1954_v27 = vshll.u32 %v3814_v59, 16  ;;  %3063 = vmatprep.subr.bf16.mxu0 %v3354_v40  ;;  %v1934_v47 = vshrl.u32 %v3811_v8, 16  ;;  %v1937_v0 = vshll.u32 %v3811_v8, 16 }
  0xad   :  { %3064 = vmatpush3.bf16.msra.mxu0 %v3356_v23  ;;  %v1965_v48 = vor.u32 %v1964_v36, %v1961_v26  ;;  %v1691_v63 = vrot.slane %v3814_v59, 2  ;;  %v1983_v21 = vor.u32 %v1982_v45, %v1979_v17  ;;  %v1970_v40 = vrot.slane %v1968_v60, 2  ;;  %v3377_v59 = vld [vmem:[#allocation2 + $0x408] sm:$0xff]  }
  0xae   :  { %3110 = vmatpush3.bf16.msra.mxu1 %v3358_v15  ;;  %v1953_v50 = vrot.slane %v1951_v7, 2  ;;  %v1956_v25 = vrot.slane %v1954_v27, 3  ;;  %3065 = vmatprep.subr.bf16.mxu0 %v3359_v13  ;;  %v1936_v33 = vrot.slane %v1934_v47, 2  ;;  %v1939_v34 = vrot.slane %v1937_v0, 3  ;;  %v3381_v13 = vld [vmem:[#allocation2 + $0x450] sm:$0xff]  }
  0xaf   :  { %3111 = vmatprep.subr.bf16.mxu1 %v3363_v62  ;;  %v1973_v62 = vrot.slane %v1971_v28, 3  ;;  %v1984_v11 = vsel %vm1932_vm4, %v1965_v48, %v1983_v21  ;;  %v1688_v23 = vrot.slane %v3811_v8, 2  ;;  %v1986_v27 = vshrl.u32 %v3872_v42, 16 }
  0xb0   :  { %v1957_v38 = vor.u32 %v1956_v25, %v1953_v50  ;;  %1350 = vmatmul.mubr.bf16.gmra.mrb[52].mxu0 %v1177_v4  ;;  %v1940_v55 = vor.u32 %v1939_v34, %v1936_v33  ;;  %v1989_v8 = vshll.u32 %v3872_v42, 16  ;;  %v3382_v25 = vld [vmem:[#allocation2 + $0x410] sm:$0xff]   ;;  %v3385_v4 = vld [vmem:[#allocation2 + $0x458] sm:$0xff]   ;;  %v1698_v45 = vrot.slane %v3872_v42, 2 }
  0xb1   :  { %1580 = vmatmul.mubr.bf16.gmra.mrb[52].mxu1 %v2653_v19  ;;  %1357 = vmatprep.mubr.bf16.mxu0 %v3793_v6  ;;  %v1693_v6 = vsel %vm1687_vm5, %v1691_v63, %v1692_v3  ;;  %v2000_v19 = vrot.slane %v1998_v41, 3  ;;  %v1974_v7 = vor.u32 %v1973_v62, %v1970_v40  ;;  %v1613_v33 = vld [vmem:[%s4060_s0 + $0x50] sm:$0x33]  ;;  %v3395_v41 = vld [vmem:[#allocation2 + $0x428] sm:$0xff]  }
  0xb2   :  { %1587 = vmatprep.mubr.bf16.mxu1 %v2656_v51  ;;  %3112 = vmatpush3.bf16.msra.mxu1 %v3364_v24  ;;  %v1966_v54 = vsel %vm1932_vm4, %v1957_v38, %v1965_v48  ;;  %v1949_v15 = vsel %vm1932_vm4, %v1940_v55, %v1948_v2  ;;  %v1689_v51 = vrot.slane %v3827_v58, 2  ;;  %v1893_v24 = vld [vmem:[%s4060_s0 + $0x50] sm:$0x77]  ;;  %v1991_v26 = vrot.slane %v1989_v8, 3  ;;  %v3387_v48 = vld [vmem:[#allocation2 + $0x418] sm:$0xff]  }
  0xb3   :  { %3113 = vmatprep.subr.bf16.mxu1 %v3367_v53  ;;  %3066 = vmatpush3.bf16.msra.mxu0 %v3361_v5  ;;  %v1696_v53 = vrot.slane %v3845_v39, 2  ;;  %v1975_v47 = vsel %vm1932_vm4, %v1948_v2, %v1974_v7  ;;  %v3893_v36 = vcombine.low %v3773_v52, %v1893_v24  ;;  %v2682_v63 = vcombine.high %v3773_v52, %v1613_v33  ;;  %v3394_v2 = vld [vmem:[#allocation2 + $0x468] sm:$0xff]   ;;  %v3397_v62 = vld [vmem:[#allocation2 + $0x430] sm:$0xff]  }
  0xb4   :  { %3067 = vmatprep.subr.bf16.mxu0 %v3365_v43  ;;  %v1690_v5 = vsel %vm1687_vm5, %v1688_v23, %v1689_v51  ;;  %v1695_v61 = vsel %vm1687_vm5, %v1689_v51, %v1694_v46 }
  0xb5   :  { %v1697_v50 = vsel %vm1687_vm5, %v1692_v3, %v1696_v53  ;;  %v2004_v34 = vshrl.u32 %v3893_v36, 16  ;;  %v2007_v44 = vshll.u32 %v3893_v36, 16  ;;  %v1704_v28 = vrot.slane %v2682_v63, 2 }
  0xb6   :  { %3114 = vmatpush3.bf16.msra.mxu1 %v3368_v9  ;;  %v2001_v9 = vor.u32 %v2000_v19, %v1997_v56  ;;  %v3399_v56 = vld [vmem:[#allocation2 + $0x438] sm:$0xff]   ;;  %v2259_v19 = vrot.slane %v3862_v35, 3  ;;  %v2257_v35 = vrot.slane %v3872_v42, 3 }
  0xb7   :  { %3191 = vmatprep.subr.bf16.mxu1 %v3374_v30  ;;  %3068 = vmatpush3.bf16.msra.mxu0 %v3366_v31  ;;  %v1701_v31 = vsel %vm1687_vm5, %v1696_v53, %v1700_v18  ;;  %v2006_v17 = vrot.slane %v2004_v34, 2  ;;  %v2009_v60 = vrot.slane %v2007_v44, 3 }
  0xb8   :  { %3145 = vmatprep.subr.bf16.mxu0 %v3374_v30  ;;  %1358 = vmatmul.mubr.bf16.gmra.mrb[56].mxu0 %v3822_v29  ;;  %v3883_v29 = vcombine.high %v3773_v52, %v1893_v24  ;;  %v1988_v30 = vrot.slane %v1986_v27, 2  ;;  %v2002_v0 = vsel %vm1932_vm4, %v1983_v21, %v2001_v9  ;;  %v3396_v21 = vld [vmem:[#allocation2 + $0x470] sm:$0xff]  }
  0xb9   :  { %1588 = vmatmul.mubr.bf16.gmra.mrb[56].mxu1 %v2655_v37  ;;  %1844 = vmatprep.mubr.bf16.mxu0 %v1693_v6  ;;  %v2010_v57 = vor.u32 %v2009_v60, %v2006_v17  ;;  %v1699_v6 = vsel %vm1687_vm5, %v1694_v46, %v1698_v45 }
  0xba   :  { %2159 = vmatprep.mubr.bf16.mxu1 %v1966_v54  ;;  %v2013_v12 = vshrl.u32 %v3883_v29, 16  ;;  %v2016_v22 = vshll.u32 %v3883_v29, 16  ;;  %v1992_v37 = vor.u32 %v1991_v26, %v1988_v30  ;;  %v2263_v23 = vrot.slane %v3883_v29, 3 }
  0xbb   :  { %v2261_v29 = vrot.slane %v3893_v36, 3 }
  0xbc   :  { %v2015_v43 = vrot.slane %v2013_v12, 2  ;;  %v2018_v38 = vrot.slane %v2016_v22, 3  ;;  %v1993_v3 = vsel %vm1932_vm4, %v1974_v7, %v1992_v37  ;;  %v2011_v40 = vsel %vm1932_vm4, %v1992_v37, %v2010_v57 }
  0xbd   :  { %v2251_v7 = vrot.slane %v3819_v20, 3  ;;  %v2248_v12 = vrot.slane %v3827_v58, 3  ;;  %v2255_v20 = vrot.slane %v3845_v39, 3 }
  0xbe   :  { %v2019_v54 = vor.u32 %v2018_v38, %v2015_v43 }
  0xbf   :  { %v2256_v22 = vsel %vm883_vm2, %v2251_v7, %v2255_v20 }
  0xc0   :  { %1845 = vmatmul.mubr.bf16.vlgmr.msra.gmra.mrb[60].mxu0 %v1690_v5  ;;  %v2020_v55 = vsel %vm1932_vm4, %v2001_v9, %v2019_v54 }
  0xc1   :  { %2160 = vmatmul.mubr.bf16.vlgmr.msra.gmra.mrb[60].mxu1 %v1949_v15  ;;  %3146 = vmatpush3.bf16.msra.mxu0 %v3375_v14  ;;  %v1705_v15 = vsel %vm1687_vm5, %v1700_v18, %v1704_v28 }
  0xc2   :  { %2167 = vmatprep.mubr.bf16.mxu1 %v1984_v11  ;;  %3199 = vmatpush3.bf16.msra.mxu1 %v3375_v14  ;;  %v2681_v14 = vcombine.low %v3773_v52, %v1613_v33  ;;  %v2208_v52 = vld [vmem:[%s4060_s0 + $0x8] sm:$0x88] }
  0xc3   :  { %3192 = vmatprep.subr.bf16.mxu1 %v3376_v49  ;;  %1852 = vmatprep.mubr.bf16.mxu0 %v1697_v50  ;;  %v2718_v24 = vcombine.high %v2208_v52, %v3806_v32  ;;  %v2717_v27 = vcombine.low %v2208_v52, %v3806_v32  ;;  %v2253_v32 = vrot.slane %v3850_v16, 3  ;;  %v2260_v50 = vsel %vm883_vm2, %v2255_v20, %v2259_v19 }
  0xc4   :  { %3147 = vmatprep.subr.bf16.mxu0 %v3376_v49  ;;  %v3398_v49 = vld [vmem:[#allocation2 + $0x478] sm:$0xff]   ;;  %v1702_v11 = vrot.slane %v2681_v14, 2 }
  0xc5   :  { %3148 = vmatpush3.bf16.msra.mxu0 %v3377_v59  ;;  %v2250_v53 = vrot.slane %v2718_v24, 3  ;;  %v2247_v9 = vrot.slane %v2717_v27, 3  ;;  %v2254_v5 = vsel %vm883_vm2, %v2248_v12, %v2253_v32  ;;  %v2258_v58 = vsel %vm883_vm2, %v2253_v32, %v2257_v35 }
  0xc6   :  { %3200 = vmatpush3.bf16.msra.mxu1 %v3377_v59  ;;  %3149 = vmatprep.subr.bf16.mxu0 %v3381_v13  ;;  %v1703_v51 = vsel %vm1687_vm5, %v1698_v45, %v1702_v11  ;;  %v2264_v59 = vsel %vm883_vm2, %v2259_v19, %v2263_v23 }
  0xc7   :  { %3193 = vmatprep.subr.bf16.mxu1 %v3381_v13  ;;  %v2252_v8 = vsel %vm883_vm2, %v2250_v53, %v2251_v7  ;;  %v2262_v13 = vsel %vm883_vm2, %v2257_v35, %v2261_v29  ;;  %v2249_v42 = vsel %vm883_vm2, %v2247_v9, %v2248_v12 }
  0xc8   :  { %1853 = vmatmul.mubr.bf16.gmra.mrb[64].mxu0 %v1695_v61 }
  0xc9   :  { %2168 = vmatmul.mubr.bf16.gmra.mrb[64].mxu1 %v1975_v47  ;;  %3150 = vmatpush3.bf16.msra.mxu0 %v3382_v25 }
  0xca   :  { %2175 = vmatprep.mubr.bf16.mxu1 %v2002_v0  ;;  %3201 = vmatpush3.bf16.msra.mxu1 %v3382_v25 }
  0xcb   :  { %3194 = vmatprep.subr.bf16.mxu1 %v3385_v4  ;;  %1860 = vmatprep.mubr.bf16.mxu0 %v1701_v31 }
  0xcc   :  { %3151 = vmatprep.subr.bf16.mxu0 %v3385_v4 }
  0xcd   :  { %3152 = vmatpush3.bf16.msra.mxu0 %v3387_v48 }
  0xce   :  { %3202 = vmatpush3.bf16.msra.mxu1 %v3387_v48  ;;  %3153 = vmatprep.subr.bf16.mxu0 %v3388_v1 }
  0xcf   :  { %3195 = vmatprep.subr.bf16.mxu1 %v3388_v1 }
  0xd0   :  { %1861 = vmatmul.mubr.bf16.gmra.mrb[68].mxu0 %v1699_v6 }
  0xd1   :  { %2176 = vmatmul.mubr.bf16.gmra.mrb[68].mxu1 %v1993_v3  ;;  %3154 = vmatpush3.bf16.msra.mxu0 %v3389_v10 }
  0xd2   :  { %2183 = vmatprep.mubr.bf16.mxu1 %v2020_v55  ;;  %3203 = vmatpush3.bf16.msra.mxu1 %v3389_v10 }
  0xd3   :  { %3196 = vmatprep.subr.bf16.mxu1 %v3394_v2  ;;  %1868 = vmatprep.mubr.bf16.mxu0 %v1705_v15 }
  0xd4   :  { %3155 = vmatprep.subr.bf16.mxu0 %v3394_v2 }
  0xd5   :  { %3156 = vmatpush3.bf16.msra.mxu0 %v3395_v41 }
  0xd6   :  { %3204 = vmatpush3.bf16.msra.mxu1 %v3395_v41  ;;  %3157 = vmatprep.subr.bf16.mxu0 %v3396_v21 }
  0xd7   :  { %3197 = vmatprep.subr.bf16.mxu1 %v3396_v21 }
  0xd8   :  { %1869 = vmatmul.mubr.bf16.gmra.mrb[72].mxu0 %v1703_v51 }
  0xd9   :  { %2184 = vmatmul.mubr.bf16.gmra.mrb[72].mxu1 %v2011_v40  ;;  %1876 = vmatprep.mubr.bf16.mxu0 %v1704_v28 }
  0xda   :  { %2191 = vmatprep.mubr.bf16.mxu1 %v2019_v54  ;;  %3205 = vmatpush3.bf16.msra.mxu1 %v3397_v62 }
  0xdb   :  { %3198 = vmatprep.subr.bf16.mxu1 %v3398_v49  ;;  %3158 = vmatpush3.bf16.msra.mxu0 %v3397_v62 }
  0xdc   :  { %3159 = vmatprep.subr.bf16.mxu0 %v3398_v49 }
  0xde   :  { %3206 = vmatpush3.bf16.msra.mxu1 %v3399_v56 }
  0xdf   :  { %3160 = vmatpush3.bf16.msra.mxu0 %v3399_v56 }
  0xe0   :  { %1877 = vmatmul.mubr.bf16.gmra.mrb[76].mxu0 %v1702_v11 }
  0xe1   :  { %2192 = vmatmul.mubr.bf16.gmra.mrb[76].mxu1 %v2010_v57  ;;  %2403 = vmatprep.mubr.bf16.mxu0 %v2252_v8 }
  0xe2   :  { %2427 = vmatprep.mubr.bf16.mxu1 %v2264_v59 }
  0xe8   :  { %2404 = vmatmul.mubr.bf16.vlgmr.msra.gmra.mrb[80].mxu0 %v2249_v42 }
  0xe9   :  { %2428 = vmatmul.mubr.bf16.vlgmr.msra.gmra.mrb[80].mxu1 %v2262_v13  ;;  %2411 = vmatprep.mubr.bf16.mxu0 %v2256_v22 }
  0xea   :  { %2435 = vmatprep.mubr.bf16.mxu1 %v2263_v23 }
  0xf0   :  { %2412 = vmatmul.mubr.bf16.gmra.mrb[84].mxu0 %v2254_v5 }
  0xf1   :  { %2436 = vmatmul.mubr.bf16.gmra.mrb[84].mxu1 %v2261_v29  ;;  %2419 = vmatprep.mubr.bf16.mxu0 %v2260_v50 }
  0xf8   :  { %2420 = vmatmul.mubr.bf16.gmra.mrb[88].mxu0 %v2258_v58 }
 0x11b   :  { %v2793_v0 = vpop.f32.mrb[0].mxu0 }
 0x11c   :  { %v2839_v39 = vpop.f32.mrb[0].mxu1  ;;  %v2794_v4 = vpop.f32.mrb[1].mxu0 }
 0x11d   :  { %v2840_v25 = vpop.f32.mrb[1].mxu1  ;;  %v2795_v16 = vadd.f32 %v2794_v4, %v2793_v0  ;;  %v2796_v38 = vpop.f32.mrb[2].mxu0 }
 0x11e   :  { %v2841_v47 = vadd.f32 %v2840_v25, %v2839_v39  ;;  %v2842_v30 = vpop.f32.mrb[2].mxu1  ;;  %v2797_v18 = vpop.f32.mrb[3].mxu0 }
 0x11f   :  { %v2843_v26 = vpop.f32.mrb[3].mxu1  ;;  %v2798_v34 = vadd.f32 %v2797_v18, %v2796_v38 }
 0x120   :  { %v2844_v36 = vadd.f32 %v2843_v26, %v2842_v30  ;;  %v3935_v33 = vadd.f32 %v2841_v47, %v2795_v16 }
 0x122   :  { %v3937_v54 = vadd.f32 %v2844_v36, %v2798_v34 }
 0x123   :  { %v2799_v61 = vpop.f32.mrb[4].mxu0 }
 0x124   :  { %v2845_v43 = vpop.f32.mrb[4].mxu1  ;;  %v2800_v31 = vpop.f32.mrb[5].mxu0 }
 0x125   :  { %v2846_v46 = vpop.f32.mrb[5].mxu1  ;;  %v2801_v3 = vadd.f32 %v2800_v31, %v2799_v61  ;;  %v2802_v10 = vpop.f32.mrb[6].mxu0 }
 0x126   :  { %v2847_v37 = vadd.f32 %v2846_v46, %v2845_v43  ;;  %v2848_v48 = vpop.f32.mrb[6].mxu1  ;;  %v2803_v60 = vpop.f32.mrb[7].mxu0 }
 0x127   :  { %v2849_v44 = vpop.f32.mrb[7].mxu1  ;;  %v2804_v28 = vadd.f32 %v2803_v60, %v2802_v10 }
 0x128   :  { %v2850_v1 = vadd.f32 %v2849_v44, %v2848_v48  ;;  %v3939_v45 = vadd.f32 %v2847_v37, %v2801_v3 }
 0x12a   :  { %v3941_v21 = vadd.f32 %v2850_v1, %v2804_v28 }
 0x12b   :  { %v2805_v6 = vpop.f32.mrb[8].mxu0 }
 0x12c   :  { %v2851_v63 = vpop.f32.mrb[8].mxu1  ;;  %v2806_v14 = vpop.f32.mrb[9].mxu0 }
 0x12d   :  { %v2852_v17 = vpop.f32.mrb[9].mxu1  ;;  %v2807_v40 = vadd.f32 %v2806_v14, %v2805_v6  ;;  %v2808_v62 = vpop.f32.mrb[10].mxu0 }
 0x12e   :  { %v2853_v55 = vadd.f32 %v2852_v17, %v2851_v63  ;;  %v2854_v2 = vpop.f32.mrb[10].mxu1  ;;  %v2809_v11 = vpop.f32.mrb[11].mxu0 }
 0x12f   :  { %v2855_v57 = vpop.f32.mrb[11].mxu1  ;;  %v2810_v23 = vadd.f32 %v2809_v11, %v2808_v62 }
 0x130   :  { %v2856_v41 = vadd.f32 %v2855_v57, %v2854_v2  ;;  %v3943_v19 = vadd.f32 %v2853_v55, %v2807_v40 }
 0x132   :  { %v3945_v59 = vadd.f32 %v2856_v41, %v2810_v23 }
 0x133   :  { %v2811_v53 = vpop.f32.mrb[12].mxu0 }
 0x134   :  { %v2857_v15 = vpop.f32.mrb[12].mxu1  ;;  %v2812_v7 = vpop.f32.mrb[13].mxu0 }
 0x135   :  { %v2858_v49 = vpop.f32.mrb[13].mxu1  ;;  %v2813_v35 = vadd.f32 %v2812_v7, %v2811_v53  ;;  %v2814_v29 = vpop.f32.mrb[14].mxu0 }
 0x136   :  { %v2859_v56 = vadd.f32 %v2858_v49, %v2857_v15  ;;  %v2860_v52 = vpop.f32.mrb[14].mxu1  ;;  %v2815_v8 = vpop.f32.mrb[15].mxu0 }
 0x137   :  { %v2861_v51 = vpop.f32.mrb[15].mxu1  ;;  %v2816_v12 = vadd.f32 %v2815_v8, %v2814_v29 }
 0x138   :  { %v2862_v24 = vadd.f32 %v2861_v51, %v2860_v52  ;;  %v3947_v9 = vadd.f32 %v2859_v56, %v2813_v35 }
 0x13a   :  { %v3949_v32 = vadd.f32 %v2862_v24, %v2816_v12 }
 0x13b   :  { %v2817_v5 = vpop.f32.mrb[16].mxu0 }
 0x13c   :  { %v2863_v27 = vpop.f32.mrb[16].mxu1  ;;  %v2818_v50 = vpop.f32.mrb[17].mxu0 }
 0x13d   :  { %v2864_v13 = vpop.f32.mrb[17].mxu1  ;;  %v2819_v58 = vadd.f32 %v2818_v50, %v2817_v5  ;;  %v2820_v39 = vpop.f32.mrb[18].mxu0 }
 0x13e   :  { %v2865_v20 = vadd.f32 %v2864_v13, %v2863_v27  ;;  %v2866_v42 = vpop.f32.mrb[18].mxu1  ;;  %v2821_v47 = vpop.f32.mrb[19].mxu0 }
 0x13f   :  { %v2867_v22 = vpop.f32.mrb[19].mxu1 }
 0x140   :  { %v3951_v26 = vadd.f32 %v2865_v20, %v2819_v58 }
 0x143   :  { %v2885_v16 = vpop.f32.mrb[20].mxu0 }
 0x144   :  { %v2931_v25 = vpop.f32.mrb[20].mxu1  ;;  %v2886_v38 = vpop.f32.mrb[21].mxu0 }
 0x145   :  { %v2932_v30 = vpop.f32.mrb[21].mxu1  ;;  %v2887_v46 = vadd.f32 %v2886_v38, %v2885_v16  ;;  %v2888_v18 = vpop.f32.mrb[22].mxu0 }
 0x146   :  { %v2933_v36 = vadd.f32 %v2932_v30, %v2931_v25  ;;  %v2934_v0 = vpop.f32.mrb[22].mxu1  ;;  %v2889_v48 = vpop.f32.mrb[23].mxu0 }
 0x147   :  { %v2935_v4 = vpop.f32.mrb[23].mxu1  ;;  %v829_v44 = vadd.f32 %v2887_v46, %v3935_v33  ;;  %v2890_v1 = vadd.f32 %v2889_v48, %v2888_v18 }
 0x148   :  { %v2936_v43 = vadd.f32 %v2935_v4, %v2934_v0 }
 0x149   :  { %v830_v3 = vadd.f32 %v2890_v1, %v3937_v54  ;;  %v3955_v10 = vadd.f32 %v2933_v36, %v829_v44 }
 0x14b   :  { %v3957_v60 = vadd.f32 %v2936_v43, %v830_v3  ;;  %v2891_v55 = vpop.f32.mrb[24].mxu0 }
 0x14c   :  { %v2937_v37 = vpop.f32.mrb[24].mxu1  ;;  %v2892_v2 = vpop.f32.mrb[25].mxu0 }
 0x14d   :  { %v2938_v34 = vpop.f32.mrb[25].mxu1  ;;  %v2893_v28 = vadd.f32 %v2892_v2, %v2891_v55  ;;  %v2894_v57 = vpop.f32.mrb[26].mxu0 }
 0x14e   :  { %v2939_v61 = vadd.f32 %v2938_v34, %v2937_v37  ;;  %v2940_v31 = vpop.f32.mrb[26].mxu1  ;;  %v2895_v6 = vpop.f32.mrb[27].mxu0 }
 0x14f   :  { %v2941_v63 = vpop.f32.mrb[27].mxu1  ;;  %v831_v33 = vadd.f32 %v2893_v28, %v3939_v45  ;;  %v2896_v15 = vadd.f32 %v2895_v6, %v2894_v57 }
 0x150   :  { %v2942_v17 = vadd.f32 %v2941_v63, %v2940_v31 }
 0x151   :  { %v832_v54 = vadd.f32 %v2896_v15, %v3941_v21  ;;  %v3961_v11 = vadd.f32 %v2939_v61, %v831_v33 }
 0x153   :  { %v3963_v52 = vadd.f32 %v2942_v17, %v832_v54  ;;  %v2897_v23 = vpop.f32.mrb[28].mxu0 }
 0x154   :  { %v2943_v41 = vpop.f32.mrb[28].mxu1  ;;  %v2898_v51 = vpop.f32.mrb[29].mxu0 }
 0x155   :  { %v2944_v14 = vpop.f32.mrb[29].mxu1  ;;  %v2899_v24 = vadd.f32 %v2898_v51, %v2897_v23  ;;  %v2900_v53 = vpop.f32.mrb[30].mxu0 }
 0x156   :  { %v2945_v40 = vadd.f32 %v2944_v14, %v2943_v41  ;;  %v2946_v62 = vpop.f32.mrb[30].mxu1  ;;  %v2901_v35 = vpop.f32.mrb[31].mxu0 }
 0x157   :  { %v2947_v49 = vpop.f32.mrb[31].mxu1  ;;  %v833_v45 = vadd.f32 %v2899_v24, %v3943_v19  ;;  %v2902_v27 = vadd.f32 %v2901_v35, %v2900_v53 }
 0x158   :  { %v2948_v56 = vadd.f32 %v2947_v49, %v2946_v62 }
 0x159   :  { %v834_v21 = vadd.f32 %v2902_v27, %v3945_v59  ;;  %v3967_v20 = vadd.f32 %v2945_v40, %v833_v45 }
 0x15b   :  { %v3969_v22 = vadd.f32 %v2948_v56, %v834_v21  ;;  %v2903_v5 = vpop.f32.mrb[32].mxu0 }
 0x15c   :  { %v2949_v7 = vpop.f32.mrb[32].mxu1  ;;  %v2904_v50 = vpop.f32.mrb[33].mxu0 }
 0x15d   :  { %v2950_v29 = vpop.f32.mrb[33].mxu1  ;;  %v2905_v58 = vadd.f32 %v2904_v50, %v2903_v5  ;;  %v2906_v39 = vpop.f32.mrb[34].mxu0 }
 0x15e   :  { %v2951_v8 = vadd.f32 %v2950_v29, %v2949_v7  ;;  %v2952_v13 = vpop.f32.mrb[34].mxu1  ;;  %v2907_v47 = vpop.f32.mrb[35].mxu0 }
 0x15f   :  { %v2953_v12 = vpop.f32.mrb[35].mxu1  ;;  %v835_v19 = vadd.f32 %v2905_v58, %v3947_v9  ;;  %v2908_v36 = vadd.f32 %v2907_v47, %v2906_v39 }
 0x160   :  { %v2954_v42 = vadd.f32 %v2953_v12, %v2952_v13 }
 0x161   :  { %v836_v59 = vadd.f32 %v2908_v36, %v3949_v32  ;;  %v3973_v16 = vadd.f32 %v2951_v8, %v835_v19 }
 0x163   :  { %v3975_v38 = vadd.f32 %v2954_v42, %v836_v59  ;;  %v2909_v46 = vpop.f32.mrb[36].mxu0 }
 0x164   :  { %v2955_v25 = vpop.f32.mrb[36].mxu1  ;;  %v2910_v18 = vpop.f32.mrb[37].mxu0 }
 0x165   :  { %v2956_v30 = vpop.f32.mrb[37].mxu1  ;;  %v2911_v37 = vadd.f32 %v2910_v18, %v2909_v46  ;;  %v2912_v48 = vpop.f32.mrb[38].mxu0 }
 0x166   :  { %v2957_v0 = vadd.f32 %v2956_v30, %v2955_v25  ;;  %v2958_v4 = vpop.f32.mrb[38].mxu1  ;;  %v2913_v44 = vpop.f32.mrb[39].mxu0 }
 0x167   :  { %v2959_v43 = vpop.f32.mrb[39].mxu1  ;;  %v837_v61 = vadd.f32 %v2911_v37, %v3951_v26 }
 0x169   :  { %v3978_v3 = vadd.f32 %v2957_v0, %v837_v61 }
 0x16b   :  { %v2977_v32 = vpop.f32.mrb[40].mxu0 }
 0x16c   :  { %v3023_v34 = vpop.f32.mrb[40].mxu1  ;;  %v2978_v55 = vpop.f32.mrb[41].mxu0 }
 0x16d   :  { %v3024_v1 = vpop.f32.mrb[41].mxu1  ;;  %v2979_v2 = vadd.f32 %v2978_v55, %v2977_v32  ;;  %v2980_v28 = vpop.f32.mrb[42].mxu0 }
 0x16e   :  { %v3025_v9 = vadd.f32 %v3024_v1, %v3023_v34  ;;  %v3026_v31 = vpop.f32.mrb[42].mxu1  ;;  %v2981_v41 = vpop.f32.mrb[43].mxu0 }
 0x16f   :  { %v3027_v63 = vpop.f32.mrb[43].mxu1  ;;  %v1365_v14 = vadd.f32 %v2979_v2, %v3955_v10  ;;  %v2982_v33 = vadd.f32 %v2981_v41, %v2980_v28 }
 0x170   :  { %v3028_v17 = vadd.f32 %v3027_v63, %v3026_v31 }
 0x171   :  { %v1366_v26 = vadd.f32 %v2982_v33, %v3957_v60  ;;  %v3982_v49 = vadd.f32 %v3025_v9, %v1365_v14 }
 0x173   :  { %v3984_v56 = vadd.f32 %v3028_v17, %v1366_v26  ;;  %v2983_v23 = vpop.f32.mrb[44].mxu0 }
 0x174   :  { %v3029_v57 = vpop.f32.mrb[44].mxu1  ;;  %v2984_v51 = vpop.f32.mrb[45].mxu0 }
 0x175   :  { %v3030_v6 = vpop.f32.mrb[45].mxu1  ;;  %v2985_v24 = vadd.f32 %v2984_v51, %v2983_v23  ;;  %v2986_v53 = vpop.f32.mrb[46].mxu0 }
 0x176   :  { %v3031_v15 = vadd.f32 %v3030_v6, %v3029_v57  ;;  %v3032_v40 = vpop.f32.mrb[46].mxu1  ;;  %v2987_v35 = vpop.f32.mrb[47].mxu0 }
 0x177   :  { %v3033_v62 = vpop.f32.mrb[47].mxu1  ;;  %v1367_v10 = vadd.f32 %v2985_v24, %v3961_v11  ;;  %v2988_v45 = vadd.f32 %v2987_v35, %v2986_v53 }
 0x178   :  { %v3034_v54 = vadd.f32 %v3033_v62, %v3032_v40 }
 0x179   :  { %v1368_v60 = vadd.f32 %v2988_v45, %v3963_v52  ;;  %v3988_v12 = vadd.f32 %v3031_v15, %v1367_v10 }
 0x17b   :  { %v3990_v42 = vadd.f32 %v3034_v54, %v1368_v60  ;;  %v2989_v5 = vpop.f32.mrb[48].mxu0 }
 0x17c   :  { %v3035_v7 = vpop.f32.mrb[48].mxu1  ;;  %v2990_v50 = vpop.f32.mrb[49].mxu0 }
 0x17d   :  { %v3036_v29 = vpop.f32.mrb[49].mxu1  ;;  %v2991_v58 = vadd.f32 %v2990_v50, %v2989_v5  ;;  %v2992_v39 = vpop.f32.mrb[50].mxu0 }
 0x17e   :  { %v3037_v27 = vadd.f32 %v3036_v29, %v3035_v7  ;;  %v3038_v8 = vpop.f32.mrb[50].mxu1  ;;  %v2993_v47 = vpop.f32.mrb[51].mxu0 }
 0x17f   :  { %v3039_v13 = vpop.f32.mrb[51].mxu1  ;;  %v1369_v11 = vadd.f32 %v2991_v58, %v3967_v20  ;;  %v2994_v19 = vadd.f32 %v2993_v47, %v2992_v39 }
 0x180   :  { %v3040_v21 = vadd.f32 %v3039_v13, %v3038_v8 }
 0x181   :  { %v1370_v52 = vadd.f32 %v2994_v19, %v3969_v22  ;;  %v3994_v43 = vadd.f32 %v3037_v27, %v1369_v11 }
 0x183   :  { %v3996_v46 = vadd.f32 %v3040_v21, %v1370_v52  ;;  %v2995_v18 = vpop.f32.mrb[52].mxu0 }
 0x184   :  { %v3041_v25 = vpop.f32.mrb[52].mxu1  ;;  %v2996_v37 = vpop.f32.mrb[53].mxu0 }
 0x185   :  { %v3042_v30 = vpop.f32.mrb[53].mxu1  ;;  %v2997_v48 = vadd.f32 %v2996_v37, %v2995_v18  ;;  %v2998_v34 = vpop.f32.mrb[54].mxu0 }
 0x186   :  { %v3043_v36 = vadd.f32 %v3042_v30, %v3041_v25  ;;  %v3044_v0 = vpop.f32.mrb[54].mxu1  ;;  %v2999_v1 = vpop.f32.mrb[55].mxu0 }
 0x187   :  { %v3045_v4 = vpop.f32.mrb[55].mxu1  ;;  %v1371_v20 = vadd.f32 %v2997_v48, %v3973_v16  ;;  %v3000_v9 = vadd.f32 %v2999_v1, %v2998_v34 }
 0x188   :  { %v3046_v59 = vadd.f32 %v3045_v4, %v3044_v0 }
 0x189   :  { %v1372_v22 = vadd.f32 %v3000_v9, %v3975_v38  ;;  %v4000_v32 = vadd.f32 %v3043_v36, %v1371_v20 }
 0x18b   :  { %v4002_v55 = vadd.f32 %v3046_v59, %v1372_v22  ;;  %v3001_v2 = vpop.f32.mrb[56].mxu0 }
 0x18c   :  { %v3047_v44 = vpop.f32.mrb[56].mxu1  ;;  %v3002_v28 = vpop.f32.mrb[57].mxu0 }
 0x18d   :  { %v3048_v61 = vpop.f32.mrb[57].mxu1  ;;  %v3003_v57 = vadd.f32 %v3002_v28, %v3001_v2  ;;  %v3004_v41 = vpop.f32.mrb[58].mxu0 }
 0x18e   :  { %v3049_v31 = vadd.f32 %v3048_v61, %v3047_v44  ;;  %v3050_v63 = vpop.f32.mrb[58].mxu1  ;;  %v3005_v14 = vpop.f32.mrb[59].mxu0 }
 0x18f   :  { %v3051_v17 = vpop.f32.mrb[59].mxu1  ;;  %v1373_v15 = vadd.f32 %v3003_v57, %v3978_v3 }
 0x191   :  { %v4005_v26 = vadd.f32 %v3049_v31, %v1373_v15 }
 0x193   :  { %v3069_v38 = vpop.f32.mrb[60].mxu0 }
 0x194   :  { %v3115_v6 = vpop.f32.mrb[60].mxu1  ;;  %v3070_v23 = vpop.f32.mrb[61].mxu0 }
 0x195   :  { %v3116_v33 = vpop.f32.mrb[61].mxu1  ;;  %v3071_v51 = vadd.f32 %v3070_v23, %v3069_v38  ;;  %v3072_v24 = vpop.f32.mrb[62].mxu0 }
 0x196   :  { %v3117_v16 = vadd.f32 %v3116_v33, %v3115_v6  ;;  %v3118_v40 = vpop.f32.mrb[62].mxu1  ;;  %v3073_v7 = vpop.f32.mrb[63].mxu0 }
 0x197   :  { %v3119_v62 = vpop.f32.mrb[63].mxu1  ;;  %v1884_v29 = vadd.f32 %v3071_v51, %v3982_v49  ;;  %v3074_v10 = vadd.f32 %v3073_v7, %v3072_v24 }
 0x198   :  { %v3120_v54 = vadd.f32 %v3119_v62, %v3118_v40 }
 0x199   :  { %v1885_v3 = vadd.f32 %v3074_v10, %v3984_v56  ;;  %v4009_v13 = vadd.f32 %v3117_v16, %v1884_v29 }
 0x19b   :  { %v4011_v21 = vadd.f32 %v3120_v54, %v1885_v3  ;;  %v3075_v5 = vpop.f32.mrb[64].mxu0 }
 0x19c   :  { %v3121_v53 = vpop.f32.mrb[64].mxu1  ;;  %v3076_v50 = vpop.f32.mrb[65].mxu0 }
 0x19d   :  { %v3122_v35 = vpop.f32.mrb[65].mxu1  ;;  %v3077_v58 = vadd.f32 %v3076_v50, %v3075_v5  ;;  %v3078_v39 = vpop.f32.mrb[66].mxu0 }
 0x19e   :  { %v3123_v45 = vadd.f32 %v3122_v35, %v3121_v53  ;;  %v3124_v27 = vpop.f32.mrb[66].mxu1  ;;  %v3079_v47 = vpop.f32.mrb[67].mxu0 }
 0x19f   :  { %v3125_v8 = vpop.f32.mrb[67].mxu1  ;;  %v1886_v49 = vadd.f32 %v3077_v58, %v3988_v12  ;;  %v3080_v11 = vadd.f32 %v3079_v47, %v3078_v39 }
 0x1a0   :  { %v3126_v60 = vadd.f32 %v3125_v8, %v3124_v27 }
 0x1a1   :  { %v1887_v56 = vadd.f32 %v3080_v11, %v3990_v42  ;;  %v4015_v4 = vadd.f32 %v3123_v45, %v1886_v49 }
 0x1a3   :  { %v4017_v59 = vadd.f32 %v3126_v60, %v1887_v56  ;;  %v3081_v18 = vpop.f32.mrb[68].mxu0 }
 0x1a4   :  { %v3127_v25 = vpop.f32.mrb[68].mxu1  ;;  %v3082_v37 = vpop.f32.mrb[69].mxu0 }
 0x1a5   :  { %v3128_v30 = vpop.f32.mrb[69].mxu1  ;;  %v3083_v48 = vadd.f32 %v3082_v37, %v3081_v18  ;;  %v3084_v34 = vpop.f32.mrb[70].mxu0 }
 0x1a6   :  { %v3129_v19 = vadd.f32 %v3128_v30, %v3127_v25  ;;  %v3130_v36 = vpop.f32.mrb[70].mxu1  ;;  %v3085_v1 = vpop.f32.mrb[71].mxu0 }
 0x1a7   :  { %v3131_v0 = vpop.f32.mrb[71].mxu1  ;;  %v1888_v12 = vadd.f32 %v3083_v48, %v3994_v43  ;;  %v3086_v20 = vadd.f32 %v3085_v1, %v3084_v34 }
 0x1a8   :  { %v3132_v52 = vadd.f32 %v3131_v0, %v3130_v36 }
 0x1a9   :  { %v1889_v42 = vadd.f32 %v3086_v20, %v3996_v46  ;;  %v4021_v17 = vadd.f32 %v3129_v19, %v1888_v12 }
 0x1ab   :  { %v4023_v2 = vadd.f32 %v3132_v52, %v1889_v42  ;;  %v3087_v28 = vpop.f32.mrb[72].mxu0 }
 0x1ac   :  { %v3133_v44 = vpop.f32.mrb[72].mxu1  ;;  %v3088_v57 = vpop.f32.mrb[73].mxu0 }
 0x1ad   :  { %v3134_v61 = vpop.f32.mrb[73].mxu1  ;;  %v3089_v41 = vadd.f32 %v3088_v57, %v3087_v28  ;;  %v3090_v6 = vpop.f32.mrb[74].mxu0 }
 0x1ae   :  { %v3135_v9 = vadd.f32 %v3134_v61, %v3133_v44  ;;  %v3136_v31 = vpop.f32.mrb[74].mxu1  ;;  %v3091_v33 = vpop.f32.mrb[75].mxu0 }
 0x1af   :  { %v3137_v63 = vpop.f32.mrb[75].mxu1  ;;  %v1890_v43 = vadd.f32 %v3089_v41, %v4000_v32  ;;  %v3092_v16 = vadd.f32 %v3091_v33, %v3090_v6  ;;  %v4028_v32 = vld [vmem:[#allocation4] ss:$0 sm:$0xff] }
 0x1b0   :  { %v3138_v22 = vadd.f32 %v3137_v63, %v3136_v31 }
 0x1b1   :  { %v1891_v46 = vadd.f32 %v3092_v16, %v4002_v55  ;;  %v2205_v38 = vadd.f32 %v3135_v9, %v1890_v43 }
 0x1b3   :  { %v2206_v23 = vadd.f32 %v3138_v22, %v1891_v46  ;;  %v3093_v51 = vpop.f32.mrb[76].mxu0 }
 0x1b4   :  { %v3139_v14 = vpop.f32.mrb[76].mxu1  ;;  %v3094_v24 = vpop.f32.mrb[77].mxu0 }
 0x1b5   :  { %v3140_v15 = vpop.f32.mrb[77].mxu1  ;;  %v3095_v53 = vadd.f32 %v3094_v24, %v3093_v51  ;;  %v3096_v7 = vpop.f32.mrb[78].mxu0 }
 0x1b6   :  { %v3141_v40 = vadd.f32 %v3140_v15, %v3139_v14  ;;  %v3142_v62 = vpop.f32.mrb[78].mxu1  ;;  %v3097_v29 = vpop.f32.mrb[79].mxu0 }
 0x1b7   :  { %v3143_v54 = vpop.f32.mrb[79].mxu1  ;;  %v1892_v45 = vadd.f32 %v3095_v53, %v4005_v26 }
 0x1b9   :  { %v2207_v60 = vadd.f32 %v3141_v40, %v1892_v45 }
 0x1bb   :  { %v3161_v55 = vpop.f32.mrb[80].mxu0 }
 0x1bc   :  { %v3179_v35 = vpop.f32.mrb[80].mxu1  ;;  %v3162_v25 = vpop.f32.mrb[81].mxu0 }
 0x1bd   :  { %v3180_v10 = vpop.f32.mrb[81].mxu1  ;;  %v3163_v47 = vadd.f32 %v3162_v25, %v3161_v55  ;;  %v3164_v30 = vpop.f32.mrb[82].mxu0 }
 0x1be   :  { %v3181_v27 = vadd.f32 %v3180_v10, %v3179_v35  ;;  %v3182_v8 = vpop.f32.mrb[82].mxu1  ;;  %v3165_v26 = vpop.f32.mrb[83].mxu0 }
 0x1bf   :  { %v3183_v3 = vpop.f32.mrb[83].mxu1  ;;  %v2443_v0 = vadd.f32 %v3163_v47, %v4009_v13  ;;  %v3166_v56 = vadd.f32 %v3165_v26, %v3164_v30 }
 0x1c0   :  { %v2449_v5 = vadd.f32 %v3181_v27, %v2205_v38  ;;  %v3184_v50 = vadd.f32 %v3183_v3, %v3182_v8 }
 0x1c1   :  { %v2459_v34 = vadd.f32 %v4028_v32, %v2443_v0  ;;  %v2444_v44 = vadd.f32 %v3166_v56, %v4011_v21 }
 0x1c2   :  { %v2465_v58 = vadd.f32 %v4028_v32, %v2449_v5  ;;  %v2450_v39 = vadd.f32 %v3184_v50, %v2206_v23 }
 0x1c3   :  { %v2477_v20 = vmul.f32 0.01, %v2459_v34  ;;  %v2460_v9 = vadd.f32 %v4028_v32, %v2444_v44  ;;  %v3167_v63 = vpop.f32.mrb[84].mxu0  ;;  %vm2468_vm8 = vcmp.ge.f32.partialorder %v2459_v34, 0.0 }
 0x1c4   :  { %v2466_v49 = vadd.f32 %v4028_v32, %v2450_v39  ;;  %v3185_v11 = vpop.f32.mrb[84].mxu1  ;;  %v2483_v19 = vmul.f32 0.01, %v2465_v58  ;;  %vm2474_vm6 = vcmp.ge.f32.partialorder %v2465_v58, 0.0  ;;  %v3168_v13 = vpop.f32.mrb[85].mxu0 }
 0x1c5   :  { %v3186_v36 = vpop.f32.mrb[85].mxu1  ;;  %vm2469_vm9 = vcmp.ge.f32.partialorder %v2460_v9, 0.0  ;;  %v2478_v22 = vmul.f32 0.01, %v2460_v9  ;;  %v3169_v28 = vadd.f32 %v3168_v13, %v3167_v63  ;;  %v3170_v21 = vpop.f32.mrb[86].mxu0  ;;  %v2486_v6 = vsel %vm2468_vm8, %v2459_v34, %v2477_v20 }
 0x1c6   :  { %vm2475_vm7 = vcmp.ge.f32.partialorder %v2466_v49, 0.0  ;;  %v3188_v52 = vpop.f32.mrb[86].mxu1  ;;  %v2484_v18 = vmul.f32 0.01, %v2466_v49  ;;  %v3187_v37 = vadd.f32 %v3186_v36, %v3185_v11  ;;  %v2492_v1 = vsel %vm2474_vm6, %v2465_v58, %v2483_v19  ;;  %v3171_v41 = vpop.f32.mrb[87].mxu0 }
 0x1c7   :  { %v3189_v48 = vpop.f32.mrb[87].mxu1  ;;  %v2487_v14 = vsel %vm2469_vm9, %v2460_v9, %v2478_v22  ;;  %v2445_v33 = vadd.f32 %v3169_v28, %v4015_v4  ;;  %v3172_v15 = vadd.f32 %v3171_v41, %v3170_v21 }
 0x1c8   :  { %v2493_v61 = vsel %vm2475_vm7, %v2466_v49, %v2484_v18  ;;  %v2451_v12 = vadd.f32 %v3187_v37, %v2207_v60  ;;  %v2757_v43 = vpack.c.bf16 %v2487_v14, %v2486_v6 }
 0x1c9   :  { %v2772_v31 = vpack.c.bf16 %v2493_v61, %v2492_v1  ;;  %v2461_v40 = vadd.f32 %v4028_v32, %v2445_v33  ;;  %v2446_v54 = vadd.f32 %v3172_v15, %v4017_v59 }
 0x1ca   :  { %v2467_v42 = vadd.f32 %v4028_v32, %v2451_v12  ;;  %2758 = vst [vmem:[%s4063_s3] sm:$0xff] %v2757_v43  }
 0x1cb   :  { %2776 = vst [vmem:[%s4063_s3 + $0x18] sm:$0xff] %v2772_v31   ;;  %v2479_v46 = vmul.f32 0.01, %v2461_v40  ;;  %v2462_v38 = vadd.f32 %v4028_v32, %v2446_v54  ;;  %v3173_v4 = vpop.f32.mrb[88].mxu0  ;;  %vm2470_vm11 = vcmp.ge.f32.partialorder %v2461_v40, 0.0 }
 0x1cc   :  { %vm2476_vm10 = vcmp.ge.f32.partialorder %v2467_v42, 0.0  ;;  %v2485_v57 = vmul.f32 0.01, %v2467_v42  ;;  %v3174_v23 = vpop.f32.mrb[89].mxu0 }
 0x1cd   :  { %vm2471_vm12 = vcmp.ge.f32.partialorder %v2462_v38, 0.0  ;;  %v2480_v51 = vmul.f32 0.01, %v2462_v38  ;;  %v3175_v24 = vadd.f32 %v3174_v23, %v3173_v4  ;;  %v3176_v53 = vpop.f32.mrb[90].mxu0  ;;  %v2488_v59 = vsel %vm2470_vm11, %v2461_v40, %v2479_v46 }
 0x1ce   :  { %v2494_v16 = vsel %vm2476_vm10, %v2467_v42, %v2485_v57  ;;  %v3177_v7 = vpop.f32.mrb[91].mxu0 }
 0x1cf   :  { %v2753_v62 = vpack.c.bf16 %v2494_v16, %v2494_v16  ;;  %v2489_v35 = vsel %vm2471_vm12, %v2462_v38, %v2480_v51  ;;  %v2447_v29 = vadd.f32 %v3175_v24, %v4021_v17  ;;  %v3178_v10 = vadd.f32 %v3177_v7, %v3176_v53 }
 0x1d0   :  { %v2762_v45 = vpack.c.bf16 %v2489_v35, %v2488_v59 }
 0x1d1   :  { %2540 = vst [vmem:[%s4063_s3 + $0x20] sm:$0xf] %v2753_v62  ;;  %v2463_v27 = vadd.f32 %v4028_v32, %v2447_v29  ;;  %v2448_v8 = vadd.f32 %v3178_v10, %v4023_v2 }
 0x1d2   :  { %2774 = vst [vmem:[%s4063_s3 + $0x8] sm:$0xff] %v2762_v45  }
 0x1d3   :  { %v2481_v3 = vmul.f32 0.01, %v2463_v27  ;;  %v2464_v60 = vadd.f32 %v4028_v32, %v2448_v8  ;;  %vm2472_vm13 = vcmp.ge.f32.partialorder %v2463_v27, 0.0 }
 0x1d5   :  { %vm2473_vm14 = vcmp.ge.f32.partialorder %v2464_v60, 0.0  ;;  %v2482_v5 = vmul.f32 0.01, %v2464_v60  ;;  %v2490_v50 = vsel %vm2472_vm13, %v2463_v27, %v2481_v3 }
 0x1d7   :  { %v2491_v55 = vsel %vm2473_vm14, %v2464_v60, %v2482_v5 }
 0x1d8   :  { %v2767_v58 = vpack.c.bf16 %v2491_v55, %v2490_v50 }
 0x1da   :  { %2775 = vst [vmem:[%s4063_s3 + $0x10] sm:$0xff] %v2767_v58  }
 0x1db   :  { %2545 = vsyncpa [#allocation3], 1 }
 0x1dc   :  { %2546 = vsyncpa [#allocation5], 1 }

// kernel: forward.8
= control target key start
LH: loop header
LB: loop body
LE: loop exit
PB: predicated region body
PF: predicated region fallthrough
CT: control target
= control target key end

     0   :  { %vm195_vm0 = vsmask.f32 7424  ;;  %vm2313_vm1 = vsmask.f32 5376  ;;  %vm2917_vm2 = vcmask 1044480   ;;  %vm1221_vm3 = vcmask 1046528   ;;  %s9694_s1 = inlined_call_operand.vmem [shape: bf16[3,3,512,256], index: 1, kind: input, shape index: {}]   ;;  %s9695_s0 = inlined_call_operand.vmem [shape: bf16[48,512], index: 0, kind: input, shape index: {}]   ;;  %s9696_s2 = inlined_call_operand.vmem [shape: f32[1,256], index: 2, kind: input, shape index: {}]   ;;  %s9697_s3 = inlined_call_operand.vmem [shape: bf16[32,256], index: 3, kind: output, shape index: {}]  }
   0x1   :  { %v6445_v0 = vld [vmem:[%s9694_s1 + $0x204] ss:$8 sps:$4 sm:$0xff]   ;;  %v6449_v2 = vld [vmem:[%s9694_s1 + $0x200] ss:$8 sps:$4 sm:$0xff]   ;;  %v6451_v4 = vld [vmem:[%s9694_s1 + $0x214] ss:$8 sps:$4 sm:$0xff]  }
   0x2   :  { %v6447_v1 = vld [vmem:[%s9694_s1 + $0x904] ss:$8 sps:$4 sm:$0xff]   ;;  %604 = vmatprep.subr.bf16.mxu1 %v6445_v0  ;;  %v6450_v3 = vld [vmem:[%s9694_s1 + $0x900] ss:$8 sps:$4 sm:$0xff]   ;;  %v6453_v5 = vld [vmem:[%s9694_s1 + $0x914] ss:$8 sps:$4 sm:$0xff]  }
   0x3   :  { %2779 = vmatprep.subr.bf16.mxu0 %v6447_v1  ;;  %605 = vmatpush1.bf16.msra.mxu1 %v6449_v2  ;;  %v6455_v6 = vld [vmem:[%s9694_s1 + $0x210] ss:$8 sps:$4 sm:$0xff]   ;;  %v6457_v8 = vld [vmem:[%s9694_s1 + $0x224] ss:$8 sps:$4 sm:$0xff]   ;;  %v6461_v10 = vld [vmem:[%s9694_s1 + $0x220] ss:$8 sps:$4 sm:$0xff]  }
   0x4   :  { %2780 = vmatpush1.bf16.msra.mxu0 %v6450_v3  ;;  %606 = vmatprep.subr.bf16.mxu1 %v6451_v4  ;;  %v6456_v7 = vld [vmem:[%s9694_s1 + $0x910] ss:$8 sps:$4 sm:$0xff]   ;;  %v6459_v9 = vld [vmem:[%s9694_s1 + $0x924] ss:$8 sps:$4 sm:$0xff]   ;;  %v6462_v11 = vld [vmem:[%s9694_s1 + $0x920] ss:$8 sps:$4 sm:$0xff]  }
   0x5   :  { %2781 = vmatprep.subr.bf16.mxu0 %v6453_v5  ;;  %v6463_v12 = vld [vmem:[%s9694_s1 + $0x234] ss:$8 sps:$4 sm:$0xff]   ;;  %v6467_v14 = vld [vmem:[%s9694_s1 + $0x230] ss:$8 sps:$4 sm:$0xff]   ;;  %v6469_v16 = vld [vmem:[%s9694_s1 + $0x244] ss:$8 sps:$4 sm:$0xff]  }
   0x6   :  { %v6465_v13 = vld [vmem:[%s9694_s1 + $0x934] ss:$8 sps:$4 sm:$0xff]   ;;  %v6468_v15 = vld [vmem:[%s9694_s1 + $0x930] ss:$8 sps:$4 sm:$0xff]   ;;  %v6471_v17 = vld [vmem:[%s9694_s1 + $0x944] ss:$8 sps:$4 sm:$0xff]  }
   0x7   :  { %607 = vmatpush1.bf16.msra.mxu1 %v6455_v6  ;;  %v6473_v18 = vld [vmem:[%s9694_s1 + $0x240] ss:$8 sps:$4 sm:$0xff]   ;;  %v6475_v20 = vld [vmem:[%s9694_s1 + $0x254] ss:$8 sps:$4 sm:$0xff]   ;;  %v6479_v22 = vld [vmem:[%s9694_s1 + $0x250] ss:$8 sps:$4 sm:$0xff]  }
   0x8   :  { %2782 = vmatpush1.bf16.msra.mxu0 %v6456_v7  ;;  %608 = vmatprep.subr.bf16.mxu1 %v6457_v8  ;;  %v6474_v19 = vld [vmem:[%s9694_s1 + $0x940] ss:$8 sps:$4 sm:$0xff]   ;;  %v6477_v21 = vld [vmem:[%s9694_s1 + $0x954] ss:$8 sps:$4 sm:$0xff]   ;;  %v6480_v23 = vld [vmem:[%s9694_s1 + $0x950] ss:$8 sps:$4 sm:$0xff]  }
   0x9   :  { %2783 = vmatprep.subr.bf16.mxu0 %v6459_v9  ;;  %v6481_v24 = vld [vmem:[%s9694_s1 + $0x264] ss:$8 sps:$4 sm:$0xff]   ;;  %v6485_v26 = vld [vmem:[%s9694_s1 + $0x260] ss:$8 sps:$4 sm:$0xff]   ;;  %v6487_v28 = vld [vmem:[%s9694_s1 + $0x274] ss:$8 sps:$4 sm:$0xff]  }
   0xa   :  { %v6483_v25 = vld [vmem:[%s9694_s1 + $0x964] ss:$8 sps:$4 sm:$0xff]   ;;  %v6486_v27 = vld [vmem:[%s9694_s1 + $0x960] ss:$8 sps:$4 sm:$0xff]   ;;  %v6489_v29 = vld [vmem:[%s9694_s1 + $0x974] ss:$8 sps:$4 sm:$0xff]  }
   0xb   :  { %609 = vmatpush1.bf16.msra.mxu1 %v6461_v10  ;;  %v6491_v30 = vld [vmem:[%s9694_s1 + $0x270] ss:$8 sps:$4 sm:$0xff]   ;;  %v6493_v32 = vld [vmem:[%s9694_s1 + $0x284] ss:$8 sps:$4 sm:$0xff]   ;;  %v6497_v34 = vld [vmem:[%s9694_s1 + $0x280] ss:$8 sps:$4 sm:$0xff]  }
   0xc   :  { %2784 = vmatpush1.bf16.msra.mxu0 %v6462_v11  ;;  %610 = vmatprep.subr.bf16.mxu1 %v6463_v12  ;;  %v6492_v31 = vld [vmem:[%s9694_s1 + $0x970] ss:$8 sps:$4 sm:$0xff]   ;;  %v6495_v33 = vld [vmem:[%s9694_s1 + $0x984] ss:$8 sps:$4 sm:$0xff]   ;;  %v6498_v35 = vld [vmem:[%s9694_s1 + $0x980] ss:$8 sps:$4 sm:$0xff]  }
   0xd   :  { %2785 = vmatprep.subr.bf16.mxu0 %v6465_v13  ;;  %v6499_v36 = vld [vmem:[%s9694_s1 + $0x294] ss:$8 sps:$4 sm:$0xff]   ;;  %v6503_v38 = vld [vmem:[%s9694_s1 + $0x290] ss:$8 sps:$4 sm:$0xff]   ;;  %v6505_v40 = vld [vmem:[%s9694_s1 + $0x2a4] ss:$8 sps:$4 sm:$0xff]  }
   0xe   :  { %v6501_v37 = vld [vmem:[%s9694_s1 + $0x994] ss:$8 sps:$4 sm:$0xff]   ;;  %v6504_v39 = vld [vmem:[%s9694_s1 + $0x990] ss:$8 sps:$4 sm:$0xff]   ;;  %v6507_v41 = vld [vmem:[%s9694_s1 + $0x9a4] ss:$8 sps:$4 sm:$0xff]  }
   0xf   :  { %611 = vmatpush1.bf16.msra.mxu1 %v6467_v14  ;;  %v6509_v42 = vld [vmem:[%s9694_s1 + $0x2a0] ss:$8 sps:$4 sm:$0xff]   ;;  %v6511_v44 = vld [vmem:[%s9694_s1 + $0x2b4] ss:$8 sps:$4 sm:$0xff]   ;;  %v6515_v46 = vld [vmem:[%s9694_s1 + $0x2b0] ss:$8 sps:$4 sm:$0xff]  }
  0x10   :  { %2786 = vmatpush1.bf16.msra.mxu0 %v6468_v15  ;;  %612 = vmatprep.subr.bf16.mxu1 %v6469_v16  ;;  %v6510_v43 = vld [vmem:[%s9694_s1 + $0x9a0] ss:$8 sps:$4 sm:$0xff]   ;;  %v6513_v45 = vld [vmem:[%s9694_s1 + $0x9b4] ss:$8 sps:$4 sm:$0xff]   ;;  %v6516_v47 = vld [vmem:[%s9694_s1 + $0x9b0] ss:$8 sps:$4 sm:$0xff]  }
  0x11   :  { %2787 = vmatprep.subr.bf16.mxu0 %v6471_v17  ;;  %v14_v48 = vld [vmem:[%s9695_s0] sm:$0xff]  ;;  %v7545_v49 = vld [vmem:[%s9695_s0 + $0x10] sm:$0xff]  ;;  %v7567_v56 = vld [vmem:[%s9695_s0 + $0x18] sm:$0xff]  ;;  %vm1773_vm4 = vcmask 1045504  }
  0x12   :  { %v18_v50 = vld [vmem:[%s9695_s0 + $0x20] sm:$0xff]  ;;  %v20_v51 = vld [vmem:[%s9695_s0 + $0x30] sm:$0xff]  ;;  %v7557_v53 = vcombine.high %v14_v48, %v7545_v49  ;;  %v19_v57 = vld [vmem:[%s9695_s0 + $0x28] sm:$0xff]  ;;  %v7603_v7 = vcombine.low %v14_v48, %v7545_v49 }
  0x13   :  { %613 = vmatpush1.bf16.msra.mxu1 %v6473_v18  ;;  %v6517_v52 = vld [vmem:[%s9694_s1 + $0x2c4] ss:$8 sps:$4 sm:$0xff]   ;;  %v7559_v54 = vcombine.high %v18_v50, %v20_v51  ;;  %v6521_v58 = vld [vmem:[%s9694_s1 + $0x2c0] ss:$8 sps:$4 sm:$0xff]   ;;  %v21_v63 = vld [vmem:[%s9695_s0 + $0x38] sm:$0xff]  ;;  %v7614_v15 = vcombine.low %v18_v50, %v20_v51 }
  0x14   :  { %2788 = vmatpush1.bf16.msra.mxu0 %v6474_v19  ;;  %614 = vmatprep.subr.bf16.mxu1 %v6475_v20  ;;  %v6519_v55 = vld [vmem:[%s9694_s1 + $0x9c4] ss:$8 sps:$4 sm:$0xff]   ;;  %v6522_v59 = vld [vmem:[%s9694_s1 + $0x9c0] ss:$8 sps:$4 sm:$0xff]   ;;  %v209_v60 = vshrl.u32 %v7557_v53, 16  ;;  %v211_v61 = vshll.u32 %v7557_v53, 16  ;;  %v7590_v2 = vcombine.high %v19_v57, %v21_v63  ;;  %v7605_v8 = vcombine.low %v19_v57, %v21_v63 }
  0x15   :  { %2789 = vmatprep.subr.bf16.mxu0 %v6477_v21  ;;  %v216_v62 = vshll.u32 %v7559_v54, 16  ;;  %v1685_v0 = vld [vmem:[%s9695_s0 + $0x8] sm:$0xcc]  ;;  %v6523_v1 = vld [vmem:[%s9694_s1 + $0x2d4] ss:$8 sps:$4 sm:$0xff]  }
  0x16   :  { %v7593_v3 = vcombine.high %v1685_v0, %v7567_v56  ;;  %v6525_v4 = vld [vmem:[%s9694_s1 + $0x9d4] ss:$8 sps:$4 sm:$0xff]   ;;  %v213_v5 = vrot.slane %v211_v61, 1  ;;  %v240_v9 = vshll.u32 %v7590_v2, 16  ;;  %v268_v10 = vshrl.u32 %v7590_v2, 16 }
  0x17   :  { %615 = vmatpush1.bf16.msra.mxu1 %v6479_v22  ;;  %v7600_v6 = vrot.slane %v216_v62, 1  ;;  %v6527_v13 = vld [vmem:[%s9694_s1 + $0x2d0] ss:$8 sps:$4 sm:$0xff]   ;;  %v6529_v21 = vld [vmem:[%s9694_s1 + $0x2e4] ss:$8 sps:$4 sm:$0xff]  }
  0x18   :  { %2790 = vmatpush1.bf16.msra.mxu0 %v6480_v23  ;;  %616 = vmatprep.subr.bf16.mxu1 %v6481_v24  ;;  %v2351_v11 = vshrl.u32 %v7593_v3, 16  ;;  %v2354_v12 = vshll.u32 %v7593_v3, 16  ;;  %v214_v14 = vor.u32 %v213_v5, %v209_v60  ;;  %v6528_v16 = vld [vmem:[%s9694_s1 + $0x9d0] ss:$8 sps:$4 sm:$0xff]   ;;  %v2358_v19 = vrot.slane %v268_v10, 2 }
  0x19   :  { %2791 = vmatprep.subr.bf16.mxu0 %v6483_v25  ;;  %v2359_v20 = vrot.slane %v240_v9, 3  ;;  %v199_v23 = vshll.u32 %v7603_v7, 16  ;;  %v228_v24 = vshll.u32 %v7605_v8, 16  ;;  %v260_v25 = vshrl.u32 %v7605_v8, 16  ;;  %v6557_v63 = vld [vmem:[%s9694_s1 + $0x314] ss:$8 sps:$4 sm:$0xff]  }
  0x1a   :  { %v2353_v17 = vrot.slane %v2351_v11, 2  ;;  %v2356_v18 = vrot.slane %v2354_v12, 3  ;;  %v219_v22 = vsel %vm195_vm0, %v214_v14, %v7600_v6  ;;  %v6563_v5 = vld [vmem:[%s9694_s1 + $0x324] ss:$8 sps:$4 sm:$0xff]   ;;  %v6561_v12 = vld [vmem:[%s9694_s1 + $0x320] ss:$8 sps:$4 sm:$0xff]  }
  0x1b   :  { %617 = vmatpush1.bf16.msra.mxu1 %v6485_v26  ;;  %v6531_v26 = vld [vmem:[%s9694_s1 + $0x9e4] ss:$8 sps:$4 sm:$0xff]   ;;  %636 = vmatprep.mubr.bf16.mxu1 %v219_v22  ;;  %v6569_v14 = vld [vmem:[%s9694_s1 + $0x334] ss:$8 sps:$4 sm:$0xff]   ;;  %v6576_v22 = vld [vmem:[%s9694_s1 + $0xa40] ss:$8 sps:$4 sm:$0xff]  }
  0x1c   :  { %2792 = vmatpush1.bf16.msra.mxu0 %v6486_v27  ;;  %618 = vmatprep.subr.bf16.mxu1 %v6487_v28  ;;  %v2357_v27 = vor.u32 %v2356_v18, %v2353_v17  ;;  %v7634_v28 = vor.u32 %v2359_v20, %v2358_v19  ;;  %v6566_v11 = vld [vmem:[%s9694_s1 + $0xa24] ss:$8 sps:$4 sm:$0xff]   ;;  %v6567_v17 = vld [vmem:[%s9694_s1 + $0x330] ss:$8 sps:$4 sm:$0xff]  }
  0x1d   :  { %2793 = vmatprep.subr.bf16.mxu0 %v6489_v29  ;;  %v7637_v29 = vcombine.low %v1685_v0, %v7567_v56  ;;  %v6560_v0 = vld [vmem:[%s9694_s1 + $0xa14] ss:$8 sps:$4 sm:$0xff]   ;;  %v6570_v18 = vld [vmem:[%s9694_s1 + $0xa30] ss:$8 sps:$4 sm:$0xff]   ;;  %v6575_v19 = vld [vmem:[%s9694_s1 + $0x344] ss:$8 sps:$4 sm:$0xff]  }
  0x1e   :  { %v6578_v20 = vld [vmem:[%s9694_s1 + $0xa44] ss:$8 sps:$4 sm:$0xff]  }
  0x1f   :  { %619 = vmatpush1.bf16.msra.mxu1 %v6491_v30  ;;  %v6533_v30 = vld [vmem:[%s9694_s1 + $0x2e0] ss:$8 sps:$4 sm:$0xff]  }
  0x20   :  { %2794 = vmatpush1.bf16.msra.mxu0 %v6492_v31  ;;  %620 = vmatprep.subr.bf16.mxu1 %v6493_v32  ;;  %v6534_v31 = vld [vmem:[%s9694_s1 + $0x9e0] ss:$8 sps:$4 sm:$0xff]   ;;  %v6535_v32 = vld [vmem:[%s9694_s1 + $0x2f4] ss:$8 sps:$4 sm:$0xff]  }
  0x21   :  { %2795 = vmatprep.subr.bf16.mxu0 %v6495_v33  ;;  %v2361_v33 = vsel %vm2313_vm1, %v2357_v27, %v7634_v28  ;;  %v6582_v27 = vld [vmem:[%s9694_s1 + $0xa50] ss:$8 sps:$4 sm:$0xff]  }
  0x22   :  { %2811 = vmatprep.mubr.bf16.mxu0 %v2361_v33  ;;  %v86_v33 = vld [vmem:[%s9695_s0 + $0x40] sm:$0x11] }
  0x23   :  { %621 = vmatpush1.bf16.msra.mxu1 %v6497_v34  ;;  %v204_v34 = vshll.u32 %v7614_v15, 16 }
  0x24   :  { %2796 = vmatpush1.bf16.msra.mxu0 %v6498_v35  ;;  %622 = vmatprep.subr.bf16.mxu1 %v6499_v36  ;;  %v2339_v35 = vshrl.u32 %v7637_v29, 16  ;;  %v2342_v36 = vshll.u32 %v7637_v29, 16 }
  0x25   :  { %2797 = vmatprep.subr.bf16.mxu0 %v6501_v37  ;;  %v197_v37 = vshrl.u32 %v7603_v7, 16 }
  0x27   :  { %623 = vmatpush1.bf16.msra.mxu1 %v6503_v38  ;;  %v201_v38 = vrot.slane %v199_v23, 1  ;;  %v6581_v23 = vld [vmem:[%s9694_s1 + $0x354] ss:$8 sps:$4 sm:$0xff]  }
  0x28   :  { %2798 = vmatpush1.bf16.msra.mxu0 %v6504_v39  ;;  %624 = vmatprep.subr.bf16.mxu1 %v6505_v40  ;;  %v2346_v39 = vrot.slane %v260_v25, 2  ;;  %v2347_v40 = vrot.slane %v228_v24, 3 }
  0x29   :  { %2799 = vmatprep.subr.bf16.mxu0 %v6507_v41  ;;  %v6537_v41 = vld [vmem:[%s9694_s1 + $0x9f4] ss:$8 sps:$4 sm:$0xff]   ;;  %v202_v48 = vor.u32 %v201_v38, %v197_v37  ;;  %v7766_v37 = vcombine.low %v86_v33, %v86_v33 }
  0x2a   :  { %v7670_v51 = vor.u32 %v2347_v40, %v2346_v39  ;;  %v2237_v39 = vld [vmem:[%s9695_s0 + $0x48] sm:$0x77] }
  0x2b   :  { %625 = vmatpush1.bf16.msra.mxu1 %v6509_v42  ;;  %v2341_v42 = vrot.slane %v2339_v35, 2  ;;  %v6585_v35 = vld [vmem:[%s9694_s1 + $0x360] ss:$8 sps:$4 sm:$0xff]  }
  0x2c   :  { %2800 = vmatpush1.bf16.msra.mxu0 %v6510_v43  ;;  %626 = vmatprep.subr.bf16.mxu1 %v6511_v44  ;;  %v2344_v43 = vrot.slane %v2342_v36, 3  ;;  %v6539_v44 = vld [vmem:[%s9694_s1 + $0x2f0] ss:$8 sps:$4 sm:$0xff]   ;;  %v7764_v36 = vcombine.high %v86_v33, %v86_v33 }
  0x2d   :  { %2801 = vmatprep.subr.bf16.mxu0 %v6513_v45  ;;  %v6540_v45 = vld [vmem:[%s9694_s1 + $0x9f0] ss:$8 sps:$4 sm:$0xff]  }
  0x2e   :  { %v2345_v50 = vor.u32 %v2344_v43, %v2341_v42  ;;  %v6593_v42 = vld [vmem:[%s9694_s1 + $0x374] ss:$8 sps:$4 sm:$0xff]   ;;  %v7784_v43 = vcombine.high %v2237_v39, %v2237_v39 }
  0x2f   :  { %627 = vmatpush1.bf16.msra.mxu1 %v6515_v46  ;;  %v7665_v46 = vrot.slane %v204_v34, 1 }
  0x30   :  { %2802 = vmatpush1.bf16.msra.mxu0 %v6516_v47  ;;  %628 = vmatprep.subr.bf16.mxu1 %v6517_v52  ;;  %v6545_v47 = vld [vmem:[%s9694_s1 + $0x304] ss:$8 sps:$4 sm:$0xff]   ;;  %v7672_v52 = vrot.slane %v228_v24, 1  ;;  %v2349_v61 = vsel %vm2313_vm1, %v2345_v50, %v7670_v51  ;;  %v6584_v24 = vld [vmem:[%s9694_s1 + $0xa54] ss:$8 sps:$4 sm:$0xff]   ;;  %v2390_v50 = vshrl.u32 %v7784_v43, 16 }
  0x31   :  { %2803 = vmatprep.subr.bf16.mxu0 %v6519_v55  ;;  %v6550_v55 = vld [vmem:[%s9694_s1 + $0xa04] ss:$8 sps:$4 sm:$0xff]   ;;  %v207_v60 = vsel %vm195_vm0, %v202_v48, %v7665_v46 }
  0x32   :  { %v7678_v57 = vor.u32 %v260_v25, %v7672_v52  ;;  %v252_v25 = vshrl.u32 %v7559_v54, 16 }
  0x33   :  { %629 = vmatpush1.bf16.msra.mxu1 %v6521_v58  ;;  %v6543_v58 = vld [vmem:[%s9694_s1 + $0x300] ss:$8 sps:$4 sm:$0xff]  }
  0x34   :  { %2804 = vmatpush1.bf16.msra.mxu0 %v6522_v59  ;;  %630 = vmatprep.subr.bf16.mxu1 %v6523_v1  ;;  %v6548_v59 = vld [vmem:[%s9694_s1 + $0xa00] ss:$8 sps:$4 sm:$0xff]   ;;  %v6555_v1 = vld [vmem:[%s9694_s1 + $0x310] ss:$8 sps:$4 sm:$0xff]   ;;  %v254_v38 = vor.u32 %v252_v25, %v7600_v6  ;;  %v256_v6 = vshll.u32 %v7764_v36, 16 }
  0x35   :  { %2805 = vmatprep.subr.bf16.mxu0 %v6525_v4  ;;  %v6558_v4 = vld [vmem:[%s9694_s1 + $0xa10] ss:$8 sps:$4 sm:$0xff]  }
  0x36   :  { %v258_v48 = vrot.slane %v256_v6, 1 }
  0x37   :  { %631 = vmatpush1.bf16.msra.mxu1 %v6527_v13  ;;  %v6564_v13 = vld [vmem:[%s9694_s1 + $0xa20] ss:$8 sps:$4 sm:$0xff]  }
  0x38   :  { %2806 = vmatpush1.bf16.msra.mxu0 %v6528_v16  ;;  %632 = vmatprep.subr.bf16.mxu1 %v6529_v21  ;;  %v6572_v16 = vld [vmem:[%s9694_s1 + $0xa34] ss:$8 sps:$4 sm:$0xff]   ;;  %v6573_v21 = vld [vmem:[%s9694_s1 + $0x340] ss:$8 sps:$4 sm:$0xff]  }
  0x39   :  { %2807 = vmatprep.subr.bf16.mxu0 %v6531_v26  ;;  %v6579_v26 = vld [vmem:[%s9694_s1 + $0x350] ss:$8 sps:$4 sm:$0xff]  }
  0x3b   :  { %633 = vmatpush1.bf16.msra.mxu1 %v6533_v30  ;;  %v244_v30 = vshrl.u32 %v7614_v15, 16 }
  0x3c   :  { %2808 = vmatpush1.bf16.msra.mxu0 %v6534_v31  ;;  %634 = vmatprep.subr.bf16.mxu1 %v6535_v32  ;;  %v6587_v31 = vld [vmem:[%s9694_s1 + $0x364] ss:$8 sps:$4 sm:$0xff]  }
  0x3d   :  { %2809 = vmatprep.subr.bf16.mxu0 %v6537_v41  ;;  %v6590_v32 = vld [vmem:[%s9694_s1 + $0xa64] ss:$8 sps:$4 sm:$0xff]   ;;  %v246_v40 = vor.u32 %v244_v30, %v7665_v46  ;;  %v6588_v41 = vld [vmem:[%s9694_s1 + $0xa60] ss:$8 sps:$4 sm:$0xff]   ;;  %v6596_v46 = vld [vmem:[%s9694_s1 + $0xa74] ss:$8 sps:$4 sm:$0xff]  }
  0x3f   :  { %635 = vmatpush1.bf16.msra.mxu1 %v6539_v44  ;;  %v248_v44 = vshll.u32 %v7766_v37, 16 }
  0x40   :  { %2810 = vmatpush1.bf16.msra.mxu0 %v6540_v45  ;;  %657 = vmatprep.subr.bf16.mxu1 %v6545_v47  ;;  %v7787_v45 = vcombine.low %v2237_v39, %v2237_v39  ;;  %v6591_v47 = vld [vmem:[%s9694_s1 + $0x370] ss:$8 sps:$4 sm:$0xff]  }
  0x41   :  { %3266 = vmatprep.subr.bf16.mxu0 %v6550_v55  ;;  %v2393_v55 = vshll.u32 %v7784_v43, 16  ;;  %v6603_v39 = vld [vmem:[%s9694_s1 + $0x390] ss:$8 sps:$4 sm:$0xff]  }
  0x42   :  { %637 = vmatmul.mubr.bf16.vlgmr.msra.gmra.mrb[0].mxu1 %v207_v60  ;;  %v2381_v60 = vshrl.u32 %v7787_v45, 16 }
  0x43   :  { %2812 = vmatmul.mubr.bf16.vlgmr.msra.gmra.mrb[0].mxu0 %v2349_v61  ;;  %658 = vmatpush1.bf16.msra.mxu1 %v6543_v58  ;;  %v250_v58 = vrot.slane %v248_v44, 1  ;;  %v2384_v61 = vshll.u32 %v7787_v45, 16  ;;  %v6609_v44 = vld [vmem:[%s9694_s1 + $0x3a0] ss:$8 sps:$4 sm:$0xff]  }
  0x44   :  { %3267 = vmatpush1.bf16.msra.mxu0 %v6548_v59  ;;  %659 = vmatprep.subr.bf16.mxu1 %v6557_v63  ;;  %v6594_v59 = vld [vmem:[%s9694_s1 + $0xa70] ss:$8 sps:$4 sm:$0xff]   ;;  %v6599_v63 = vld [vmem:[%s9694_s1 + $0x384] ss:$8 sps:$4 sm:$0xff]  }
  0x45   :  { %3268 = vmatprep.subr.bf16.mxu0 %v6560_v0  ;;  %v259_v0 = vsel %vm195_vm0, %v254_v38, %v258_v48  ;;  %v7847_v38 = vrot.slane %v240_v9, 1  ;;  %v6611_v9 = vld [vmem:[%s9694_s1 + $0x3a4] ss:$8 sps:$4 sm:$0xff]   ;;  %v6620_v48 = vld [vmem:[%s9694_s1 + $0xab4] ss:$8 sps:$4 sm:$0xff]  }
  0x46   :  { %646 = vmatprep.mubr.bf16.mxu1 %v259_v0  ;;  %v6629_v0 = vld [vmem:[%s9694_s1 + $0x3d4] ss:$8 sps:$4 sm:$0xff]  }
  0x47   :  { %660 = vmatpush1.bf16.msra.mxu1 %v6555_v1  ;;  %v2392_v1 = vrot.slane %v2390_v50, 2  ;;  %v6615_v50 = vld [vmem:[%s9694_s1 + $0x3b0] ss:$8 sps:$4 sm:$0xff]  }
  0x48   :  { %3269 = vmatpush1.bf16.msra.mxu0 %v6558_v4  ;;  %661 = vmatprep.subr.bf16.mxu1 %v6563_v5  ;;  %v2395_v4 = vrot.slane %v2393_v55, 3  ;;  %v251_v5 = vsel %vm195_vm0, %v246_v40, %v250_v58  ;;  %v6618_v55 = vld [vmem:[%s9694_s1 + $0xab0] ss:$8 sps:$4 sm:$0xff]   ;;  %v6623_v58 = vld [vmem:[%s9694_s1 + $0x3c4] ss:$8 sps:$4 sm:$0xff]  }
  0x49   :  { %3270 = vmatprep.subr.bf16.mxu0 %v6566_v11  ;;  %v7810_v11 = vld [vmem:[%s9695_s0 + $0x8] sm:$0xff] }
  0x4a   :  { %647 = vmatmul.mubr.bf16.gmra.mrb[4].mxu1 %v251_v5  ;;  %v6630_v5 = vld [vmem:[%s9694_s1 + $0xad0] ss:$8 sps:$4 sm:$0xff]  }
  0x4b   :  { %662 = vmatpush1.bf16.msra.mxu1 %v6561_v12  ;;  %v6602_v12 = vld [vmem:[%s9694_s1 + $0xa84] ss:$8 sps:$4 sm:$0xff]  }
  0x4c   :  { %3271 = vmatpush1.bf16.msra.mxu0 %v6564_v13  ;;  %663 = vmatprep.subr.bf16.mxu1 %v6569_v14  ;;  %v2383_v13 = vrot.slane %v2381_v60, 2  ;;  %v2386_v14 = vrot.slane %v2384_v61, 3  ;;  %v6621_v60 = vld [vmem:[%s9694_s1 + $0x3c0] ss:$8 sps:$4 sm:$0xff]  }
  0x4d   :  { %3272 = vmatprep.subr.bf16.mxu0 %v6572_v16  ;;  %v7817_v16 = vcombine.high %v7810_v11, %v7567_v56  ;;  %v6624_v61 = vld [vmem:[%s9694_s1 + $0xac0] ss:$8 sps:$4 sm:$0xff]  }
  0x4f   :  { %664 = vmatpush1.bf16.msra.mxu1 %v6567_v17  ;;  %v2396_v17 = vor.u32 %v2395_v4, %v2392_v1  ;;  %v6632_v1 = vld [vmem:[%s9694_s1 + $0xad4] ss:$8 sps:$4 sm:$0xff]   ;;  %v6627_v4 = vld [vmem:[%s9694_s1 + $0x3d0] ss:$8 sps:$4 sm:$0xff]  }
  0x50   :  { %3273 = vmatpush1.bf16.msra.mxu0 %v6570_v18  ;;  %665 = vmatprep.subr.bf16.mxu1 %v6575_v19  ;;  %v7822_v18 = vld [vmem:[%s9695_s0] sm:$0x88] }
  0x51   :  { %3274 = vmatprep.subr.bf16.mxu0 %v6578_v20  ;;  %v6597_v19 = vld [vmem:[%s9694_s1 + $0x380] ss:$8 sps:$4 sm:$0xff]  }
  0x52   :  { %v6600_v20 = vld [vmem:[%s9694_s1 + $0xa80] ss:$8 sps:$4 sm:$0xff]  }
  0x53   :  { %666 = vmatpush1.bf16.msra.mxu1 %v6573_v21  ;;  %v2387_v21 = vor.u32 %v2386_v14, %v2383_v13  ;;  %v6640_v13 = vld [vmem:[%s9694_s1 + $0xae4] ss:$8 sps:$4 sm:$0xff]   ;;  %v6634_v14 = vld [vmem:[%s9694_s1 + $0x3e0] ss:$8 sps:$4 sm:$0xff]  }
  0x54   :  { %3275 = vmatpush1.bf16.msra.mxu0 %v6576_v22  ;;  %667 = vmatprep.subr.bf16.mxu1 %v6581_v23  ;;  %v233_v22 = vshrl.u32 %v7817_v16, 16  ;;  %v235_v23 = vshll.u32 %v7817_v16, 16 }
  0x55   :  { %3276 = vmatprep.subr.bf16.mxu0 %v6584_v24  ;;  %v6605_v24 = vld [vmem:[%s9694_s1 + $0x394] ss:$8 sps:$4 sm:$0xff]   ;;  %v2388_v33 = vsel %vm2313_vm1, %v7670_v51, %v2387_v21  ;;  %v5825_v21 = vcombine.low %v7822_v18, %v7545_v49 }
  0x57   :  { %668 = vmatpush1.bf16.msra.mxu1 %v6579_v26  ;;  %v2397_v26 = vsel %vm2313_vm1, %v7634_v28, %v2396_v17  ;;  %v6638_v17 = vld [vmem:[%s9694_s1 + $0xae0] ss:$8 sps:$4 sm:$0xff]  }
  0x58   :  { %3277 = vmatpush1.bf16.msra.mxu0 %v6582_v27  ;;  %669 = vmatprep.subr.bf16.mxu1 %v6587_v31  ;;  %v5826_v27 = vcombine.high %v7822_v18, %v7545_v49  ;;  %v2922_v31 = vrot.slane %v7559_v54, 3 }
  0x59   :  { %3278 = vmatprep.subr.bf16.mxu0 %v6590_v32  ;;  %v6608_v32 = vld [vmem:[%s9694_s1 + $0xa94] ss:$8 sps:$4 sm:$0xff]   ;;  %2821 = vmatprep.mubr.bf16.mxu0 %v2397_v26 }
  0x5a   :  { %v2921_v28 = vrot.slane %v5826_v27, 3  ;;  %2822 = vmatmul.mubr.bf16.gmra.mrb[4].mxu0 %v2388_v33  ;;  %v6645_v26 = vld [vmem:[%s9694_s1 + $0x3f4] ss:$8 sps:$4 sm:$0xff]   ;;  %v2918_v33 = vrot.slane %v5825_v21, 3 }
  0x5b   :  { %670 = vmatpush1.bf16.msra.mxu1 %v6585_v35  ;;  %v237_v35 = vrot.slane %v235_v23, 1  ;;  %v6648_v27 = vld [vmem:[%s9694_s1 + $0xaf4] ss:$8 sps:$4 sm:$0xff]  }
  0x5c   :  { %3279 = vmatpush1.bf16.msra.mxu0 %v6588_v41  ;;  %671 = vmatprep.subr.bf16.mxu1 %v6593_v42  ;;  %v6606_v41 = vld [vmem:[%s9694_s1 + $0xa90] ss:$8 sps:$4 sm:$0xff]   ;;  %v2923_v51 = vsel %vm2917_vm2, %v2921_v28, %v2922_v31  ;;  %v6614_v42 = vld [vmem:[%s9694_s1 + $0xaa4] ss:$8 sps:$4 sm:$0xff]   ;;  %v2919_v28 = vrot.slane %v7614_v15, 3 }
  0x5d   :  { %3280 = vmatprep.subr.bf16.mxu0 %v6596_v46  ;;  %v238_v40 = vor.u32 %v237_v35, %v233_v22  ;;  %3298 = vmatprep.mubr.bf16.mxu0 %v2923_v51  ;;  %v6612_v46 = vld [vmem:[%s9694_s1 + $0xaa0] ss:$8 sps:$4 sm:$0xff]  }
  0x5e   :  { %v6656_v51 = vld [vmem:[%s9694_s1 + $0xb00] ss:$8 sps:$4 sm:$0xff]  }
  0x5f   :  { %672 = vmatpush1.bf16.msra.mxu1 %v6591_v47  ;;  %v243_v6 = vsel %vm195_vm0, %v238_v40, %v7847_v38  ;;  %v6617_v47 = vld [vmem:[%s9694_s1 + $0x3b4] ss:$8 sps:$4 sm:$0xff]   ;;  %v6658_v40 = vld [vmem:[%s9694_s1 + $0xb04] ss:$8 sps:$4 sm:$0xff]  }
  0x60   :  { %3281 = vmatpush1.bf16.msra.mxu0 %v6594_v59  ;;  %673 = vmatprep.subr.bf16.mxu1 %v6599_v63  ;;  %v6626_v59 = vld [vmem:[%s9694_s1 + $0xac4] ss:$8 sps:$4 sm:$0xff]   ;;  %v7898_v63 = vcombine.low %v7810_v11, %v7567_v56 }
  0x61   :  { %3282 = vmatprep.subr.bf16.mxu0 %v6602_v12  ;;  %689 = vmatprep.mubr.bf16.mxu1 %v243_v6  ;;  %v6636_v12 = vld [vmem:[%s9694_s1 + $0x3e4] ss:$8 sps:$4 sm:$0xff]   ;;  %v6661_v6 = vld [vmem:[%s9694_s1 + $0x14] ss:$8 sps:$4 sm:$0xff]  }
  0x62   :  { %v223_v11 = vshll.u32 %v7898_v63, 16  ;;  %v221_v22 = vshrl.u32 %v7898_v63, 16 }
  0x63   :  { %674 = vmatpush1.bf16.msra.mxu1 %v6597_v19  ;;  %v2928_v19 = vrot.slane %v7590_v2, 3 }
  0x64   :  { %3283 = vmatpush1.bf16.msra.mxu0 %v6600_v20  ;;  %675 = vmatprep.subr.bf16.mxu1 %v6605_v24  ;;  %v2925_v20 = vrot.slane %v7605_v8, 3  ;;  %v225_v23 = vrot.slane %v223_v11, 1  ;;  %v2936_v24 = vrot.slane %v7784_v43, 3  ;;  %v6643_v43 = vld [vmem:[%s9694_s1 + $0x3f0] ss:$8 sps:$4 sm:$0xff]  }
  0x65   :  { %3284 = vmatprep.subr.bf16.mxu0 %v6608_v32  ;;  %v2934_v32 = vrot.slane %v7787_v45, 3  ;;  %v6646_v45 = vld [vmem:[%s9694_s1 + $0xaf0] ss:$8 sps:$4 sm:$0xff]   ;;  %v6668_v11 = vld [vmem:[%s9694_s1 + $0xb20] ss:$8 sps:$4 sm:$0xff]  }
  0x66   :  { %v7941_v49 = vsel %vm2917_vm2, %v2928_v19, %v2936_v24  ;;  %v226_v35 = vor.u32 %v225_v23, %v221_v22  ;;  %v8029_v24 = vld [vmem:[%s9695_s0 + $0x8] sm:$0x88] }
  0x67   :  { %676 = vmatpush1.bf16.msra.mxu1 %v6603_v39  ;;  %v7949_v18 = vsel %vm2917_vm2, %v2925_v20, %v2934_v32  ;;  %v6653_v39 = vld [vmem:[%s9694_s1 + $0x4] ss:$8 sps:$4 sm:$0xff]   ;;  %v6674_v32 = vld [vmem:[%s9694_s1 + $0xb30] ss:$8 sps:$4 sm:$0xff]  }
  0x68   :  { %3285 = vmatpush1.bf16.msra.mxu0 %v6606_v41  ;;  %677 = vmatprep.subr.bf16.mxu1 %v6611_v9  ;;  %v6651_v41 = vld [vmem:[%s9694_s1] ss:$8 sps:$4 sm:$0xff]   ;;  %v231_v9 = vsel %vm195_vm0, %v226_v35, %v7672_v52 }
  0x69   :  { %3286 = vmatprep.subr.bf16.mxu0 %v6614_v42  ;;  %v2920_v42 = vsel %vm2917_vm2, %v2918_v33, %v2919_v28  ;;  %v87_v52 = vld [vmem:[%s9695_s0 + $0x48] sm:$0x11] }
  0x6a   :  { %v6677_v33 = vld [vmem:[%s9694_s1 + $0x40] ss:$8 sps:$4 sm:$0xff]  }
  0x6b   :  { %678 = vmatpush1.bf16.msra.mxu1 %v6609_v44  ;;  %v6664_v44 = vld [vmem:[%s9694_s1 + $0xb14] ss:$8 sps:$4 sm:$0xff]   ;;  %v6680_v35 = vld [vmem:[%s9694_s1 + $0xb40] ss:$8 sps:$4 sm:$0xff]  }
  0x6c   :  { %3287 = vmatpush1.bf16.msra.mxu0 %v6612_v46  ;;  %679 = vmatprep.subr.bf16.mxu1 %v6617_v47  ;;  %v6659_v46 = vld [vmem:[%s9694_s1 + $0x10] ss:$8 sps:$4 sm:$0xff]  }
  0x6d   :  { %3288 = vmatprep.subr.bf16.mxu0 %v6620_v48  ;;  %v6662_v47 = vld [vmem:[%s9694_s1 + $0xb10] ss:$8 sps:$4 sm:$0xff]   ;;  %v6667_v48 = vld [vmem:[%s9694_s1 + $0x24] ss:$8 sps:$4 sm:$0xff]  }
  0x6f   :  { %680 = vmatpush1.bf16.msra.mxu1 %v6615_v50  ;;  %v7988_v50 = vcombine.high %v87_v52, %v87_v52 }
  0x70   :  { %3289 = vmatpush1.bf16.msra.mxu0 %v6618_v55  ;;  %681 = vmatprep.subr.bf16.mxu1 %v6623_v58  ;;  %v2236_v55 = vld [vmem:[%s9695_s0 + $0x40] sm:$0x77]  ;;  %v7993_v58 = vcombine.low %v87_v52, %v87_v52 }
  0x71   :  { %3290 = vmatprep.subr.bf16.mxu0 %v6626_v59  ;;  %v6670_v59 = vld [vmem:[%s9694_s1 + $0xb24] ss:$8 sps:$4 sm:$0xff]  }
  0x72   :  { %v6703_v52 = vld [vmem:[%s9694_s1 + $0x84] ss:$8 sps:$4 sm:$0xff]  }
  0x73   :  { %682 = vmatpush1.bf16.msra.mxu1 %v6621_v60  ;;  %v7998_v60 = vcombine.high %v2236_v55, %v2236_v55 }
  0x74   :  { %3291 = vmatpush1.bf16.msra.mxu0 %v6624_v61  ;;  %683 = vmatprep.subr.bf16.mxu1 %v6629_v0  ;;  %v8000_v61 = vcombine.low %v2236_v55, %v2236_v55  ;;  %v270_v0 = vor.u32 %v268_v10, %v7847_v38  ;;  %v6673_v10 = vld [vmem:[%s9694_s1 + $0x34] ss:$8 sps:$4 sm:$0xff]   ;;  %v6704_v55 = vld [vmem:[%s9694_s1 + $0xb80] ss:$8 sps:$4 sm:$0xff]  }
  0x75   :  { %3292 = vmatprep.subr.bf16.mxu0 %v6632_v1  ;;  %v272_v1 = vshll.u32 %v7988_v50, 16 }
  0x77   :  { %684 = vmatpush1.bf16.msra.mxu1 %v6627_v4  ;;  %v264_v4 = vshll.u32 %v7993_v58, 16  ;;  %v274_v38 = vrot.slane %v272_v1, 1  ;;  %v6707_v1 = vld [vmem:[%s9694_s1 + $0x90] ss:$8 sps:$4 sm:$0xff]  }
  0x78   :  { %3293 = vmatpush1.bf16.msra.mxu0 %v6630_v5  ;;  %685 = vmatprep.subr.bf16.mxu1 %v6636_v12  ;;  %v6665_v5 = vld [vmem:[%s9694_s1 + $0x20] ss:$8 sps:$4 sm:$0xff]   ;;  %v2932_v12 = vrot.slane %v7998_v60, 3 }
  0x79   :  { %3294 = vmatprep.subr.bf16.mxu0 %v6640_v13  ;;  %v2930_v13 = vrot.slane %v8000_v61, 3  ;;  %v275_v23 = vsel %vm195_vm0, %v270_v0, %v274_v38  ;;  %v6712_v0 = vld [vmem:[%s9694_s1 + $0xb94] ss:$8 sps:$4 sm:$0xff]  }
  0x7a   :  { %v2933_v21 = vsel %vm2917_vm2, %v2922_v31, %v2932_v12  ;;  %v5828_v31 = vcombine.high %v8029_v24, %v7567_v56  ;;  %v6713_v12 = vld [vmem:[%s9694_s1 + $0xa0] ss:$8 sps:$4 sm:$0xff]   ;;  %v6724_v38 = vld [vmem:[%s9694_s1 + $0xbb4] ss:$8 sps:$4 sm:$0xff]  }
  0x7b   :  { %686 = vmatpush1.bf16.msra.mxu1 %v6634_v14  ;;  %v266_v14 = vrot.slane %v264_v4, 1  ;;  %v2931_v22 = vsel %vm2917_vm2, %v2919_v28, %v2930_v13  ;;  %v6683_v28 = vld [vmem:[%s9694_s1 + $0x50] ss:$8 sps:$4 sm:$0xff]   ;;  %v6716_v13 = vld [vmem:[%s9694_s1 + $0xba0] ss:$8 sps:$4 sm:$0xff]  }
  0x7c   :  { %3295 = vmatpush1.bf16.msra.mxu0 %v6638_v17  ;;  %687 = vmatprep.subr.bf16.mxu1 %v6645_v26  ;;  %v6676_v17 = vld [vmem:[%s9694_s1 + $0xb34] ss:$8 sps:$4 sm:$0xff]   ;;  %v6671_v26 = vld [vmem:[%s9694_s1 + $0x30] ss:$8 sps:$4 sm:$0xff]  }
  0x7d   :  { %3296 = vmatprep.subr.bf16.mxu0 %v6648_v27  ;;  %v267_v27 = vsel %vm195_vm0, %v7678_v57, %v266_v14  ;;  %v6682_v57 = vld [vmem:[%s9694_s1 + $0xb44] ss:$8 sps:$4 sm:$0xff]   ;;  %v6710_v4 = vld [vmem:[%s9694_s1 + $0xb90] ss:$8 sps:$4 sm:$0xff]  }
  0x7e   :  { %v6719_v14 = vld [vmem:[%s9694_s1 + $0xb0] ss:$8 sps:$4 sm:$0xff]  }
  0x7f   :  { %688 = vmatpush1.bf16.msra.mxu1 %v6643_v43  ;;  %v6679_v43 = vld [vmem:[%s9694_s1 + $0x44] ss:$8 sps:$4 sm:$0xff]  }
  0x80   :  { %3297 = vmatpush1.bf16.msra.mxu0 %v6646_v45  ;;  %1038 = vmatprep.subr.bf16.mxu1 %v6653_v39  ;;  %v2927_v45 = vrot.slane %v5828_v31, 3  ;;  %v6686_v39 = vld [vmem:[%s9694_s1 + $0xb50] ss:$8 sps:$4 sm:$0xff]   ;;  %v6736_v31 = vld [vmem:[%s9694_s1 + $0xbd4] ss:$8 sps:$4 sm:$0xff]  }
  0x81   :  { %3319 = vmatprep.subr.bf16.mxu0 %v6658_v40  ;;  %v6691_v40 = vld [vmem:[%s9694_s1 + $0x64] ss:$8 sps:$4 sm:$0xff]  }
  0x82   :  { %690 = vmatmul.mubr.bf16.vlgmr.msra.gmra.mrb[0].mxu1 %v231_v9  ;;  %v2929_v56 = vsel %vm2917_vm2, %v2927_v45, %v2928_v19  ;;  %v6688_v19 = vld [vmem:[%s9694_s1 + $0xb54] ss:$8 sps:$4 sm:$0xff]   ;;  %v6692_v9 = vld [vmem:[%s9694_s1 + $0xb60] ss:$8 sps:$4 sm:$0xff]   ;;  %v6744_v45 = vld [vmem:[%s9694_s1 + $0xbe4] ss:$8 sps:$4 sm:$0xff]  }
  0x83   :  { %3299 = vmatmul.mubr.bf16.vlgmr.msra.gmra.mrb[0].mxu0 %v2920_v42  ;;  %1039 = vmatpush1.bf16.msra.mxu1 %v6651_v41  ;;  %v6694_v41 = vld [vmem:[%s9694_s1 + $0xb64] ss:$8 sps:$4 sm:$0xff]   ;;  %v6697_v42 = vld [vmem:[%s9694_s1 + $0x74] ss:$8 sps:$4 sm:$0xff]  }
  0x84   :  { %3320 = vmatpush1.bf16.msra.mxu0 %v6656_v51  ;;  %1040 = vmatprep.subr.bf16.mxu1 %v6661_v6  ;;  %v6689_v51 = vld [vmem:[%s9694_s1 + $0x60] ss:$8 sps:$4 sm:$0xff]   ;;  %v6700_v6 = vld [vmem:[%s9694_s1 + $0xb74] ss:$8 sps:$4 sm:$0xff]  }
  0x85   :  { %3321 = vmatprep.subr.bf16.mxu0 %v6664_v44  ;;  %3308 = vmatprep.mubr.bf16.mxu0 %v2933_v21  ;;  %v6695_v44 = vld [vmem:[%s9694_s1 + $0x70] ss:$8 sps:$4 sm:$0xff]   ;;  %v6727_v21 = vld [vmem:[%s9694_s1 + $0xc4] ss:$8 sps:$4 sm:$0xff]  }
  0x86   :  { %699 = vmatprep.mubr.bf16.mxu1 %v275_v23  ;;  %v6725_v23 = vld [vmem:[%s9694_s1 + $0xc0] ss:$8 sps:$4 sm:$0xff]  }
  0x87   :  { %1041 = vmatpush1.bf16.msra.mxu1 %v6659_v46  ;;  %v6698_v46 = vld [vmem:[%s9694_s1 + $0xb70] ss:$8 sps:$4 sm:$0xff]  }
  0x88   :  { %3322 = vmatpush1.bf16.msra.mxu0 %v6662_v47  ;;  %1042 = vmatprep.subr.bf16.mxu1 %v6667_v48  ;;  %v6706_v47 = vld [vmem:[%s9694_s1 + $0xb84] ss:$8 sps:$4 sm:$0xff]   ;;  %v6701_v48 = vld [vmem:[%s9694_s1 + $0x80] ss:$8 sps:$4 sm:$0xff]  }
  0x89   :  { %3323 = vmatprep.subr.bf16.mxu0 %v6670_v59  ;;  %v6709_v59 = vld [vmem:[%s9694_s1 + $0x94] ss:$8 sps:$4 sm:$0xff]  }
  0x8a   :  { %700 = vmatmul.mubr.bf16.gmra.mrb[4].mxu1 %v267_v27  ;;  %v6733_v27 = vld [vmem:[%s9694_s1 + $0xd4] ss:$8 sps:$4 sm:$0xff]  }
  0x8b   :  { %3309 = vmatmul.mubr.bf16.gmra.mrb[4].mxu0 %v2931_v22  ;;  %1043 = vmatpush1.bf16.msra.mxu1 %v6665_v5  ;;  %v6715_v5 = vld [vmem:[%s9694_s1 + $0xa4] ss:$8 sps:$4 sm:$0xff]  }
  0x8c   :  { %3324 = vmatpush1.bf16.msra.mxu0 %v6668_v11  ;;  %1044 = vmatprep.subr.bf16.mxu1 %v6673_v10  ;;  %v6718_v11 = vld [vmem:[%s9694_s1 + $0xba4] ss:$8 sps:$4 sm:$0xff]   ;;  %v6721_v10 = vld [vmem:[%s9694_s1 + $0xb4] ss:$8 sps:$4 sm:$0xff]  }
  0x8d   :  { %3325 = vmatprep.subr.bf16.mxu0 %v6676_v17  ;;  %1070 = vmatprep.mubr.bf16.mxu1 %v7557_v53  ;;  %v6685_v53 = vld [vmem:[%s9694_s1 + $0x54] ss:$8 sps:$4 sm:$0xff]   ;;  %v6722_v17 = vld [vmem:[%s9694_s1 + $0xbb0] ss:$8 sps:$4 sm:$0xff]   ;;  %v6730_v22 = vld [vmem:[%s9694_s1 + $0xbc4] ss:$8 sps:$4 sm:$0xff]  }
  0x8e   :  { %3351 = vmatprep.mubr.bf16.mxu0 %v2929_v56  ;;  %v6738_v56 = vld [vmem:[%s9694_s1 + $0xe0] ss:$8 sps:$4 sm:$0xff]  }
  0x8f   :  { %1045 = vmatpush1.bf16.msra.mxu1 %v6671_v26  ;;  %v6728_v26 = vld [vmem:[%s9694_s1 + $0xbc0] ss:$8 sps:$4 sm:$0xff]  }
  0x90   :  { %3326 = vmatpush1.bf16.msra.mxu0 %v6674_v32  ;;  %1046 = vmatprep.subr.bf16.mxu1 %v6679_v43  ;;  %v6731_v32 = vld [vmem:[%s9694_s1 + $0xd0] ss:$8 sps:$4 sm:$0xff]  }
  0x91   :  { %3327 = vmatprep.subr.bf16.mxu0 %v6682_v57  ;;  %v6734_v43 = vld [vmem:[%s9694_s1 + $0xbd0] ss:$8 sps:$4 sm:$0xff]   ;;  %v6740_v57 = vld [vmem:[%s9694_s1 + $0xe4] ss:$8 sps:$4 sm:$0xff]  }
  0x93   :  { %1047 = vmatpush1.bf16.msra.mxu1 %v6677_v33  ;;  %v6742_v33 = vld [vmem:[%s9694_s1 + $0xbe0] ss:$8 sps:$4 sm:$0xff]  }
  0x94   :  { %3328 = vmatpush1.bf16.msra.mxu0 %v6680_v35  ;;  %1048 = vmatprep.subr.bf16.mxu1 %v6685_v53  ;;  %v8180_v35 = vld [vmem:[%s9695_s0 + $0x18] sm:$0xff] }
  0x95   :  { %3329 = vmatprep.subr.bf16.mxu0 %v6688_v19  ;;  %v5827_v53 = vcombine.low %v8029_v24, %v8180_v35  ;;  %v6749_v19 = vld [vmem:[%s9694_s1 + $0xf4] ss:$8 sps:$4 sm:$0xff]   ;;  %v6750_v24 = vld [vmem:[%s9694_s1 + $0xbf0] ss:$8 sps:$4 sm:$0xff]  }
  0x97   :  { %1049 = vmatpush1.bf16.msra.mxu1 %v6683_v28  ;;  %v6752_v28 = vld [vmem:[%s9694_s1 + $0xbf4] ss:$8 sps:$4 sm:$0xff]  }
  0x98   :  { %3330 = vmatpush1.bf16.msra.mxu0 %v6686_v39  ;;  %1050 = vmatprep.subr.bf16.mxu1 %v6691_v40  ;;  %v6747_v39 = vld [vmem:[%s9694_s1 + $0xf0] ss:$8 sps:$4 sm:$0xff]   ;;  %v2924_v40 = vrot.slane %v5827_v53, 3  ;;  %v6811_v53 = vld [vmem:[%s9694_s1 + $0x194] ss:$8 sps:$4 sm:$0xff]  }
  0x99   :  { %3331 = vmatprep.subr.bf16.mxu0 %v6694_v41  ;;  %v6755_v41 = vld [vmem:[%s9694_s1 + $0x104] ss:$8 sps:$4 sm:$0xff]  }
  0x9b   :  { %1051 = vmatpush1.bf16.msra.mxu1 %v6689_v51  ;;  %v6760_v51 = vld [vmem:[%s9694_s1 + $0xc04] ss:$8 sps:$4 sm:$0xff]  }
  0x9c   :  { %3332 = vmatpush1.bf16.msra.mxu0 %v6692_v9  ;;  %1052 = vmatprep.subr.bf16.mxu1 %v6697_v42  ;;  %v6753_v9 = vld [vmem:[%s9694_s1 + $0x100] ss:$8 sps:$4 sm:$0xff]  }
  0x9d   :  { %3333 = vmatprep.subr.bf16.mxu0 %v6700_v6  ;;  %v6758_v42 = vld [vmem:[%s9694_s1 + $0xc00] ss:$8 sps:$4 sm:$0xff]   ;;  %v2926_v6 = vsel %vm2917_vm2, %v2924_v40, %v2925_v20  ;;  %v6764_v20 = vld [vmem:[%s9694_s1 + $0xc10] ss:$8 sps:$4 sm:$0xff]   ;;  %v6820_v40 = vld [vmem:[%s9694_s1 + $0xca4] ss:$8 sps:$4 sm:$0xff]  }
  0x9f   :  { %1053 = vmatpush1.bf16.msra.mxu1 %v6695_v44  ;;  %v6763_v44 = vld [vmem:[%s9694_s1 + $0x114] ss:$8 sps:$4 sm:$0xff]  }
  0xa0   :  { %3334 = vmatpush1.bf16.msra.mxu0 %v6698_v46  ;;  %1054 = vmatprep.subr.bf16.mxu1 %v6703_v52  ;;  %v6766_v46 = vld [vmem:[%s9694_s1 + $0xc14] ss:$8 sps:$4 sm:$0xff]   ;;  %v6761_v52 = vld [vmem:[%s9694_s1 + $0x110] ss:$8 sps:$4 sm:$0xff]  }
  0xa1   :  { %3335 = vmatprep.subr.bf16.mxu0 %v6706_v47  ;;  %v6769_v47 = vld [vmem:[%s9694_s1 + $0x124] ss:$8 sps:$4 sm:$0xff]  }
  0xa3   :  { %1055 = vmatpush1.bf16.msra.mxu1 %v6701_v48  ;;  %v6767_v48 = vld [vmem:[%s9694_s1 + $0x120] ss:$8 sps:$4 sm:$0xff]  }
  0xa4   :  { %3336 = vmatpush1.bf16.msra.mxu0 %v6704_v55  ;;  %1056 = vmatprep.subr.bf16.mxu1 %v6709_v59  ;;  %v6770_v55 = vld [vmem:[%s9694_s1 + $0xc20] ss:$8 sps:$4 sm:$0xff]   ;;  %v6775_v59 = vld [vmem:[%s9694_s1 + $0x134] ss:$8 sps:$4 sm:$0xff]  }
  0xa5   :  { %3337 = vmatprep.subr.bf16.mxu0 %v6712_v0  ;;  %v8247_v0 = vld [vmem:[%s9695_s0 + $0x10] sm:$0xff] }
  0xa7   :  { %1057 = vmatpush1.bf16.msra.mxu1 %v6707_v1  ;;  %v8252_v1 = vld [vmem:[%s9695_s0 + $0x20] sm:$0xff] }
  0xa8   :  { %3338 = vmatpush1.bf16.msra.mxu0 %v6710_v4  ;;  %1058 = vmatprep.subr.bf16.mxu1 %v6715_v5  ;;  %v5958_v4 = vcombine.high %v8247_v0, %v8252_v1  ;;  %v6773_v5 = vld [vmem:[%s9694_s1 + $0x130] ss:$8 sps:$4 sm:$0xff]  }
  0xa9   :  { %3339 = vmatprep.subr.bf16.mxu0 %v6718_v11  ;;  %v6776_v11 = vld [vmem:[%s9694_s1 + $0xc30] ss:$8 sps:$4 sm:$0xff]  }
  0xab   :  { %1059 = vmatpush1.bf16.msra.mxu1 %v6713_v12  ;;  %v6781_v12 = vld [vmem:[%s9694_s1 + $0x144] ss:$8 sps:$4 sm:$0xff]  }
  0xac   :  { %3340 = vmatpush1.bf16.msra.mxu0 %v6716_v13  ;;  %1060 = vmatprep.subr.bf16.mxu1 %v6721_v10  ;;  %v6779_v13 = vld [vmem:[%s9694_s1 + $0x140] ss:$8 sps:$4 sm:$0xff]  }
  0xad   :  { %3341 = vmatprep.subr.bf16.mxu0 %v6724_v38  ;;  %v6782_v10 = vld [vmem:[%s9694_s1 + $0xc40] ss:$8 sps:$4 sm:$0xff]   ;;  %v6787_v38 = vld [vmem:[%s9694_s1 + $0x154] ss:$8 sps:$4 sm:$0xff]  }
  0xaf   :  { %1061 = vmatpush1.bf16.msra.mxu1 %v6719_v14  ;;  %v6785_v14 = vld [vmem:[%s9694_s1 + $0x150] ss:$8 sps:$4 sm:$0xff]  }
  0xb0   :  { %3342 = vmatpush1.bf16.msra.mxu0 %v6722_v17  ;;  %1062 = vmatprep.subr.bf16.mxu1 %v6727_v21  ;;  %v6788_v17 = vld [vmem:[%s9694_s1 + $0xc50] ss:$8 sps:$4 sm:$0xff]   ;;  %v6793_v21 = vld [vmem:[%s9694_s1 + $0x164] ss:$8 sps:$4 sm:$0xff]  }
  0xb1   :  { %3343 = vmatprep.subr.bf16.mxu0 %v6730_v22  ;;  %v6796_v22 = vld [vmem:[%s9694_s1 + $0xc64] ss:$8 sps:$4 sm:$0xff]  }
  0xb3   :  { %1063 = vmatpush1.bf16.msra.mxu1 %v6725_v23  ;;  %v6791_v23 = vld [vmem:[%s9694_s1 + $0x160] ss:$8 sps:$4 sm:$0xff]  }
  0xb4   :  { %3344 = vmatpush1.bf16.msra.mxu0 %v6728_v26  ;;  %1064 = vmatprep.subr.bf16.mxu1 %v6733_v27  ;;  %v6794_v26 = vld [vmem:[%s9694_s1 + $0xc60] ss:$8 sps:$4 sm:$0xff]   ;;  %v6799_v27 = vld [vmem:[%s9694_s1 + $0x174] ss:$8 sps:$4 sm:$0xff]  }
  0xb5   :  { %3345 = vmatprep.subr.bf16.mxu0 %v6736_v31  ;;  %v6802_v31 = vld [vmem:[%s9694_s1 + $0xc74] ss:$8 sps:$4 sm:$0xff]  }
  0xb7   :  { %1065 = vmatpush1.bf16.msra.mxu1 %v6731_v32  ;;  %v6797_v32 = vld [vmem:[%s9694_s1 + $0x170] ss:$8 sps:$4 sm:$0xff]  }
  0xb8   :  { %3346 = vmatpush1.bf16.msra.mxu0 %v6734_v43  ;;  %1066 = vmatprep.subr.bf16.mxu1 %v6740_v57  ;;  %v6800_v43 = vld [vmem:[%s9694_s1 + $0xc70] ss:$8 sps:$4 sm:$0xff]   ;;  %v6805_v57 = vld [vmem:[%s9694_s1 + $0x184] ss:$8 sps:$4 sm:$0xff]  }
  0xb9   :  { %3347 = vmatprep.subr.bf16.mxu0 %v6744_v45  ;;  %v6808_v45 = vld [vmem:[%s9694_s1 + $0xc84] ss:$8 sps:$4 sm:$0xff]  }
  0xbb   :  { %1067 = vmatpush1.bf16.msra.mxu1 %v6738_v56  ;;  %v6803_v56 = vld [vmem:[%s9694_s1 + $0x180] ss:$8 sps:$4 sm:$0xff]  }
  0xbc   :  { %3348 = vmatpush1.bf16.msra.mxu0 %v6742_v33  ;;  %1068 = vmatprep.subr.bf16.mxu1 %v6749_v19  ;;  %v6806_v33 = vld [vmem:[%s9694_s1 + $0xc80] ss:$8 sps:$4 sm:$0xff]   ;;  %v6814_v19 = vld [vmem:[%s9694_s1 + $0xc94] ss:$8 sps:$4 sm:$0xff]  }
  0xbd   :  { %3349 = vmatprep.subr.bf16.mxu0 %v6752_v28  ;;  %v6809_v28 = vld [vmem:[%s9694_s1 + $0x190] ss:$8 sps:$4 sm:$0xff]  }
  0xbf   :  { %1069 = vmatpush1.bf16.msra.mxu1 %v6747_v39  ;;  %v6812_v39 = vld [vmem:[%s9694_s1 + $0xc90] ss:$8 sps:$4 sm:$0xff]  }
  0xc0   :  { %3350 = vmatpush1.bf16.msra.mxu0 %v6750_v24  ;;  %1091 = vmatprep.subr.bf16.mxu1 %v6755_v41  ;;  %v6817_v24 = vld [vmem:[%s9694_s1 + $0x1a4] ss:$8 sps:$4 sm:$0xff]   ;;  %v6815_v41 = vld [vmem:[%s9694_s1 + $0x1a0] ss:$8 sps:$4 sm:$0xff]  }
  0xc1   :  { %3789 = vmatprep.subr.bf16.mxu0 %v6760_v51  ;;  %v6818_v51 = vld [vmem:[%s9694_s1 + $0xca0] ss:$8 sps:$4 sm:$0xff]  }
  0xc2   :  { %1071 = vmatmul.mubr.bf16.vlgmr.msra.gmra.mrb[0].mxu1 %v7603_v7  ;;  %v6772_v7 = vld [vmem:[%s9694_s1 + $0xc24] ss:$8 sps:$4 sm:$0xff]  }
  0xc3   :  { %3352 = vmatmul.mubr.bf16.vlgmr.msra.gmra.mrb[0].mxu0 %v2926_v6  ;;  %1092 = vmatpush1.bf16.msra.mxu1 %v6753_v9  ;;  %v6823_v9 = vld [vmem:[%s9694_s1 + $0x1b4] ss:$8 sps:$4 sm:$0xff]   ;;  %v6821_v6 = vld [vmem:[%s9694_s1 + $0x1b0] ss:$8 sps:$4 sm:$0xff]  }
  0xc4   :  { %3790 = vmatpush1.bf16.msra.mxu0 %v6758_v42  ;;  %1093 = vmatprep.subr.bf16.mxu1 %v6763_v44  ;;  %v6826_v42 = vld [vmem:[%s9694_s1 + $0xcb4] ss:$8 sps:$4 sm:$0xff]   ;;  %v6824_v44 = vld [vmem:[%s9694_s1 + $0xcb0] ss:$8 sps:$4 sm:$0xff]  }
  0xc5   :  { %3791 = vmatprep.subr.bf16.mxu0 %v6766_v46  ;;  %1080 = vmatprep.mubr.bf16.mxu1 %v7559_v54  ;;  %v6829_v46 = vld [vmem:[%s9694_s1 + $0x1c4] ss:$8 sps:$4 sm:$0xff]  }
  0xc6   :  { %3361 = vmatprep.mubr.bf16.mxu0 %v7941_v49  ;;  %v6778_v49 = vld [vmem:[%s9694_s1 + $0xc34] ss:$8 sps:$4 sm:$0xff]  }
  0xc7   :  { %1094 = vmatpush1.bf16.msra.mxu1 %v6761_v52  ;;  %v6832_v52 = vld [vmem:[%s9694_s1 + $0xcc4] ss:$8 sps:$4 sm:$0xff]  }
  0xc8   :  { %3792 = vmatpush1.bf16.msra.mxu0 %v6764_v20  ;;  %1095 = vmatprep.subr.bf16.mxu1 %v6769_v47  ;;  %v6827_v20 = vld [vmem:[%s9694_s1 + $0x1c0] ss:$8 sps:$4 sm:$0xff]  }
  0xc9   :  { %3793 = vmatprep.subr.bf16.mxu0 %v6772_v7  ;;  %v6830_v47 = vld [vmem:[%s9694_s1 + $0xcc0] ss:$8 sps:$4 sm:$0xff]   ;;  %v6835_v7 = vld [vmem:[%s9694_s1 + $0x1d4] ss:$8 sps:$4 sm:$0xff]  }
  0xca   :  { %1081 = vmatmul.mubr.bf16.gmra.mrb[4].mxu1 %v7614_v15 }
  0xcb   :  { %3362 = vmatmul.mubr.bf16.gmra.mrb[4].mxu0 %v7949_v18  ;;  %1096 = vmatpush1.bf16.msra.mxu1 %v6767_v48  ;;  %v6784_v18 = vld [vmem:[%s9694_s1 + $0xc44] ss:$8 sps:$4 sm:$0xff]   ;;  %v6838_v48 = vld [vmem:[%s9694_s1 + $0xcd4] ss:$8 sps:$4 sm:$0xff]  }
  0xcc   :  { %3794 = vmatpush1.bf16.msra.mxu0 %v6770_v55  ;;  %1097 = vmatprep.subr.bf16.mxu1 %v6775_v59  ;;  %v6833_v55 = vld [vmem:[%s9694_s1 + $0x1d0] ss:$8 sps:$4 sm:$0xff]  }
  0xcd   :  { %3795 = vmatprep.subr.bf16.mxu0 %v6778_v49  ;;  %1123 = vmatprep.mubr.bf16.mxu1 %v7817_v16  ;;  %v6790_v16 = vld [vmem:[%s9694_s1 + $0xc54] ss:$8 sps:$4 sm:$0xff]   ;;  %v6836_v59 = vld [vmem:[%s9694_s1 + $0xcd0] ss:$8 sps:$4 sm:$0xff]   ;;  %v6841_v49 = vld [vmem:[%s9694_s1 + $0x1e4] ss:$8 sps:$4 sm:$0xff]  }
  0xce   :  { %3821 = vmatprep.mubr.bf16.mxu0 %v5958_v4  ;;  %v6844_v4 = vld [vmem:[%s9694_s1 + $0xce4] ss:$8 sps:$4 sm:$0xff]  }
  0xcf   :  { %1098 = vmatpush1.bf16.msra.mxu1 %v6773_v5  ;;  %v6839_v5 = vld [vmem:[%s9694_s1 + $0x1e0] ss:$8 sps:$4 sm:$0xff]  }
  0xd0   :  { %3796 = vmatpush1.bf16.msra.mxu0 %v6776_v11  ;;  %1099 = vmatprep.subr.bf16.mxu1 %v6781_v12  ;;  %v6842_v11 = vld [vmem:[%s9694_s1 + $0xce0] ss:$8 sps:$4 sm:$0xff]   ;;  %v6847_v12 = vld [vmem:[%s9694_s1 + $0x1f4] ss:$8 sps:$4 sm:$0xff]  }
  0xd1   :  { %3797 = vmatprep.subr.bf16.mxu0 %v6784_v18  ;;  %v6850_v18 = vld [vmem:[%s9694_s1 + $0xcf4] ss:$8 sps:$4 sm:$0xff]  }
  0xd3   :  { %1100 = vmatpush1.bf16.msra.mxu1 %v6779_v13  ;;  %v6845_v13 = vld [vmem:[%s9694_s1 + $0x1f0] ss:$8 sps:$4 sm:$0xff]  }
  0xd4   :  { %3798 = vmatpush1.bf16.msra.mxu0 %v6782_v10  ;;  %1101 = vmatprep.subr.bf16.mxu1 %v6787_v38  ;;  %v6848_v10 = vld [vmem:[%s9694_s1 + $0xcf0] ss:$8 sps:$4 sm:$0xff]   ;;  %v6853_v38 = vld [vmem:[%s9694_s1 + $0x404] ss:$8 sps:$4 sm:$0xff]  }
  0xd5   :  { %3799 = vmatprep.subr.bf16.mxu0 %v6790_v16  ;;  %v6857_v16 = vld [vmem:[%s9694_s1 + $0xd04] ss:$8 sps:$4 sm:$0xff]  }
  0xd7   :  { %1102 = vmatpush1.bf16.msra.mxu1 %v6785_v14  ;;  %v6851_v14 = vld [vmem:[%s9694_s1 + $0x400] ss:$8 sps:$4 sm:$0xff]  }
  0xd8   :  { %3800 = vmatpush1.bf16.msra.mxu0 %v6788_v17  ;;  %1103 = vmatprep.subr.bf16.mxu1 %v6793_v21  ;;  %v6855_v17 = vld [vmem:[%s9694_s1 + $0xd00] ss:$8 sps:$4 sm:$0xff]   ;;  %v5957_v21 = vcombine.low %v8247_v0, %v8252_v1  ;;  %v6864_v1 = vld [vmem:[%s9694_s1 + $0xd14] ss:$8 sps:$4 sm:$0xff]  }
  0xd9   :  { %3801 = vmatprep.subr.bf16.mxu0 %v6796_v22  ;;  %v8426_v22 = vld [vmem:[%s9695_s0 + $0x40] sm:$0xff] }
  0xdb   :  { %1104 = vmatpush1.bf16.msra.mxu1 %v6791_v23  ;;  %v8431_v23 = vld [vmem:[%s9695_s0] sm:$0xee] }
  0xdc   :  { %3802 = vmatpush1.bf16.msra.mxu0 %v6794_v26  ;;  %1105 = vmatprep.subr.bf16.mxu1 %v6799_v27  ;;  %v6861_v26 = vld [vmem:[%s9694_s1 + $0x414] ss:$8 sps:$4 sm:$0xff]  }
  0xdd   :  { %3803 = vmatprep.subr.bf16.mxu0 %v6802_v31  ;;  %v7368_v27 = vld [vmem:[%s9695_s0 + $0x30] sm:$0xff] }
  0xde   :  { %v5962_v31 = vcombine.high %v7368_v27, %v8426_v22 }
  0xdf   :  { %1106 = vmatpush1.bf16.msra.mxu1 %v6797_v32  ;;  %v6859_v32 = vld [vmem:[%s9694_s1 + $0x410] ss:$8 sps:$4 sm:$0xff]  }
  0xe0   :  { %3804 = vmatpush1.bf16.msra.mxu0 %v6800_v43  ;;  %1107 = vmatprep.subr.bf16.mxu1 %v6805_v57  ;;  %v5426_v43 = vcombine.high %v8431_v23, %v8247_v0  ;;  %v6862_v57 = vld [vmem:[%s9694_s1 + $0xd10] ss:$8 sps:$4 sm:$0xff]  }
  0xe1   :  { %3805 = vmatprep.subr.bf16.mxu0 %v6808_v45  ;;  %v6870_v45 = vld [vmem:[%s9694_s1 + $0xd24] ss:$8 sps:$4 sm:$0xff]  }
  0xe3   :  { %1108 = vmatpush1.bf16.msra.mxu1 %v6803_v56  ;;  %v5961_v56 = vcombine.low %v7368_v27, %v8426_v22  ;;  %v6918_v27 = vld [vmem:[%s9694_s1 + $0xda4] ss:$8 sps:$4 sm:$0xff]  }
  0xe4   :  { %3806 = vmatpush1.bf16.msra.mxu0 %v6806_v33  ;;  %1109 = vmatprep.subr.bf16.mxu1 %v6811_v53  ;;  %v1225_v33 = vrot.slane %v5426_v43, 1  ;;  %v1226_v53 = vrot.slane %v7559_v54, 1  ;;  %v6921_v43 = vld [vmem:[%s9694_s1 + $0x4b4] ss:$8 sps:$4 sm:$0xff]  }
  0xe5   :  { %3807 = vmatprep.subr.bf16.mxu0 %v6814_v19  ;;  %v6865_v19 = vld [vmem:[%s9694_s1 + $0x420] ss:$8 sps:$4 sm:$0xff]  }
  0xe7   :  { %1110 = vmatpush1.bf16.msra.mxu1 %v6809_v28  ;;  %v6868_v28 = vld [vmem:[%s9694_s1 + $0xd20] ss:$8 sps:$4 sm:$0xff]  }
  0xe8   :  { %3808 = vmatpush1.bf16.msra.mxu0 %v6812_v39  ;;  %1111 = vmatprep.subr.bf16.mxu1 %v6817_v24  ;;  %v6873_v39 = vld [vmem:[%s9694_s1 + $0x434] ss:$8 sps:$4 sm:$0xff]  }
  0xe9   :  { %3809 = vmatprep.subr.bf16.mxu0 %v6820_v40  ;;  %v6876_v24 = vld [vmem:[%s9694_s1 + $0xd34] ss:$8 sps:$4 sm:$0xff]   ;;  %v8476_v40 = vld [vmem:[%s9695_s0 + $0x28] sm:$0xff] }
  0xeb   :  { %1112 = vmatpush1.bf16.msra.mxu1 %v6815_v41  ;;  %v5960_v41 = vcombine.high %v8180_v35, %v8476_v40 }
  0xec   :  { %3810 = vmatpush1.bf16.msra.mxu0 %v6818_v51  ;;  %1113 = vmatprep.subr.bf16.mxu1 %v6823_v9  ;;  %v1227_v51 = vsel %vm1221_vm3, %v1225_v33, %v1226_v53  ;;  %v6871_v9 = vld [vmem:[%s9694_s1 + $0x430] ss:$8 sps:$4 sm:$0xff]   ;;  %v6930_v33 = vld [vmem:[%s9694_s1 + $0xdc4] ss:$8 sps:$4 sm:$0xff]  }
  0xed   :  { %3811 = vmatprep.subr.bf16.mxu0 %v6826_v42  ;;  %v6874_v42 = vld [vmem:[%s9694_s1 + $0xd30] ss:$8 sps:$4 sm:$0xff]  }
  0xef   :  { %1114 = vmatpush1.bf16.msra.mxu1 %v6821_v6  ;;  %v6879_v6 = vld [vmem:[%s9694_s1 + $0x444] ss:$8 sps:$4 sm:$0xff]  }
  0xf0   :  { %3812 = vmatpush1.bf16.msra.mxu0 %v6824_v44  ;;  %1115 = vmatprep.subr.bf16.mxu1 %v6829_v46  ;;  %v6882_v44 = vld [vmem:[%s9694_s1 + $0xd44] ss:$8 sps:$4 sm:$0xff]   ;;  %v6877_v46 = vld [vmem:[%s9694_s1 + $0x440] ss:$8 sps:$4 sm:$0xff]  }
  0xf1   :  { %3813 = vmatprep.subr.bf16.mxu0 %v6832_v52  ;;  %v6880_v52 = vld [vmem:[%s9694_s1 + $0xd40] ss:$8 sps:$4 sm:$0xff]  }
  0xf3   :  { %1116 = vmatpush1.bf16.msra.mxu1 %v6827_v20  ;;  %v6885_v20 = vld [vmem:[%s9694_s1 + $0x454] ss:$8 sps:$4 sm:$0xff]  }
  0xf4   :  { %3814 = vmatpush1.bf16.msra.mxu0 %v6830_v47  ;;  %1117 = vmatprep.subr.bf16.mxu1 %v6835_v7  ;;  %v6888_v47 = vld [vmem:[%s9694_s1 + $0xd54] ss:$8 sps:$4 sm:$0xff]   ;;  %v6883_v7 = vld [vmem:[%s9694_s1 + $0x450] ss:$8 sps:$4 sm:$0xff]  }
  0xf5   :  { %3815 = vmatprep.subr.bf16.mxu0 %v6838_v48  ;;  %v6886_v48 = vld [vmem:[%s9694_s1 + $0xd50] ss:$8 sps:$4 sm:$0xff]  }
  0xf7   :  { %1118 = vmatpush1.bf16.msra.mxu1 %v6833_v55  ;;  %v6891_v55 = vld [vmem:[%s9694_s1 + $0x464] ss:$8 sps:$4 sm:$0xff]  }
  0xf8   :  { %3816 = vmatpush1.bf16.msra.mxu0 %v6836_v59  ;;  %1119 = vmatprep.subr.bf16.mxu1 %v6841_v49  ;;  %v6894_v59 = vld [vmem:[%s9694_s1 + $0xd64] ss:$8 sps:$4 sm:$0xff]   ;;  %v6889_v49 = vld [vmem:[%s9694_s1 + $0x460] ss:$8 sps:$4 sm:$0xff]  }
  0xf9   :  { %3817 = vmatprep.subr.bf16.mxu0 %v6844_v4  ;;  %v6892_v4 = vld [vmem:[%s9694_s1 + $0xd60] ss:$8 sps:$4 sm:$0xff]  }
  0xfb   :  { %1120 = vmatpush1.bf16.msra.mxu1 %v6839_v5  ;;  %v6897_v5 = vld [vmem:[%s9694_s1 + $0x474] ss:$8 sps:$4 sm:$0xff]  }
  0xfc   :  { %3818 = vmatpush1.bf16.msra.mxu0 %v6842_v11  ;;  %1121 = vmatprep.subr.bf16.mxu1 %v6847_v12  ;;  %v6900_v11 = vld [vmem:[%s9694_s1 + $0xd74] ss:$8 sps:$4 sm:$0xff]   ;;  %v6895_v12 = vld [vmem:[%s9694_s1 + $0x470] ss:$8 sps:$4 sm:$0xff]  }
  0xfd   :  { %3819 = vmatprep.subr.bf16.mxu0 %v6850_v18  ;;  %v6898_v18 = vld [vmem:[%s9694_s1 + $0xd70] ss:$8 sps:$4 sm:$0xff]  }
  0xff   :  { %1122 = vmatpush1.bf16.msra.mxu1 %v6845_v13  ;;  %v6903_v13 = vld [vmem:[%s9694_s1 + $0x484] ss:$8 sps:$4 sm:$0xff]  }
 0x100   :  { %3820 = vmatpush1.bf16.msra.mxu0 %v6848_v10  ;;  %1570 = vmatprep.subr.bf16.mxu1 %v6853_v38  ;;  %v6906_v10 = vld [vmem:[%s9694_s1 + $0xd84] ss:$8 sps:$4 sm:$0xff]   ;;  %v6901_v38 = vld [vmem:[%s9694_s1 + $0x480] ss:$8 sps:$4 sm:$0xff]  }
 0x101   :  { %3842 = vmatprep.subr.bf16.mxu0 %v6857_v16  ;;  %v6904_v16 = vld [vmem:[%s9694_s1 + $0xd80] ss:$8 sps:$4 sm:$0xff]  }
 0x102   :  { %1124 = vmatmul.mubr.bf16.vlgmr.msra.gmra.mrb[0].mxu1 %v7898_v63  ;;  %v6867_v63 = vld [vmem:[%s9694_s1 + $0x424] ss:$8 sps:$4 sm:$0xff]  }
 0x103   :  { %3822 = vmatmul.mubr.bf16.vlgmr.msra.gmra.mrb[0].mxu0 %v5957_v21  ;;  %1571 = vmatpush1.bf16.msra.mxu1 %v6851_v14  ;;  %v6909_v14 = vld [vmem:[%s9694_s1 + $0x494] ss:$8 sps:$4 sm:$0xff]   ;;  %v6907_v21 = vld [vmem:[%s9694_s1 + $0x490] ss:$8 sps:$4 sm:$0xff]  }
 0x104   :  { %3843 = vmatpush1.bf16.msra.mxu0 %v6855_v17  ;;  %1572 = vmatprep.subr.bf16.mxu1 %v6861_v26  ;;  %v6912_v17 = vld [vmem:[%s9694_s1 + $0xd94] ss:$8 sps:$4 sm:$0xff]   ;;  %v6910_v26 = vld [vmem:[%s9694_s1 + $0xd90] ss:$8 sps:$4 sm:$0xff]  }
 0x105   :  { %3844 = vmatprep.subr.bf16.mxu0 %v6864_v1  ;;  %1133 = vmatprep.mubr.bf16.mxu1 %v7590_v2  ;;  %v6915_v1 = vld [vmem:[%s9694_s1 + $0x4a4] ss:$8 sps:$4 sm:$0xff]  }
 0x106   :  { %3831 = vmatprep.mubr.bf16.mxu0 %v5962_v31  ;;  %v6913_v31 = vld [vmem:[%s9694_s1 + $0x4a0] ss:$8 sps:$4 sm:$0xff]  }
 0x107   :  { %1573 = vmatpush1.bf16.msra.mxu1 %v6859_v32  ;;  %v6916_v32 = vld [vmem:[%s9694_s1 + $0xda0] ss:$8 sps:$4 sm:$0xff]  }
 0x108   :  { %3845 = vmatpush1.bf16.msra.mxu0 %v6862_v57  ;;  %1574 = vmatprep.subr.bf16.mxu1 %v6867_v63  ;;  %v6924_v57 = vld [vmem:[%s9694_s1 + $0xdb4] ss:$8 sps:$4 sm:$0xff]   ;;  %v6919_v63 = vld [vmem:[%s9694_s1 + $0x4b0] ss:$8 sps:$4 sm:$0xff]  }
 0x109   :  { %3846 = vmatprep.subr.bf16.mxu0 %v6870_v45  ;;  %v6922_v45 = vld [vmem:[%s9694_s1 + $0xdb0] ss:$8 sps:$4 sm:$0xff]  }
 0x10a   :  { %1134 = vmatmul.mubr.bf16.gmra.mrb[4].mxu1 %v7605_v8 }
 0x10b   :  { %3832 = vmatmul.mubr.bf16.gmra.mrb[4].mxu0 %v5961_v56  ;;  %1575 = vmatpush1.bf16.msra.mxu1 %v6865_v19  ;;  %v6927_v56 = vld [vmem:[%s9694_s1 + $0x4c4] ss:$8 sps:$4 sm:$0xff]   ;;  %v6925_v19 = vld [vmem:[%s9694_s1 + $0x4c0] ss:$8 sps:$4 sm:$0xff]  }
 0x10c   :  { %3847 = vmatpush1.bf16.msra.mxu0 %v6868_v28  ;;  %1576 = vmatprep.subr.bf16.mxu1 %v6873_v39  ;;  %v6928_v28 = vld [vmem:[%s9694_s1 + $0xdc0] ss:$8 sps:$4 sm:$0xff]   ;;  %v6933_v39 = vld [vmem:[%s9694_s1 + $0x4d4] ss:$8 sps:$4 sm:$0xff]  }
 0x10d   :  { %3848 = vmatprep.subr.bf16.mxu0 %v6876_v24  ;;  %1602 = vmatprep.mubr.bf16.mxu1 %v1227_v51  ;;  %v6936_v24 = vld [vmem:[%s9694_s1 + $0xdd4] ss:$8 sps:$4 sm:$0xff]   ;;  %v6934_v51 = vld [vmem:[%s9694_s1 + $0xdd0] ss:$8 sps:$4 sm:$0xff]  }
 0x10e   :  { %3874 = vmatprep.mubr.bf16.mxu0 %v5960_v41  ;;  %v6931_v41 = vld [vmem:[%s9694_s1 + $0x4d0] ss:$8 sps:$4 sm:$0xff]  }
 0x10f   :  { %1577 = vmatpush1.bf16.msra.mxu1 %v6871_v9  ;;  %v6939_v9 = vld [vmem:[%s9694_s1 + $0x4e4] ss:$8 sps:$4 sm:$0xff]  }
 0x110   :  { %3849 = vmatpush1.bf16.msra.mxu0 %v6874_v42  ;;  %1578 = vmatprep.subr.bf16.mxu1 %v6879_v6  ;;  %v6943_v42 = vld [vmem:[%s9694_s1 + $0xde4] ss:$8 sps:$4 sm:$0xff]   ;;  %v6937_v6 = vld [vmem:[%s9694_s1 + $0x4e0] ss:$8 sps:$4 sm:$0xff]  }
 0x111   :  { %3850 = vmatprep.subr.bf16.mxu0 %v6882_v44  ;;  %v6941_v44 = vld [vmem:[%s9694_s1 + $0xde0] ss:$8 sps:$4 sm:$0xff]  }
 0x113   :  { %1579 = vmatpush1.bf16.msra.mxu1 %v6877_v46  ;;  %v5425_v46 = vcombine.low %v8431_v23, %v8247_v0  ;;  %v6950_v0 = vld [vmem:[%s9694_s1 + $0xdf4] ss:$8 sps:$4 sm:$0xff]   ;;  %v6945_v23 = vld [vmem:[%s9694_s1 + $0x4f0] ss:$8 sps:$4 sm:$0xff]  }
 0x114   :  { %3851 = vmatpush1.bf16.msra.mxu0 %v6880_v52  ;;  %1580 = vmatprep.subr.bf16.mxu1 %v6885_v20  ;;  %v8627_v52 = vld [vmem:[%s9695_s0 + $0x10] sm:$0xff]  ;;  %v8632_v20 = vld [vmem:[%s9695_s0 + $0x20] sm:$0xff] }
 0x115   :  { %3852 = vmatprep.subr.bf16.mxu0 %v6888_v47  ;;  %v6947_v47 = vld [vmem:[%s9694_s1 + $0x4f4] ss:$8 sps:$4 sm:$0xff]  }
 0x117   :  { %1581 = vmatpush1.bf16.msra.mxu1 %v6883_v7  ;;  %v6094_v7 = vcombine.high %v8627_v52, %v8632_v20 }
 0x118   :  { %3853 = vmatpush1.bf16.msra.mxu0 %v6886_v48  ;;  %1582 = vmatprep.subr.bf16.mxu1 %v6891_v55  ;;  %v6948_v48 = vld [vmem:[%s9694_s1 + $0xdf0] ss:$8 sps:$4 sm:$0xff]   ;;  %v1222_v55 = vrot.slane %v5425_v46, 1 }
 0x119   :  { %3854 = vmatprep.subr.bf16.mxu0 %v6894_v59  ;;  %v1223_v59 = vrot.slane %v7614_v15, 1  ;;  %v6973_v46 = vld [vmem:[%s9694_s1 + $0x530] ss:$8 sps:$4 sm:$0xff]  }
 0x11b   :  { %1583 = vmatpush1.bf16.msra.mxu1 %v6889_v49  ;;  %v8652_v49 = vld [vmem:[%s9695_s0 + $0x30] sm:$0xff] }
 0x11c   :  { %3855 = vmatpush1.bf16.msra.mxu0 %v6892_v4  ;;  %1584 = vmatprep.subr.bf16.mxu1 %v6897_v5  ;;  %v6955_v4 = vld [vmem:[%s9694_s1 + $0x504] ss:$8 sps:$4 sm:$0xff]  }
 0x11d   :  { %3856 = vmatprep.subr.bf16.mxu0 %v6900_v11  ;;  %v6959_v5 = vld [vmem:[%s9694_s1 + $0xe04] ss:$8 sps:$4 sm:$0xff]  }
 0x11e   :  { %v8663_v11 = vld [vmem:[%s9695_s0 + $0x48] sm:$0xff] }
 0x11f   :  { %1585 = vmatpush1.bf16.msra.mxu1 %v6895_v12  ;;  %v1236_v12 = vrot.slane %v7764_v36, 1  ;;  %v1224_v36 = vsel %vm1221_vm3, %v1222_v55, %v1223_v59  ;;  %v6987_v55 = vld [vmem:[%s9694_s1 + $0x554] ss:$8 sps:$4 sm:$0xff]  }
 0x120   :  { %3857 = vmatpush1.bf16.msra.mxu0 %v6898_v18  ;;  %1586 = vmatprep.subr.bf16.mxu1 %v6903_v13  ;;  %v5959_v18 = vcombine.low %v8180_v35, %v8476_v40  ;;  %v8670_v13 = vcombine.high %v8652_v49, %v8426_v22  ;;  %v8682_v35 = vld [vmem:[%s9695_s0 + $0x8] sm:$0xee]  ;;  %v6963_v40 = vld [vmem:[%s9694_s1 + $0x514] ss:$8 sps:$4 sm:$0xff]  }
 0x121   :  { %3858 = vmatprep.subr.bf16.mxu0 %v6906_v10  ;;  %v4035_v10 = vshll.u32 %v6094_v7, 16 }
 0x123   :  { %1587 = vmatpush1.bf16.msra.mxu1 %v6901_v38  ;;  %v6953_v38 = vld [vmem:[%s9694_s1 + $0x500] ss:$8 sps:$4 sm:$0xff]  }
 0x124   :  { %3859 = vmatpush1.bf16.msra.mxu0 %v6904_v16  ;;  %1588 = vmatprep.subr.bf16.mxu1 %v6909_v14  ;;  %v6957_v16 = vld [vmem:[%s9694_s1 + $0xe00] ss:$8 sps:$4 sm:$0xff]   ;;  %v6966_v14 = vld [vmem:[%s9694_s1 + $0xe14] ss:$8 sps:$4 sm:$0xff]  }
 0x125   :  { %3860 = vmatprep.subr.bf16.mxu0 %v6912_v17  ;;  %v1237_v17 = vsel %vm1221_vm3, %v1226_v53, %v1236_v12  ;;  %v4040_v53 = vshll.u32 %v8670_v13, 16  ;;  %v6993_v12 = vld [vmem:[%s9694_s1 + $0x564] ss:$8 sps:$4 sm:$0xff]  }
 0x127   :  { %1589 = vmatpush1.bf16.msra.mxu1 %v6907_v21  ;;  %v7370_v21 = vld [vmem:[%s9695_s0 + $0x38] sm:$0xff] }
 0x128   :  { %3861 = vmatpush1.bf16.msra.mxu0 %v6910_v26  ;;  %1590 = vmatprep.subr.bf16.mxu1 %v6915_v1  ;;  %v5964_v26 = vcombine.high %v7370_v21, %v8663_v11  ;;  %v8700_v1 = vld [vmem:[%s9695_s0 + $0x18] sm:$0xff] }
 0x129   :  { %3862 = vmatprep.subr.bf16.mxu0 %v6918_v27  ;;  %v5428_v27 = vcombine.high %v8682_v35, %v8700_v1 }
 0x12b   :  { %1591 = vmatpush1.bf16.msra.mxu1 %v6913_v31  ;;  %v4033_v31 = vshrl.u32 %v6094_v7, 16  ;;  %v6979_v7 = vld [vmem:[%s9694_s1 + $0x540] ss:$8 sps:$4 sm:$0xff]  }
 0x12c   :  { %3863 = vmatpush1.bf16.msra.mxu0 %v6916_v32  ;;  %1592 = vmatprep.subr.bf16.mxu1 %v6921_v43  ;;  %v4037_v32 = vrot.slane %v4035_v10, 1  ;;  %v6961_v43 = vld [vmem:[%s9694_s1 + $0x510] ss:$8 sps:$4 sm:$0xff]   ;;  %v6991_v10 = vld [vmem:[%s9694_s1 + $0x560] ss:$8 sps:$4 sm:$0xff]  }
 0x12d   :  { %3864 = vmatprep.subr.bf16.mxu0 %v6924_v57  ;;  %v6964_v57 = vld [vmem:[%s9694_s1 + $0xe10] ss:$8 sps:$4 sm:$0xff]  }
 0x12f   :  { %1593 = vmatpush1.bf16.msra.mxu1 %v6919_v63  ;;  %v1234_v63 = vrot.slane %v7766_v37, 1  ;;  %v6967_v37 = vld [vmem:[%s9694_s1 + $0x520] ss:$8 sps:$4 sm:$0xff]  }
 0x130   :  { %3865 = vmatpush1.bf16.msra.mxu0 %v6922_v45  ;;  %1594 = vmatprep.subr.bf16.mxu1 %v6927_v56  ;;  %v6969_v45 = vld [vmem:[%s9694_s1 + $0x524] ss:$8 sps:$4 sm:$0xff]  }
 0x131   :  { %3866 = vmatprep.subr.bf16.mxu0 %v6930_v33  ;;  %v6972_v56 = vld [vmem:[%s9694_s1 + $0xe24] ss:$8 sps:$4 sm:$0xff]   ;;  %v1232_v33 = vrot.slane %v7590_v2, 1 }
 0x133   :  { %1595 = vmatpush1.bf16.msra.mxu1 %v6925_v19  ;;  %v5963_v19 = vcombine.low %v7370_v21, %v8663_v11  ;;  %v7008_v21 = vld [vmem:[%s9694_s1 + $0xe84] ss:$8 sps:$4 sm:$0xff]  }
 0x134   :  { %3867 = vmatpush1.bf16.msra.mxu0 %v6928_v28  ;;  %1596 = vmatprep.subr.bf16.mxu1 %v6933_v39  ;;  %v1231_v28 = vrot.slane %v5428_v27, 1  ;;  %v4038_v39 = vor.u32 %v4037_v32, %v4033_v31  ;;  %v7006_v27 = vld [vmem:[%s9694_s1 + $0xe80] ss:$8 sps:$4 sm:$0xff]   ;;  %v7011_v31 = vld [vmem:[%s9694_s1 + $0x594] ss:$8 sps:$4 sm:$0xff]  }
 0x135   :  { %3868 = vmatprep.subr.bf16.mxu0 %v6936_v24  ;;  %v8720_v24 = vrot.slane %v4040_v53, 1  ;;  %v7014_v32 = vld [vmem:[%s9694_s1 + $0xe94] ss:$8 sps:$4 sm:$0xff]   ;;  %v7009_v53 = vld [vmem:[%s9694_s1 + $0x590] ss:$8 sps:$4 sm:$0xff]  }
 0x137   :  { %1597 = vmatpush1.bf16.msra.mxu1 %v6931_v41  ;;  %v6970_v41 = vld [vmem:[%s9694_s1 + $0xe20] ss:$8 sps:$4 sm:$0xff]  }
 0x138   :  { %3869 = vmatpush1.bf16.msra.mxu0 %v6934_v51  ;;  %1598 = vmatprep.subr.bf16.mxu1 %v6939_v9  ;;  %v1235_v51 = vsel %vm1221_vm3, %v1223_v59, %v1234_v63  ;;  %v6975_v9 = vld [vmem:[%s9694_s1 + $0x534] ss:$8 sps:$4 sm:$0xff]   ;;  %v7020_v63 = vld [vmem:[%s9694_s1 + $0xea4] ss:$8 sps:$4 sm:$0xff]  }
 0x139   :  { %3870 = vmatprep.subr.bf16.mxu0 %v6943_v42  ;;  %v6978_v42 = vld [vmem:[%s9694_s1 + $0xe34] ss:$8 sps:$4 sm:$0xff]  }
 0x13a   :  { %v6990_v59 = vld [vmem:[%s9694_s1 + $0xe54] ss:$8 sps:$4 sm:$0xff]  }
 0x13b   :  { %1599 = vmatpush1.bf16.msra.mxu1 %v6937_v6  ;;  %v1233_v6 = vsel %vm1221_vm3, %v1231_v28, %v1232_v33  ;;  %v7026_v28 = vld [vmem:[%s9694_s1 + $0xeb4] ss:$8 sps:$4 sm:$0xff]  }
 0x13c   :  { %3871 = vmatpush1.bf16.msra.mxu0 %v6941_v44  ;;  %1600 = vmatprep.subr.bf16.mxu1 %v6947_v47  ;;  %v4043_v44 = vsel %vm195_vm0, %v4038_v39, %v8720_v24  ;;  %v6976_v47 = vld [vmem:[%s9694_s1 + $0xe30] ss:$8 sps:$4 sm:$0xff]  }
 0x13d   :  { %3872 = vmatprep.subr.bf16.mxu0 %v6950_v0  ;;  %v6981_v0 = vld [vmem:[%s9694_s1 + $0x544] ss:$8 sps:$4 sm:$0xff]   ;;  %v7021_v39 = vld [vmem:[%s9694_s1 + $0x5b0] ss:$8 sps:$4 sm:$0xff]  }
 0x13f   :  { %1601 = vmatpush1.bf16.msra.mxu1 %v6945_v23  ;;  %v6984_v23 = vld [vmem:[%s9694_s1 + $0xe44] ss:$8 sps:$4 sm:$0xff]  }
 0x140   :  { %3873 = vmatpush1.bf16.msra.mxu0 %v6948_v48  ;;  %1623 = vmatprep.subr.bf16.mxu1 %v6955_v4  ;;  %v6982_v48 = vld [vmem:[%s9694_s1 + $0xe40] ss:$8 sps:$4 sm:$0xff]   ;;  %v6985_v4 = vld [vmem:[%s9694_s1 + $0x550] ss:$8 sps:$4 sm:$0xff]  }
 0x141   :  { %4428 = vmatprep.subr.bf16.mxu0 %v6959_v5  ;;  %v6988_v5 = vld [vmem:[%s9694_s1 + $0xe50] ss:$8 sps:$4 sm:$0xff]  }
 0x142   :  { %1603 = vmatmul.mubr.bf16.vlgmr.msra.gmra.mrb[0].mxu1 %v1224_v36  ;;  %v7002_v36 = vld [vmem:[%s9694_s1 + $0xe74] ss:$8 sps:$4 sm:$0xff]  }
 0x143   :  { %3875 = vmatmul.mubr.bf16.vlgmr.msra.gmra.mrb[0].mxu0 %v5959_v18  ;;  %1624 = vmatpush1.bf16.msra.mxu1 %v6953_v38  ;;  %v6996_v18 = vld [vmem:[%s9694_s1 + $0xe64] ss:$8 sps:$4 sm:$0xff]   ;;  %v6994_v38 = vld [vmem:[%s9694_s1 + $0xe60] ss:$8 sps:$4 sm:$0xff]  }
 0x144   :  { %4429 = vmatpush1.bf16.msra.mxu0 %v6957_v16  ;;  %1625 = vmatprep.subr.bf16.mxu1 %v6963_v40  ;;  %v6999_v16 = vld [vmem:[%s9694_s1 + $0x574] ss:$8 sps:$4 sm:$0xff]   ;;  %v6997_v40 = vld [vmem:[%s9694_s1 + $0x570] ss:$8 sps:$4 sm:$0xff]  }
 0x145   :  { %4430 = vmatprep.subr.bf16.mxu0 %v6966_v14  ;;  %1612 = vmatprep.mubr.bf16.mxu1 %v1237_v17  ;;  %v7000_v14 = vld [vmem:[%s9694_s1 + $0xe70] ss:$8 sps:$4 sm:$0xff]   ;;  %v7005_v17 = vld [vmem:[%s9694_s1 + $0x584] ss:$8 sps:$4 sm:$0xff]  }
 0x146   :  { %3884 = vmatprep.mubr.bf16.mxu0 %v5964_v26  ;;  %v7003_v26 = vld [vmem:[%s9694_s1 + $0x580] ss:$8 sps:$4 sm:$0xff]  }
 0x147   :  { %1626 = vmatpush1.bf16.msra.mxu1 %v6961_v43  ;;  %v7012_v43 = vld [vmem:[%s9694_s1 + $0xe90] ss:$8 sps:$4 sm:$0xff]  }
 0x148   :  { %4431 = vmatpush1.bf16.msra.mxu0 %v6964_v57  ;;  %1627 = vmatprep.subr.bf16.mxu1 %v6969_v45  ;;  %v7017_v57 = vld [vmem:[%s9694_s1 + $0x5a4] ss:$8 sps:$4 sm:$0xff]   ;;  %v7015_v45 = vld [vmem:[%s9694_s1 + $0x5a0] ss:$8 sps:$4 sm:$0xff]  }
 0x149   :  { %4432 = vmatprep.subr.bf16.mxu0 %v6972_v56  ;;  %v7018_v56 = vld [vmem:[%s9694_s1 + $0xea0] ss:$8 sps:$4 sm:$0xff]  }
 0x14a   :  { %1613 = vmatmul.mubr.bf16.gmra.mrb[4].mxu1 %v1235_v51  ;;  %v7032_v51 = vld [vmem:[%s9694_s1 + $0xec4] ss:$8 sps:$4 sm:$0xff]  }
 0x14b   :  { %3885 = vmatmul.mubr.bf16.gmra.mrb[4].mxu0 %v5963_v19  ;;  %1628 = vmatpush1.bf16.msra.mxu1 %v6967_v37  ;;  %v7023_v19 = vld [vmem:[%s9694_s1 + $0x5b4] ss:$8 sps:$4 sm:$0xff]   ;;  %v7024_v37 = vld [vmem:[%s9694_s1 + $0xeb0] ss:$8 sps:$4 sm:$0xff]  }
 0x14c   :  { %4433 = vmatpush1.bf16.msra.mxu0 %v6970_v41  ;;  %1629 = vmatprep.subr.bf16.mxu1 %v6975_v9  ;;  %v7029_v41 = vld [vmem:[%s9694_s1 + $0x5c4] ss:$8 sps:$4 sm:$0xff]   ;;  %v7027_v9 = vld [vmem:[%s9694_s1 + $0x5c0] ss:$8 sps:$4 sm:$0xff]  }
 0x14d   :  { %4434 = vmatprep.subr.bf16.mxu0 %v6978_v42  ;;  %1655 = vmatprep.mubr.bf16.mxu1 %v1233_v6  ;;  %v7030_v42 = vld [vmem:[%s9694_s1 + $0xec0] ss:$8 sps:$4 sm:$0xff]   ;;  %v6093_v6 = vcombine.low %v8627_v52, %v8632_v20  ;;  %v7033_v52 = vld [vmem:[%s9694_s1 + $0x5d0] ss:$8 sps:$4 sm:$0xff]  }
 0x14e   :  { %4460 = vmatprep.mubr.bf16.mxu0 %v4043_v44  ;;  %v7035_v44 = vld [vmem:[%s9694_s1 + $0x5d4] ss:$8 sps:$4 sm:$0xff]   ;;  %v7036_v20 = vld [vmem:[%s9694_s1 + $0xed0] ss:$8 sps:$4 sm:$0xff]  }
 0x14f   :  { %1630 = vmatpush1.bf16.msra.mxu1 %v6973_v46  ;;  %v7038_v46 = vld [vmem:[%s9694_s1 + $0xed4] ss:$8 sps:$4 sm:$0xff]  }
 0x150   :  { %4435 = vmatpush1.bf16.msra.mxu0 %v6976_v47  ;;  %1631 = vmatprep.subr.bf16.mxu1 %v6981_v0  ;;  %v3911_v47 = vld [vmem:[%s9695_s0 + $0x50] sm:$0x11]  ;;  %v8873_v0 = vcombine.low %v8652_v49, %v8426_v22  ;;  %v7043_v22 = vld [vmem:[%s9694_s1 + $0xee0] ss:$8 sps:$4 sm:$0xff]  }
 0x151   :  { %4436 = vmatprep.subr.bf16.mxu0 %v6984_v23  ;;  %v4023_v23 = vshll.u32 %v6093_v6, 16  ;;  %v8887_v49 = vcombine.high %v3911_v47, %v3911_v47 }
 0x153   :  { %1632 = vmatpush1.bf16.msra.mxu1 %v6979_v7  ;;  %v7041_v7 = vld [vmem:[%s9694_s1 + $0x5e4] ss:$8 sps:$4 sm:$0xff]  }
 0x154   :  { %4437 = vmatpush1.bf16.msra.mxu0 %v6982_v48  ;;  %1633 = vmatprep.subr.bf16.mxu1 %v6987_v55  ;;  %v7045_v48 = vld [vmem:[%s9694_s1 + $0xee4] ss:$8 sps:$4 sm:$0xff]   ;;  %v7039_v55 = vld [vmem:[%s9694_s1 + $0x5e0] ss:$8 sps:$4 sm:$0xff]  }
 0x155   :  { %4438 = vmatprep.subr.bf16.mxu0 %v6990_v59  ;;  %v5427_v59 = vcombine.low %v8682_v35, %v8700_v1  ;;  %v7049_v35 = vld [vmem:[%s9694_s1 + $0x5f4] ss:$8 sps:$4 sm:$0xff]  }
 0x156   :  { %v7052_v1 = vld [vmem:[%s9694_s1 + $0xef4] ss:$8 sps:$4 sm:$0xff]  }
 0x157   :  { %1634 = vmatpush1.bf16.msra.mxu1 %v6985_v4  ;;  %v4021_v4 = vshrl.u32 %v6093_v6, 16 }
 0x158   :  { %4439 = vmatpush1.bf16.msra.mxu0 %v6988_v5  ;;  %1635 = vmatprep.subr.bf16.mxu1 %v6993_v12  ;;  %v4025_v5 = vrot.slane %v4023_v23, 1  ;;  %v4028_v12 = vshll.u32 %v8873_v0, 16 }
 0x159   :  { %4440 = vmatprep.subr.bf16.mxu0 %v6996_v18  ;;  %v8895_v18 = vld [vmem:[%s9695_s0 + $0x18] sm:$0xff] }
 0x15b   :  { %1636 = vmatpush1.bf16.msra.mxu1 %v6991_v10  ;;  %v8900_v10 = vld [vmem:[%s9695_s0 + $0x28] sm:$0xff] }
 0x15c   :  { %4441 = vmatpush1.bf16.msra.mxu0 %v6994_v38  ;;  %1637 = vmatprep.subr.bf16.mxu1 %v6999_v16  ;;  %v4076_v38 = vshrl.u32 %v8670_v13, 16  ;;  %v4080_v16 = vshll.u32 %v8887_v49, 16 }
 0x15d   :  { %4442 = vmatprep.subr.bf16.mxu0 %v7002_v36  ;;  %v7047_v36 = vld [vmem:[%s9694_s1 + $0x5f0] ss:$8 sps:$4 sm:$0xff]  }
 0x15f   :  { %1638 = vmatpush1.bf16.msra.mxu1 %v6997_v40  ;;  %v1229_v40 = vrot.slane %v7605_v8, 1 }
 0x160   :  { %4443 = vmatpush1.bf16.msra.mxu0 %v7000_v14  ;;  %1639 = vmatprep.subr.bf16.mxu1 %v7005_v17  ;;  %v6096_v14 = vcombine.high %v8895_v18, %v8900_v10  ;;  %v7050_v17 = vld [vmem:[%s9694_s1 + $0xef0] ss:$8 sps:$4 sm:$0xff]  }
 0x161   :  { %4444 = vmatprep.subr.bf16.mxu0 %v7008_v21  ;;  %v1228_v21 = vrot.slane %v5427_v59, 1  ;;  %v7073_v59 = vld [vmem:[%s9694_s1 + $0x624] ss:$8 sps:$4 sm:$0xff]  }
 0x163   :  { %1640 = vmatpush1.bf16.msra.mxu1 %v7003_v26  ;;  %v4026_v26 = vor.u32 %v4025_v5, %v4021_v4  ;;  %v7076_v4 = vld [vmem:[%s9694_s1 + $0xf24] ss:$8 sps:$4 sm:$0xff]  }
 0x164   :  { %4445 = vmatpush1.bf16.msra.mxu0 %v7006_v27  ;;  %1641 = vmatprep.subr.bf16.mxu1 %v7011_v31  ;;  %v4030_v27 = vrot.slane %v4028_v12, 1  ;;  %v8919_v31 = vcombine.low %v3911_v47, %v3911_v47  ;;  %v1778_v12 = vrot.slane %v7559_v54, 2  ;;  %v7279_v54 = vld [vmem:[%s9694_s1 + $0x824] ss:$8 sps:$4 sm:$0xff]  }
 0x165   :  { %4446 = vmatprep.subr.bf16.mxu0 %v7014_v32  ;;  %v8924_v32 = vld [vmem:[%s9695_s0 + $0x38] sm:$0xff] }
 0x167   :  { %1642 = vmatpush1.bf16.msra.mxu1 %v7009_v53  ;;  %v7057_v53 = vld [vmem:[%s9694_s1 + $0x604] ss:$8 sps:$4 sm:$0xff]  }
 0x168   :  { %4447 = vmatpush1.bf16.msra.mxu0 %v7012_v43  ;;  %1643 = vmatprep.subr.bf16.mxu1 %v7017_v57  ;;  %v7064_v43 = vld [vmem:[%s9694_s1 + $0xf04] ss:$8 sps:$4 sm:$0xff]   ;;  %v1240_v57 = vrot.slane %v7988_v50, 1  ;;  %v1230_v50 = vsel %vm1221_vm3, %v1228_v21, %v1229_v40 }
 0x169   :  { %4448 = vmatprep.subr.bf16.mxu0 %v7020_v63  ;;  %v4078_v63 = vor.u32 %v4076_v38, %v8720_v24  ;;  %v4031_v24 = vsel %vm195_vm0, %v4026_v26, %v4030_v27  ;;  %v7074_v38 = vld [vmem:[%s9694_s1 + $0xf20] ss:$8 sps:$4 sm:$0xff]   ;;  %v7077_v26 = vld [vmem:[%s9694_s1 + $0x630] ss:$8 sps:$4 sm:$0xff]  }
 0x16a   :  { %v1241_v6 = vsel %vm1221_vm3, %v1232_v33, %v1240_v57  ;;  %v7065_v33 = vld [vmem:[%s9694_s1 + $0x610] ss:$8 sps:$4 sm:$0xff]   ;;  %v7083_v57 = vld [vmem:[%s9694_s1 + $0x640] ss:$8 sps:$4 sm:$0xff]  }
 0x16b   :  { %1644 = vmatpush1.bf16.msra.mxu1 %v7015_v45  ;;  %v4082_v45 = vrot.slane %v4080_v16, 1 }
 0x16c   :  { %4449 = vmatpush1.bf16.msra.mxu0 %v7018_v56  ;;  %1645 = vmatprep.subr.bf16.mxu1 %v7023_v19  ;;  %v7055_v56 = vld [vmem:[%s9694_s1 + $0x600] ss:$8 sps:$4 sm:$0xff]   ;;  %v8939_v19 = vcombine.high %v8924_v32, %v8663_v11 }
 0x16d   :  { %4450 = vmatprep.subr.bf16.mxu0 %v7026_v28  ;;  %v4059_v28 = vshll.u32 %v6096_v14, 16 }
 0x16e   :  { %v4064_v23 = vshll.u32 %v8939_v19, 16 }
 0x16f   :  { %1646 = vmatpush1.bf16.msra.mxu1 %v7021_v39  ;;  %v7062_v39 = vld [vmem:[%s9694_s1 + $0xf00] ss:$8 sps:$4 sm:$0xff]  }
 0x170   :  { %4451 = vmatpush1.bf16.msra.mxu0 %v7024_v37  ;;  %1647 = vmatprep.subr.bf16.mxu1 %v7029_v41  ;;  %v4068_v37 = vshrl.u32 %v8873_v0, 16  ;;  %v4072_v41 = vshll.u32 %v8919_v31, 16 }
 0x171   :  { %4452 = vmatprep.subr.bf16.mxu0 %v7032_v51  ;;  %v8953_v51 = vld [vmem:[%s9695_s0] sm:$0xcc] }
 0x173   :  { %1648 = vmatpush1.bf16.msra.mxu1 %v7027_v9  ;;  %v7067_v9 = vld [vmem:[%s9694_s1 + $0x614] ss:$8 sps:$4 sm:$0xff]  }
 0x174   :  { %4453 = vmatpush1.bf16.msra.mxu0 %v7030_v42  ;;  %1649 = vmatprep.subr.bf16.mxu1 %v7035_v44  ;;  %v7070_v42 = vld [vmem:[%s9694_s1 + $0xf14] ss:$8 sps:$4 sm:$0xff]   ;;  %v4083_v44 = vsel %vm195_vm0, %v4078_v63, %v4082_v45  ;;  %v7086_v63 = vld [vmem:[%s9694_s1 + $0xf40] ss:$8 sps:$4 sm:$0xff]  }
 0x175   :  { %4454 = vmatprep.subr.bf16.mxu0 %v7038_v46  ;;  %v8968_v46 = vld [vmem:[%s9695_s0 + $0x10] sm:$0xff] }
 0x176   :  { %v8972_v47 = vcombine.high %v8953_v51, %v8968_v46  ;;  %v7091_v45 = vld [vmem:[%s9694_s1 + $0x654] ss:$8 sps:$4 sm:$0xff]  }
 0x177   :  { %1650 = vmatpush1.bf16.msra.mxu1 %v7033_v52  ;;  %v4057_v52 = vshrl.u32 %v6096_v14, 16  ;;  %v7079_v14 = vld [vmem:[%s9694_s1 + $0x634] ss:$8 sps:$4 sm:$0xff]  }
 0x178   :  { %4455 = vmatpush1.bf16.msra.mxu0 %v7036_v20  ;;  %1651 = vmatprep.subr.bf16.mxu1 %v7041_v7  ;;  %v4061_v20 = vrot.slane %v4059_v28, 1  ;;  %v7068_v7 = vld [vmem:[%s9694_s1 + $0xf10] ss:$8 sps:$4 sm:$0xff]   ;;  %v1777_v5 = vrot.slane %v8972_v47, 2 }
 0x179   :  { %4456 = vmatprep.subr.bf16.mxu0 %v7045_v48  ;;  %v1238_v48 = vrot.slane %v7993_v58, 1  ;;  %v8990_v58 = vrot.slane %v4064_v23, 1  ;;  %v7089_v28 = vld [vmem:[%s9694_s1 + $0x650] ss:$8 sps:$4 sm:$0xff]   ;;  %v7107_v23 = vld [vmem:[%s9694_s1 + $0x680] ss:$8 sps:$4 sm:$0xff]  }
 0x17a   :  { %v1779_v21 = vsel %vm1773_vm4, %v1777_v5, %v1778_v12  ;;  %v7119_v5 = vld [vmem:[%s9694_s1 + $0x6a0] ss:$8 sps:$4 sm:$0xff]  }
 0x17b   :  { %1652 = vmatpush1.bf16.msra.mxu1 %v7039_v55  ;;  %v4070_v55 = vor.u32 %v4068_v37, %v4030_v27  ;;  %v1239_v16 = vsel %vm1221_vm3, %v1229_v40, %v1238_v48  ;;  %v7080_v27 = vld [vmem:[%s9694_s1 + $0xf30] ss:$8 sps:$4 sm:$0xff]   ;;  %v7095_v37 = vld [vmem:[%s9694_s1 + $0x660] ss:$8 sps:$4 sm:$0xff]   ;;  %v7118_v48 = vld [vmem:[%s9694_s1 + $0xf94] ss:$8 sps:$4 sm:$0xff]  }
 0x17c   :  { %4457 = vmatpush1.bf16.msra.mxu0 %v7043_v22  ;;  %1653 = vmatprep.subr.bf16.mxu1 %v7049_v35  ;;  %v4074_v22 = vrot.slane %v4072_v41, 1  ;;  %v4062_v35 = vor.u32 %v4061_v20, %v4057_v52  ;;  %v7098_v41 = vld [vmem:[%s9694_s1 + $0xf60] ss:$8 sps:$4 sm:$0xff]   ;;  %v7109_v52 = vld [vmem:[%s9694_s1 + $0x684] ss:$8 sps:$4 sm:$0xff]  }
 0x17d   :  { %4458 = vmatprep.subr.bf16.mxu0 %v7052_v1  ;;  %v7071_v1 = vld [vmem:[%s9694_s1 + $0x620] ss:$8 sps:$4 sm:$0xff]   ;;  %v7112_v20 = vld [vmem:[%s9694_s1 + $0xf84] ss:$8 sps:$4 sm:$0xff]  }
 0x17e   :  { %v4067_v40 = vsel %vm195_vm0, %v4062_v35, %v8990_v58  ;;  %v7122_v35 = vld [vmem:[%s9694_s1 + $0xfa0] ss:$8 sps:$4 sm:$0xff]  }
 0x17f   :  { %1654 = vmatpush1.bf16.msra.mxu1 %v7047_v36  ;;  %v4075_v36 = vsel %vm195_vm0, %v4070_v55, %v4074_v22  ;;  %v7113_v55 = vld [vmem:[%s9694_s1 + $0x690] ss:$8 sps:$4 sm:$0xff]  }
 0x180   :  { %4459 = vmatpush1.bf16.msra.mxu0 %v7050_v17  ;;  %2122 = vmatprep.subr.bf16.mxu1 %v7057_v53  ;;  %v7082_v17 = vld [vmem:[%s9694_s1 + $0xf34] ss:$8 sps:$4 sm:$0xff]   ;;  %v7085_v53 = vld [vmem:[%s9694_s1 + $0x644] ss:$8 sps:$4 sm:$0xff]   ;;  %v7116_v22 = vld [vmem:[%s9694_s1 + $0xf90] ss:$8 sps:$4 sm:$0xff]  }
 0x181   :  { %4481 = vmatprep.subr.bf16.mxu0 %v7064_v43  ;;  %v7088_v43 = vld [vmem:[%s9694_s1 + $0xf44] ss:$8 sps:$4 sm:$0xff]  }
 0x182   :  { %1656 = vmatmul.mubr.bf16.vlgmr.msra.gmra.mrb[0].mxu1 %v1230_v50  ;;  %v7097_v50 = vld [vmem:[%s9694_s1 + $0x664] ss:$8 sps:$4 sm:$0xff]  }
 0x183   :  { %4461 = vmatmul.mubr.bf16.vlgmr.msra.gmra.mrb[0].mxu0 %v4031_v24  ;;  %2123 = vmatpush1.bf16.msra.mxu1 %v7055_v56  ;;  %v7094_v56 = vld [vmem:[%s9694_s1 + $0xf54] ss:$8 sps:$4 sm:$0xff]   ;;  %v7100_v24 = vld [vmem:[%s9694_s1 + $0xf64] ss:$8 sps:$4 sm:$0xff]  }
 0x184   :  { %4482 = vmatpush1.bf16.msra.mxu0 %v7062_v39  ;;  %2124 = vmatprep.subr.bf16.mxu1 %v7067_v9  ;;  %v7092_v39 = vld [vmem:[%s9694_s1 + $0xf50] ss:$8 sps:$4 sm:$0xff]   ;;  %v7103_v9 = vld [vmem:[%s9694_s1 + $0x674] ss:$8 sps:$4 sm:$0xff]  }
 0x185   :  { %4483 = vmatprep.subr.bf16.mxu0 %v7070_v42  ;;  %1665 = vmatprep.mubr.bf16.mxu1 %v1241_v6  ;;  %v7106_v42 = vld [vmem:[%s9694_s1 + $0xf74] ss:$8 sps:$4 sm:$0xff]   ;;  %v7101_v6 = vld [vmem:[%s9694_s1 + $0x670] ss:$8 sps:$4 sm:$0xff]  }
 0x186   :  { %4470 = vmatprep.mubr.bf16.mxu0 %v4083_v44  ;;  %v7104_v44 = vld [vmem:[%s9694_s1 + $0xf70] ss:$8 sps:$4 sm:$0xff]  }
 0x187   :  { %2125 = vmatpush1.bf16.msra.mxu1 %v7065_v33  ;;  %v7110_v33 = vld [vmem:[%s9694_s1 + $0xf80] ss:$8 sps:$4 sm:$0xff]  }
 0x188   :  { %4484 = vmatpush1.bf16.msra.mxu0 %v7068_v7  ;;  %2126 = vmatprep.subr.bf16.mxu1 %v7073_v59  ;;  %v7115_v7 = vld [vmem:[%s9694_s1 + $0x694] ss:$8 sps:$4 sm:$0xff]   ;;  %v7121_v59 = vld [vmem:[%s9694_s1 + $0x6a4] ss:$8 sps:$4 sm:$0xff]  }
 0x189   :  { %4485 = vmatprep.subr.bf16.mxu0 %v7076_v4  ;;  %v7124_v4 = vld [vmem:[%s9694_s1 + $0xfa4] ss:$8 sps:$4 sm:$0xff]  }
 0x18a   :  { %1666 = vmatmul.mubr.bf16.gmra.mrb[4].mxu1 %v1239_v16  ;;  %v7125_v16 = vld [vmem:[%s9694_s1 + $0x6b0] ss:$8 sps:$4 sm:$0xff]  }
 0x18b   :  { %4471 = vmatmul.mubr.bf16.gmra.mrb[4].mxu0 %v4075_v36  ;;  %2127 = vmatpush1.bf16.msra.mxu1 %v7071_v1  ;;  %v7127_v1 = vld [vmem:[%s9694_s1 + $0x6b4] ss:$8 sps:$4 sm:$0xff]   ;;  %v7128_v36 = vld [vmem:[%s9694_s1 + $0xfb0] ss:$8 sps:$4 sm:$0xff]  }
 0x18c   :  { %4486 = vmatpush1.bf16.msra.mxu0 %v7074_v38  ;;  %2128 = vmatprep.subr.bf16.mxu1 %v7079_v14  ;;  %v7130_v38 = vld [vmem:[%s9694_s1 + $0xfb4] ss:$8 sps:$4 sm:$0xff]   ;;  %v7133_v14 = vld [vmem:[%s9694_s1 + $0x6c4] ss:$8 sps:$4 sm:$0xff]  }
 0x18d   :  { %4487 = vmatprep.subr.bf16.mxu0 %v7082_v17  ;;  %2154 = vmatprep.mubr.bf16.mxu1 %v1779_v21  ;;  %v7136_v17 = vld [vmem:[%s9694_s1 + $0xfc4] ss:$8 sps:$4 sm:$0xff]   ;;  %v6095_v21 = vcombine.low %v8895_v18, %v8900_v10  ;;  %v7142_v18 = vld [vmem:[%s9694_s1 + $0xfd4] ss:$8 sps:$4 sm:$0xff]  }
 0x18e   :  { %4513 = vmatprep.mubr.bf16.mxu0 %v4067_v40  ;;  %v7131_v40 = vld [vmem:[%s9694_s1 + $0x6c0] ss:$8 sps:$4 sm:$0xff]  }
 0x18f   :  { %2129 = vmatpush1.bf16.msra.mxu1 %v7077_v26  ;;  %v7134_v26 = vld [vmem:[%s9694_s1 + $0xfc0] ss:$8 sps:$4 sm:$0xff]  }
 0x190   :  { %4488 = vmatpush1.bf16.msra.mxu0 %v7080_v27  ;;  %2130 = vmatprep.subr.bf16.mxu1 %v7085_v53  ;;  %v7139_v27 = vld [vmem:[%s9694_s1 + $0x6d4] ss:$8 sps:$4 sm:$0xff]   ;;  %v9137_v53 = vcombine.low %v8924_v32, %v8663_v11  ;;  %v7145_v11 = vld [vmem:[%s9694_s1 + $0x6e4] ss:$8 sps:$4 sm:$0xff]  }
 0x191   :  { %4489 = vmatprep.subr.bf16.mxu0 %v7088_v43  ;;  %v4047_v43 = vshll.u32 %v6095_v21, 16  ;;  %v7149_v32 = vld [vmem:[%s9694_s1 + $0xfe4] ss:$8 sps:$4 sm:$0xff]  }
 0x193   :  { %2131 = vmatpush1.bf16.msra.mxu1 %v7083_v57  ;;  %v7137_v57 = vld [vmem:[%s9694_s1 + $0x6d0] ss:$8 sps:$4 sm:$0xff]  }
 0x194   :  { %4490 = vmatpush1.bf16.msra.mxu0 %v7086_v63  ;;  %2132 = vmatprep.subr.bf16.mxu1 %v7091_v45  ;;  %v7140_v63 = vld [vmem:[%s9694_s1 + $0xfd0] ss:$8 sps:$4 sm:$0xff]  }
 0x195   :  { %4491 = vmatprep.subr.bf16.mxu0 %v7094_v56  ;;  %v3912_v45 = vld [vmem:[%s9695_s0 + $0x58] sm:$0x11]  ;;  %v9156_v56 = vcombine.low %v8953_v51, %v8968_v46  ;;  %v1686_v51 = vld [vmem:[%s9695_s0 + $0x40] sm:$0x33] }
 0x196   :  { %v7153_v46 = vld [vmem:[%s9694_s1 + $0x6f4] ss:$8 sps:$4 sm:$0xff]  }
 0x197   :  { %2133 = vmatpush1.bf16.msra.mxu1 %v7089_v28  ;;  %v4052_v28 = vshll.u32 %v9137_v53, 16 }
 0x198   :  { %4492 = vmatpush1.bf16.msra.mxu0 %v7092_v39  ;;  %2134 = vmatprep.subr.bf16.mxu1 %v7097_v50  ;;  %v4045_v39 = vshrl.u32 %v6095_v21, 16  ;;  %v4049_v50 = vrot.slane %v4047_v43, 1 }
 0x199   :  { %4493 = vmatprep.subr.bf16.mxu0 %v7100_v24  ;;  %v9159_v24 = vcombine.high %v3912_v45, %v3912_v45 }
 0x19b   :  { %2135 = vmatpush1.bf16.msra.mxu1 %v7095_v37  ;;  %v7143_v37 = vld [vmem:[%s9694_s1 + $0x6e0] ss:$8 sps:$4 sm:$0xff]  }
 0x19c   :  { %4494 = vmatpush1.bf16.msra.mxu0 %v7098_v41  ;;  %2136 = vmatprep.subr.bf16.mxu1 %v7103_v9  ;;  %v7147_v41 = vld [vmem:[%s9694_s1 + $0xfe0] ss:$8 sps:$4 sm:$0xff]   ;;  %v7156_v9 = vld [vmem:[%s9694_s1 + $0xff4] ss:$8 sps:$4 sm:$0xff]  }
 0x19d   :  { %4495 = vmatprep.subr.bf16.mxu0 %v7106_v42  ;;  %v1774_v42 = vrot.slane %v9156_v56, 2 }
 0x19f   :  { %2137 = vmatpush1.bf16.msra.mxu1 %v7101_v6  ;;  %v1775_v6 = vrot.slane %v7614_v15, 2 }
 0x1a0   :  { %4496 = vmatpush1.bf16.msra.mxu0 %v7104_v44  ;;  %2138 = vmatprep.subr.bf16.mxu1 %v7109_v52  ;;  %v4054_v44 = vrot.slane %v4052_v28, 1  ;;  %v4050_v52 = vor.u32 %v4049_v50, %v4045_v39  ;;  %v7177_v39 = vld [vmem:[%s9694_s1 + $0x724] ss:$8 sps:$4 sm:$0xff]  }
 0x1a1   :  { %4497 = vmatprep.subr.bf16.mxu0 %v7112_v20  ;;  %v5562_v20 = vcombine.high %v1686_v51, %v1686_v51  ;;  %v7180_v50 = vld [vmem:[%s9694_s1 + $0x1024] ss:$8 sps:$4 sm:$0xff]  }
 0x1a3   :  { %2139 = vmatpush1.bf16.msra.mxu1 %v7107_v23  ;;  %v4092_v23 = vshrl.u32 %v8939_v19, 16 }
 0x1a4   :  { %4498 = vmatpush1.bf16.msra.mxu0 %v7110_v33  ;;  %2140 = vmatprep.subr.bf16.mxu1 %v7115_v7  ;;  %v4096_v33 = vshll.u32 %v9159_v24, 16  ;;  %v2323_v7 = vrot.slane %v204_v34, 3  ;;  %v7161_v34 = vld [vmem:[%s9694_s1 + $0x704] ss:$8 sps:$4 sm:$0xff]  }
 0x1a5   :  { %4499 = vmatprep.subr.bf16.mxu0 %v7118_v48  ;;  %v2322_v48 = vrot.slane %v244_v30, 2  ;;  %v7168_v30 = vld [vmem:[%s9694_s1 + $0x1004] ss:$8 sps:$4 sm:$0xff]  }
 0x1a7   :  { %2141 = vmatpush1.bf16.msra.mxu1 %v7113_v55  ;;  %v7151_v55 = vld [vmem:[%s9694_s1 + $0x6f0] ss:$8 sps:$4 sm:$0xff]  }
 0x1a8   :  { %4500 = vmatpush1.bf16.msra.mxu0 %v7116_v22  ;;  %2142 = vmatprep.subr.bf16.mxu1 %v7121_v59  ;;  %v7154_v22 = vld [vmem:[%s9694_s1 + $0xff0] ss:$8 sps:$4 sm:$0xff]   ;;  %v9190_v59 = vcombine.low %v3912_v45, %v3912_v45 }
 0x1a9   :  { %4501 = vmatprep.subr.bf16.mxu0 %v7124_v4  ;;  %v1776_v4 = vsel %vm1773_vm4, %v1774_v42, %v1775_v6  ;;  %v7169_v45 = vld [vmem:[%s9694_s1 + $0x710] ss:$8 sps:$4 sm:$0xff]   ;;  %v7178_v42 = vld [vmem:[%s9694_s1 + $0x1020] ss:$8 sps:$4 sm:$0xff]  }
 0x1aa   :  { %v4088_v21 = vshll.u32 %v9190_v59, 16 }
 0x1ab   :  { %2143 = vmatpush1.bf16.msra.mxu1 %v7119_v5  ;;  %v7159_v5 = vld [vmem:[%s9694_s1 + $0x700] ss:$8 sps:$4 sm:$0xff]  }
 0x1ac   :  { %4502 = vmatpush1.bf16.msra.mxu0 %v7122_v35  ;;  %2144 = vmatprep.subr.bf16.mxu1 %v7127_v1  ;;  %v4055_v35 = vsel %vm195_vm0, %v4050_v52, %v4054_v44  ;;  %v1788_v1 = vrot.slane %v5562_v20, 2  ;;  %v4090_v28 = vrot.slane %v4088_v21, 1  ;;  %v7183_v52 = vld [vmem:[%s9694_s1 + $0x734] ss:$8 sps:$4 sm:$0xff]   ;;  %v7208_v21 = vld [vmem:[%s9694_s1 + $0x1070] ss:$8 sps:$4 sm:$0xff]  }
 0x1ad   :  { %4503 = vmatprep.subr.bf16.mxu0 %v7130_v38  ;;  %v4094_v38 = vor.u32 %v4092_v23, %v8990_v58  ;;  %v7171_v58 = vld [vmem:[%s9694_s1 + $0x714] ss:$8 sps:$4 sm:$0xff]   ;;  %v7181_v23 = vld [vmem:[%s9694_s1 + $0x730] ss:$8 sps:$4 sm:$0xff]  }
 0x1ae   :  { %v7186_v20 = vld [vmem:[%s9694_s1 + $0x1034] ss:$8 sps:$4 sm:$0xff]  }
 0x1af   :  { %2145 = vmatpush1.bf16.msra.mxu1 %v7125_v16  ;;  %v4098_v16 = vrot.slane %v4096_v33, 1  ;;  %v7184_v33 = vld [vmem:[%s9694_s1 + $0x1030] ss:$8 sps:$4 sm:$0xff]  }
 0x1b0   :  { %4504 = vmatpush1.bf16.msra.mxu0 %v7128_v36  ;;  %2146 = vmatprep.subr.bf16.mxu1 %v7133_v14  ;;  %v7166_v36 = vld [vmem:[%s9694_s1 + $0x1000] ss:$8 sps:$4 sm:$0xff]   ;;  %v5561_v14 = vcombine.low %v1686_v51, %v1686_v51 }
 0x1b1   :  { %4505 = vmatprep.subr.bf16.mxu0 %v7136_v17  ;;  %v4084_v17 = vshrl.u32 %v9137_v53, 16  ;;  %v4099_v43 = vsel %vm195_vm0, %v4094_v38, %v4098_v16  ;;  %v7199_v38 = vld [vmem:[%s9694_s1 + $0x760] ss:$8 sps:$4 sm:$0xff]  }
 0x1b2   :  { %v7202_v16 = vld [vmem:[%s9694_s1 + $0x1060] ss:$8 sps:$4 sm:$0xff]  }
 0x1b3   :  { %2147 = vmatpush1.bf16.msra.mxu1 %v7131_v40  ;;  %v9214_v40 = vld [vmem:[%s9695_s0 + $0x10] sm:$0xee] }
 0x1b4   :  { %4506 = vmatpush1.bf16.msra.mxu0 %v7134_v26  ;;  %2148 = vmatprep.subr.bf16.mxu1 %v7139_v27  ;;  %v9216_v26 = vor.u32 %v2323_v7, %v2322_v48  ;;  %v7174_v27 = vld [vmem:[%s9694_s1 + $0x1014] ss:$8 sps:$4 sm:$0xff]   ;;  %v7189_v7 = vld [vmem:[%s9694_s1 + $0x744] ss:$8 sps:$4 sm:$0xff]  }
 0x1b5   :  { %4507 = vmatprep.subr.bf16.mxu0 %v7142_v18  ;;  %v1789_v18 = vsel %vm1773_vm4, %v1778_v12, %v1788_v1  ;;  %v7172_v12 = vld [vmem:[%s9694_s1 + $0x1010] ss:$8 sps:$4 sm:$0xff]   ;;  %v7192_v48 = vld [vmem:[%s9694_s1 + $0x1044] ss:$8 sps:$4 sm:$0xff]  }
 0x1b6   :  { %v7204_v1 = vld [vmem:[%s9694_s1 + $0x1064] ss:$8 sps:$4 sm:$0xff]  }
 0x1b7   :  { %2149 = vmatpush1.bf16.msra.mxu1 %v7137_v57  ;;  %v9231_v57 = vld [vmem:[%s9695_s0 + $0x20] sm:$0xff] }
 0x1b8   :  { %4508 = vmatpush1.bf16.msra.mxu0 %v7140_v63  ;;  %2150 = vmatprep.subr.bf16.mxu1 %v7145_v11  ;;  %v6234_v63 = vcombine.high %v9214_v40, %v9231_v57  ;;  %v1786_v11 = vrot.slane %v5561_v14, 2  ;;  %v7210_v14 = vld [vmem:[%s9694_s1 + $0x1074] ss:$8 sps:$4 sm:$0xff]  }
 0x1b9   :  { %4509 = vmatprep.subr.bf16.mxu0 %v7149_v32  ;;  %v4086_v32 = vor.u32 %v4084_v17, %v4054_v44  ;;  %v7205_v17 = vld [vmem:[%s9694_s1 + $0x770] ss:$8 sps:$4 sm:$0xff]  }
 0x1ba   :  { %v4622_v51 = vrot.slane %v6234_v63, 1  ;;  %v1787_v44 = vsel %vm1773_vm4, %v1775_v6, %v1786_v11  ;;  %v7219_v63 = vld [vmem:[%s9694_s1 + $0x794] ss:$8 sps:$4 sm:$0xff]   ;;  %v7220_v11 = vld [vmem:[%s9694_s1 + $0x1090] ss:$8 sps:$4 sm:$0xff]  }
 0x1bb   :  { %2151 = vmatpush1.bf16.msra.mxu1 %v7143_v37  ;;  %v1783_v37 = vrot.slane %v7593_v3, 2  ;;  %v4091_v3 = vsel %vm195_vm0, %v4086_v32, %v4090_v28  ;;  %v7225_v32 = vld [vmem:[%s9694_s1 + $0x7a4] ss:$8 sps:$4 sm:$0xff]  }
 0x1bc   :  { %4510 = vmatpush1.bf16.msra.mxu0 %v7147_v41  ;;  %2152 = vmatprep.subr.bf16.mxu1 %v7153_v46  ;;  %v1784_v41 = vrot.slane %v7590_v2, 2  ;;  %v4623_v46 = vrot.slane %v8670_v13, 1  ;;  %v7228_v28 = vld [vmem:[%s9694_s1 + $0x10a4] ss:$8 sps:$4 sm:$0xff]   ;;  %v7271_v2 = vld [vmem:[%s9694_s1 + $0x810] ss:$8 sps:$4 sm:$0xff]  }
 0x1bd   :  { %4511 = vmatprep.subr.bf16.mxu0 %v7156_v9  ;;  %v7175_v9 = vld [vmem:[%s9694_s1 + $0x720] ss:$8 sps:$4 sm:$0xff]   ;;  %v7274_v13 = vld [vmem:[%s9694_s1 + $0x1110] ss:$8 sps:$4 sm:$0xff]  }
 0x1be   :  { %v1785_v15 = vsel %vm1773_vm4, %v1783_v37, %v1784_v41  ;;  %v4624_v6 = vsel %vm1221_vm3, %v4622_v51, %v4623_v46  ;;  %v7231_v37 = vld [vmem:[%s9694_s1 + $0x7b4] ss:$8 sps:$4 sm:$0xff]  }
 0x1bf   :  { %2153 = vmatpush1.bf16.msra.mxu1 %v7151_v55  ;;  %v7187_v55 = vld [vmem:[%s9694_s1 + $0x740] ss:$8 sps:$4 sm:$0xff]   ;;  %v7234_v51 = vld [vmem:[%s9694_s1 + $0x10b4] ss:$8 sps:$4 sm:$0xff]  }
 0x1c0   :  { %4512 = vmatpush1.bf16.msra.mxu0 %v7154_v22  ;;  %2175 = vmatprep.subr.bf16.mxu1 %v7161_v34  ;;  %v7190_v22 = vld [vmem:[%s9694_s1 + $0x1040] ss:$8 sps:$4 sm:$0xff]   ;;  %v7195_v34 = vld [vmem:[%s9694_s1 + $0x754] ss:$8 sps:$4 sm:$0xff]  }
 0x1c1   :  { %4967 = vmatprep.subr.bf16.mxu0 %v7168_v30  ;;  %v7198_v30 = vld [vmem:[%s9694_s1 + $0x1054] ss:$8 sps:$4 sm:$0xff]  }
 0x1c2   :  { %2155 = vmatmul.mubr.bf16.vlgmr.msra.gmra.mrb[0].mxu1 %v1776_v4  ;;  %v7193_v4 = vld [vmem:[%s9694_s1 + $0x750] ss:$8 sps:$4 sm:$0xff]  }
 0x1c3   :  { %4514 = vmatmul.mubr.bf16.vlgmr.msra.gmra.mrb[0].mxu0 %v4055_v35  ;;  %2176 = vmatpush1.bf16.msra.mxu1 %v7159_v5  ;;  %v7196_v5 = vld [vmem:[%s9694_s1 + $0x1050] ss:$8 sps:$4 sm:$0xff]   ;;  %v7201_v35 = vld [vmem:[%s9694_s1 + $0x764] ss:$8 sps:$4 sm:$0xff]  }
 0x1c4   :  { %4968 = vmatpush1.bf16.msra.mxu0 %v7166_v36  ;;  %2177 = vmatprep.subr.bf16.mxu1 %v7171_v58  ;;  %v7207_v36 = vld [vmem:[%s9694_s1 + $0x774] ss:$8 sps:$4 sm:$0xff]   ;;  %v7213_v58 = vld [vmem:[%s9694_s1 + $0x784] ss:$8 sps:$4 sm:$0xff]  }
 0x1c5   :  { %4969 = vmatprep.subr.bf16.mxu0 %v7174_v27  ;;  %2164 = vmatprep.mubr.bf16.mxu1 %v1789_v18  ;;  %v7216_v27 = vld [vmem:[%s9694_s1 + $0x1084] ss:$8 sps:$4 sm:$0xff]   ;;  %v7211_v18 = vld [vmem:[%s9694_s1 + $0x780] ss:$8 sps:$4 sm:$0xff]  }
 0x1c6   :  { %4523 = vmatprep.mubr.bf16.mxu0 %v4099_v43  ;;  %v7214_v43 = vld [vmem:[%s9694_s1 + $0x1080] ss:$8 sps:$4 sm:$0xff]  }
 0x1c7   :  { %2178 = vmatpush1.bf16.msra.mxu1 %v7169_v45  ;;  %v7222_v45 = vld [vmem:[%s9694_s1 + $0x1094] ss:$8 sps:$4 sm:$0xff]  }
 0x1c8   :  { %4970 = vmatpush1.bf16.msra.mxu0 %v7172_v12  ;;  %2179 = vmatprep.subr.bf16.mxu1 %v7177_v39  ;;  %v7217_v12 = vld [vmem:[%s9694_s1 + $0x790] ss:$8 sps:$4 sm:$0xff]   ;;  %v7223_v39 = vld [vmem:[%s9694_s1 + $0x7a0] ss:$8 sps:$4 sm:$0xff]  }
 0x1c9   :  { %4971 = vmatprep.subr.bf16.mxu0 %v7180_v50  ;;  %v7226_v50 = vld [vmem:[%s9694_s1 + $0x10a0] ss:$8 sps:$4 sm:$0xff]  }
 0x1ca   :  { %2165 = vmatmul.mubr.bf16.gmra.mrb[4].mxu1 %v1787_v44  ;;  %v7237_v44 = vld [vmem:[%s9694_s1 + $0x7c4] ss:$8 sps:$4 sm:$0xff]  }
 0x1cb   :  { %4524 = vmatmul.mubr.bf16.gmra.mrb[4].mxu0 %v4091_v3  ;;  %2180 = vmatpush1.bf16.msra.mxu1 %v7175_v9  ;;  %v7229_v9 = vld [vmem:[%s9694_s1 + $0x7b0] ss:$8 sps:$4 sm:$0xff]   ;;  %v7240_v3 = vld [vmem:[%s9694_s1 + $0x10c4] ss:$8 sps:$4 sm:$0xff]  }
 0x1cc   :  { %4972 = vmatpush1.bf16.msra.mxu0 %v7178_v42  ;;  %2181 = vmatprep.subr.bf16.mxu1 %v7183_v52  ;;  %v7232_v42 = vld [vmem:[%s9694_s1 + $0x10b0] ss:$8 sps:$4 sm:$0xff]   ;;  %v7235_v52 = vld [vmem:[%s9694_s1 + $0x7c0] ss:$8 sps:$4 sm:$0xff]  }
 0x1cd   :  { %4973 = vmatprep.subr.bf16.mxu0 %v7186_v20  ;;  %2207 = vmatprep.mubr.bf16.mxu1 %v1785_v15  ;;  %v7238_v20 = vld [vmem:[%s9694_s1 + $0x10c0] ss:$8 sps:$4 sm:$0xff]   ;;  %v7243_v15 = vld [vmem:[%s9694_s1 + $0x7d4] ss:$8 sps:$4 sm:$0xff]  }
 0x1ce   :  { %4999 = vmatprep.mubr.bf16.mxu0 %v4624_v6  ;;  %v7246_v6 = vld [vmem:[%s9694_s1 + $0x10d4] ss:$8 sps:$4 sm:$0xff]  }
 0x1cf   :  { %2182 = vmatpush1.bf16.msra.mxu1 %v7181_v23  ;;  %v7241_v23 = vld [vmem:[%s9694_s1 + $0x7d0] ss:$8 sps:$4 sm:$0xff]  }
 0x1d0   :  { %4974 = vmatpush1.bf16.msra.mxu0 %v7184_v33  ;;  %2183 = vmatprep.subr.bf16.mxu1 %v7189_v7  ;;  %v7244_v33 = vld [vmem:[%s9694_s1 + $0x10d0] ss:$8 sps:$4 sm:$0xff]   ;;  %v7250_v7 = vld [vmem:[%s9694_s1 + $0x7e4] ss:$8 sps:$4 sm:$0xff]  }
 0x1d1   :  { %4975 = vmatprep.subr.bf16.mxu0 %v7192_v48  ;;  %v7254_v48 = vld [vmem:[%s9694_s1 + $0x10e4] ss:$8 sps:$4 sm:$0xff]  }
 0x1d3   :  { %2184 = vmatpush1.bf16.msra.mxu1 %v7187_v55  ;;  %v1687_v55 = vld [vmem:[%s9695_s0 + $0x48] sm:$0x33] }
 0x1d4   :  { %4976 = vmatpush1.bf16.msra.mxu0 %v7190_v22  ;;  %2185 = vmatprep.subr.bf16.mxu1 %v7195_v34  ;;  %v7248_v22 = vld [vmem:[%s9694_s1 + $0x7e0] ss:$8 sps:$4 sm:$0xff]  }
 0x1d5   :  { %4977 = vmatprep.subr.bf16.mxu0 %v7198_v30  ;;  %v7252_v34 = vld [vmem:[%s9694_s1 + $0x10e0] ss:$8 sps:$4 sm:$0xff]   ;;  %v6233_v30 = vcombine.low %v9214_v40, %v9231_v57  ;;  %v7260_v40 = vld [vmem:[%s9694_s1 + $0x10f0] ss:$8 sps:$4 sm:$0xff]  }
 0x1d7   :  { %2186 = vmatpush1.bf16.msra.mxu1 %v7193_v4  ;;  %v7259_v4 = vld [vmem:[%s9694_s1 + $0x7f4] ss:$8 sps:$4 sm:$0xff]   ;;  %v4619_v57 = vrot.slane %v6233_v30, 1 }
 0x1d8   :  { %4978 = vmatpush1.bf16.msra.mxu0 %v7196_v5  ;;  %2187 = vmatprep.subr.bf16.mxu1 %v7201_v35  ;;  %v7262_v5 = vld [vmem:[%s9694_s1 + $0x10f4] ss:$8 sps:$4 sm:$0xff]   ;;  %v5564_v35 = vcombine.high %v1687_v55, %v1687_v55 }
 0x1d9   :  { %4979 = vmatprep.subr.bf16.mxu0 %v7204_v1  ;;  %v7257_v1 = vld [vmem:[%s9694_s1 + $0x7f0] ss:$8 sps:$4 sm:$0xff]   ;;  %v7300_v30 = vld [vmem:[%s9694_s1 + $0x1154] ss:$8 sps:$4 sm:$0xff]  }
 0x1db   :  { %2188 = vmatpush1.bf16.msra.mxu1 %v7199_v38  ;;  %v1780_v38 = vrot.slane %v7637_v29, 2  ;;  %v2330_v29 = vshll.u32 %v8972_v47, 16 }
 0x1dc   :  { %4980 = vmatpush1.bf16.msra.mxu0 %v7202_v16  ;;  %2189 = vmatprep.subr.bf16.mxu1 %v7207_v36  ;;  %v1781_v16 = vrot.slane %v7605_v8, 2  ;;  %v4620_v36 = vrot.slane %v8873_v0, 1  ;;  %v7263_v8 = vld [vmem:[%s9694_s1 + $0x800] ss:$8 sps:$4 sm:$0xff]  }
 0x1dd   :  { %4981 = vmatprep.subr.bf16.mxu0 %v7210_v14  ;;  %v7265_v14 = vld [vmem:[%s9694_s1 + $0x804] ss:$8 sps:$4 sm:$0xff]   ;;  %v7268_v0 = vld [vmem:[%s9694_s1 + $0x1100] ss:$8 sps:$4 sm:$0xff]  }
 0x1df   :  { %2190 = vmatpush1.bf16.msra.mxu1 %v7205_v17  ;;  %v7270_v17 = vld [vmem:[%s9694_s1 + $0x1104] ss:$8 sps:$4 sm:$0xff]  }
 0x1e0   :  { %4982 = vmatpush1.bf16.msra.mxu0 %v7208_v21  ;;  %2191 = vmatprep.subr.bf16.mxu1 %v7213_v58  ;;  %v1792_v21 = vrot.slane %v5564_v35, 2  ;;  %v4633_v58 = vrot.slane %v8887_v49, 1  ;;  %v9450_v49 = vld [vmem:[%s9695_s0 + $0x18] sm:$0xee]  ;;  %v7303_v35 = vld [vmem:[%s9694_s1 + $0x864] ss:$8 sps:$4 sm:$0xff]  }
 0x1e1   :  { %4983 = vmatprep.subr.bf16.mxu0 %v7216_v27  ;;  %v2327_v27 = vshrl.u32 %v8972_v47, 16  ;;  %v7273_v47 = vld [vmem:[%s9694_s1 + $0x814] ss:$8 sps:$4 sm:$0xff]  }
 0x1e3   :  { %2192 = vmatpush1.bf16.msra.mxu1 %v7211_v18  ;;  %v1782_v18 = vsel %vm1773_vm4, %v1780_v38, %v1781_v16  ;;  %v7309_v38 = vld [vmem:[%s9694_s1 + $0x874] ss:$8 sps:$4 sm:$0xff]  }
 0x1e4   :  { %4984 = vmatpush1.bf16.msra.mxu0 %v7214_v43  ;;  %2193 = vmatprep.subr.bf16.mxu1 %v7219_v63  ;;  %v4621_v43 = vsel %vm1221_vm3, %v4619_v57, %v4620_v36  ;;  %v5563_v63 = vcombine.low %v1687_v55, %v1687_v55  ;;  %v7289_v55 = vld [vmem:[%s9694_s1 + $0x840] ss:$8 sps:$4 sm:$0xff]  }
 0x1e5   :  { %4985 = vmatprep.subr.bf16.mxu0 %v7222_v45  ;;  %v7276_v45 = vld [vmem:[%s9694_s1 + $0x1114] ss:$8 sps:$4 sm:$0xff]   ;;  %v7304_v57 = vld [vmem:[%s9694_s1 + $0x1160] ss:$8 sps:$4 sm:$0xff]  }
 0x1e7   :  { %2194 = vmatpush1.bf16.msra.mxu1 %v7217_v12  ;;  %v1793_v12 = vsel %vm1773_vm4, %v1784_v41, %v1792_v21  ;;  %v1790_v41 = vrot.slane %v5563_v63, 2  ;;  %v7318_v21 = vld [vmem:[%s9694_s1 + $0x1184] ss:$8 sps:$4 sm:$0xff]  }
 0x1e8   :  { %4986 = vmatpush1.bf16.msra.mxu0 %v7220_v11  ;;  %2195 = vmatprep.subr.bf16.mxu1 %v7225_v32  ;;  %v4634_v11 = vsel %vm1221_vm3, %v4623_v46, %v4633_v58  ;;  %v2329_v32 = vrot.slane %v2327_v27, 2  ;;  %v4631_v46 = vrot.slane %v8919_v31, 1  ;;  %v7277_v31 = vld [vmem:[%s9694_s1 + $0x820] ss:$8 sps:$4 sm:$0xff]   ;;  %v7330_v63 = vld [vmem:[%s9694_s1 + $0x11a4] ss:$8 sps:$4 sm:$0xff]  }
 0x1e9   :  { %4987 = vmatprep.subr.bf16.mxu0 %v7228_v28  ;;  %v2332_v28 = vrot.slane %v2330_v29, 3  ;;  %v7313_v58 = vld [vmem:[%s9694_s1 + $0x880] ss:$8 sps:$4 sm:$0xff]   ;;  %v7321_v29 = vld [vmem:[%s9694_s1 + $0x894] ss:$8 sps:$4 sm:$0xff]  }
 0x1ea   :  { %v7316_v27 = vld [vmem:[%s9694_s1 + $0x1180] ss:$8 sps:$4 sm:$0xff]  }
 0x1eb   :  { %2196 = vmatpush1.bf16.msra.mxu1 %v7223_v39  ;;  %v2334_v39 = vrot.slane %v252_v25, 2  ;;  %v2333_v25 = vor.u32 %v2332_v28, %v2329_v32  ;;  %v7331_v32 = vld [vmem:[%s9694_s1 + $0x8b0] ss:$8 sps:$4 sm:$0xff]  }
 0x1ec   :  { %4988 = vmatpush1.bf16.msra.mxu0 %v7226_v50  ;;  %2197 = vmatprep.subr.bf16.mxu1 %v7231_v37  ;;  %v2335_v50 = vrot.slane %v216_v62, 3  ;;  %v6236_v37 = vcombine.high %v9450_v49, %v8900_v10  ;;  %v7282_v62 = vld [vmem:[%s9694_s1 + $0x1124] ss:$8 sps:$4 sm:$0xff]   ;;  %v7334_v28 = vld [vmem:[%s9694_s1 + $0x11b0] ss:$8 sps:$4 sm:$0xff]  }
 0x1ed   :  { %4989 = vmatprep.subr.bf16.mxu0 %v7234_v51 }
 0x1ee   :  { %v9483_v10 = vor.u32 %v2335_v50, %v2334_v39  ;;  %v4628_v51 = vrot.slane %v6236_v37, 1  ;;  %v7339_v39 = vld [vmem:[%s9694_s1 + $0x8c4] ss:$8 sps:$4 sm:$0xff]   ;;  %v7337_v37 = vld [vmem:[%s9694_s1 + $0x8c0] ss:$8 sps:$4 sm:$0xff]  }
 0x1ef   :  { %2198 = vmatpush1.bf16.msra.mxu1 %v7229_v9  ;;  %v4629_v9 = vrot.slane %v8939_v19, 1  ;;  %v7342_v50 = vld [vmem:[%s9694_s1 + $0x11c4] ss:$8 sps:$4 sm:$0xff]   ;;  %v5081_v19 = vld [vmem:[%s9696_s2] sm:$0x3] }
 0x1f0   :  { %4990 = vmatpush1.bf16.msra.mxu0 %v7232_v42  ;;  %2199 = vmatprep.subr.bf16.mxu1 %v7237_v44  ;;  %v7280_v42 = vld [vmem:[%s9694_s1 + $0x1120] ss:$8 sps:$4 sm:$0xff]   ;;  %v1791_v44 = vsel %vm1773_vm4, %v1781_v16, %v1790_v41  ;;  %v7312_v16 = vld [vmem:[%s9694_s1 + $0x1174] ss:$8 sps:$4 sm:$0xff]  }
 0x1f1   :  { %4991 = vmatprep.subr.bf16.mxu0 %v7240_v3  ;;  %v4632_v3 = vsel %vm1221_vm3, %v4620_v36, %v4631_v46  ;;  %v7307_v36 = vld [vmem:[%s9694_s1 + $0x870] ss:$8 sps:$4 sm:$0xff]   ;;  %v7348_v41 = vld [vmem:[%s9694_s1 + $0x11d4] ss:$8 sps:$4 sm:$0xff]  }
 0x1f2   :  { %v7343_v46 = vld [vmem:[%s9694_s1 + $0x8d0] ss:$8 sps:$4 sm:$0xff]  }
 0x1f3   :  { %2200 = vmatpush1.bf16.msra.mxu1 %v7235_v52  ;;  %v7285_v52 = vld [vmem:[%s9694_s1 + $0x834] ss:$8 sps:$4 sm:$0xff]  }
 0x1f4   :  { %4992 = vmatpush1.bf16.msra.mxu0 %v7238_v20  ;;  %2201 = vmatprep.subr.bf16.mxu1 %v7243_v15  ;;  %v7288_v20 = vld [vmem:[%s9694_s1 + $0x1134] ss:$8 sps:$4 sm:$0xff]   ;;  %v2337_v15 = vsel %vm2313_vm1, %v2333_v25, %v9483_v10  ;;  %v2318_v25 = vshll.u32 %v9156_v56, 16 }
 0x1f5   :  { %4993 = vmatprep.subr.bf16.mxu0 %v7246_v6  ;;  %v4630_v6 = vsel %vm1221_vm3, %v4628_v51, %v4629_v9  ;;  %v7353_v51 = vld [vmem:[%s9694_s1 + $0x8e4] ss:$8 sps:$4 sm:$0xff]  }
 0x1f7   :  { %2202 = vmatpush1.bf16.msra.mxu1 %v7241_v23  ;;  %v7283_v23 = vld [vmem:[%s9694_s1 + $0x830] ss:$8 sps:$4 sm:$0xff]  }
 0x1f8   :  { %4994 = vmatpush1.bf16.msra.mxu0 %v7244_v33  ;;  %2203 = vmatprep.subr.bf16.mxu1 %v7250_v7  ;;  %v7286_v33 = vld [vmem:[%s9694_s1 + $0x1130] ss:$8 sps:$4 sm:$0xff]   ;;  %v7291_v7 = vld [vmem:[%s9694_s1 + $0x844] ss:$8 sps:$4 sm:$0xff]  }
 0x1f9   :  { %4995 = vmatprep.subr.bf16.mxu0 %v7254_v48  ;;  %v7294_v48 = vld [vmem:[%s9694_s1 + $0x1144] ss:$8 sps:$4 sm:$0xff]  }
 0x1fb   :  { %2204 = vmatpush1.bf16.msra.mxu1 %v7248_v22  ;;  %v7292_v22 = vld [vmem:[%s9694_s1 + $0x1140] ss:$8 sps:$4 sm:$0xff]  }
 0x1fc   :  { %4996 = vmatpush1.bf16.msra.mxu0 %v7252_v34  ;;  %2205 = vmatprep.subr.bf16.mxu1 %v7259_v4  ;;  %v7297_v34 = vld [vmem:[%s9694_s1 + $0x854] ss:$8 sps:$4 sm:$0xff]   ;;  %v7295_v4 = vld [vmem:[%s9694_s1 + $0x850] ss:$8 sps:$4 sm:$0xff]  }
 0x1fd   :  { %4997 = vmatprep.subr.bf16.mxu0 %v7262_v5  ;;  %v7298_v5 = vld [vmem:[%s9694_s1 + $0x1150] ss:$8 sps:$4 sm:$0xff]  }
 0x1ff   :  { %2206 = vmatpush1.bf16.msra.mxu1 %v7257_v1  ;;  %v7306_v1 = vld [vmem:[%s9694_s1 + $0x1164] ss:$8 sps:$4 sm:$0xff]  }
 0x200   :  { %4998 = vmatpush1.bf16.msra.mxu0 %v7260_v40  ;;  %2726 = vmatprep.subr.bf16.mxu1 %v7265_v14  ;;  %v7301_v40 = vld [vmem:[%s9694_s1 + $0x860] ss:$8 sps:$4 sm:$0xff]   ;;  %v7310_v14 = vld [vmem:[%s9694_s1 + $0x1170] ss:$8 sps:$4 sm:$0xff]  }
 0x201   :  { %5020 = vmatprep.subr.bf16.mxu0 %v7270_v17  ;;  %v7315_v17 = vld [vmem:[%s9694_s1 + $0x884] ss:$8 sps:$4 sm:$0xff]  }
 0x202   :  { %2208 = vmatmul.mubr.bf16.vlgmr.msra.gmra.mrb[0].mxu1 %v1782_v18  ;;  %v7322_v18 = vld [vmem:[%s9694_s1 + $0x1190] ss:$8 sps:$4 sm:$0xff]  }
 0x203   :  { %5000 = vmatmul.mubr.bf16.vlgmr.msra.gmra.mrb[0].mxu0 %v4621_v43  ;;  %2727 = vmatpush1.bf16.msra.mxu1 %v7263_v8  ;;  %v7324_v8 = vld [vmem:[%s9694_s1 + $0x1194] ss:$8 sps:$4 sm:$0xff]   ;;  %v7327_v43 = vld [vmem:[%s9694_s1 + $0x8a4] ss:$8 sps:$4 sm:$0xff]  }
 0x204   :  { %5021 = vmatpush1.bf16.msra.mxu0 %v7268_v0  ;;  %2728 = vmatprep.subr.bf16.mxu1 %v7273_v47  ;;  %v7319_v0 = vld [vmem:[%s9694_s1 + $0x890] ss:$8 sps:$4 sm:$0xff]   ;;  %v7325_v47 = vld [vmem:[%s9694_s1 + $0x8a0] ss:$8 sps:$4 sm:$0xff]  }
 0x205   :  { %5022 = vmatprep.subr.bf16.mxu0 %v7276_v45  ;;  %2217 = vmatprep.mubr.bf16.mxu1 %v1793_v12  ;;  %v7328_v45 = vld [vmem:[%s9694_s1 + $0x11a0] ss:$8 sps:$4 sm:$0xff]   ;;  %v7333_v12 = vld [vmem:[%s9694_s1 + $0x8b4] ss:$8 sps:$4 sm:$0xff]  }
 0x206   :  { %5009 = vmatprep.mubr.bf16.mxu0 %v4634_v11  ;;  %v7336_v11 = vld [vmem:[%s9694_s1 + $0x11b4] ss:$8 sps:$4 sm:$0xff]  }
 0x207   :  { %2729 = vmatpush1.bf16.msra.mxu1 %v7271_v2  ;;  %v7340_v2 = vld [vmem:[%s9694_s1 + $0x11c0] ss:$8 sps:$4 sm:$0xff]  }
 0x208   :  { %5023 = vmatpush1.bf16.msra.mxu0 %v7274_v13  ;;  %2730 = vmatprep.subr.bf16.mxu1 %v7279_v54  ;;  %v7345_v13 = vld [vmem:[%s9694_s1 + $0x8d4] ss:$8 sps:$4 sm:$0xff]   ;;  %v7346_v54 = vld [vmem:[%s9694_s1 + $0x11d0] ss:$8 sps:$4 sm:$0xff]  }
 0x209   :  { %5024 = vmatprep.subr.bf16.mxu0 %v7282_v62  ;;  %v2315_v62 = vshrl.u32 %v9156_v56, 16 }
 0x20a   :  { %2218 = vmatmul.mubr.bf16.gmra.mrb[4].mxu1 %v1791_v44  ;;  %v2375_v44 = vshll.u32 %v7998_v60, 16 }
 0x20b   :  { %5010 = vmatmul.mubr.bf16.gmra.mrb[4].mxu0 %v4632_v3  ;;  %2731 = vmatpush1.bf16.msra.mxu1 %v7277_v31  ;;  %v7356_v31 = vld [vmem:[%s9694_s1 + $0x11e4] ss:$8 sps:$4 sm:$0xff]  }
 0x20c   :  { %5025 = vmatpush1.bf16.msra.mxu0 %v7280_v42  ;;  %2732 = vmatprep.subr.bf16.mxu1 %v7285_v52  ;;  %v2372_v42 = vshrl.u32 %v7998_v60, 16  ;;  %v7374_v3 = vld [vmem:[%s9695_s0 + $0x28] sm:$0xff]  ;;  %v7359_v60 = vld [vmem:[%s9694_s1 + $0x8f4] ss:$8 sps:$4 sm:$0xff]  }
 0x20d   :  { %5026 = vmatprep.subr.bf16.mxu0 %v7288_v20  ;;  %2758 = vmatprep.mubr.bf16.mxu1 %v2337_v15  ;;  %v6235_v56 = vcombine.low %v9450_v49, %v7374_v3  ;;  %v7351_v52 = vld [vmem:[%s9694_s1 + $0x8e0] ss:$8 sps:$4 sm:$0xff]   ;;  %v2317_v15 = vrot.slane %v2315_v62, 2  ;;  %v7362_v49 = vld [vmem:[%s9694_s1 + $0x11f4] ss:$8 sps:$4 sm:$0xff]  }
 0x20e   :  { %5052 = vmatprep.mubr.bf16.mxu0 %v4630_v6  ;;  %v7354_v20 = vld [vmem:[%s9694_s1 + $0x11e0] ss:$8 sps:$4 sm:$0xff]   ;;  %v2320_v6 = vrot.slane %v2318_v25, 3 }
 0x20f   :  { %2733 = vmatpush1.bf16.msra.mxu1 %v7283_v23  ;;  %v2374_v23 = vrot.slane %v2372_v42, 2 }
 0x210   :  { %5027 = vmatpush1.bf16.msra.mxu0 %v7286_v33  ;;  %2734 = vmatprep.subr.bf16.mxu1 %v7291_v7  ;;  %v2377_v33 = vrot.slane %v2375_v44, 3  ;;  %v7357_v7 = vld [vmem:[%s9694_s1 + $0x8f0] ss:$8 sps:$4 sm:$0xff]  }
 0x211   :  { %5028 = vmatprep.subr.bf16.mxu0 %v7294_v48  ;;  %v4625_v48 = vrot.slane %v6235_v56, 1 }
 0x213   :  { %2735 = vmatpush1.bf16.msra.mxu1 %v7289_v55  ;;  %v7360_v55 = vld [vmem:[%s9694_s1 + $0x11f0] ss:$8 sps:$4 sm:$0xff]  }
 0x214   :  { %5029 = vmatpush1.bf16.msra.mxu0 %v7292_v22  ;;  %2736 = vmatprep.subr.bf16.mxu1 %v7297_v34  ;;  %v2321_v22 = vor.u32 %v2320_v6, %v2317_v15  ;;  %v4626_v34 = vrot.slane %v9137_v53, 1 }
 0x215   :  { %5030 = vmatprep.subr.bf16.mxu0 %v7300_v30  ;;  %v2363_v30 = vshrl.u32 %v8000_v61, 16 }
 0x217   :  { %2737 = vmatpush1.bf16.msra.mxu1 %v7295_v4  ;;  %v2366_v4 = vshll.u32 %v8000_v61, 16 }
 0x218   :  { %5031 = vmatpush1.bf16.msra.mxu0 %v7298_v5  ;;  %2738 = vmatprep.subr.bf16.mxu1 %v7303_v35  ;;  %v2378_v5 = vor.u32 %v2377_v33, %v2374_v23  ;;  %v4637_v35 = vrot.slane %v9159_v24, 1 }
 0x219   :  { %5032 = vmatprep.subr.bf16.mxu0 %v7306_v1  ;;  %v2325_v1 = vsel %vm2313_vm1, %v2321_v22, %v9216_v26 }
 0x21a   :  { %v2379_v53 = vsel %vm2313_vm1, %v9483_v10, %v2378_v5  ;;  %v4638_v61 = vsel %vm1221_vm3, %v4629_v9, %v4637_v35 }
 0x21b   :  { %2739 = vmatpush1.bf16.msra.mxu1 %v7301_v40  ;;  %v4627_v40 = vsel %vm1221_vm3, %v4625_v48, %v4626_v34 }
 0x21c   :  { %5033 = vmatpush1.bf16.msra.mxu0 %v7304_v57  ;;  %2740 = vmatprep.subr.bf16.mxu1 %v7309_v38  ;;  %v2365_v57 = vrot.slane %v2363_v30, 2  ;;  %v2368_v38 = vrot.slane %v2366_v4, 3 }
 0x21d   :  { %5034 = vmatprep.subr.bf16.mxu0 %v7312_v16  ;;  %v4635_v16 = vrot.slane %v9190_v59, 1 }
 0x21e   :  { %v2369_v24 = vor.u32 %v2368_v38, %v2365_v57 }
 0x21f   :  { %2741 = vmatpush1.bf16.msra.mxu1 %v7307_v36 }
 0x220   :  { %5035 = vmatpush1.bf16.msra.mxu0 %v7310_v14  ;;  %2742 = vmatprep.subr.bf16.mxu1 %v7315_v17  ;;  %v2370_v36 = vsel %vm2313_vm1, %v9216_v26, %v2369_v24  ;;  %v4636_v14 = vsel %vm1221_vm3, %v4626_v34, %v4635_v16  ;;  %v5083_v17 = vlaneseq }
 0x221   :  { %5036 = vmatprep.subr.bf16.mxu0 %v7318_v21 }
 0x222   :  { %v5084_v10 = vshrl.u32 %v5083_v17, 7 }
 0x223   :  { %2743 = vmatpush1.bf16.msra.mxu1 %v7313_v58 }
 0x224   :  { %5037 = vmatpush1.bf16.msra.mxu0 %v7316_v27  ;;  %2744 = vmatprep.subr.bf16.mxu1 %v7321_v29  ;;  %v5085_v21 = vsub.s32 0, %v5084_v10  ;;  %v5089_v9 = vsub.s32 1, %v5084_v10 }
 0x225   :  { %5038 = vmatprep.subr.bf16.mxu0 %v7324_v8 }
 0x226   :  { %v5086_v58 = vrot.slane %v5081_v19, %v5085_v21  ;;  %v5090_v8 = vrot.slane %v5081_v19, %v5089_v9 }
 0x227   :  { %2745 = vmatpush1.bf16.msra.mxu1 %v7319_v0 }
 0x228   :  { %5039 = vmatpush1.bf16.msra.mxu0 %v7322_v18  ;;  %2746 = vmatprep.subr.bf16.mxu1 %v7327_v43 }
 0x229   :  { %5040 = vmatprep.subr.bf16.mxu0 %v7330_v63 }
 0x22b   :  { %2747 = vmatpush1.bf16.msra.mxu1 %v7325_v47 }
 0x22c   :  { %5041 = vmatpush1.bf16.msra.mxu0 %v7328_v45  ;;  %2748 = vmatprep.subr.bf16.mxu1 %v7333_v12 }
 0x22d   :  { %5042 = vmatprep.subr.bf16.mxu0 %v7336_v11 }
 0x22f   :  { %2749 = vmatpush1.bf16.msra.mxu1 %v7331_v32 }
 0x230   :  { %5043 = vmatpush1.bf16.msra.mxu0 %v7334_v28  ;;  %2750 = vmatprep.subr.bf16.mxu1 %v7339_v39 }
 0x231   :  { %5044 = vmatprep.subr.bf16.mxu0 %v7342_v50 }
 0x233   :  { %2751 = vmatpush1.bf16.msra.mxu1 %v7337_v37 }
 0x234   :  { %5045 = vmatpush1.bf16.msra.mxu0 %v7340_v2  ;;  %2752 = vmatprep.subr.bf16.mxu1 %v7345_v13 }
 0x235   :  { %5046 = vmatprep.subr.bf16.mxu0 %v7348_v41 }
 0x237   :  { %2753 = vmatpush1.bf16.msra.mxu1 %v7343_v46 }
 0x238   :  { %5047 = vmatpush1.bf16.msra.mxu0 %v7346_v54  ;;  %2754 = vmatprep.subr.bf16.mxu1 %v7353_v51 }
 0x239   :  { %5048 = vmatprep.subr.bf16.mxu0 %v7356_v31 }
 0x23b   :  { %2755 = vmatpush1.bf16.msra.mxu1 %v7351_v52 }
 0x23c   :  { %5049 = vmatpush1.bf16.msra.mxu0 %v7354_v20  ;;  %2756 = vmatprep.subr.bf16.mxu1 %v7359_v60 }
 0x23d   :  { %5050 = vmatprep.subr.bf16.mxu0 %v7362_v49 }
 0x23f   :  { %2757 = vmatpush1.bf16.msra.mxu1 %v7357_v7 }
 0x240   :  { %5051 = vmatpush1.bf16.msra.mxu0 %v7360_v55 }
 0x242   :  { %2759 = vmatmul.mubr.bf16.vlgmr.msra.gmra.mrb[0].mxu1 %v2325_v1 }
 0x243   :  { %5053 = vmatmul.mubr.bf16.vlgmr.msra.gmra.mrb[0].mxu0 %v4627_v40  ;;  %2768 = vmatprep.mubr.bf16.mxu1 %v2379_v53 }
 0x244   :  { %5062 = vmatprep.mubr.bf16.mxu0 %v4638_v61 }
 0x24a   :  { %2769 = vmatmul.mubr.bf16.gmra.mrb[4].mxu1 %v2370_v36 }
 0x24b   :  { %5063 = vmatmul.mubr.bf16.gmra.mrb[4].mxu0 %v4636_v14 }
 0x315   :  { %v2760_v27 = vpop.f32.mrb[0].mxu1 }
 0x316   :  { %v5054_v29 = vpop.f32.mrb[0].mxu0  ;;  %v2762_v0 = vpop.f32.mrb[1].mxu1 }
 0x317   :  { %v6309_v59 = vadd.f32 %v5054_v29, %v2760_v27  ;;  %v5056_v18 = vpop.f32.mrb[1].mxu0  ;;  %v2764_v43 = vpop.f32.mrb[2].mxu1 }
 0x318   :  { %v6310_v26 = vadd.f32 %v5056_v18, %v2762_v0  ;;  %v5058_v63 = vpop.f32.mrb[2].mxu0  ;;  %v2766_v12 = vpop.f32.mrb[3].mxu1 }
 0x319   :  { %v5093_v47 = vadd.f32 %v6309_v59, %v5086_v58  ;;  %v6311_v45 = vadd.f32 %v5058_v63, %v2764_v43  ;;  %v5060_v11 = vpop.f32.mrb[3].mxu0 }
 0x31a   :  { %v5094_v32 = vadd.f32 %v6310_v26, %v5090_v8  ;;  %v6312_v28 = vadd.f32 %v5060_v11, %v2766_v12 }
 0x31b   :  { %vm5101_vm5 = vcmp.ge.f32.partialorder %v5093_v47, 0.0  ;;  %v5109_v39 = vmul.f32 0.01, %v5093_v47  ;;  %v5095_v50 = vadd.f32 %v6311_v45, %v5086_v58 }
 0x31c   :  { %vm5102_vm6 = vcmp.ge.f32.partialorder %v5094_v32, 0.0  ;;  %v5110_v37 = vmul.f32 0.01, %v5094_v32  ;;  %v5096_v2 = vadd.f32 %v6312_v28, %v5090_v8 }
 0x31d   :  { %v5117_v13 = vsel %vm5101_vm5, %v5093_v47, %v5109_v39  ;;  %vm5103_vm7 = vcmp.ge.f32.partialorder %v5095_v50, 0.0  ;;  %v5111_v41 = vmul.f32 0.01, %v5095_v50  ;;  %v2770_v62 = vpop.f32.mrb[4].mxu1 }
 0x31e   :  { %v5118_v46 = vsel %vm5102_vm6, %v5094_v32, %v5110_v37  ;;  %vm5104_vm8 = vcmp.ge.f32.partialorder %v5096_v2, 0.0  ;;  %v5112_v54 = vmul.f32 0.01, %v5096_v2  ;;  %v5064_v25 = vpop.f32.mrb[4].mxu0  ;;  %v2772_v44 = vpop.f32.mrb[5].mxu1 }
 0x31f   :  { %v6305_v51 = vpack.c.bf16 %v5118_v46, %v5117_v13  ;;  %v5119_v31 = vsel %vm5103_vm7, %v5095_v50, %v5111_v41  ;;  %v6313_v42 = vadd.f32 %v5064_v25, %v2770_v62  ;;  %v5066_v3 = vpop.f32.mrb[5].mxu0  ;;  %v2774_v20 = vpop.f32.mrb[6].mxu1 }
 0x320   :  { %v5120_v56 = vsel %vm5104_vm8, %v5096_v2, %v5112_v54  ;;  %v6314_v52 = vadd.f32 %v5066_v3, %v2772_v44  ;;  %v5068_v15 = vpop.f32.mrb[6].mxu0  ;;  %v2776_v23 = vpop.f32.mrb[7].mxu1 }
 0x321   :  { %5149 = vst [vmem:[%s9697_s3] sm:$0xff] %v6305_v51  ;;  %v6306_v6 = vpack.c.bf16 %v5120_v56, %v5119_v31  ;;  %v5097_v60 = vadd.f32 %v6313_v42, %v5086_v58  ;;  %v6315_v49 = vadd.f32 %v5068_v15, %v2774_v20  ;;  %v5070_v33 = vpop.f32.mrb[7].mxu0 }
 0x322   :  { %v5098_v7 = vadd.f32 %v6314_v52, %v5090_v8  ;;  %v6316_v48 = vadd.f32 %v5070_v33, %v2776_v23 }
 0x323   :  { %5150 = vst [vmem:[%s9697_s3 + $0x8] sm:$0xff] %v6306_v6  ;;  %vm5105_vm9 = vcmp.ge.f32.partialorder %v5097_v60, 0.0  ;;  %v5113_v55 = vmul.f32 0.01, %v5097_v60  ;;  %v5099_v22 = vadd.f32 %v6315_v49, %v5086_v58 }
 0x324   :  { %vm5106_vm10 = vcmp.ge.f32.partialorder %v5098_v7, 0.0  ;;  %v5114_v34 = vmul.f32 0.01, %v5098_v7  ;;  %v5100_v30 = vadd.f32 %v6316_v48, %v5090_v8 }
 0x325   :  { %v5121_v4 = vsel %vm5105_vm9, %v5097_v60, %v5113_v55  ;;  %vm5107_vm11 = vcmp.ge.f32.partialorder %v5099_v22, 0.0  ;;  %v5115_v5 = vmul.f32 0.01, %v5099_v22 }
 0x326   :  { %v5122_v35 = vsel %vm5106_vm10, %v5098_v7, %v5114_v34  ;;  %vm5108_vm12 = vcmp.ge.f32.partialorder %v5100_v30, 0.0  ;;  %v5116_v1 = vmul.f32 0.01, %v5100_v30 }
 0x327   :  { %v6307_v40 = vpack.c.bf16 %v5122_v35, %v5121_v4  ;;  %v5123_v57 = vsel %vm5107_vm11, %v5099_v22, %v5115_v5 }
 0x328   :  { %v5124_v38 = vsel %vm5108_vm12, %v5100_v30, %v5116_v1 }
 0x329   :  { %5151 = vst [vmem:[%s9697_s3 + $0x10] sm:$0xff] %v6307_v40  ;;  %v6308_v53 = vpack.c.bf16 %v5124_v38, %v5123_v57 }
 0x32b   :  { %5152 = vst [vmem:[%s9697_s3 + $0x18] sm:$0xff] %v6308_v53 }

// kernel: forward.9
= control target key start
LH: loop header
LB: loop body
LE: loop exit
PB: predicated region body
PF: predicated region fallthrough
CT: control target
= control target key end

     0   :  { %vm339_vm0 = vsmask.f32 7424  ;;  %vm4553_vm1 = vcmask 1045504   ;;  %vm5597_vm2 = vsmask.f32 5376  ;;  %vm6753_vm3 = vcmask 1044480   ;;  %s18698_s1 = inlined_call_operand.vmem [shape: bf16[3,3,1024,256], index: 1, kind: input, shape index: {}]   ;;  %s18699_s0 = inlined_call_operand.vmem [shape: bf16[32,1024], index: 0, kind: input, shape index: {}]   ;;  %s18700_s2 = inlined_call_operand.vmem [shape: f32[1,256], index: 2, kind: input, shape index: {}]   ;;  %s18701_s3 = inlined_call_operand.vmem [shape: bf16[18,256], index: 3, kind: output, shape index: {}]  }
   0x1   :  { %v12348_v0 = vld [vmem:[%s18698_s1 + $0x404] ss:$8 sps:$4 sm:$0xff]   ;;  %v12352_v2 = vld [vmem:[%s18698_s1 + $0x400] ss:$8 sps:$4 sm:$0xff]   ;;  %v12354_v4 = vld [vmem:[%s18698_s1 + $0x414] ss:$8 sps:$4 sm:$0xff]  }
   0x2   :  { %v12350_v1 = vld [vmem:[%s18698_s1 + $0x1204] ss:$8 sps:$4 sm:$0xff]   ;;  %1116 = vmatprep.subr.bf16.mxu1 %v12348_v0  ;;  %v12353_v3 = vld [vmem:[%s18698_s1 + $0x1200] ss:$8 sps:$4 sm:$0xff]   ;;  %v12356_v5 = vld [vmem:[%s18698_s1 + $0x1214] ss:$8 sps:$4 sm:$0xff]  }
   0x3   :  { %5336 = vmatprep.subr.bf16.mxu0 %v12350_v1  ;;  %1117 = vmatpush1.bf16.msra.mxu1 %v12352_v2  ;;  %v12358_v6 = vld [vmem:[%s18698_s1 + $0x410] ss:$8 sps:$4 sm:$0xff]   ;;  %v12360_v8 = vld [vmem:[%s18698_s1 + $0x424] ss:$8 sps:$4 sm:$0xff]   ;;  %v12364_v10 = vld [vmem:[%s18698_s1 + $0x420] ss:$8 sps:$4 sm:$0xff]  }
   0x4   :  { %5337 = vmatpush1.bf16.msra.mxu0 %v12353_v3  ;;  %1118 = vmatprep.subr.bf16.mxu1 %v12354_v4  ;;  %v12359_v7 = vld [vmem:[%s18698_s1 + $0x1210] ss:$8 sps:$4 sm:$0xff]   ;;  %v12362_v9 = vld [vmem:[%s18698_s1 + $0x1224] ss:$8 sps:$4 sm:$0xff]   ;;  %v12365_v11 = vld [vmem:[%s18698_s1 + $0x1220] ss:$8 sps:$4 sm:$0xff]  }
   0x5   :  { %5338 = vmatprep.subr.bf16.mxu0 %v12356_v5  ;;  %v12366_v12 = vld [vmem:[%s18698_s1 + $0x434] ss:$8 sps:$4 sm:$0xff]   ;;  %v12370_v14 = vld [vmem:[%s18698_s1 + $0x430] ss:$8 sps:$4 sm:$0xff]   ;;  %v12372_v16 = vld [vmem:[%s18698_s1 + $0x444] ss:$8 sps:$4 sm:$0xff]  }
   0x6   :  { %v12368_v13 = vld [vmem:[%s18698_s1 + $0x1234] ss:$8 sps:$4 sm:$0xff]   ;;  %v12371_v15 = vld [vmem:[%s18698_s1 + $0x1230] ss:$8 sps:$4 sm:$0xff]   ;;  %v12374_v17 = vld [vmem:[%s18698_s1 + $0x1244] ss:$8 sps:$4 sm:$0xff]  }
   0x7   :  { %1119 = vmatpush1.bf16.msra.mxu1 %v12358_v6  ;;  %v12376_v18 = vld [vmem:[%s18698_s1 + $0x440] ss:$8 sps:$4 sm:$0xff]   ;;  %v12378_v20 = vld [vmem:[%s18698_s1 + $0x454] ss:$8 sps:$4 sm:$0xff]   ;;  %v12382_v22 = vld [vmem:[%s18698_s1 + $0x450] ss:$8 sps:$4 sm:$0xff]  }
   0x8   :  { %5339 = vmatpush1.bf16.msra.mxu0 %v12359_v7  ;;  %1120 = vmatprep.subr.bf16.mxu1 %v12360_v8  ;;  %v12377_v19 = vld [vmem:[%s18698_s1 + $0x1240] ss:$8 sps:$4 sm:$0xff]   ;;  %v12380_v21 = vld [vmem:[%s18698_s1 + $0x1254] ss:$8 sps:$4 sm:$0xff]   ;;  %v12383_v23 = vld [vmem:[%s18698_s1 + $0x1250] ss:$8 sps:$4 sm:$0xff]  }
   0x9   :  { %5340 = vmatprep.subr.bf16.mxu0 %v12362_v9  ;;  %v12384_v24 = vld [vmem:[%s18698_s1 + $0x464] ss:$8 sps:$4 sm:$0xff]   ;;  %v12388_v26 = vld [vmem:[%s18698_s1 + $0x460] ss:$8 sps:$4 sm:$0xff]   ;;  %v12390_v28 = vld [vmem:[%s18698_s1 + $0x474] ss:$8 sps:$4 sm:$0xff]  }
   0xa   :  { %v12386_v25 = vld [vmem:[%s18698_s1 + $0x1264] ss:$8 sps:$4 sm:$0xff]   ;;  %v12389_v27 = vld [vmem:[%s18698_s1 + $0x1260] ss:$8 sps:$4 sm:$0xff]   ;;  %v12392_v29 = vld [vmem:[%s18698_s1 + $0x1274] ss:$8 sps:$4 sm:$0xff]  }
   0xb   :  { %1121 = vmatpush1.bf16.msra.mxu1 %v12364_v10  ;;  %v12394_v30 = vld [vmem:[%s18698_s1 + $0x470] ss:$8 sps:$4 sm:$0xff]   ;;  %v12396_v32 = vld [vmem:[%s18698_s1 + $0x484] ss:$8 sps:$4 sm:$0xff]   ;;  %v12400_v34 = vld [vmem:[%s18698_s1 + $0x480] ss:$8 sps:$4 sm:$0xff]  }
   0xc   :  { %5341 = vmatpush1.bf16.msra.mxu0 %v12365_v11  ;;  %1122 = vmatprep.subr.bf16.mxu1 %v12366_v12  ;;  %v12395_v31 = vld [vmem:[%s18698_s1 + $0x1270] ss:$8 sps:$4 sm:$0xff]   ;;  %v12398_v33 = vld [vmem:[%s18698_s1 + $0x1284] ss:$8 sps:$4 sm:$0xff]   ;;  %v12401_v35 = vld [vmem:[%s18698_s1 + $0x1280] ss:$8 sps:$4 sm:$0xff]  }
   0xd   :  { %5342 = vmatprep.subr.bf16.mxu0 %v12368_v13  ;;  %v12402_v36 = vld [vmem:[%s18698_s1 + $0x494] ss:$8 sps:$4 sm:$0xff]   ;;  %v12406_v38 = vld [vmem:[%s18698_s1 + $0x490] ss:$8 sps:$4 sm:$0xff]   ;;  %v12408_v40 = vld [vmem:[%s18698_s1 + $0x4a4] ss:$8 sps:$4 sm:$0xff]  }
   0xe   :  { %v12404_v37 = vld [vmem:[%s18698_s1 + $0x1294] ss:$8 sps:$4 sm:$0xff]   ;;  %v12407_v39 = vld [vmem:[%s18698_s1 + $0x1290] ss:$8 sps:$4 sm:$0xff]   ;;  %v12410_v41 = vld [vmem:[%s18698_s1 + $0x12a4] ss:$8 sps:$4 sm:$0xff]  }
   0xf   :  { %1123 = vmatpush1.bf16.msra.mxu1 %v12370_v14  ;;  %v12412_v42 = vld [vmem:[%s18698_s1 + $0x4a0] ss:$8 sps:$4 sm:$0xff]   ;;  %v12414_v44 = vld [vmem:[%s18698_s1 + $0x4b4] ss:$8 sps:$4 sm:$0xff]   ;;  %v12418_v46 = vld [vmem:[%s18698_s1 + $0x4b0] ss:$8 sps:$4 sm:$0xff]  }
  0x10   :  { %5343 = vmatpush1.bf16.msra.mxu0 %v12371_v15  ;;  %1124 = vmatprep.subr.bf16.mxu1 %v12372_v16  ;;  %v12413_v43 = vld [vmem:[%s18698_s1 + $0x12a0] ss:$8 sps:$4 sm:$0xff]   ;;  %v12416_v45 = vld [vmem:[%s18698_s1 + $0x12b4] ss:$8 sps:$4 sm:$0xff]   ;;  %v12419_v47 = vld [vmem:[%s18698_s1 + $0x12b0] ss:$8 sps:$4 sm:$0xff]  }
  0x11   :  { %5344 = vmatprep.subr.bf16.mxu0 %v12374_v17  ;;  %v14_v48 = vld [vmem:[%s18699_s0] sm:$0xff]  ;;  %v14329_v55 = vld [vmem:[%s18699_s0 + $0x30] sm:$0xff]  ;;  %vm2353_vm4 = vcmask 1046528   ;;  %vm7853_vm5 = vsmask.f32 4352 }
  0x12   :  { %v14310_v49 = vld [vmem:[%s18699_s0 + $0x20] sm:$0xff]  ;;  %v3246_v56 = vld [vmem:[%s18699_s0 + $0x50] sm:$0x77]  ;;  %vm3397_vm6 = vsmask.f32 6400 }
  0x13   :  { %1125 = vmatpush1.bf16.msra.mxu1 %v12376_v18  ;;  %v154_v50 = vld [vmem:[%s18699_s0 + $0x40] sm:$0x33]  ;;  %v14322_v53 = vcombine.high %v14_v48, %v14310_v49  ;;  %v4402_v57 = vld [vmem:[%s18699_s0 + $0x10] sm:$0xcc]  ;;  %v14340_v61 = vcombine.high %v3246_v56, %v3246_v56  ;;  %v14353_v4 = vcombine.low %v14_v48, %v14310_v49 }
  0x14   :  { %5345 = vmatpush1.bf16.msra.mxu0 %v12377_v19  ;;  %1126 = vmatprep.subr.bf16.mxu1 %v12378_v20  ;;  %v12420_v51 = vld [vmem:[%s18698_s1 + $0x4c4] ss:$8 sps:$4 sm:$0xff]   ;;  %v14324_v54 = vcombine.high %v154_v50, %v154_v50  ;;  %v12424_v62 = vld [vmem:[%s18698_s1 + $0x4c0] ss:$8 sps:$4 sm:$0xff]   ;;  %v14349_v0 = vcombine.high %v4402_v57, %v14329_v55  ;;  %v12426_v5 = vld [vmem:[%s18698_s1 + $0x4d4] ss:$8 sps:$4 sm:$0xff]   ;;  %v14372_v13 = vcombine.low %v154_v50, %v154_v50 }
  0x15   :  { %5346 = vmatprep.subr.bf16.mxu0 %v12380_v21  ;;  %v12422_v52 = vld [vmem:[%s18698_s1 + $0x12c4] ss:$8 sps:$4 sm:$0xff]   ;;  %v353_v58 = vshrl.u32 %v14322_v53, 16  ;;  %v355_v59 = vshll.u32 %v14322_v53, 16  ;;  %v12425_v63 = vld [vmem:[%s18698_s1 + $0x12c0] ss:$8 sps:$4 sm:$0xff]  }
  0x16   :  { %v360_v60 = vshll.u32 %v14324_v54, 16  ;;  %v4570_v3 = vrot.slane %v14340_v61, 2  ;;  %v12428_v6 = vld [vmem:[%s18698_s1 + $0x12d4] ss:$8 sps:$4 sm:$0xff]   ;;  %v4569_v7 = vrot.slane %v14349_v0, 2  ;;  %v343_v14 = vshll.u32 %v14353_v4, 16 }
  0x17   :  { %1127 = vmatpush1.bf16.msra.mxu1 %v12382_v22  ;;  %v357_v1 = vrot.slane %v355_v59, 1  ;;  %v12430_v9 = vld [vmem:[%s18698_s1 + $0x4d0] ss:$8 sps:$4 sm:$0xff]   ;;  %v12432_v15 = vld [vmem:[%s18698_s1 + $0x4e4] ss:$8 sps:$4 sm:$0xff]   ;;  %v341_v18 = vshrl.u32 %v14353_v4, 16  ;;  %v14389_v22 = vcombine.low %v3246_v56, %v3246_v56 }
  0x18   :  { %5347 = vmatpush1.bf16.msra.mxu0 %v12383_v23  ;;  %1128 = vmatprep.subr.bf16.mxu1 %v12384_v24  ;;  %v362_v2 = vrot.slane %v360_v60, 1  ;;  %v4571_v10 = vsel %vm4553_vm1, %v4569_v7, %v4570_v3  ;;  %v12431_v11 = vld [vmem:[%s18698_s1 + $0x12d0] ss:$8 sps:$4 sm:$0xff]   ;;  %v12434_v16 = vld [vmem:[%s18698_s1 + $0x12e4] ss:$8 sps:$4 sm:$0xff]   ;;  %v345_v20 = vrot.slane %v343_v14, 1  ;;  %v14392_v23 = vcombine.low %v4402_v57, %v14329_v55 }
  0x19   :  { %5348 = vmatprep.subr.bf16.mxu0 %v12386_v25  ;;  %v358_v8 = vor.u32 %v357_v1, %v353_v58  ;;  %5368 = vmatprep.mubr.bf16.mxu0 %v4571_v10  ;;  %v12436_v17 = vld [vmem:[%s18698_s1 + $0x4e0] ss:$8 sps:$4 sm:$0xff]   ;;  %v348_v21 = vshll.u32 %v14372_v13, 16  ;;  %v12438_v24 = vld [vmem:[%s18698_s1 + $0x4f4] ss:$8 sps:$4 sm:$0xff]  }
  0x1a   :  { %v12437_v19 = vld [vmem:[%s18698_s1 + $0x12e0] ss:$8 sps:$4 sm:$0xff]   ;;  %v12440_v25 = vld [vmem:[%s18698_s1 + $0x12f4] ss:$8 sps:$4 sm:$0xff]   ;;  %v12466_v56 = vld [vmem:[%s18698_s1 + $0x530] ss:$8 sps:$4 sm:$0xff]  }
  0x1b   :  { %1129 = vmatpush1.bf16.msra.mxu1 %v12388_v26  ;;  %v363_v12 = vsel %vm339_vm0, %v358_v8, %v362_v2  ;;  %v12442_v26 = vld [vmem:[%s18698_s1 + $0x4f0] ss:$8 sps:$4 sm:$0xff]   ;;  %v12463_v50 = vld [vmem:[%s18698_s1 + $0x1320] ss:$8 sps:$4 sm:$0xff]   ;;  %v12474_v58 = vld [vmem:[%s18698_s1 + $0x544] ss:$8 sps:$4 sm:$0xff]  }
  0x1c   :  { %5349 = vmatpush1.bf16.msra.mxu0 %v12389_v27  ;;  %1130 = vmatprep.subr.bf16.mxu1 %v12390_v28  ;;  %v12443_v27 = vld [vmem:[%s18698_s1 + $0x12f0] ss:$8 sps:$4 sm:$0xff]   ;;  %v346_v28 = vor.u32 %v345_v20, %v341_v18  ;;  %v12477_v59 = vld [vmem:[%s18698_s1 + $0x1344] ss:$8 sps:$4 sm:$0xff]   ;;  %v12472_v60 = vld [vmem:[%s18698_s1 + $0x540] ss:$8 sps:$4 sm:$0xff]  }
  0x1d   :  { %5350 = vmatprep.subr.bf16.mxu0 %v12392_v29  ;;  %1148 = vmatprep.mubr.bf16.mxu1 %v363_v12  ;;  %v350_v29 = vrot.slane %v348_v21, 1  ;;  %v12469_v57 = vld [vmem:[%s18698_s1 + $0x1330] ss:$8 sps:$4 sm:$0xff]   ;;  %v12483_v1 = vld [vmem:[%s18698_s1 + $0x1354] ss:$8 sps:$4 sm:$0xff]   ;;  %v14512_v12 = vld [vmem:[%s18699_s0 + $0x28] sm:$0xff] }
  0x1e   :  { %v12484_v7 = vld [vmem:[%s18698_s1 + $0x560] ss:$8 sps:$4 sm:$0xff]   ;;  %v12495_v10 = vld [vmem:[%s18698_s1 + $0x1374] ss:$8 sps:$4 sm:$0xff]  }
  0x1f   :  { %1131 = vmatpush1.bf16.msra.mxu1 %v12394_v30  ;;  %v4566_v30 = vrot.slane %v14392_v23, 2  ;;  %v12487_v8 = vld [vmem:[%s18698_s1 + $0x1360] ss:$8 sps:$4 sm:$0xff]   ;;  %v14533_v18 = vld [vmem:[%s18699_s0 + $0x38] sm:$0xff] }
  0x20   :  { %5351 = vmatpush1.bf16.msra.mxu0 %v12395_v31  ;;  %1132 = vmatprep.subr.bf16.mxu1 %v12396_v32  ;;  %v4567_v31 = vrot.slane %v14389_v22, 2  ;;  %v12447_v32 = vld [vmem:[%s18698_s1 + $0x504] ss:$8 sps:$4 sm:$0xff]  }
  0x21   :  { %5352 = vmatprep.subr.bf16.mxu0 %v12398_v33  ;;  %v12451_v33 = vld [vmem:[%s18698_s1 + $0x1304] ss:$8 sps:$4 sm:$0xff]  }
  0x22   :  { %v14517_v14 = vld [vmem:[%s18699_s0 + $0x48] sm:$0x33] }
  0x23   :  { %1133 = vmatpush1.bf16.msra.mxu1 %v12400_v34  ;;  %v439_v34 = vshrl.u32 %v14324_v54, 16 }
  0x24   :  { %5353 = vmatpush1.bf16.msra.mxu0 %v12401_v35  ;;  %1134 = vmatprep.subr.bf16.mxu1 %v12402_v36  ;;  %v12445_v35 = vld [vmem:[%s18698_s1 + $0x500] ss:$8 sps:$4 sm:$0xff]  }
  0x25   :  { %5354 = vmatprep.subr.bf16.mxu0 %v12404_v37  ;;  %v12449_v36 = vld [vmem:[%s18698_s1 + $0x1300] ss:$8 sps:$4 sm:$0xff]   ;;  %v351_v37 = vsel %vm339_vm0, %v346_v28, %v350_v29  ;;  %v12498_v28 = vld [vmem:[%s18698_s1 + $0x584] ss:$8 sps:$4 sm:$0xff]  }
  0x27   :  { %1135 = vmatpush1.bf16.msra.mxu1 %v12406_v38  ;;  %v4568_v38 = vsel %vm4553_vm1, %v4566_v30, %v4567_v31 }
  0x28   :  { %5355 = vmatpush1.bf16.msra.mxu0 %v12407_v39  ;;  %1136 = vmatprep.subr.bf16.mxu1 %v12408_v40  ;;  %v12456_v39 = vld [vmem:[%s18698_s1 + $0x514] ss:$8 sps:$4 sm:$0xff]  }
  0x29   :  { %5356 = vmatprep.subr.bf16.mxu0 %v12410_v41  ;;  %v12459_v40 = vld [vmem:[%s18698_s1 + $0x1314] ss:$8 sps:$4 sm:$0xff]   ;;  %v441_v41 = vor.u32 %v439_v34, %v362_v2  ;;  %v12478_v2 = vld [vmem:[%s18698_s1 + $0x550] ss:$8 sps:$4 sm:$0xff]   ;;  %v12496_v34 = vld [vmem:[%s18698_s1 + $0x580] ss:$8 sps:$4 sm:$0xff]  }
  0x2b   :  { %1137 = vmatpush1.bf16.msra.mxu1 %v12412_v42  ;;  %v12454_v42 = vld [vmem:[%s18698_s1 + $0x510] ss:$8 sps:$4 sm:$0xff]  }
  0x2c   :  { %5357 = vmatpush1.bf16.msra.mxu0 %v12413_v43  ;;  %1138 = vmatprep.subr.bf16.mxu1 %v12414_v44  ;;  %v436_v43 = vshrl.u32 %v14372_v13, 16  ;;  %v12457_v44 = vld [vmem:[%s18698_s1 + $0x1310] ss:$8 sps:$4 sm:$0xff]  }
  0x2d   :  { %5358 = vmatprep.subr.bf16.mxu0 %v12416_v45  ;;  %v12462_v45 = vld [vmem:[%s18698_s1 + $0x524] ss:$8 sps:$4 sm:$0xff]  }
  0x2e   :  { %v438_v48 = vor.u32 %v436_v43, %v350_v29  ;;  %v12501_v29 = vld [vmem:[%s18698_s1 + $0x1384] ss:$8 sps:$4 sm:$0xff]   ;;  %v12505_v43 = vld [vmem:[%s18698_s1 + $0x1390] ss:$8 sps:$4 sm:$0xff]  }
  0x2f   :  { %1139 = vmatpush1.bf16.msra.mxu1 %v12418_v46  ;;  %v12465_v46 = vld [vmem:[%s18698_s1 + $0x1324] ss:$8 sps:$4 sm:$0xff]  }
  0x30   :  { %5359 = vmatpush1.bf16.msra.mxu0 %v12419_v47  ;;  %1140 = vmatprep.subr.bf16.mxu1 %v12420_v51  ;;  %v12460_v47 = vld [vmem:[%s18698_s1 + $0x520] ss:$8 sps:$4 sm:$0xff]   ;;  %v12468_v51 = vld [vmem:[%s18698_s1 + $0x534] ss:$8 sps:$4 sm:$0xff]  }
  0x31   :  { %5360 = vmatprep.subr.bf16.mxu0 %v12422_v52  ;;  %v12471_v52 = vld [vmem:[%s18698_s1 + $0x1334] ss:$8 sps:$4 sm:$0xff]  }
  0x33   :  { %1141 = vmatpush1.bf16.msra.mxu1 %v12424_v62  ;;  %v12475_v62 = vld [vmem:[%s18698_s1 + $0x1340] ss:$8 sps:$4 sm:$0xff]  }
  0x34   :  { %5361 = vmatpush1.bf16.msra.mxu0 %v12425_v63  ;;  %1142 = vmatprep.subr.bf16.mxu1 %v12426_v5  ;;  %v12480_v63 = vld [vmem:[%s18698_s1 + $0x554] ss:$8 sps:$4 sm:$0xff]   ;;  %v12486_v5 = vld [vmem:[%s18698_s1 + $0x564] ss:$8 sps:$4 sm:$0xff]  }
  0x35   :  { %5362 = vmatprep.subr.bf16.mxu0 %v12428_v6  ;;  %v12489_v6 = vld [vmem:[%s18698_s1 + $0x1364] ss:$8 sps:$4 sm:$0xff]  }
  0x37   :  { %1143 = vmatpush1.bf16.msra.mxu1 %v12430_v9  ;;  %v12492_v9 = vld [vmem:[%s18698_s1 + $0x574] ss:$8 sps:$4 sm:$0xff]  }
  0x38   :  { %5363 = vmatpush1.bf16.msra.mxu0 %v12431_v11  ;;  %1144 = vmatprep.subr.bf16.mxu1 %v12432_v15  ;;  %v14507_v11 = vld [vmem:[%s18699_s0 + $0x8] sm:$0xff] }
  0x39   :  { %5364 = vmatprep.subr.bf16.mxu0 %v12434_v16  ;;  %v14521_v15 = vcombine.high %v14507_v11, %v14512_v12  ;;  %v12490_v16 = vld [vmem:[%s18698_s1 + $0x570] ss:$8 sps:$4 sm:$0xff]  }
  0x3b   :  { %1145 = vmatpush1.bf16.msra.mxu1 %v12436_v17  ;;  %v14528_v17 = vcombine.high %v14517_v14, %v14517_v14  ;;  %v377_v20 = vshrl.u32 %v14521_v15, 16  ;;  %v379_v21 = vshll.u32 %v14521_v15, 16 }
  0x3c   :  { %5365 = vmatpush1.bf16.msra.mxu0 %v12437_v19  ;;  %1146 = vmatprep.subr.bf16.mxu1 %v12438_v24  ;;  %v12493_v19 = vld [vmem:[%s18698_s1 + $0x1370] ss:$8 sps:$4 sm:$0xff]  }
  0x3d   :  { %5366 = vmatprep.subr.bf16.mxu0 %v12440_v25  ;;  %v14543_v24 = vld [vmem:[%s18699_s0 + $0x58] sm:$0x77]  ;;  %v384_v25 = vshll.u32 %v14528_v17, 16  ;;  %v381_v30 = vrot.slane %v379_v21, 1 }
  0x3e   :  { %v12543_v21 = vld [vmem:[%s18698_s1 + $0x13f4] ss:$8 sps:$4 sm:$0xff]  }
  0x3f   :  { %1147 = vmatpush1.bf16.msra.mxu1 %v12442_v26  ;;  %v14548_v26 = vcombine.high %v14543_v24, %v14543_v24 }
  0x40   :  { %5367 = vmatpush1.bf16.msra.mxu0 %v12443_v27  ;;  %1167 = vmatprep.subr.bf16.mxu1 %v12447_v32  ;;  %v14553_v27 = vld [vmem:[%s18699_s0 + $0x18] sm:$0xcc]  ;;  %v14565_v32 = vrot.slane %v384_v25, 1 }
  0x41   :  { %5387 = vmatprep.subr.bf16.mxu0 %v12451_v33  ;;  %v4576_v33 = vrot.slane %v14548_v26, 2  ;;  %v12538_v25 = vld [vmem:[%s18698_s1 + $0x5f0] ss:$8 sps:$4 sm:$0xff]  }
  0x42   :  { %1149 = vmatmul.mubr.bf16.vlgmr.msra.gmra.mrb[0].mxu1 %v351_v37 }
  0x43   :  { %5369 = vmatmul.mubr.bf16.vlgmr.msra.gmra.mrb[0].mxu0 %v4568_v38  ;;  %1168 = vmatpush1.bf16.msra.mxu1 %v12445_v35  ;;  %v12499_v35 = vld [vmem:[%s18698_s1 + $0x1380] ss:$8 sps:$4 sm:$0xff]   ;;  %v12504_v38 = vld [vmem:[%s18698_s1 + $0x594] ss:$8 sps:$4 sm:$0xff]  }
  0x44   :  { %5388 = vmatpush1.bf16.msra.mxu0 %v12449_v36  ;;  %1169 = vmatprep.subr.bf16.mxu1 %v12456_v39  ;;  %v382_v36 = vor.u32 %v381_v30, %v377_v20  ;;  %v12507_v39 = vld [vmem:[%s18698_s1 + $0x1394] ss:$8 sps:$4 sm:$0xff]   ;;  %v14672_v20 = vcombine.low %v14553_v27, %v14533_v18 }
  0x45   :  { %5389 = vmatprep.subr.bf16.mxu0 %v12459_v40  ;;  %1158 = vmatprep.mubr.bf16.mxu1 %v441_v41 }
  0x46   :  { %5378 = vmatprep.mubr.bf16.mxu0 %v4570_v3  ;;  %v12481_v3 = vld [vmem:[%s18698_s1 + $0x1350] ss:$8 sps:$4 sm:$0xff]   ;;  %v387_v40 = vsel %vm339_vm0, %v382_v36, %v14565_v32  ;;  %v4572_v30 = vrot.slane %v14672_v20, 2  ;;  %v445_v36 = vshrl.u32 %v14528_v17, 16 }
  0x47   :  { %1170 = vmatpush1.bf16.msra.mxu1 %v12454_v42  ;;  %v12502_v42 = vld [vmem:[%s18698_s1 + $0x590] ss:$8 sps:$4 sm:$0xff]  }
  0x48   :  { %5390 = vmatpush1.bf16.msra.mxu0 %v12457_v44  ;;  %1171 = vmatprep.subr.bf16.mxu1 %v12462_v45  ;;  %v12510_v44 = vld [vmem:[%s18698_s1 + $0x5a4] ss:$8 sps:$4 sm:$0xff]  }
  0x49   :  { %5391 = vmatprep.subr.bf16.mxu0 %v12465_v46  ;;  %v12513_v45 = vld [vmem:[%s18698_s1 + $0x13a4] ss:$8 sps:$4 sm:$0xff]   ;;  %v12508_v46 = vld [vmem:[%s18698_s1 + $0x5a0] ss:$8 sps:$4 sm:$0xff]  }
  0x4a   :  { %1159 = vmatmul.mubr.bf16.gmra.mrb[4].mxu1 %v438_v48  ;;  %v12516_v48 = vld [vmem:[%s18698_s1 + $0x5b4] ss:$8 sps:$4 sm:$0xff]  }
  0x4b   :  { %5379 = vmatmul.mubr.bf16.gmra.mrb[4].mxu0 %v4567_v31  ;;  %1172 = vmatpush1.bf16.msra.mxu1 %v12460_v47  ;;  %v14563_v31 = vcombine.high %v14553_v27, %v14533_v18  ;;  %v12511_v47 = vld [vmem:[%s18698_s1 + $0x13a0] ss:$8 sps:$4 sm:$0xff]  }
  0x4c   :  { %5392 = vmatpush1.bf16.msra.mxu0 %v12463_v50  ;;  %1173 = vmatprep.subr.bf16.mxu1 %v12468_v51  ;;  %v12519_v50 = vld [vmem:[%s18698_s1 + $0x13b4] ss:$8 sps:$4 sm:$0xff]   ;;  %v12514_v51 = vld [vmem:[%s18698_s1 + $0x5b0] ss:$8 sps:$4 sm:$0xff]  }
  0x4d   :  { %5393 = vmatprep.subr.bf16.mxu0 %v12471_v52  ;;  %v4575_v37 = vrot.slane %v14563_v31, 2  ;;  %1199 = vmatprep.mubr.bf16.mxu1 %v387_v40  ;;  %v12517_v52 = vld [vmem:[%s18698_s1 + $0x13b0] ss:$8 sps:$4 sm:$0xff]  }
  0x4f   :  { %1174 = vmatpush1.bf16.msra.mxu1 %v12466_v56  ;;  %v4577_v41 = vsel %vm4553_vm1, %v4575_v37, %v4576_v33  ;;  %v12522_v56 = vld [vmem:[%s18698_s1 + $0x5c4] ss:$8 sps:$4 sm:$0xff]   ;;  %v12546_v37 = vld [vmem:[%s18698_s1 + $0x600] ss:$8 sps:$4 sm:$0xff]  }
  0x50   :  { %5394 = vmatpush1.bf16.msra.mxu0 %v12469_v57  ;;  %1175 = vmatprep.subr.bf16.mxu1 %v12474_v58  ;;  %v12525_v57 = vld [vmem:[%s18698_s1 + $0x13c4] ss:$8 sps:$4 sm:$0xff]   ;;  %v12520_v58 = vld [vmem:[%s18698_s1 + $0x5c0] ss:$8 sps:$4 sm:$0xff]  }
  0x51   :  { %5395 = vmatprep.subr.bf16.mxu0 %v12477_v59  ;;  %5419 = vmatprep.mubr.bf16.mxu0 %v4577_v41  ;;  %v12523_v59 = vld [vmem:[%s18698_s1 + $0x13c0] ss:$8 sps:$4 sm:$0xff]   ;;  %v12556_v41 = vld [vmem:[%s18698_s1 + $0x614] ss:$8 sps:$4 sm:$0xff]  }
  0x53   :  { %1176 = vmatpush1.bf16.msra.mxu1 %v12472_v60  ;;  %v12528_v60 = vld [vmem:[%s18698_s1 + $0x5d4] ss:$8 sps:$4 sm:$0xff]  }
  0x54   :  { %5396 = vmatpush1.bf16.msra.mxu0 %v12475_v62  ;;  %1177 = vmatprep.subr.bf16.mxu1 %v12480_v63  ;;  %v14633_v62 = vcombine.low %v14507_v11, %v14512_v12  ;;  %v12531_v63 = vld [vmem:[%s18698_s1 + $0x13d4] ss:$8 sps:$4 sm:$0xff]  }
  0x55   :  { %5397 = vmatprep.subr.bf16.mxu0 %v12483_v1  ;;  %v12526_v1 = vld [vmem:[%s18698_s1 + $0x5d0] ss:$8 sps:$4 sm:$0xff]   ;;  %v12540_v11 = vld [vmem:[%s18698_s1 + $0x5f4] ss:$8 sps:$4 sm:$0xff]  }
  0x57   :  { %1178 = vmatpush1.bf16.msra.mxu1 %v12478_v2  ;;  %v12529_v2 = vld [vmem:[%s18698_s1 + $0x13d0] ss:$8 sps:$4 sm:$0xff]  }
  0x58   :  { %5398 = vmatpush1.bf16.msra.mxu0 %v12481_v3  ;;  %1179 = vmatprep.subr.bf16.mxu1 %v12486_v5  ;;  %v12534_v3 = vld [vmem:[%s18698_s1 + $0x5e4] ss:$8 sps:$4 sm:$0xff]   ;;  %v14649_v5 = vcombine.low %v14517_v14, %v14517_v14 }
  0x59   :  { %5399 = vmatprep.subr.bf16.mxu0 %v12489_v6  ;;  %v367_v6 = vshll.u32 %v14633_v62, 16 }
  0x5b   :  { %1180 = vmatpush1.bf16.msra.mxu1 %v12484_v7  ;;  %v12537_v7 = vld [vmem:[%s18698_s1 + $0x13e4] ss:$8 sps:$4 sm:$0xff]   ;;  %v369_v14 = vrot.slane %v367_v6, 1 }
  0x5c   :  { %5400 = vmatpush1.bf16.msra.mxu0 %v12487_v8  ;;  %1181 = vmatprep.subr.bf16.mxu1 %v12492_v9  ;;  %v12532_v8 = vld [vmem:[%s18698_s1 + $0x5e0] ss:$8 sps:$4 sm:$0xff]  }
  0x5d   :  { %5401 = vmatprep.subr.bf16.mxu0 %v12495_v10  ;;  %v12535_v9 = vld [vmem:[%s18698_s1 + $0x13e0] ss:$8 sps:$4 sm:$0xff]   ;;  %v365_v10 = vshrl.u32 %v14633_v62, 16 }
  0x5f   :  { %1182 = vmatpush1.bf16.msra.mxu1 %v12490_v16  ;;  %v372_v16 = vshll.u32 %v14649_v5, 16  ;;  %v370_v27 = vor.u32 %v369_v14, %v365_v10  ;;  %v12574_v10 = vld [vmem:[%s18698_s1 + $0x644] ss:$8 sps:$4 sm:$0xff]  }
  0x60   :  { %5402 = vmatpush1.bf16.msra.mxu0 %v12493_v19  ;;  %1183 = vmatprep.subr.bf16.mxu1 %v12498_v28  ;;  %v14668_v19 = vcombine.low %v14543_v24, %v14543_v24  ;;  %v12541_v28 = vld [vmem:[%s18698_s1 + $0x13f0] ss:$8 sps:$4 sm:$0xff]   ;;  %v12548_v24 = vld [vmem:[%s18698_s1 + $0x604] ss:$8 sps:$4 sm:$0xff]  }
  0x61   :  { %5403 = vmatprep.subr.bf16.mxu0 %v12501_v29  ;;  %v374_v29 = vrot.slane %v372_v16, 1  ;;  %v12577_v16 = vld [vmem:[%s18698_s1 + $0x1444] ss:$8 sps:$4 sm:$0xff]  }
  0x63   :  { %1184 = vmatpush1.bf16.msra.mxu1 %v12496_v34  ;;  %v4573_v34 = vrot.slane %v14668_v19, 2 }
  0x64   :  { %5404 = vmatpush1.bf16.msra.mxu0 %v12499_v35  ;;  %1185 = vmatprep.subr.bf16.mxu1 %v12504_v38  ;;  %v12553_v35 = vld [vmem:[%s18698_s1 + $0x1404] ss:$8 sps:$4 sm:$0xff]   ;;  %v12551_v38 = vld [vmem:[%s18698_s1 + $0x1400] ss:$8 sps:$4 sm:$0xff]  }
  0x65   :  { %5405 = vmatprep.subr.bf16.mxu0 %v12507_v39  ;;  %v375_v39 = vsel %vm339_vm0, %v370_v27, %v374_v29  ;;  %v4574_v40 = vsel %vm4553_vm1, %v4572_v30, %v4573_v34 }
  0x67   :  { %1186 = vmatpush1.bf16.msra.mxu1 %v12502_v42  ;;  %v12559_v42 = vld [vmem:[%s18698_s1 + $0x1414] ss:$8 sps:$4 sm:$0xff]  }
  0x68   :  { %5406 = vmatpush1.bf16.msra.mxu0 %v12505_v43  ;;  %1187 = vmatprep.subr.bf16.mxu1 %v12510_v44  ;;  %v447_v43 = vor.u32 %v445_v36, %v14565_v32  ;;  %v12554_v44 = vld [vmem:[%s18698_s1 + $0x610] ss:$8 sps:$4 sm:$0xff]   ;;  %v12565_v32 = vld [vmem:[%s18698_s1 + $0x1424] ss:$8 sps:$4 sm:$0xff]   ;;  %v12575_v36 = vld [vmem:[%s18698_s1 + $0x1440] ss:$8 sps:$4 sm:$0xff]  }
  0x69   :  { %5407 = vmatprep.subr.bf16.mxu0 %v12513_v45  ;;  %v12557_v45 = vld [vmem:[%s18698_s1 + $0x1410] ss:$8 sps:$4 sm:$0xff]  }
  0x6b   :  { %1188 = vmatpush1.bf16.msra.mxu1 %v12508_v46  ;;  %v442_v46 = vshrl.u32 %v14649_v5, 16 }
  0x6c   :  { %5408 = vmatpush1.bf16.msra.mxu0 %v12511_v47  ;;  %1189 = vmatprep.subr.bf16.mxu1 %v12516_v48  ;;  %v12562_v47 = vld [vmem:[%s18698_s1 + $0x624] ss:$8 sps:$4 sm:$0xff]   ;;  %v12560_v48 = vld [vmem:[%s18698_s1 + $0x620] ss:$8 sps:$4 sm:$0xff]  }
  0x6d   :  { %5409 = vmatprep.subr.bf16.mxu0 %v12519_v50  ;;  %v14728_v50 = vld [vmem:[%s18699_s0 + $0x10] sm:$0xff] }
  0x6f   :  { %1190 = vmatpush1.bf16.msra.mxu1 %v12514_v51  ;;  %v444_v51 = vor.u32 %v442_v46, %v374_v29  ;;  %v12584_v46 = vld [vmem:[%s18698_s1 + $0x660] ss:$8 sps:$4 sm:$0xff]  }
  0x70   :  { %5410 = vmatpush1.bf16.msra.mxu0 %v12517_v52  ;;  %1191 = vmatprep.subr.bf16.mxu1 %v12522_v56  ;;  %v14733_v52 = vld [vmem:[%s18699_s0 + $0x50] sm:$0x33]  ;;  %v14737_v56 = vcombine.high %v14728_v50, %v14329_v55 }
  0x71   :  { %5411 = vmatprep.subr.bf16.mxu0 %v12525_v57  ;;  %v12568_v57 = vld [vmem:[%s18698_s1 + $0x634] ss:$8 sps:$4 sm:$0xff]  }
  0x72   :  { %v12571_v55 = vld [vmem:[%s18698_s1 + $0x1434] ss:$8 sps:$4 sm:$0xff]  }
  0x73   :  { %1192 = vmatpush1.bf16.msra.mxu1 %v12520_v58  ;;  %v14747_v58 = vcombine.high %v14733_v52, %v14733_v52 }
  0x74   :  { %5412 = vmatpush1.bf16.msra.mxu0 %v12523_v59  ;;  %1193 = vmatprep.subr.bf16.mxu1 %v12528_v60  ;;  %v14752_v59 = vld [vmem:[%s18699_s0] sm:$0xcc]  ;;  %v401_v60 = vshrl.u32 %v14737_v56, 16 }
  0x75   :  { %5413 = vmatprep.subr.bf16.mxu0 %v12531_v63  ;;  %v403_v63 = vshll.u32 %v14737_v56, 16  ;;  %v14770_v6 = vcombine.high %v14752_v59, %v14310_v49 }
  0x77   :  { %1194 = vmatpush1.bf16.msra.mxu1 %v12526_v1  ;;  %v14762_v1 = vld [vmem:[%s18699_s0 + $0x40] sm:$0xff]  ;;  %v5616_v49 = vshrl.u32 %v14770_v6, 16  ;;  %v5619_v14 = vshll.u32 %v14770_v6, 16 }
  0x78   :  { %5414 = vmatpush1.bf16.msra.mxu0 %v12529_v2  ;;  %1195 = vmatprep.subr.bf16.mxu1 %v12534_v3  ;;  %v12566_v2 = vld [vmem:[%s18698_s1 + $0x630] ss:$8 sps:$4 sm:$0xff]   ;;  %v408_v3 = vshll.u32 %v14747_v58, 16 }
  0x79   :  { %5415 = vmatprep.subr.bf16.mxu0 %v12537_v7  ;;  %v12569_v7 = vld [vmem:[%s18698_s1 + $0x1430] ss:$8 sps:$4 sm:$0xff]   ;;  %v5621_v27 = vrot.slane %v5619_v14, 3  ;;  %v12608_v14 = vld [vmem:[%s18698_s1 + $0x6a0] ss:$8 sps:$4 sm:$0xff]  }
  0x7b   :  { %1196 = vmatpush1.bf16.msra.mxu1 %v12532_v8  ;;  %v405_v8 = vrot.slane %v403_v63, 1  ;;  %v12599_v63 = vld [vmem:[%s18698_s1 + $0x1480] ss:$8 sps:$4 sm:$0xff]  }
  0x7c   :  { %5416 = vmatpush1.bf16.msra.mxu0 %v12535_v9  ;;  %1197 = vmatprep.subr.bf16.mxu1 %v12540_v11  ;;  %v14777_v9 = vcombine.high %v14762_v1, %v14762_v1  ;;  %v14782_v11 = vrot.slane %v408_v3, 1  ;;  %v12607_v3 = vld [vmem:[%s18698_s1 + $0x1494] ss:$8 sps:$4 sm:$0xff]  }
  0x7d   :  { %5417 = vmatprep.subr.bf16.mxu0 %v12543_v21  ;;  %v406_v21 = vor.u32 %v405_v8, %v401_v60  ;;  %v12596_v60 = vld [vmem:[%s18698_s1 + $0x680] ss:$8 sps:$4 sm:$0xff]   ;;  %v12605_v8 = vld [vmem:[%s18698_s1 + $0x1490] ss:$8 sps:$4 sm:$0xff]  }
  0x7f   :  { %1198 = vmatpush1.bf16.msra.mxu1 %v12538_v25  ;;  %v5624_v25 = vshrl.u32 %v14777_v9, 16  ;;  %v411_v29 = vsel %vm339_vm0, %v406_v21, %v14782_v11  ;;  %v12616_v21 = vld [vmem:[%s18698_s1 + $0x6b4] ss:$8 sps:$4 sm:$0xff]  }
  0x80   :  { %5418 = vmatpush1.bf16.msra.mxu0 %v12541_v28  ;;  %1218 = vmatprep.subr.bf16.mxu1 %v12548_v24  ;;  %v5627_v28 = vshll.u32 %v14777_v9, 16  ;;  %v5618_v24 = vrot.slane %v5616_v49, 2  ;;  %v12613_v49 = vld [vmem:[%s18698_s1 + $0x14a4] ss:$8 sps:$4 sm:$0xff]  }
  0x81   :  { %6390 = vmatprep.subr.bf16.mxu0 %v12553_v35  ;;  %v5626_v30 = vrot.slane %v5624_v25, 2  ;;  %v12572_v35 = vld [vmem:[%s18698_s1 + $0x640] ss:$8 sps:$4 sm:$0xff]   ;;  %v12619_v25 = vld [vmem:[%s18698_s1 + $0x14b4] ss:$8 sps:$4 sm:$0xff]  }
  0x82   :  { %1200 = vmatmul.mubr.bf16.vlgmr.msra.gmra.mrb[0].mxu1 %v375_v39  ;;  %v12583_v39 = vld [vmem:[%s18698_s1 + $0x1454] ss:$8 sps:$4 sm:$0xff]  }
  0x83   :  { %5420 = vmatmul.mubr.bf16.vlgmr.msra.gmra.mrb[0].mxu0 %v4574_v40  ;;  %1219 = vmatpush1.bf16.msra.mxu1 %v12546_v37  ;;  %v5622_v37 = vor.u32 %v5621_v27, %v5618_v24  ;;  %v12617_v24 = vld [vmem:[%s18698_s1 + $0x14b0] ss:$8 sps:$4 sm:$0xff]   ;;  %v12622_v27 = vld [vmem:[%s18698_s1 + $0x6c4] ss:$8 sps:$4 sm:$0xff]  }
  0x84   :  { %6391 = vmatpush1.bf16.msra.mxu0 %v12551_v38  ;;  %1220 = vmatprep.subr.bf16.mxu1 %v12556_v41  ;;  %v12580_v38 = vld [vmem:[%s18698_s1 + $0x654] ss:$8 sps:$4 sm:$0xff]   ;;  %v12578_v41 = vld [vmem:[%s18698_s1 + $0x650] ss:$8 sps:$4 sm:$0xff]  }
  0x85   :  { %6392 = vmatprep.subr.bf16.mxu0 %v12559_v42  ;;  %1209 = vmatprep.mubr.bf16.mxu1 %v447_v43  ;;  %v12581_v43 = vld [vmem:[%s18698_s1 + $0x1450] ss:$8 sps:$4 sm:$0xff]  }
  0x86   :  { %5429 = vmatprep.mubr.bf16.mxu0 %v4576_v33  ;;  %v12563_v33 = vld [vmem:[%s18698_s1 + $0x1420] ss:$8 sps:$4 sm:$0xff]  }
  0x87   :  { %1221 = vmatpush1.bf16.msra.mxu1 %v12554_v44  ;;  %v12586_v44 = vld [vmem:[%s18698_s1 + $0x664] ss:$8 sps:$4 sm:$0xff]  }
  0x88   :  { %6393 = vmatpush1.bf16.msra.mxu0 %v12557_v45  ;;  %1222 = vmatprep.subr.bf16.mxu1 %v12562_v47  ;;  %v12589_v45 = vld [vmem:[%s18698_s1 + $0x1464] ss:$8 sps:$4 sm:$0xff]   ;;  %v12587_v47 = vld [vmem:[%s18698_s1 + $0x1460] ss:$8 sps:$4 sm:$0xff]  }
  0x89   :  { %6394 = vmatprep.subr.bf16.mxu0 %v12565_v32  ;;  %v12592_v32 = vld [vmem:[%s18698_s1 + $0x674] ss:$8 sps:$4 sm:$0xff]  }
  0x8a   :  { %1210 = vmatmul.mubr.bf16.gmra.mrb[8].mxu1 %v444_v51  ;;  %v12590_v51 = vld [vmem:[%s18698_s1 + $0x670] ss:$8 sps:$4 sm:$0xff]  }
  0x8b   :  { %5430 = vmatmul.mubr.bf16.gmra.mrb[8].mxu0 %v4573_v34  ;;  %1223 = vmatpush1.bf16.msra.mxu1 %v12560_v48  ;;  %v5629_v34 = vrot.slane %v5627_v28, 3  ;;  %v12595_v48 = vld [vmem:[%s18698_s1 + $0x1474] ss:$8 sps:$4 sm:$0xff]   ;;  %v12614_v28 = vld [vmem:[%s18698_s1 + $0x6b0] ss:$8 sps:$4 sm:$0xff]  }
  0x8c   :  { %6395 = vmatpush1.bf16.msra.mxu0 %v12563_v33  ;;  %1224 = vmatprep.subr.bf16.mxu1 %v12568_v57  ;;  %v12593_v33 = vld [vmem:[%s18698_s1 + $0x1470] ss:$8 sps:$4 sm:$0xff]   ;;  %v12598_v57 = vld [vmem:[%s18698_s1 + $0x684] ss:$8 sps:$4 sm:$0xff]  }
  0x8d   :  { %6396 = vmatprep.subr.bf16.mxu0 %v12571_v55  ;;  %v14805_v40 = vor.u32 %v5629_v34, %v5626_v30  ;;  %1250 = vmatprep.mubr.bf16.mxu1 %v411_v29  ;;  %v12601_v55 = vld [vmem:[%s18698_s1 + $0x1484] ss:$8 sps:$4 sm:$0xff]   ;;  %v12620_v30 = vld [vmem:[%s18698_s1 + $0x6c0] ss:$8 sps:$4 sm:$0xff]   ;;  %v14116_v34 = vld [vmem:[%s18699_s0 + $0x30] sm:$0xff] }
  0x8e   :  { %v12625_v29 = vld [vmem:[%s18698_s1 + $0x14c4] ss:$8 sps:$4 sm:$0xff]  }
  0x8f   :  { %1225 = vmatpush1.bf16.msra.mxu1 %v12566_v2  ;;  %v5631_v42 = vsel %vm5597_vm2, %v5622_v37, %v14805_v40  ;;  %v12604_v2 = vld [vmem:[%s18698_s1 + $0x694] ss:$8 sps:$4 sm:$0xff]  }
  0x90   :  { %6397 = vmatpush1.bf16.msra.mxu0 %v12569_v7  ;;  %1226 = vmatprep.subr.bf16.mxu1 %v12574_v10  ;;  %v12602_v7 = vld [vmem:[%s18698_s1 + $0x690] ss:$8 sps:$4 sm:$0xff]   ;;  %v12610_v10 = vld [vmem:[%s18698_s1 + $0x6a4] ss:$8 sps:$4 sm:$0xff]  }
  0x91   :  { %6398 = vmatprep.subr.bf16.mxu0 %v12577_v16  ;;  %6422 = vmatprep.mubr.bf16.mxu0 %v5631_v42  ;;  %v12611_v16 = vld [vmem:[%s18698_s1 + $0x14a0] ss:$8 sps:$4 sm:$0xff]   ;;  %v12626_v42 = vld [vmem:[%s18698_s1 + $0x6d0] ss:$8 sps:$4 sm:$0xff]  }
  0x93   :  { %1227 = vmatpush1.bf16.msra.mxu1 %v12572_v35  ;;  %v14900_v35 = vcombine.low %v14728_v50, %v14116_v34  ;;  %v14916_v50 = vcombine.low %v14762_v1, %v14762_v1  ;;  %v12629_v1 = vld [vmem:[%s18698_s1 + $0x14d0] ss:$8 sps:$4 sm:$0xff]  }
  0x94   :  { %6399 = vmatpush1.bf16.msra.mxu0 %v12575_v36  ;;  %1228 = vmatprep.subr.bf16.mxu1 %v12580_v38  ;;  %v14117_v36 = vld [vmem:[%s18699_s0 + $0x20] sm:$0xff] }
  0x95   :  { %6400 = vmatprep.subr.bf16.mxu0 %v12583_v39  ;;  %v14906_v37 = vcombine.low %v14752_v59, %v14117_v36  ;;  %v12623_v38 = vld [vmem:[%s18698_s1 + $0x14c0] ss:$8 sps:$4 sm:$0xff]   ;;  %v12628_v39 = vld [vmem:[%s18698_s1 + $0x6d4] ss:$8 sps:$4 sm:$0xff]   ;;  %v12653_v36 = vld [vmem:[%s18698_s1 + $0x1504] ss:$8 sps:$4 sm:$0xff]  }
  0x96   :  { %v12631_v59 = vld [vmem:[%s18698_s1 + $0x14d4] ss:$8 sps:$4 sm:$0xff]  }
  0x97   :  { %1229 = vmatpush1.bf16.msra.mxu1 %v12578_v41  ;;  %v14923_v41 = vcombine.low %v14733_v52, %v14733_v52  ;;  %v5610_v52 = vshll.u32 %v14916_v50, 16 }
  0x98   :  { %6401 = vmatpush1.bf16.msra.mxu0 %v12581_v43  ;;  %1230 = vmatprep.subr.bf16.mxu1 %v12586_v44  ;;  %v391_v43 = vshll.u32 %v14900_v35, 16  ;;  %v5599_v44 = vshrl.u32 %v14906_v37, 16 }
  0x99   :  { %6402 = vmatprep.subr.bf16.mxu0 %v12589_v45  ;;  %v5602_v45 = vshll.u32 %v14906_v37, 16 }
  0x9b   :  { %1231 = vmatpush1.bf16.msra.mxu1 %v12584_v46  ;;  %v5607_v46 = vshrl.u32 %v14916_v50, 16 }
  0x9c   :  { %6403 = vmatpush1.bf16.msra.mxu0 %v12587_v47  ;;  %1232 = vmatprep.subr.bf16.mxu1 %v12592_v32  ;;  %v12634_v47 = vld [vmem:[%s18698_s1 + $0x6e4] ss:$8 sps:$4 sm:$0xff]  }
  0x9d   :  { %6404 = vmatprep.subr.bf16.mxu0 %v12595_v48  ;;  %v12637_v32 = vld [vmem:[%s18698_s1 + $0x14e4] ss:$8 sps:$4 sm:$0xff]   ;;  %v12632_v48 = vld [vmem:[%s18698_s1 + $0x6e0] ss:$8 sps:$4 sm:$0xff]  }
  0x9f   :  { %1233 = vmatpush1.bf16.msra.mxu1 %v12590_v51  ;;  %v12635_v51 = vld [vmem:[%s18698_s1 + $0x14e0] ss:$8 sps:$4 sm:$0xff]  }
  0xa0   :  { %6405 = vmatpush1.bf16.msra.mxu0 %v12593_v33  ;;  %1234 = vmatprep.subr.bf16.mxu1 %v12598_v57  ;;  %v389_v33 = vshrl.u32 %v14900_v35, 16  ;;  %v396_v57 = vshll.u32 %v14923_v41, 16 }
  0xa1   :  { %6406 = vmatprep.subr.bf16.mxu0 %v12601_v55  ;;  %v393_v55 = vrot.slane %v391_v43, 1 }
  0xa3   :  { %1235 = vmatpush1.bf16.msra.mxu1 %v12596_v60  ;;  %v5601_v60 = vrot.slane %v5599_v44, 2 }
  0xa4   :  { %6407 = vmatpush1.bf16.msra.mxu0 %v12599_v63  ;;  %1236 = vmatprep.subr.bf16.mxu1 %v12604_v2  ;;  %v14953_v63 = vld [vmem:[%s18699_s0 + $0x18] sm:$0xff]  ;;  %v14958_v2 = vld [vmem:[%s18699_s0 + $0x8] sm:$0xcc] }
  0xa5   :  { %6408 = vmatprep.subr.bf16.mxu0 %v12607_v3  ;;  %v5604_v3 = vrot.slane %v5602_v45, 3 }
  0xa7   :  { %1237 = vmatpush1.bf16.msra.mxu1 %v12602_v7  ;;  %v5609_v7 = vrot.slane %v5607_v46, 2 }
  0xa8   :  { %6409 = vmatpush1.bf16.msra.mxu0 %v12605_v8  ;;  %1238 = vmatprep.subr.bf16.mxu1 %v12610_v10  ;;  %v5612_v8 = vrot.slane %v5610_v52, 3  ;;  %v14963_v10 = vld [vmem:[%s18699_s0 + $0x48] sm:$0xff] }
  0xa9   :  { %6410 = vmatprep.subr.bf16.mxu0 %v12613_v49  ;;  %v12640_v49 = vld [vmem:[%s18698_s1 + $0x6f4] ss:$8 sps:$4 sm:$0xff]   ;;  %v12651_v52 = vld [vmem:[%s18698_s1 + $0x1500] ss:$8 sps:$4 sm:$0xff]  }
  0xaa   :  { %v5613_v34 = vor.u32 %v5612_v8, %v5609_v7 }
  0xab   :  { %1239 = vmatpush1.bf16.msra.mxu1 %v12608_v14  ;;  %v12643_v14 = vld [vmem:[%s18698_s1 + $0x14f4] ss:$8 sps:$4 sm:$0xff]  }
  0xac   :  { %6411 = vmatpush1.bf16.msra.mxu0 %v12611_v16  ;;  %1240 = vmatprep.subr.bf16.mxu1 %v12616_v21  ;;  %v14973_v16 = vcombine.high %v14953_v63, %v14533_v18  ;;  %v14978_v21 = vld [vmem:[%s18699_s0 + $0x58] sm:$0x33] }
  0xad   :  { %6412 = vmatprep.subr.bf16.mxu0 %v12619_v25  ;;  %v14982_v25 = vcombine.high %v14958_v2, %v14512_v12  ;;  %v12638_v18 = vld [vmem:[%s18698_s1 + $0x6f0] ss:$8 sps:$4 sm:$0xff]   ;;  %v12648_v12 = vld [vmem:[%s18698_s1 + $0x704] ss:$8 sps:$4 sm:$0xff]  }
  0xaf   :  { %1241 = vmatpush1.bf16.msra.mxu1 %v12614_v28  ;;  %v14986_v28 = vcombine.high %v14963_v10, %v14963_v10  ;;  %v5650_v43 = vshrl.u32 %v14982_v25, 16  ;;  %v5653_v44 = vshll.u32 %v14982_v25, 16 }
  0xb0   :  { %6413 = vmatpush1.bf16.msra.mxu0 %v12617_v24  ;;  %1242 = vmatprep.subr.bf16.mxu1 %v12622_v27  ;;  %v12641_v24 = vld [vmem:[%s18698_s1 + $0x14f0] ss:$8 sps:$4 sm:$0xff]   ;;  %v394_v27 = vor.u32 %v393_v55, %v389_v33 }
  0xb1   :  { %6414 = vmatprep.subr.bf16.mxu0 %v12625_v29  ;;  %v398_v29 = vrot.slane %v396_v57, 1  ;;  %v5661_v45 = vshll.u32 %v14986_v28, 16  ;;  %v12654_v33 = vld [vmem:[%s18698_s1 + $0x710] ss:$8 sps:$4 sm:$0xff]   ;;  %v5652_v8 = vrot.slane %v5650_v43, 2 }
  0xb2   :  { %v12657_v57 = vld [vmem:[%s18698_s1 + $0x1510] ss:$8 sps:$4 sm:$0xff]  }
  0xb3   :  { %1243 = vmatpush1.bf16.msra.mxu1 %v12620_v30  ;;  %v5605_v30 = vor.u32 %v5604_v3, %v5601_v60  ;;  %v399_v46 = vsel %vm339_vm0, %v394_v27, %v398_v29  ;;  %v425_v60 = vshrl.u32 %v14973_v16, 16  ;;  %v12666_v43 = vld [vmem:[%s18698_s1 + $0x730] ss:$8 sps:$4 sm:$0xff]  }
  0xb4   :  { %6415 = vmatpush1.bf16.msra.mxu0 %v12623_v38  ;;  %1244 = vmatprep.subr.bf16.mxu1 %v12628_v39  ;;  %v12646_v38 = vld [vmem:[%s18698_s1 + $0x700] ss:$8 sps:$4 sm:$0xff]   ;;  %v451_v39 = vshrl.u32 %v14747_v58, 16 }
  0xb5   :  { %6416 = vmatprep.subr.bf16.mxu0 %v12631_v59  ;;  %v15006_v59 = vcombine.high %v14978_v21, %v14978_v21 }
  0xb6   :  { %v453_v55 = vor.u32 %v451_v39, %v14782_v11  ;;  %v12665_v11 = vld [vmem:[%s18698_s1 + $0x1524] ss:$8 sps:$4 sm:$0xff]  }
  0xb7   :  { %1245 = vmatpush1.bf16.msra.mxu1 %v12626_v42  ;;  %v427_v42 = vshll.u32 %v14973_v16, 16  ;;  %v432_v7 = vshll.u32 %v15006_v59, 16 }
  0xb8   :  { %6417 = vmatpush1.bf16.msra.mxu0 %v12629_v1  ;;  %1246 = vmatprep.subr.bf16.mxu1 %v12634_v47  ;;  %v5658_v1 = vshrl.u32 %v14986_v28, 16  ;;  %v5614_v47 = vsel %vm5597_vm2, %v5605_v30, %v5613_v34  ;;  %v12660_v30 = vld [vmem:[%s18698_s1 + $0x720] ss:$8 sps:$4 sm:$0xff]  }
  0xb9   :  { %6418 = vmatprep.subr.bf16.mxu0 %v12637_v32  ;;  %v12656_v32 = vld [vmem:[%s18698_s1 + $0x714] ss:$8 sps:$4 sm:$0xff]   ;;  %v429_v3 = vrot.slane %v427_v42, 1 }
  0xbb   :  { %1247 = vmatpush1.bf16.msra.mxu1 %v12632_v48  ;;  %v12659_v48 = vld [vmem:[%s18698_s1 + $0x1514] ss:$8 sps:$4 sm:$0xff]  }
  0xbc   :  { %6419 = vmatpush1.bf16.msra.mxu0 %v12635_v51  ;;  %1248 = vmatprep.subr.bf16.mxu1 %v12640_v49  ;;  %v448_v51 = vshrl.u32 %v14923_v41, 16  ;;  %v5655_v49 = vrot.slane %v5653_v44, 3  ;;  %v12669_v44 = vld [vmem:[%s18698_s1 + $0x1530] ss:$8 sps:$4 sm:$0xff]  }
  0xbd   :  { %6420 = vmatprep.subr.bf16.mxu0 %v12643_v14  ;;  %v5660_v14 = vrot.slane %v5658_v1, 2 }
  0xbe   :  { %v450_v27 = vor.u32 %v448_v51, %v398_v29  ;;  %v5656_v39 = vor.u32 %v5655_v49, %v5652_v8  ;;  %v12671_v29 = vld [vmem:[%s18698_s1 + $0x1534] ss:$8 sps:$4 sm:$0xff]   ;;  %v12678_v51 = vld [vmem:[%s18698_s1 + $0x750] ss:$8 sps:$4 sm:$0xff]  }
  0xbf   :  { %1249 = vmatpush1.bf16.msra.mxu1 %v12638_v18  ;;  %v5663_v18 = vrot.slane %v5661_v45, 3  ;;  %v12695_v8 = vld [vmem:[%s18698_s1 + $0x1574] ss:$8 sps:$4 sm:$0xff]   ;;  %v12690_v49 = vld [vmem:[%s18698_s1 + $0x770] ss:$8 sps:$4 sm:$0xff]  }
  0xc0   :  { %6421 = vmatpush1.bf16.msra.mxu0 %v12641_v24  ;;  %1269 = vmatprep.subr.bf16.mxu1 %v12648_v12  ;;  %v12662_v24 = vld [vmem:[%s18698_s1 + $0x724] ss:$8 sps:$4 sm:$0xff]   ;;  %v12663_v12 = vld [vmem:[%s18698_s1 + $0x1520] ss:$8 sps:$4 sm:$0xff]  }
  0xc1   :  { %6441 = vmatprep.subr.bf16.mxu0 %v12653_v36  ;;  %v430_v36 = vor.u32 %v429_v3, %v425_v60  ;;  %v15049_v42 = vor.u32 %v5663_v18, %v5660_v14  ;;  %v12684_v60 = vld [vmem:[%s18698_s1 + $0x760] ss:$8 sps:$4 sm:$0xff]   ;;  %v12693_v14 = vld [vmem:[%s18698_s1 + $0x1570] ss:$8 sps:$4 sm:$0xff]   ;;  %v12698_v18 = vld [vmem:[%s18698_s1 + $0x784] ss:$8 sps:$4 sm:$0xff]  }
  0xc2   :  { %1251 = vmatmul.mubr.bf16.vlgmr.msra.gmra.mrb[0].mxu1 %v399_v46  ;;  %v12674_v46 = vld [vmem:[%s18698_s1 + $0x744] ss:$8 sps:$4 sm:$0xff]   ;;  %v12687_v3 = vld [vmem:[%s18698_s1 + $0x1560] ss:$8 sps:$4 sm:$0xff]  }
  0xc3   :  { %6423 = vmatmul.mubr.bf16.vlgmr.msra.gmra.mrb[0].mxu0 %v5614_v47  ;;  %1270 = vmatpush1.bf16.msra.mxu1 %v12646_v38  ;;  %v15047_v38 = vrot.slane %v432_v7, 1  ;;  %v5665_v45 = vsel %vm5597_vm2, %v5656_v39, %v15049_v42  ;;  %v12675_v47 = vld [vmem:[%s18698_s1 + $0x1540] ss:$8 sps:$4 sm:$0xff]   ;;  %v12692_v7 = vld [vmem:[%s18698_s1 + $0x774] ss:$8 sps:$4 sm:$0xff]  }
  0xc4   :  { %6442 = vmatpush1.bf16.msra.mxu0 %v12651_v52  ;;  %1271 = vmatprep.subr.bf16.mxu1 %v12656_v32  ;;  %v12677_v52 = vld [vmem:[%s18698_s1 + $0x1544] ss:$8 sps:$4 sm:$0xff]   ;;  %v12680_v32 = vld [vmem:[%s18698_s1 + $0x754] ss:$8 sps:$4 sm:$0xff]   ;;  %v12705_v39 = vld [vmem:[%s18698_s1 + $0x1590] ss:$8 sps:$4 sm:$0xff]  }
  0xc5   :  { %6443 = vmatprep.subr.bf16.mxu0 %v12659_v48  ;;  %1260 = vmatprep.mubr.bf16.mxu1 %v453_v55  ;;  %v435_v1 = vsel %vm339_vm0, %v430_v36, %v15047_v38  ;;  %v12683_v48 = vld [vmem:[%s18698_s1 + $0x1554] ss:$8 sps:$4 sm:$0xff]   ;;  %v12689_v55 = vld [vmem:[%s18698_s1 + $0x1564] ss:$8 sps:$4 sm:$0xff]   ;;  %v12702_v36 = vld [vmem:[%s18698_s1 + $0x790] ss:$8 sps:$4 sm:$0xff]  }
  0xc6   :  { %6432 = vmatprep.mubr.bf16.mxu0 %v14805_v40  ;;  %v12668_v40 = vld [vmem:[%s18698_s1 + $0x734] ss:$8 sps:$4 sm:$0xff]  }
  0xc7   :  { %1272 = vmatpush1.bf16.msra.mxu1 %v12654_v33  ;;  %v12681_v33 = vld [vmem:[%s18698_s1 + $0x1550] ss:$8 sps:$4 sm:$0xff]  }
  0xc8   :  { %6444 = vmatpush1.bf16.msra.mxu0 %v12657_v57  ;;  %1273 = vmatprep.subr.bf16.mxu1 %v12662_v24  ;;  %v12686_v57 = vld [vmem:[%s18698_s1 + $0x764] ss:$8 sps:$4 sm:$0xff]  }
  0xc9   :  { %6445 = vmatprep.subr.bf16.mxu0 %v12665_v11  ;;  %v12701_v24 = vld [vmem:[%s18698_s1 + $0x1584] ss:$8 sps:$4 sm:$0xff]   ;;  %v12696_v11 = vld [vmem:[%s18698_s1 + $0x780] ss:$8 sps:$4 sm:$0xff]  }
  0xca   :  { %1261 = vmatmul.mubr.bf16.gmra.mrb[12].mxu1 %v450_v27  ;;  %v12699_v27 = vld [vmem:[%s18698_s1 + $0x1580] ss:$8 sps:$4 sm:$0xff]  }
  0xcb   :  { %6433 = vmatmul.mubr.bf16.gmra.mrb[12].mxu0 %v5613_v34  ;;  %1274 = vmatpush1.bf16.msra.mxu1 %v12660_v30  ;;  %v12672_v34 = vld [vmem:[%s18698_s1 + $0x740] ss:$8 sps:$4 sm:$0xff]   ;;  %v12704_v30 = vld [vmem:[%s18698_s1 + $0x794] ss:$8 sps:$4 sm:$0xff]  }
  0xcc   :  { %6446 = vmatpush1.bf16.msra.mxu0 %v12663_v12  ;;  %1275 = vmatprep.subr.bf16.mxu1 %v12668_v40  ;;  %v12707_v12 = vld [vmem:[%s18698_s1 + $0x1594] ss:$8 sps:$4 sm:$0xff]   ;;  %v12710_v40 = vld [vmem:[%s18698_s1 + $0x7a4] ss:$8 sps:$4 sm:$0xff]  }
  0xcd   :  { %6447 = vmatprep.subr.bf16.mxu0 %v12671_v29  ;;  %1301 = vmatprep.mubr.bf16.mxu1 %v435_v1  ;;  %v12713_v29 = vld [vmem:[%s18698_s1 + $0x15a4] ss:$8 sps:$4 sm:$0xff]   ;;  %v12716_v1 = vld [vmem:[%s18698_s1 + $0x7b4] ss:$8 sps:$4 sm:$0xff]  }
  0xce   :  { %6473 = vmatprep.mubr.bf16.mxu0 %v5665_v45  ;;  %v12719_v45 = vld [vmem:[%s18698_s1 + $0x15b4] ss:$8 sps:$4 sm:$0xff]  }
  0xcf   :  { %1276 = vmatpush1.bf16.msra.mxu1 %v12666_v43  ;;  %v12708_v43 = vld [vmem:[%s18698_s1 + $0x7a0] ss:$8 sps:$4 sm:$0xff]  }
  0xd0   :  { %6448 = vmatpush1.bf16.msra.mxu0 %v12669_v44  ;;  %1277 = vmatprep.subr.bf16.mxu1 %v12674_v46  ;;  %v12711_v44 = vld [vmem:[%s18698_s1 + $0x15a0] ss:$8 sps:$4 sm:$0xff]   ;;  %v12714_v46 = vld [vmem:[%s18698_s1 + $0x7b0] ss:$8 sps:$4 sm:$0xff]  }
  0xd1   :  { %6449 = vmatprep.subr.bf16.mxu0 %v12677_v52  ;;  %v12717_v52 = vld [vmem:[%s18698_s1 + $0x15b0] ss:$8 sps:$4 sm:$0xff]  }
  0xd3   :  { %1278 = vmatpush1.bf16.msra.mxu1 %v12672_v34  ;;  %v12722_v34 = vld [vmem:[%s18698_s1 + $0x7c4] ss:$8 sps:$4 sm:$0xff]  }
  0xd4   :  { %6450 = vmatpush1.bf16.msra.mxu0 %v12675_v47  ;;  %1279 = vmatprep.subr.bf16.mxu1 %v12680_v32  ;;  %v12725_v47 = vld [vmem:[%s18698_s1 + $0x15c4] ss:$8 sps:$4 sm:$0xff]   ;;  %v12720_v32 = vld [vmem:[%s18698_s1 + $0x7c0] ss:$8 sps:$4 sm:$0xff]  }
  0xd5   :  { %6451 = vmatprep.subr.bf16.mxu0 %v12683_v48  ;;  %v12723_v48 = vld [vmem:[%s18698_s1 + $0x15c0] ss:$8 sps:$4 sm:$0xff]  }
  0xd7   :  { %1280 = vmatpush1.bf16.msra.mxu1 %v12678_v51  ;;  %v14118_v51 = vld [vmem:[%s18699_s0 + $0x38] sm:$0xff] }
  0xd8   :  { %6452 = vmatpush1.bf16.msra.mxu0 %v12681_v33  ;;  %1281 = vmatprep.subr.bf16.mxu1 %v12686_v57  ;;  %v15179_v33 = vcombine.low %v14953_v63, %v14118_v51  ;;  %v14119_v57 = vld [vmem:[%s18699_s0 + $0x28] sm:$0xff]  ;;  %v12731_v63 = vld [vmem:[%s18698_s1 + $0x15d4] ss:$8 sps:$4 sm:$0xff]  }
  0xd9   :  { %6453 = vmatprep.subr.bf16.mxu0 %v12689_v55  ;;  %v15185_v55 = vcombine.low %v14958_v2, %v14119_v57  ;;  %v12726_v2 = vld [vmem:[%s18698_s1 + $0x7d0] ss:$8 sps:$4 sm:$0xff]   ;;  %v12750_v51 = vld [vmem:[%s18698_s1 + $0x4] ss:$8 sps:$4 sm:$0xff]  }
  0xdb   :  { %1282 = vmatpush1.bf16.msra.mxu1 %v12684_v60  ;;  %v12728_v60 = vld [vmem:[%s18698_s1 + $0x7d4] ss:$8 sps:$4 sm:$0xff]  }
  0xdc   :  { %6454 = vmatpush1.bf16.msra.mxu0 %v12687_v3  ;;  %1283 = vmatprep.subr.bf16.mxu1 %v12692_v7  ;;  %v15192_v3 = vcombine.low %v14963_v10, %v14963_v10  ;;  %v12729_v7 = vld [vmem:[%s18698_s1 + $0x15d0] ss:$8 sps:$4 sm:$0xff]   ;;  %v15208_v10 = vcombine.low %v14978_v21, %v14978_v21  ;;  %v12732_v21 = vld [vmem:[%s18698_s1 + $0x7e0] ss:$8 sps:$4 sm:$0xff]  }
  0xdd   :  { %6455 = vmatprep.subr.bf16.mxu0 %v12695_v8  ;;  %v12734_v8 = vld [vmem:[%s18698_s1 + $0x7e4] ss:$8 sps:$4 sm:$0xff]  }
  0xdf   :  { %1284 = vmatpush1.bf16.msra.mxu1 %v12690_v49  ;;  %v415_v49 = vshll.u32 %v15179_v33, 16 }
  0xe0   :  { %6456 = vmatpush1.bf16.msra.mxu0 %v12693_v14  ;;  %1285 = vmatprep.subr.bf16.mxu1 %v12698_v18  ;;  %v5633_v14 = vshrl.u32 %v15185_v55, 16  ;;  %v5636_v18 = vshll.u32 %v15185_v55, 16 }
  0xe1   :  { %6457 = vmatprep.subr.bf16.mxu0 %v12701_v24  ;;  %v5641_v24 = vshrl.u32 %v15192_v3, 16 }
  0xe3   :  { %1286 = vmatpush1.bf16.msra.mxu1 %v12696_v11  ;;  %v5644_v11 = vshll.u32 %v15192_v3, 16 }
  0xe4   :  { %6458 = vmatpush1.bf16.msra.mxu0 %v12699_v27  ;;  %1287 = vmatprep.subr.bf16.mxu1 %v12704_v30  ;;  %v12737_v27 = vld [vmem:[%s18698_s1 + $0x15e4] ss:$8 sps:$4 sm:$0xff]   ;;  %v12735_v30 = vld [vmem:[%s18698_s1 + $0x15e0] ss:$8 sps:$4 sm:$0xff]  }
  0xe5   :  { %6459 = vmatprep.subr.bf16.mxu0 %v12707_v12  ;;  %v12740_v12 = vld [vmem:[%s18698_s1 + $0x7f4] ss:$8 sps:$4 sm:$0xff]  }
  0xe7   :  { %1288 = vmatpush1.bf16.msra.mxu1 %v12702_v36  ;;  %v413_v36 = vshrl.u32 %v15179_v33, 16 }
  0xe8   :  { %6460 = vmatpush1.bf16.msra.mxu0 %v12705_v39  ;;  %1289 = vmatprep.subr.bf16.mxu1 %v12710_v40  ;;  %v417_v39 = vrot.slane %v415_v49, 1  ;;  %v420_v40 = vshll.u32 %v15208_v10, 16  ;;  %v5684_v49 = vshrl.u32 %v14349_v0, 16 }
  0xe9   :  { %6461 = vmatprep.subr.bf16.mxu0 %v12713_v29  ;;  %v5635_v29 = vrot.slane %v5633_v14, 2  ;;  %v5687_v14 = vshll.u32 %v14349_v0, 16  ;;  %v12759_v0 = vld [vmem:[%s18698_s1 + $0x1614] ss:$8 sps:$4 sm:$0xff]  }
  0xeb   :  { %1290 = vmatpush1.bf16.msra.mxu1 %v12708_v43  ;;  %v5638_v43 = vrot.slane %v5636_v18, 3 }
  0xec   :  { %6462 = vmatpush1.bf16.msra.mxu0 %v12711_v44  ;;  %1291 = vmatprep.subr.bf16.mxu1 %v12716_v1  ;;  %v5643_v44 = vrot.slane %v5641_v24, 2  ;;  %v5646_v1 = vrot.slane %v5644_v11, 3 }
  0xed   :  { %6463 = vmatprep.subr.bf16.mxu0 %v12719_v45  ;;  %v15232_v45 = vld [vmem:[%s18699_s0 + $0x50] sm:$0xff]  ;;  %v5639_v57 = vor.u32 %v5638_v43, %v5635_v29  ;;  %v5689_v29 = vrot.slane %v5687_v14, 3 }
  0xee   :  { %v12780_v14 = vld [vmem:[%s18698_s1 + $0x54] ss:$8 sps:$4 sm:$0xff]  }
  0xef   :  { %1292 = vmatpush1.bf16.msra.mxu1 %v12714_v46  ;;  %v12743_v46 = vld [vmem:[%s18698_s1 + $0x15f4] ss:$8 sps:$4 sm:$0xff]  }
  0xf0   :  { %6464 = vmatpush1.bf16.msra.mxu0 %v12717_v52  ;;  %1293 = vmatprep.subr.bf16.mxu1 %v12722_v34  ;;  %v12738_v52 = vld [vmem:[%s18698_s1 + $0x7f0] ss:$8 sps:$4 sm:$0xff]  }
  0xf1   :  { %6465 = vmatprep.subr.bf16.mxu0 %v12725_v47  ;;  %v12741_v34 = vld [vmem:[%s18698_s1 + $0x15f0] ss:$8 sps:$4 sm:$0xff]   ;;  %v15245_v47 = vcombine.high %v15232_v45, %v15232_v45 }
  0xf3   :  { %1294 = vmatpush1.bf16.msra.mxu1 %v12720_v32  ;;  %v418_v32 = vor.u32 %v417_v39, %v413_v36  ;;  %v5692_v18 = vshrl.u32 %v15245_v47, 16  ;;  %v5695_v24 = vshll.u32 %v15245_v47, 16  ;;  %v454_v39 = vshrl.u32 %v15208_v10, 16 }
  0xf4   :  { %6466 = vmatpush1.bf16.msra.mxu0 %v12723_v48  ;;  %1295 = vmatprep.subr.bf16.mxu1 %v12728_v60  ;;  %v422_v48 = vrot.slane %v420_v40, 1  ;;  %v5647_v60 = vor.u32 %v5646_v1, %v5643_v44  ;;  %v5686_v40 = vrot.slane %v5684_v49, 2  ;;  %v12762_v1 = vld [vmem:[%s18698_s1 + $0x24] ss:$8 sps:$4 sm:$0xff]   ;;  %v12775_v49 = vld [vmem:[%s18698_s1 + $0x1640] ss:$8 sps:$4 sm:$0xff]  }
  0xf5   :  { %6467 = vmatprep.subr.bf16.mxu0 %v12731_v63  ;;  %v12753_v63 = vld [vmem:[%s18698_s1 + $0x1604] ss:$8 sps:$4 sm:$0xff]   ;;  %v5694_v43 = vrot.slane %v5692_v18, 2  ;;  %v5697_v44 = vrot.slane %v5695_v24, 3  ;;  %v12778_v18 = vld [vmem:[%s18698_s1 + $0x50] ss:$8 sps:$4 sm:$0xff]  }
  0xf6   :  { %v423_v11 = vsel %vm339_vm0, %v418_v32, %v422_v48  ;;  %v5690_v32 = vor.u32 %v5689_v29, %v5686_v40  ;;  %v12781_v24 = vld [vmem:[%s18698_s1 + $0x1650] ss:$8 sps:$4 sm:$0xff]   ;;  %v12798_v40 = vld [vmem:[%s18698_s1 + $0x84] ss:$8 sps:$4 sm:$0xff]  }
  0xf7   :  { %1296 = vmatpush1.bf16.msra.mxu1 %v12726_v2  ;;  %v12748_v2 = vld [vmem:[%s18698_s1] ss:$8 sps:$4 sm:$0xff]   ;;  %v12801_v29 = vld [vmem:[%s18698_s1 + $0x1684] ss:$8 sps:$4 sm:$0xff]  }
  0xf8   :  { %6468 = vmatpush1.bf16.msra.mxu0 %v12729_v7  ;;  %1297 = vmatprep.subr.bf16.mxu1 %v12734_v8  ;;  %v12751_v7 = vld [vmem:[%s18698_s1 + $0x1600] ss:$8 sps:$4 sm:$0xff]   ;;  %v457_v8 = vshrl.u32 %v15006_v59, 16 }
  0xf9   :  { %6469 = vmatprep.subr.bf16.mxu0 %v12737_v27  ;;  %v5648_v27 = vsel %vm5597_vm2, %v5639_v57, %v5647_v60  ;;  %v12768_v57 = vld [vmem:[%s18698_s1 + $0x34] ss:$8 sps:$4 sm:$0xff]  }
  0xfa   :  { %v459_v36 = vor.u32 %v457_v8, %v15047_v38  ;;  %v12765_v38 = vld [vmem:[%s18698_s1 + $0x1624] ss:$8 sps:$4 sm:$0xff]   ;;  %v12772_v8 = vld [vmem:[%s18698_s1 + $0x40] ss:$8 sps:$4 sm:$0xff]  }
  0xfb   :  { %1298 = vmatpush1.bf16.msra.mxu1 %v12732_v21  ;;  %v12756_v21 = vld [vmem:[%s18698_s1 + $0x14] ss:$8 sps:$4 sm:$0xff]  }
  0xfc   :  { %6470 = vmatpush1.bf16.msra.mxu0 %v12735_v30  ;;  %1299 = vmatprep.subr.bf16.mxu1 %v12740_v12  ;;  %v12754_v30 = vld [vmem:[%s18698_s1 + $0x10] ss:$8 sps:$4 sm:$0xff]  }
  0xfd   :  { %6471 = vmatprep.subr.bf16.mxu0 %v12743_v46  ;;  %v12757_v12 = vld [vmem:[%s18698_s1 + $0x1610] ss:$8 sps:$4 sm:$0xff]   ;;  %v456_v46 = vor.u32 %v454_v39, %v422_v48 }
  0xfe   :  { %v12766_v48 = vld [vmem:[%s18698_s1 + $0x30] ss:$8 sps:$4 sm:$0xff]  }
  0xff   :  { %1300 = vmatpush1.bf16.msra.mxu1 %v12738_v52  ;;  %v12760_v52 = vld [vmem:[%s18698_s1 + $0x20] ss:$8 sps:$4 sm:$0xff]   ;;  %v12793_v39 = vld [vmem:[%s18698_s1 + $0x1670] ss:$8 sps:$4 sm:$0xff]  }
 0x100   :  { %6472 = vmatpush1.bf16.msra.mxu0 %v12741_v34  ;;  %1996 = vmatprep.subr.bf16.mxu1 %v12750_v51  ;;  %v12763_v34 = vld [vmem:[%s18698_s1 + $0x1620] ss:$8 sps:$4 sm:$0xff]   ;;  %v15293_v51 = vor.u32 %v5697_v44, %v5694_v43 }
 0x101   :  { %6492 = vmatprep.subr.bf16.mxu0 %v12753_v63  ;;  %v12769_v63 = vld [vmem:[%s18698_s1 + $0x1630] ss:$8 sps:$4 sm:$0xff]  }
 0x102   :  { %1302 = vmatmul.mubr.bf16.vlgmr.msra.gmra.mrb[0].mxu1 %v423_v11  ;;  %v12786_v11 = vld [vmem:[%s18698_s1 + $0x64] ss:$8 sps:$4 sm:$0xff]  }
 0x103   :  { %6474 = vmatmul.mubr.bf16.vlgmr.msra.gmra.mrb[0].mxu0 %v5648_v27  ;;  %1997 = vmatpush1.bf16.msra.mxu1 %v12748_v2  ;;  %v5699_v2 = vsel %vm5597_vm2, %v5690_v32, %v15293_v51  ;;  %v12789_v27 = vld [vmem:[%s18698_s1 + $0x1664] ss:$8 sps:$4 sm:$0xff]  }
 0x104   :  { %6493 = vmatpush1.bf16.msra.mxu0 %v12751_v7  ;;  %1998 = vmatprep.subr.bf16.mxu1 %v12756_v21  ;;  %v12774_v7 = vld [vmem:[%s18698_s1 + $0x44] ss:$8 sps:$4 sm:$0xff]   ;;  %v12784_v21 = vld [vmem:[%s18698_s1 + $0x60] ss:$8 sps:$4 sm:$0xff]  }
 0x105   :  { %6494 = vmatprep.subr.bf16.mxu0 %v12759_v0  ;;  %1311 = vmatprep.mubr.bf16.mxu1 %v459_v36  ;;  %v12787_v0 = vld [vmem:[%s18698_s1 + $0x1660] ss:$8 sps:$4 sm:$0xff]   ;;  %v12790_v36 = vld [vmem:[%s18698_s1 + $0x70] ss:$8 sps:$4 sm:$0xff]  }
 0x106   :  { %6483 = vmatprep.mubr.bf16.mxu0 %v15049_v42  ;;  %v12771_v42 = vld [vmem:[%s18698_s1 + $0x1634] ss:$8 sps:$4 sm:$0xff]  }
 0x107   :  { %1999 = vmatpush1.bf16.msra.mxu1 %v12754_v30  ;;  %v12792_v30 = vld [vmem:[%s18698_s1 + $0x74] ss:$8 sps:$4 sm:$0xff]  }
 0x108   :  { %6495 = vmatpush1.bf16.msra.mxu0 %v12757_v12  ;;  %2000 = vmatprep.subr.bf16.mxu1 %v12762_v1  ;;  %v12795_v12 = vld [vmem:[%s18698_s1 + $0x1674] ss:$8 sps:$4 sm:$0xff]   ;;  %v12796_v1 = vld [vmem:[%s18698_s1 + $0x80] ss:$8 sps:$4 sm:$0xff]  }
 0x109   :  { %6496 = vmatprep.subr.bf16.mxu0 %v12765_v38 }
 0x10a   :  { %1312 = vmatmul.mubr.bf16.gmra.mrb[16].mxu1 %v456_v46 }
 0x10b   :  { %6484 = vmatmul.mubr.bf16.gmra.mrb[16].mxu0 %v5647_v60  ;;  %2001 = vmatpush1.bf16.msra.mxu1 %v12760_v52  ;;  %v12777_v60 = vld [vmem:[%s18698_s1 + $0x1644] ss:$8 sps:$4 sm:$0xff]   ;;  %v12799_v52 = vld [vmem:[%s18698_s1 + $0x1680] ss:$8 sps:$4 sm:$0xff]  }
 0x10c   :  { %6497 = vmatpush1.bf16.msra.mxu0 %v12763_v34  ;;  %2002 = vmatprep.subr.bf16.mxu1 %v12768_v57  ;;  %v12804_v57 = vld [vmem:[%s18698_s1 + $0x94] ss:$8 sps:$4 sm:$0xff]  }
 0x10d   :  { %6498 = vmatprep.subr.bf16.mxu0 %v12771_v42  ;;  %2028 = vmatprep.mubr.bf16.mxu1 %v14322_v53  ;;  %v12783_v53 = vld [vmem:[%s18698_s1 + $0x1654] ss:$8 sps:$4 sm:$0xff]  }
 0x10e   :  { %6524 = vmatprep.mubr.bf16.mxu0 %v5699_v2  ;;  %v12807_v42 = vld [vmem:[%s18698_s1 + $0x1694] ss:$8 sps:$4 sm:$0xff]   ;;  %v12802_v2 = vld [vmem:[%s18698_s1 + $0x90] ss:$8 sps:$4 sm:$0xff]  }
 0x10f   :  { %2003 = vmatpush1.bf16.msra.mxu1 %v12766_v48 }
 0x110   :  { %6499 = vmatpush1.bf16.msra.mxu0 %v12769_v63  ;;  %2004 = vmatprep.subr.bf16.mxu1 %v12774_v7  ;;  %v12805_v7 = vld [vmem:[%s18698_s1 + $0x1690] ss:$8 sps:$4 sm:$0xff]  }
 0x111   :  { %6500 = vmatprep.subr.bf16.mxu0 %v12777_v60  ;;  %v12810_v60 = vld [vmem:[%s18698_s1 + $0xa4] ss:$8 sps:$4 sm:$0xff]  }
 0x113   :  { %2005 = vmatpush1.bf16.msra.mxu1 %v12772_v8  ;;  %v12813_v8 = vld [vmem:[%s18698_s1 + $0x16a4] ss:$8 sps:$4 sm:$0xff]  }
 0x114   :  { %6501 = vmatpush1.bf16.msra.mxu0 %v12775_v49  ;;  %2006 = vmatprep.subr.bf16.mxu1 %v12780_v14  ;;  %v12808_v49 = vld [vmem:[%s18698_s1 + $0xa0] ss:$8 sps:$4 sm:$0xff]  }
 0x115   :  { %6502 = vmatprep.subr.bf16.mxu0 %v12783_v53  ;;  %v12811_v14 = vld [vmem:[%s18698_s1 + $0x16a0] ss:$8 sps:$4 sm:$0xff]   ;;  %v12816_v53 = vld [vmem:[%s18698_s1 + $0xb4] ss:$8 sps:$4 sm:$0xff]  }
 0x117   :  { %2007 = vmatpush1.bf16.msra.mxu1 %v12778_v18  ;;  %v12819_v18 = vld [vmem:[%s18698_s1 + $0x16b4] ss:$8 sps:$4 sm:$0xff]  }
 0x118   :  { %6503 = vmatpush1.bf16.msra.mxu0 %v12781_v24  ;;  %2008 = vmatprep.subr.bf16.mxu1 %v12786_v11  ;;  %v12814_v24 = vld [vmem:[%s18698_s1 + $0xb0] ss:$8 sps:$4 sm:$0xff]  }
 0x119   :  { %6504 = vmatprep.subr.bf16.mxu0 %v12789_v27  ;;  %v12817_v11 = vld [vmem:[%s18698_s1 + $0x16b0] ss:$8 sps:$4 sm:$0xff]   ;;  %v12822_v27 = vld [vmem:[%s18698_s1 + $0xc4] ss:$8 sps:$4 sm:$0xff]  }
 0x11b   :  { %2009 = vmatpush1.bf16.msra.mxu1 %v12784_v21  ;;  %v12825_v21 = vld [vmem:[%s18698_s1 + $0x16c4] ss:$8 sps:$4 sm:$0xff]  }
 0x11c   :  { %6505 = vmatpush1.bf16.msra.mxu0 %v12787_v0  ;;  %2010 = vmatprep.subr.bf16.mxu1 %v12792_v30  ;;  %v12820_v0 = vld [vmem:[%s18698_s1 + $0xc0] ss:$8 sps:$4 sm:$0xff]  }
 0x11d   :  { %6506 = vmatprep.subr.bf16.mxu0 %v12795_v12  ;;  %v15364_v43 = vpop.f32.mrb[4].mxu1  ;;  %v12823_v30 = vld [vmem:[%s18698_s1 + $0x16c0] ss:$8 sps:$4 sm:$0xff]   ;;  %v15428_v12 = vcombine.low %v15232_v45, %v15232_v45  ;;  %v12829_v45 = vld [vmem:[%s18698_s1 + $0x16d0] ss:$8 sps:$4 sm:$0xff]  }
 0x11e   :  { %v15366_v44 = vpop.f32.mrb[4].mxu0  ;;  %v15371_v38 = vpop.f32.mrb[5].mxu1 }
 0x11f   :  { %v15373_v46 = vpop.f32.mrb[5].mxu0  ;;  %2011 = vmatpush1.bf16.msra.mxu1 %v12790_v36  ;;  %v1164_v34 = vpop.f32.mrb[6].mxu1  ;;  %v12828_v36 = vld [vmem:[%s18698_s1 + $0xd4] ss:$8 sps:$4 sm:$0xff]  }
 0x120   :  { %6507 = vmatpush1.bf16.msra.mxu0 %v12793_v39  ;;  %v5384_v32 = vpop.f32.mrb[6].mxu0  ;;  %2012 = vmatprep.subr.bf16.mxu1 %v12798_v40  ;;  %v1165_v48 = vpop.f32.mrb[7].mxu1  ;;  %v12831_v39 = vld [vmem:[%s18698_s1 + $0x16d4] ss:$8 sps:$4 sm:$0xff]   ;;  %v12826_v40 = vld [vmem:[%s18698_s1 + $0xd0] ss:$8 sps:$4 sm:$0xff]  }
 0x121   :  { %6508 = vmatprep.subr.bf16.mxu0 %v12801_v29  ;;  %v5385_v63 = vpop.f32.mrb[7].mxu0  ;;  %v5667_v29 = vshrl.u32 %v14392_v23, 16  ;;  %v5678_v34 = vshll.u32 %v15428_v12, 16  ;;  %v12834_v32 = vld [vmem:[%s18698_s1 + $0xe4] ss:$8 sps:$4 sm:$0xff]  }
 0x122   :  { %v12835_v63 = vld [vmem:[%s18698_s1 + $0x16e0] ss:$8 sps:$4 sm:$0xff]  }
 0x123   :  { %2013 = vmatpush1.bf16.msra.mxu1 %v12796_v1  ;;  %v5670_v1 = vshll.u32 %v14392_v23, 16  ;;  %v12837_v23 = vld [vmem:[%s18698_s1 + $0x16e4] ss:$8 sps:$4 sm:$0xff]  }
 0x124   :  { %6509 = vmatpush1.bf16.msra.mxu0 %v12799_v52  ;;  %2014 = vmatprep.subr.bf16.mxu1 %v12804_v57  ;;  %v5675_v52 = vshrl.u32 %v15428_v12, 16  ;;  %v12832_v57 = vld [vmem:[%s18698_s1 + $0xe0] ss:$8 sps:$4 sm:$0xff]  }
 0x125   :  { %6510 = vmatprep.subr.bf16.mxu0 %v12807_v42  ;;  %v5669_v42 = vrot.slane %v5667_v29, 2  ;;  %v5672_v48 = vrot.slane %v5670_v1, 3 }
 0x127   :  { %2015 = vmatpush1.bf16.msra.mxu1 %v12802_v2  ;;  %v5677_v2 = vrot.slane %v5675_v52, 2  ;;  %v12854_v52 = vld [vmem:[%s18698_s1 + $0x114] ss:$8 sps:$4 sm:$0xff]  }
 0x128   :  { %6511 = vmatpush1.bf16.msra.mxu0 %v12805_v7  ;;  %2016 = vmatprep.subr.bf16.mxu1 %v12810_v60  ;;  %v5680_v7 = vrot.slane %v5678_v34, 3  ;;  %v15461_v60 = vld [vmem:[%s18699_s0 + $0x58] sm:$0xff] }
 0x129   :  { %6512 = vmatprep.subr.bf16.mxu0 %v12813_v8  ;;  %v12840_v8 = vld [vmem:[%s18698_s1 + $0xf4] ss:$8 sps:$4 sm:$0xff]  }
 0x12a   :  { %v12857_v34 = vld [vmem:[%s18698_s1 + $0x1714] ss:$8 sps:$4 sm:$0xff]  }
 0x12b   :  { %2017 = vmatpush1.bf16.msra.mxu1 %v12808_v49  ;;  %v12843_v49 = vld [vmem:[%s18698_s1 + $0x16f4] ss:$8 sps:$4 sm:$0xff]  }
 0x12c   :  { %6513 = vmatpush1.bf16.msra.mxu0 %v12811_v14  ;;  %2018 = vmatprep.subr.bf16.mxu1 %v12816_v53  ;;  %v15471_v14 = vcombine.high %v15461_v60, %v15461_v60  ;;  %v12838_v53 = vld [vmem:[%s18698_s1 + $0xf0] ss:$8 sps:$4 sm:$0xff]  }
 0x12d   :  { %6514 = vmatprep.subr.bf16.mxu0 %v12819_v18  ;;  %v12841_v18 = vld [vmem:[%s18698_s1 + $0x16f0] ss:$8 sps:$4 sm:$0xff]  }
 0x12e   :  { %v5726_v29 = vshrl.u32 %v15471_v14, 16  ;;  %v5729_v1 = vshll.u32 %v15471_v14, 16 }
 0x12f   :  { %2019 = vmatpush1.bf16.msra.mxu1 %v12814_v24  ;;  %v5673_v24 = vor.u32 %v5672_v48, %v5669_v42  ;;  %v12852_v48 = vld [vmem:[%s18698_s1 + $0x110] ss:$8 sps:$4 sm:$0xff]  }
 0x130   :  { %6515 = vmatpush1.bf16.msra.mxu0 %v12817_v11  ;;  %2020 = vmatprep.subr.bf16.mxu1 %v12822_v27  ;;  %v5681_v11 = vor.u32 %v5680_v7, %v5677_v2  ;;  %v12848_v27 = vld [vmem:[%s18698_s1 + $0x104] ss:$8 sps:$4 sm:$0xff]   ;;  %v5731_v42 = vrot.slane %v5729_v1, 3  ;;  %v12860_v7 = vld [vmem:[%s18698_s1 + $0x120] ss:$8 sps:$4 sm:$0xff]  }
 0x131   :  { %6516 = vmatprep.subr.bf16.mxu0 %v12825_v21  ;;  %v12851_v21 = vld [vmem:[%s18698_s1 + $0x1704] ss:$8 sps:$4 sm:$0xff]   ;;  %v12881_v1 = vld [vmem:[%s18698_s1 + $0x1750] ss:$8 sps:$4 sm:$0xff]  }
 0x132   :  { %v12865_v2 = vld [vmem:[%s18698_s1 + $0x1724] ss:$8 sps:$4 sm:$0xff]  }
 0x133   :  { %2021 = vmatpush1.bf16.msra.mxu1 %v12820_v0  ;;  %v22_v0 = vld [vmem:[%s18699_s0 + $0x40] sm:$0x11] }
 0x134   :  { %6517 = vmatpush1.bf16.msra.mxu0 %v12823_v30  ;;  %2022 = vmatprep.subr.bf16.mxu1 %v12828_v36  ;;  %v12846_v30 = vld [vmem:[%s18698_s1 + $0x100] ss:$8 sps:$4 sm:$0xff]  }
 0x135   :  { %6518 = vmatprep.subr.bf16.mxu0 %v12831_v39  ;;  %v12849_v36 = vld [vmem:[%s18698_s1 + $0x1700] ss:$8 sps:$4 sm:$0xff]   ;;  %v5718_v39 = vshrl.u32 %v14563_v31, 16 }
 0x137   :  { %2023 = vmatpush1.bf16.msra.mxu1 %v12826_v40  ;;  %v5721_v40 = vshll.u32 %v14563_v31, 16  ;;  %v5720_v31 = vrot.slane %v5718_v39, 2  ;;  %v12875_v39 = vld [vmem:[%s18698_s1 + $0x1740] ss:$8 sps:$4 sm:$0xff]  }
 0x138   :  { %6519 = vmatpush1.bf16.msra.mxu0 %v12829_v45  ;;  %2024 = vmatprep.subr.bf16.mxu1 %v12834_v32  ;;  %v5682_v45 = vsel %vm5597_vm2, %v5673_v24, %v5681_v11  ;;  %v10203_v32 = vcombine.high %v22_v0, %v22_v0  ;;  %v12871_v24 = vld [vmem:[%s18698_s1 + $0x1734] ss:$8 sps:$4 sm:$0xff]  }
 0x139   :  { %6520 = vmatprep.subr.bf16.mxu0 %v12837_v23  ;;  %v5723_v23 = vrot.slane %v5721_v40, 3  ;;  %v12880_v40 = vld [vmem:[%s18698_s1 + $0x154] ss:$8 sps:$4 sm:$0xff]  }
 0x13b   :  { %2025 = vmatpush1.bf16.msra.mxu1 %v12832_v57  ;;  %v5728_v57 = vrot.slane %v5726_v29, 2  ;;  %v12878_v29 = vld [vmem:[%s18698_s1 + $0x150] ss:$8 sps:$4 sm:$0xff]  }
 0x13c   :  { %6521 = vmatpush1.bf16.msra.mxu0 %v12835_v63  ;;  %2026 = vmatprep.subr.bf16.mxu1 %v12840_v8  ;;  %v12855_v63 = vld [vmem:[%s18698_s1 + $0x1710] ss:$8 sps:$4 sm:$0xff]   ;;  %v10202_v8 = vcombine.low %v22_v0, %v22_v0 }
 0x13d   :  { %6522 = vmatprep.subr.bf16.mxu0 %v12843_v49  ;;  %v12863_v49 = vld [vmem:[%s18698_s1 + $0x1720] ss:$8 sps:$4 sm:$0xff]   ;;  %v12869_v0 = vld [vmem:[%s18698_s1 + $0x1730] ss:$8 sps:$4 sm:$0xff]  }
 0x13f   :  { %2027 = vmatpush1.bf16.msra.mxu1 %v12838_v53  ;;  %v5724_v53 = vor.u32 %v5723_v23, %v5720_v31  ;;  %v12892_v31 = vld [vmem:[%s18698_s1 + $0x174] ss:$8 sps:$4 sm:$0xff]  }
 0x140   :  { %6523 = vmatpush1.bf16.msra.mxu0 %v12841_v18  ;;  %2047 = vmatprep.subr.bf16.mxu1 %v12848_v27  ;;  %v15525_v18 = vor.u32 %v5731_v42, %v5728_v57  ;;  %v12895_v23 = vld [vmem:[%s18698_s1 + $0x1774] ss:$8 sps:$4 sm:$0xff]   ;;  %v12890_v57 = vld [vmem:[%s18698_s1 + $0x170] ss:$8 sps:$4 sm:$0xff]  }
 0x141   :  { %6543 = vmatprep.subr.bf16.mxu0 %v12851_v21  ;;  %v12866_v21 = vld [vmem:[%s18698_s1 + $0x130] ss:$8 sps:$4 sm:$0xff]  }
 0x142   :  { %2029 = vmatmul.mubr.bf16.vlgmr.msra.gmra.mrb[0].mxu1 %v14353_v4  ;;  %v12862_v4 = vld [vmem:[%s18698_s1 + $0x124] ss:$8 sps:$4 sm:$0xff]   ;;  %v5733_v27 = vsel %vm5597_vm2, %v5724_v53, %v15525_v18  ;;  %v12893_v42 = vld [vmem:[%s18698_s1 + $0x1770] ss:$8 sps:$4 sm:$0xff]  }
 0x143   :  { %6525 = vmatmul.mubr.bf16.vlgmr.msra.gmra.mrb[0].mxu0 %v5682_v45  ;;  %2048 = vmatpush1.bf16.msra.mxu1 %v12846_v30  ;;  %v12874_v30 = vld [vmem:[%s18698_s1 + $0x144] ss:$8 sps:$4 sm:$0xff]  }
 0x144   :  { %6544 = vmatpush1.bf16.msra.mxu0 %v12849_v36  ;;  %2049 = vmatprep.subr.bf16.mxu1 %v12854_v52  ;;  %v12872_v36 = vld [vmem:[%s18698_s1 + $0x140] ss:$8 sps:$4 sm:$0xff]   ;;  %v12886_v45 = vld [vmem:[%s18698_s1 + $0x164] ss:$8 sps:$4 sm:$0xff]  }
 0x145   :  { %6545 = vmatprep.subr.bf16.mxu0 %v12857_v34  ;;  %2038 = vmatprep.mubr.bf16.mxu1 %v10203_v32  ;;  %v12889_v52 = vld [vmem:[%s18698_s1 + $0x1764] ss:$8 sps:$4 sm:$0xff]   ;;  %v12884_v34 = vld [vmem:[%s18698_s1 + $0x160] ss:$8 sps:$4 sm:$0xff]  }
 0x146   :  { %6534 = vmatprep.mubr.bf16.mxu0 %v15293_v51  ;;  %v12868_v51 = vld [vmem:[%s18698_s1 + $0x134] ss:$8 sps:$4 sm:$0xff]   ;;  %v12887_v32 = vld [vmem:[%s18698_s1 + $0x1760] ss:$8 sps:$4 sm:$0xff]  }
 0x147   :  { %2050 = vmatpush1.bf16.msra.mxu1 %v12852_v48  ;;  %v12898_v48 = vld [vmem:[%s18698_s1 + $0x184] ss:$8 sps:$4 sm:$0xff]  }
 0x148   :  { %6546 = vmatpush1.bf16.msra.mxu0 %v12855_v63  ;;  %2051 = vmatprep.subr.bf16.mxu1 %v12862_v4  ;;  %v12901_v63 = vld [vmem:[%s18698_s1 + $0x1784] ss:$8 sps:$4 sm:$0xff]  }
 0x149   :  { %6547 = vmatprep.subr.bf16.mxu0 %v12865_v2 }
 0x14a   :  { %2039 = vmatmul.mubr.bf16.gmra.mrb[20].mxu1 %v10202_v8 }
 0x14b   :  { %6535 = vmatmul.mubr.bf16.gmra.mrb[20].mxu0 %v5681_v11  ;;  %2052 = vmatpush1.bf16.msra.mxu1 %v12860_v7  ;;  %v12877_v11 = vld [vmem:[%s18698_s1 + $0x1744] ss:$8 sps:$4 sm:$0xff]  }
 0x14c   :  { %6548 = vmatpush1.bf16.msra.mxu0 %v12863_v49  ;;  %2053 = vmatprep.subr.bf16.mxu1 %v12868_v51  ;;  %v12896_v51 = vld [vmem:[%s18698_s1 + $0x180] ss:$8 sps:$4 sm:$0xff]  }
 0x14d   :  { %6549 = vmatprep.subr.bf16.mxu0 %v12871_v24  ;;  %2079 = vmatprep.mubr.bf16.mxu1 %v14521_v15  ;;  %v12883_v15 = vld [vmem:[%s18698_s1 + $0x1754] ss:$8 sps:$4 sm:$0xff]   ;;  %v12899_v24 = vld [vmem:[%s18698_s1 + $0x1780] ss:$8 sps:$4 sm:$0xff]  }
 0x14e   :  { %6575 = vmatprep.mubr.bf16.mxu0 %v5733_v27 }
 0x14f   :  { %2054 = vmatpush1.bf16.msra.mxu1 %v12866_v21 }
 0x150   :  { %6550 = vmatpush1.bf16.msra.mxu0 %v12869_v0  ;;  %2055 = vmatprep.subr.bf16.mxu1 %v12874_v30 }
 0x151   :  { %6551 = vmatprep.subr.bf16.mxu0 %v12877_v11  ;;  %v12902_v11 = vld [vmem:[%s18698_s1 + $0x190] ss:$8 sps:$4 sm:$0xff]  }
 0x153   :  { %2056 = vmatpush1.bf16.msra.mxu1 %v12872_v36  ;;  %v12905_v36 = vld [vmem:[%s18698_s1 + $0x1790] ss:$8 sps:$4 sm:$0xff]  }
 0x154   :  { %6552 = vmatpush1.bf16.msra.mxu0 %v12875_v39  ;;  %2057 = vmatprep.subr.bf16.mxu1 %v12880_v40  ;;  %v12910_v39 = vld [vmem:[%s18698_s1 + $0x1a4] ss:$8 sps:$4 sm:$0xff]  }
 0x155   :  { %6553 = vmatprep.subr.bf16.mxu0 %v12883_v15  ;;  %v12913_v40 = vld [vmem:[%s18698_s1 + $0x17a4] ss:$8 sps:$4 sm:$0xff]   ;;  %v12908_v15 = vld [vmem:[%s18698_s1 + $0x1a0] ss:$8 sps:$4 sm:$0xff]  }
 0x157   :  { %2058 = vmatpush1.bf16.msra.mxu1 %v12878_v29  ;;  %v12911_v29 = vld [vmem:[%s18698_s1 + $0x17a0] ss:$8 sps:$4 sm:$0xff]  }
 0x158   :  { %6554 = vmatpush1.bf16.msra.mxu0 %v12881_v1  ;;  %2059 = vmatprep.subr.bf16.mxu1 %v12886_v45  ;;  %v12916_v1 = vld [vmem:[%s18698_s1 + $0x1b4] ss:$8 sps:$4 sm:$0xff]  }
 0x159   :  { %6555 = vmatprep.subr.bf16.mxu0 %v12889_v52  ;;  %v12919_v45 = vld [vmem:[%s18698_s1 + $0x17b4] ss:$8 sps:$4 sm:$0xff]   ;;  %v12914_v52 = vld [vmem:[%s18698_s1 + $0x1b0] ss:$8 sps:$4 sm:$0xff]  }
 0x15b   :  { %2060 = vmatpush1.bf16.msra.mxu1 %v12884_v34  ;;  %v12917_v34 = vld [vmem:[%s18698_s1 + $0x17b0] ss:$8 sps:$4 sm:$0xff]  }
 0x15c   :  { %6556 = vmatpush1.bf16.msra.mxu0 %v12887_v32  ;;  %2061 = vmatprep.subr.bf16.mxu1 %v12892_v31  ;;  %v12922_v32 = vld [vmem:[%s18698_s1 + $0x1c4] ss:$8 sps:$4 sm:$0xff]  }
 0x15d   :  { %6557 = vmatprep.subr.bf16.mxu0 %v12895_v23  ;;  %v1211_v4 = vpop.f32.mrb[8].mxu1  ;;  %v12925_v31 = vld [vmem:[%s18698_s1 + $0x17c4] ss:$8 sps:$4 sm:$0xff]   ;;  %v12920_v23 = vld [vmem:[%s18698_s1 + $0x1c0] ss:$8 sps:$4 sm:$0xff]  }
 0x15e   :  { %v15596_v2 = vpop.f32.mrb[8].mxu0  ;;  %v15599_v7 = vadd.f32 %v1211_v4, %v15364_v43  ;;  %v1213_v8 = vpop.f32.mrb[9].mxu1  ;;  %v12904_v43 = vld [vmem:[%s18698_s1 + $0x194] ss:$8 sps:$4 sm:$0xff]   ;;  %v12926_v4 = vld [vmem:[%s18698_s1 + $0x1d0] ss:$8 sps:$4 sm:$0xff]  }
 0x15f   :  { %v15601_v49 = vpop.f32.mrb[9].mxu0  ;;  %v15604_v53 = vadd.f32 %v1213_v8, %v15371_v38  ;;  %2062 = vmatpush1.bf16.msra.mxu1 %v12890_v57  ;;  %v1215_v27 = vpop.f32.mrb[10].mxu1  ;;  %v12907_v38 = vld [vmem:[%s18698_s1 + $0x1794] ss:$8 sps:$4 sm:$0xff]   ;;  %v12923_v57 = vld [vmem:[%s18698_s1 + $0x17c0] ss:$8 sps:$4 sm:$0xff]  }
 0x160   :  { %6558 = vmatpush1.bf16.msra.mxu0 %v12893_v42  ;;  %v5435_v21 = vpop.f32.mrb[10].mxu0  ;;  %2063 = vmatprep.subr.bf16.mxu1 %v12898_v48  ;;  %v1216_v0 = vpop.f32.mrb[11].mxu1  ;;  %v15662_v42 = vcombine.low %v15461_v60, %v15461_v60  ;;  %v12928_v48 = vld [vmem:[%s18698_s1 + $0x1d4] ss:$8 sps:$4 sm:$0xff]   ;;  %v5701_v8 = vshrl.u32 %v14672_v20, 16 }
 0x161   :  { %6559 = vmatprep.subr.bf16.mxu0 %v12901_v63  ;;  %v5436_v30 = vpop.f32.mrb[11].mxu0  ;;  %v12931_v63 = vld [vmem:[%s18698_s1 + $0x17d4] ss:$8 sps:$4 sm:$0xff]   ;;  %v12929_v60 = vld [vmem:[%s18698_s1 + $0x17d0] ss:$8 sps:$4 sm:$0xff]  }
 0x162   :  { %v5712_v27 = vshll.u32 %v15662_v42, 16  ;;  %v12934_v21 = vld [vmem:[%s18698_s1 + $0x1e4] ss:$8 sps:$4 sm:$0xff]   ;;  %v5703_v0 = vrot.slane %v5701_v8, 2 }
 0x163   :  { %2064 = vmatpush1.bf16.msra.mxu1 %v12896_v51  ;;  %v5704_v51 = vshll.u32 %v14672_v20, 16  ;;  %v12935_v20 = vld [vmem:[%s18698_s1 + $0x17e0] ss:$8 sps:$4 sm:$0xff]  }
 0x164   :  { %6560 = vmatpush1.bf16.msra.mxu0 %v12899_v24  ;;  %2065 = vmatprep.subr.bf16.mxu1 %v12904_v43  ;;  %v5709_v24 = vshrl.u32 %v15662_v42, 16  ;;  %v12937_v43 = vld [vmem:[%s18698_s1 + $0x17e4] ss:$8 sps:$4 sm:$0xff]  }
 0x165   :  { %6561 = vmatprep.subr.bf16.mxu0 %v12907_v38  ;;  %v12932_v38 = vld [vmem:[%s18698_s1 + $0x1e0] ss:$8 sps:$4 sm:$0xff]   ;;  %v5706_v30 = vrot.slane %v5704_v51, 3 }
 0x167   :  { %2066 = vmatpush1.bf16.msra.mxu1 %v12902_v11  ;;  %v5711_v11 = vrot.slane %v5709_v24, 2  ;;  %v12952_v24 = vld [vmem:[%s18698_s1 + $0x210] ss:$8 sps:$4 sm:$0xff]  }
 0x168   :  { %6562 = vmatpush1.bf16.msra.mxu0 %v12905_v36  ;;  %2067 = vmatprep.subr.bf16.mxu1 %v12910_v39  ;;  %v5714_v36 = vrot.slane %v5712_v27, 3  ;;  %v12940_v39 = vld [vmem:[%s18698_s1 + $0x1f4] ss:$8 sps:$4 sm:$0xff]   ;;  %v12955_v27 = vld [vmem:[%s18698_s1 + $0x1810] ss:$8 sps:$4 sm:$0xff]  }
 0x169   :  { %6563 = vmatprep.subr.bf16.mxu0 %v12913_v40  ;;  %v12943_v40 = vld [vmem:[%s18698_s1 + $0x17f4] ss:$8 sps:$4 sm:$0xff]  }
 0x16b   :  { %2068 = vmatpush1.bf16.msra.mxu1 %v12908_v15  ;;  %v12938_v15 = vld [vmem:[%s18698_s1 + $0x1f0] ss:$8 sps:$4 sm:$0xff]  }
 0x16c   :  { %6564 = vmatpush1.bf16.msra.mxu0 %v12911_v29  ;;  %2069 = vmatprep.subr.bf16.mxu1 %v12916_v1  ;;  %v12941_v29 = vld [vmem:[%s18698_s1 + $0x17f0] ss:$8 sps:$4 sm:$0xff]   ;;  %v12948_v1 = vld [vmem:[%s18698_s1 + $0x204] ss:$8 sps:$4 sm:$0xff]  }
 0x16d   :  { %6565 = vmatprep.subr.bf16.mxu0 %v12919_v45  ;;  %v5707_v45 = vor.u32 %v5706_v30, %v5703_v0  ;;  %v12963_v0 = vld [vmem:[%s18698_s1 + $0x1820] ss:$8 sps:$4 sm:$0xff]   ;;  %v6758_v30 = vrot.slane %v14777_v9, 3  ;;  %v13069_v9 = vld [vmem:[%s18698_s1 + $0x1934] ss:$8 sps:$4 sm:$0xff]  }
 0x16f   :  { %2070 = vmatpush1.bf16.msra.mxu1 %v12914_v52  ;;  %v5715_v52 = vor.u32 %v5714_v36, %v5711_v11  ;;  %v12971_v11 = vld [vmem:[%s18698_s1 + $0x1834] ss:$8 sps:$4 sm:$0xff]  }
 0x170   :  { %6566 = vmatpush1.bf16.msra.mxu0 %v12917_v34  ;;  %2071 = vmatprep.subr.bf16.mxu1 %v12922_v32  ;;  %v12951_v34 = vld [vmem:[%s18698_s1 + $0x1804] ss:$8 sps:$4 sm:$0xff]  }
 0x171   :  { %6567 = vmatprep.subr.bf16.mxu0 %v12925_v31  ;;  %v23_v32 = vld [vmem:[%s18699_s0 + $0x48] sm:$0x11] }
 0x172   :  { %v12946_v31 = vld [vmem:[%s18698_s1 + $0x200] ss:$8 sps:$4 sm:$0xff]   ;;  %v10205_v8 = vcombine.high %v23_v32, %v23_v32 }
 0x173   :  { %2072 = vmatpush1.bf16.msra.mxu1 %v12920_v23  ;;  %v12949_v23 = vld [vmem:[%s18698_s1 + $0x1800] ss:$8 sps:$4 sm:$0xff]  }
 0x174   :  { %6568 = vmatpush1.bf16.msra.mxu0 %v12923_v57  ;;  %2073 = vmatprep.subr.bf16.mxu1 %v12928_v48  ;;  %v15722_v57 = vld [vmem:[%s18699_s0] sm:$0x88]  ;;  %v5716_v48 = vsel %vm5597_vm2, %v5707_v45, %v5715_v52 }
 0x175   :  { %6569 = vmatprep.subr.bf16.mxu0 %v12931_v63  ;;  %v12954_v63 = vld [vmem:[%s18698_s1 + $0x214] ss:$8 sps:$4 sm:$0xff]   ;;  %v12975_v45 = vld [vmem:[%s18698_s1 + $0x1840] ss:$8 sps:$4 sm:$0xff]  }
 0x177   :  { %2074 = vmatpush1.bf16.msra.mxu1 %v12926_v4  ;;  %v12957_v4 = vld [vmem:[%s18698_s1 + $0x1814] ss:$8 sps:$4 sm:$0xff]  }
 0x178   :  { %6570 = vmatpush1.bf16.msra.mxu0 %v12929_v60  ;;  %2075 = vmatprep.subr.bf16.mxu1 %v12934_v21  ;;  %v15735_v60 = vld [vmem:[%s18699_s0 + $0x20] sm:$0xff] }
 0x179   :  { %6571 = vmatprep.subr.bf16.mxu0 %v12937_v43  ;;  %v11523_v51 = vcombine.high %v15722_v57, %v15735_v60  ;;  %v12965_v21 = vld [vmem:[%s18698_s1 + $0x1824] ss:$8 sps:$4 sm:$0xff]   ;;  %v12960_v43 = vld [vmem:[%s18698_s1 + $0x220] ss:$8 sps:$4 sm:$0xff]  }
 0x17b   :  { %2076 = vmatpush1.bf16.msra.mxu1 %v12932_v38  ;;  %v10204_v38 = vcombine.low %v23_v32, %v23_v32  ;;  %v12981_v32 = vld [vmem:[%s18698_s1 + $0x1850] ss:$8 sps:$4 sm:$0xff]  }
 0x17c   :  { %6572 = vmatpush1.bf16.msra.mxu0 %v12935_v20  ;;  %2077 = vmatprep.subr.bf16.mxu1 %v12940_v39  ;;  %v6757_v20 = vrot.slane %v11523_v51, 3  ;;  %v12966_v39 = vld [vmem:[%s18698_s1 + $0x230] ss:$8 sps:$4 sm:$0xff]  }
 0x17d   :  { %6573 = vmatprep.subr.bf16.mxu0 %v12943_v40  ;;  %v12969_v40 = vld [vmem:[%s18698_s1 + $0x1830] ss:$8 sps:$4 sm:$0xff]  }
 0x17e   :  { %v6759_v36 = vsel %vm6753_vm3, %v6757_v20, %v6758_v30  ;;  %v12990_v51 = vld [vmem:[%s18698_s1 + $0x270] ss:$8 sps:$4 sm:$0xff]  }
 0x17f   :  { %2078 = vmatpush1.bf16.msra.mxu1 %v12938_v15  ;;  %v12974_v15 = vld [vmem:[%s18698_s1 + $0x244] ss:$8 sps:$4 sm:$0xff]  }
 0x180   :  { %6574 = vmatpush1.bf16.msra.mxu0 %v12941_v29  ;;  %2098 = vmatprep.subr.bf16.mxu1 %v12948_v1  ;;  %v12977_v29 = vld [vmem:[%s18698_s1 + $0x1844] ss:$8 sps:$4 sm:$0xff]   ;;  %v12972_v1 = vld [vmem:[%s18698_s1 + $0x240] ss:$8 sps:$4 sm:$0xff]  }
 0x181   :  { %7434 = vmatprep.subr.bf16.mxu0 %v12951_v34  ;;  %v12978_v34 = vld [vmem:[%s18698_s1 + $0x250] ss:$8 sps:$4 sm:$0xff]  }
 0x182   :  { %2080 = vmatmul.mubr.bf16.vlgmr.msra.gmra.mrb[0].mxu1 %v14633_v62  ;;  %v12962_v62 = vld [vmem:[%s18698_s1 + $0x224] ss:$8 sps:$4 sm:$0xff]  }
 0x183   :  { %6576 = vmatmul.mubr.bf16.vlgmr.msra.gmra.mrb[0].mxu0 %v5716_v48  ;;  %2099 = vmatpush1.bf16.msra.mxu1 %v12946_v31  ;;  %v12986_v31 = vld [vmem:[%s18698_s1 + $0x264] ss:$8 sps:$4 sm:$0xff]   ;;  %v12984_v48 = vld [vmem:[%s18698_s1 + $0x260] ss:$8 sps:$4 sm:$0xff]  }
 0x184   :  { %7435 = vmatpush1.bf16.msra.mxu0 %v12949_v23  ;;  %2100 = vmatprep.subr.bf16.mxu1 %v12954_v63  ;;  %v12989_v23 = vld [vmem:[%s18698_s1 + $0x1864] ss:$8 sps:$4 sm:$0xff]   ;;  %v12987_v63 = vld [vmem:[%s18698_s1 + $0x1860] ss:$8 sps:$4 sm:$0xff]  }
 0x185   :  { %7436 = vmatprep.subr.bf16.mxu0 %v12957_v4  ;;  %2089 = vmatprep.mubr.bf16.mxu1 %v10205_v8  ;;  %v12992_v4 = vld [vmem:[%s18698_s1 + $0x274] ss:$8 sps:$4 sm:$0xff]  }
 0x186   :  { %6585 = vmatprep.mubr.bf16.mxu0 %v15525_v18  ;;  %v12968_v18 = vld [vmem:[%s18698_s1 + $0x234] ss:$8 sps:$4 sm:$0xff]  }
 0x187   :  { %2101 = vmatpush1.bf16.msra.mxu1 %v12952_v24  ;;  %v12995_v8 = vld [vmem:[%s18698_s1 + $0x1874] ss:$8 sps:$4 sm:$0xff]   ;;  %v12993_v24 = vld [vmem:[%s18698_s1 + $0x1870] ss:$8 sps:$4 sm:$0xff]  }
 0x188   :  { %7437 = vmatpush1.bf16.msra.mxu0 %v12955_v27  ;;  %2102 = vmatprep.subr.bf16.mxu1 %v12962_v62  ;;  %v12998_v27 = vld [vmem:[%s18698_s1 + $0x284] ss:$8 sps:$4 sm:$0xff]  }
 0x189   :  { %7438 = vmatprep.subr.bf16.mxu0 %v12965_v21  ;;  %v13001_v62 = vld [vmem:[%s18698_s1 + $0x1884] ss:$8 sps:$4 sm:$0xff]  }
 0x18a   :  { %2090 = vmatmul.mubr.bf16.gmra.mrb[24].mxu1 %v10204_v38 }
 0x18b   :  { %6586 = vmatmul.mubr.bf16.gmra.mrb[24].mxu0 %v5715_v52  ;;  %2103 = vmatpush1.bf16.msra.mxu1 %v12960_v43  ;;  %v12980_v52 = vld [vmem:[%s18698_s1 + $0x254] ss:$8 sps:$4 sm:$0xff]  }
 0x18c   :  { %7439 = vmatpush1.bf16.msra.mxu0 %v12963_v0  ;;  %2104 = vmatprep.subr.bf16.mxu1 %v12968_v18 }
 0x18d   :  { %7440 = vmatprep.subr.bf16.mxu0 %v12971_v11  ;;  %2130 = vmatprep.mubr.bf16.mxu1 %v14737_v56  ;;  %v12983_v56 = vld [vmem:[%s18698_s1 + $0x1854] ss:$8 sps:$4 sm:$0xff]   ;;  %v12996_v11 = vld [vmem:[%s18698_s1 + $0x280] ss:$8 sps:$4 sm:$0xff]  }
 0x18e   :  { %7466 = vmatprep.mubr.bf16.mxu0 %v6759_v36  ;;  %v12999_v36 = vld [vmem:[%s18698_s1 + $0x1880] ss:$8 sps:$4 sm:$0xff]  }
 0x18f   :  { %2105 = vmatpush1.bf16.msra.mxu1 %v12966_v39 }
 0x190   :  { %7441 = vmatpush1.bf16.msra.mxu0 %v12969_v40  ;;  %2106 = vmatprep.subr.bf16.mxu1 %v12974_v15 }
 0x191   :  { %7442 = vmatprep.subr.bf16.mxu0 %v12977_v29 }
 0x193   :  { %2107 = vmatpush1.bf16.msra.mxu1 %v12972_v1  ;;  %v13002_v1 = vld [vmem:[%s18698_s1 + $0x290] ss:$8 sps:$4 sm:$0xff]  }
 0x194   :  { %7443 = vmatpush1.bf16.msra.mxu0 %v12975_v45  ;;  %2108 = vmatprep.subr.bf16.mxu1 %v12980_v52  ;;  %v13005_v45 = vld [vmem:[%s18698_s1 + $0x1890] ss:$8 sps:$4 sm:$0xff]   ;;  %v13010_v52 = vld [vmem:[%s18698_s1 + $0x2a4] ss:$8 sps:$4 sm:$0xff]  }
 0x195   :  { %7444 = vmatprep.subr.bf16.mxu0 %v12983_v56  ;;  %v13013_v56 = vld [vmem:[%s18698_s1 + $0x18a4] ss:$8 sps:$4 sm:$0xff]  }
 0x197   :  { %2109 = vmatpush1.bf16.msra.mxu1 %v12978_v34  ;;  %v13008_v34 = vld [vmem:[%s18698_s1 + $0x2a0] ss:$8 sps:$4 sm:$0xff]  }
 0x198   :  { %7445 = vmatpush1.bf16.msra.mxu0 %v12981_v32  ;;  %2110 = vmatprep.subr.bf16.mxu1 %v12986_v31  ;;  %v13011_v32 = vld [vmem:[%s18698_s1 + $0x18a0] ss:$8 sps:$4 sm:$0xff]   ;;  %v13016_v31 = vld [vmem:[%s18698_s1 + $0x2b4] ss:$8 sps:$4 sm:$0xff]  }
 0x199   :  { %7446 = vmatprep.subr.bf16.mxu0 %v12989_v23  ;;  %v13019_v23 = vld [vmem:[%s18698_s1 + $0x18b4] ss:$8 sps:$4 sm:$0xff]  }
 0x19b   :  { %2111 = vmatpush1.bf16.msra.mxu1 %v12984_v48  ;;  %v13014_v48 = vld [vmem:[%s18698_s1 + $0x2b0] ss:$8 sps:$4 sm:$0xff]  }
 0x19c   :  { %7447 = vmatpush1.bf16.msra.mxu0 %v12987_v63  ;;  %2112 = vmatprep.subr.bf16.mxu1 %v12992_v4  ;;  %v13017_v63 = vld [vmem:[%s18698_s1 + $0x18b0] ss:$8 sps:$4 sm:$0xff]   ;;  %v13022_v4 = vld [vmem:[%s18698_s1 + $0x2c4] ss:$8 sps:$4 sm:$0xff]  }
 0x19d   :  { %7448 = vmatprep.subr.bf16.mxu0 %v12995_v8  ;;  %v1262_v21 = vpop.f32.mrb[12].mxu1  ;;  %v13025_v8 = vld [vmem:[%s18698_s1 + $0x18c4] ss:$8 sps:$4 sm:$0xff]  }
 0x19e   :  { %v15829_v43 = vpop.f32.mrb[12].mxu0  ;;  %v15832_v38 = vadd.f32 %v1262_v21, %v15599_v7  ;;  %v1264_v0 = vpop.f32.mrb[13].mxu1  ;;  %v13004_v7 = vld [vmem:[%s18698_s1 + $0x294] ss:$8 sps:$4 sm:$0xff]   ;;  %v13026_v21 = vld [vmem:[%s18698_s1 + $0x2d0] ss:$8 sps:$4 sm:$0xff]  }
 0x19f   :  { %v15834_v20 = vpop.f32.mrb[13].mxu0  ;;  %v15837_v18 = vadd.f32 %v1264_v0, %v15604_v53  ;;  %2113 = vmatpush1.bf16.msra.mxu1 %v12990_v51  ;;  %v1266_v39 = vpop.f32.mrb[14].mxu1  ;;  %v13007_v53 = vld [vmem:[%s18698_s1 + $0x1894] ss:$8 sps:$4 sm:$0xff]   ;;  %v13020_v51 = vld [vmem:[%s18698_s1 + $0x2c0] ss:$8 sps:$4 sm:$0xff]  }
 0x1a0   :  { %7449 = vmatpush1.bf16.msra.mxu0 %v12993_v24  ;;  %v6438_v40 = vpop.f32.mrb[14].mxu0  ;;  %2114 = vmatprep.subr.bf16.mxu1 %v12998_v27  ;;  %v1267_v15 = vpop.f32.mrb[15].mxu1  ;;  %v13023_v24 = vld [vmem:[%s18698_s1 + $0x18c0] ss:$8 sps:$4 sm:$0xff]   ;;  %v13028_v27 = vld [vmem:[%s18698_s1 + $0x2d4] ss:$8 sps:$4 sm:$0xff]  }
 0x1a1   :  { %7450 = vmatprep.subr.bf16.mxu0 %v13001_v62  ;;  %v6439_v29 = vpop.f32.mrb[15].mxu0  ;;  %v13031_v62 = vld [vmem:[%s18698_s1 + $0x18d4] ss:$8 sps:$4 sm:$0xff]   ;;  %v13029_v0 = vld [vmem:[%s18698_s1 + $0x18d0] ss:$8 sps:$4 sm:$0xff]  }
 0x1a2   :  { %v13032_v39 = vld [vmem:[%s18698_s1 + $0x2e0] ss:$8 sps:$4 sm:$0xff]   ;;  %v13043_v15 = vld [vmem:[%s18698_s1 + $0x18f4] ss:$8 sps:$4 sm:$0xff]   ;;  %v13038_v29 = vld [vmem:[%s18698_s1 + $0x2f0] ss:$8 sps:$4 sm:$0xff]  }
 0x1a3   :  { %2115 = vmatpush1.bf16.msra.mxu1 %v12996_v11  ;;  %v13034_v11 = vld [vmem:[%s18698_s1 + $0x2e4] ss:$8 sps:$4 sm:$0xff]   ;;  %v13035_v40 = vld [vmem:[%s18698_s1 + $0x18e0] ss:$8 sps:$4 sm:$0xff]  }
 0x1a4   :  { %7451 = vmatpush1.bf16.msra.mxu0 %v12999_v36  ;;  %2116 = vmatprep.subr.bf16.mxu1 %v13004_v7  ;;  %v13037_v36 = vld [vmem:[%s18698_s1 + $0x18e4] ss:$8 sps:$4 sm:$0xff]   ;;  %v11522_v7 = vcombine.low %v15722_v57, %v15735_v60  ;;  %v13041_v57 = vld [vmem:[%s18698_s1 + $0x18f0] ss:$8 sps:$4 sm:$0xff]  }
 0x1a5   :  { %7452 = vmatprep.subr.bf16.mxu0 %v13007_v53  ;;  %v13040_v53 = vld [vmem:[%s18698_s1 + $0x2f4] ss:$8 sps:$4 sm:$0xff]  }
 0x1a6   :  { %v6754_v60 = vrot.slane %v11522_v7, 3  ;;  %v13067_v7 = vld [vmem:[%s18698_s1 + $0x1930] ss:$8 sps:$4 sm:$0xff]  }
 0x1a7   :  { %2117 = vmatpush1.bf16.msra.mxu1 %v13002_v1  ;;  %v6755_v1 = vrot.slane %v14916_v50, 3  ;;  %v13044_v50 = vld [vmem:[%s18698_s1 + $0x300] ss:$8 sps:$4 sm:$0xff]  }
 0x1a8   :  { %7453 = vmatpush1.bf16.msra.mxu0 %v13005_v45  ;;  %2118 = vmatprep.subr.bf16.mxu1 %v13010_v52  ;;  %v13046_v45 = vld [vmem:[%s18698_s1 + $0x304] ss:$8 sps:$4 sm:$0xff]  }
 0x1a9   :  { %7454 = vmatprep.subr.bf16.mxu0 %v13013_v56  ;;  %v13049_v52 = vld [vmem:[%s18698_s1 + $0x1904] ss:$8 sps:$4 sm:$0xff]   ;;  %v24_v56 = vld [vmem:[%s18699_s0 + $0x50] sm:$0x11] }
 0x1ab   :  { %2119 = vmatpush1.bf16.msra.mxu1 %v13008_v34  ;;  %v13047_v34 = vld [vmem:[%s18698_s1 + $0x1900] ss:$8 sps:$4 sm:$0xff]  }
 0x1ac   :  { %7455 = vmatpush1.bf16.msra.mxu0 %v13011_v32  ;;  %2120 = vmatprep.subr.bf16.mxu1 %v13016_v31  ;;  %v6756_v32 = vsel %vm6753_vm3, %v6754_v60, %v6755_v1  ;;  %v15951_v31 = vld [vmem:[%s18699_s0 + $0x8] sm:$0x88]  ;;  %v13078_v60 = vld [vmem:[%s18698_s1 + $0x354] ss:$8 sps:$4 sm:$0xff]  }
 0x1ad   :  { %7456 = vmatprep.subr.bf16.mxu0 %v13019_v23  ;;  %v13052_v23 = vld [vmem:[%s18698_s1 + $0x314] ss:$8 sps:$4 sm:$0xff]  }
 0x1af   :  { %2121 = vmatpush1.bf16.msra.mxu1 %v13014_v48  ;;  %v13055_v48 = vld [vmem:[%s18698_s1 + $0x1914] ss:$8 sps:$4 sm:$0xff]  }
 0x1b0   :  { %7457 = vmatpush1.bf16.msra.mxu0 %v13017_v63  ;;  %2122 = vmatprep.subr.bf16.mxu1 %v13022_v4  ;;  %v10207_v63 = vcombine.high %v24_v56, %v24_v56  ;;  %v15963_v4 = vld [vmem:[%s18699_s0 + $0x28] sm:$0xff] }
 0x1b1   :  { %7458 = vmatprep.subr.bf16.mxu0 %v13025_v8  ;;  %v11525_v8 = vcombine.high %v15951_v31, %v15963_v4 }
 0x1b3   :  { %2123 = vmatpush1.bf16.msra.mxu1 %v13020_v51  ;;  %v13050_v51 = vld [vmem:[%s18698_s1 + $0x310] ss:$8 sps:$4 sm:$0xff]  }
 0x1b4   :  { %7459 = vmatpush1.bf16.msra.mxu0 %v13023_v24  ;;  %2124 = vmatprep.subr.bf16.mxu1 %v13028_v27  ;;  %v13053_v24 = vld [vmem:[%s18698_s1 + $0x1910] ss:$8 sps:$4 sm:$0xff]   ;;  %v13063_v27 = vld [vmem:[%s18698_s1 + $0x1924] ss:$8 sps:$4 sm:$0xff]  }
 0x1b5   :  { %7460 = vmatprep.subr.bf16.mxu0 %v13031_v62  ;;  %v13058_v62 = vld [vmem:[%s18698_s1 + $0x320] ss:$8 sps:$4 sm:$0xff]  }
 0x1b7   :  { %2125 = vmatpush1.bf16.msra.mxu1 %v13026_v21  ;;  %v10206_v21 = vcombine.low %v24_v56, %v24_v56  ;;  %v13087_v56 = vld [vmem:[%s18698_s1 + $0x1964] ss:$8 sps:$4 sm:$0xff]  }
 0x1b8   :  { %7461 = vmatpush1.bf16.msra.mxu0 %v13029_v0  ;;  %2126 = vmatprep.subr.bf16.mxu1 %v13034_v11  ;;  %v6763_v0 = vrot.slane %v11525_v8, 3  ;;  %v6764_v11 = vrot.slane %v14986_v28, 3  ;;  %v13096_v8 = vld [vmem:[%s18698_s1 + $0x384] ss:$8 sps:$4 sm:$0xff]   ;;  %v13164_v28 = vld [vmem:[%s18698_s1 + $0x834] ss:$8 sps:$4 sm:$0xff]  }
 0x1b9   :  { %7462 = vmatprep.subr.bf16.mxu0 %v13037_v36  ;;  %v13061_v36 = vld [vmem:[%s18698_s1 + $0x1920] ss:$8 sps:$4 sm:$0xff]  }
 0x1bb   :  { %2127 = vmatpush1.bf16.msra.mxu1 %v13032_v39  ;;  %v13066_v39 = vld [vmem:[%s18698_s1 + $0x334] ss:$8 sps:$4 sm:$0xff]  }
 0x1bc   :  { %7463 = vmatpush1.bf16.msra.mxu0 %v13035_v40  ;;  %2128 = vmatprep.subr.bf16.mxu1 %v13040_v53  ;;  %v13064_v40 = vld [vmem:[%s18698_s1 + $0x330] ss:$8 sps:$4 sm:$0xff]   ;;  %v13072_v53 = vld [vmem:[%s18698_s1 + $0x344] ss:$8 sps:$4 sm:$0xff]  }
 0x1bd   :  { %7464 = vmatprep.subr.bf16.mxu0 %v13043_v15  ;;  %v13075_v15 = vld [vmem:[%s18698_s1 + $0x1944] ss:$8 sps:$4 sm:$0xff]  }
 0x1bf   :  { %2129 = vmatpush1.bf16.msra.mxu1 %v13038_v29  ;;  %v13070_v29 = vld [vmem:[%s18698_s1 + $0x340] ss:$8 sps:$4 sm:$0xff]  }
 0x1c0   :  { %7465 = vmatpush1.bf16.msra.mxu0 %v13041_v57  ;;  %2149 = vmatprep.subr.bf16.mxu1 %v13046_v45  ;;  %v13073_v57 = vld [vmem:[%s18698_s1 + $0x1940] ss:$8 sps:$4 sm:$0xff]   ;;  %v13079_v45 = vld [vmem:[%s18698_s1 + $0x1950] ss:$8 sps:$4 sm:$0xff]  }
 0x1c1   :  { %7485 = vmatprep.subr.bf16.mxu0 %v13049_v52  ;;  %v13084_v52 = vld [vmem:[%s18698_s1 + $0x364] ss:$8 sps:$4 sm:$0xff]  }
 0x1c2   :  { %2131 = vmatmul.mubr.bf16.vlgmr.msra.gmra.mrb[0].mxu1 %v14900_v35  ;;  %v13060_v35 = vld [vmem:[%s18698_s1 + $0x324] ss:$8 sps:$4 sm:$0xff]  }
 0x1c3   :  { %7467 = vmatmul.mubr.bf16.vlgmr.msra.gmra.mrb[0].mxu0 %v6756_v32  ;;  %2150 = vmatpush1.bf16.msra.mxu1 %v13044_v50  ;;  %v13082_v50 = vld [vmem:[%s18698_s1 + $0x360] ss:$8 sps:$4 sm:$0xff]   ;;  %v13090_v32 = vld [vmem:[%s18698_s1 + $0x374] ss:$8 sps:$4 sm:$0xff]  }
 0x1c4   :  { %7486 = vmatpush1.bf16.msra.mxu0 %v13047_v34  ;;  %2151 = vmatprep.subr.bf16.mxu1 %v13052_v23  ;;  %v13085_v34 = vld [vmem:[%s18698_s1 + $0x1960] ss:$8 sps:$4 sm:$0xff]   ;;  %v13093_v23 = vld [vmem:[%s18698_s1 + $0x1974] ss:$8 sps:$4 sm:$0xff]  }
 0x1c5   :  { %7487 = vmatprep.subr.bf16.mxu0 %v13055_v48  ;;  %2140 = vmatprep.mubr.bf16.mxu1 %v10207_v63  ;;  %v13088_v48 = vld [vmem:[%s18698_s1 + $0x370] ss:$8 sps:$4 sm:$0xff]  }
 0x1c6   :  { %7476 = vmatprep.mubr.bf16.mxu0 %v6758_v30  ;;  %v6765_v30 = vsel %vm6753_vm3, %v6763_v0, %v6764_v11  ;;  %v13091_v63 = vld [vmem:[%s18698_s1 + $0x1970] ss:$8 sps:$4 sm:$0xff]  }
 0x1c7   :  { %2152 = vmatpush1.bf16.msra.mxu1 %v13050_v51  ;;  %v13099_v51 = vld [vmem:[%s18698_s1 + $0x1984] ss:$8 sps:$4 sm:$0xff]  }
 0x1c8   :  { %7488 = vmatpush1.bf16.msra.mxu0 %v13053_v24  ;;  %2153 = vmatprep.subr.bf16.mxu1 %v13060_v35 }
 0x1c9   :  { %7489 = vmatprep.subr.bf16.mxu0 %v13063_v27 }
 0x1ca   :  { %2141 = vmatmul.mubr.bf16.gmra.mrb[28].mxu1 %v10206_v21 }
 0x1cb   :  { %7477 = vmatmul.mubr.bf16.gmra.mrb[28].mxu0 %v6755_v1  ;;  %2154 = vmatpush1.bf16.msra.mxu1 %v13058_v62  ;;  %v13076_v1 = vld [vmem:[%s18698_s1 + $0x350] ss:$8 sps:$4 sm:$0xff]  }
 0x1cc   :  { %7490 = vmatpush1.bf16.msra.mxu0 %v13061_v36  ;;  %2155 = vmatprep.subr.bf16.mxu1 %v13066_v39 }
 0x1cd   :  { %7491 = vmatprep.subr.bf16.mxu0 %v13069_v9  ;;  %2181 = vmatprep.mubr.bf16.mxu1 %v14973_v16  ;;  %v13081_v16 = vld [vmem:[%s18698_s1 + $0x1954] ss:$8 sps:$4 sm:$0xff]   ;;  %v13094_v9 = vld [vmem:[%s18698_s1 + $0x380] ss:$8 sps:$4 sm:$0xff]  }
 0x1ce   :  { %7517 = vmatprep.mubr.bf16.mxu0 %v6765_v30 }
 0x1cf   :  { %2156 = vmatpush1.bf16.msra.mxu1 %v13064_v40 }
 0x1d0   :  { %7492 = vmatpush1.bf16.msra.mxu0 %v13067_v7  ;;  %2157 = vmatprep.subr.bf16.mxu1 %v13072_v53  ;;  %v13100_v53 = vld [vmem:[%s18698_s1 + $0x390] ss:$8 sps:$4 sm:$0xff]  }
 0x1d1   :  { %7493 = vmatprep.subr.bf16.mxu0 %v13075_v15  ;;  %v13103_v15 = vld [vmem:[%s18698_s1 + $0x1990] ss:$8 sps:$4 sm:$0xff]  }
 0x1d3   :  { %2158 = vmatpush1.bf16.msra.mxu1 %v13070_v29  ;;  %v13108_v29 = vld [vmem:[%s18698_s1 + $0x3a4] ss:$8 sps:$4 sm:$0xff]  }
 0x1d4   :  { %7494 = vmatpush1.bf16.msra.mxu0 %v13073_v57  ;;  %2159 = vmatprep.subr.bf16.mxu1 %v13078_v60  ;;  %v13111_v57 = vld [vmem:[%s18698_s1 + $0x19a4] ss:$8 sps:$4 sm:$0xff]   ;;  %v13106_v60 = vld [vmem:[%s18698_s1 + $0x3a0] ss:$8 sps:$4 sm:$0xff]  }
 0x1d5   :  { %7495 = vmatprep.subr.bf16.mxu0 %v13081_v16  ;;  %v13109_v16 = vld [vmem:[%s18698_s1 + $0x19a0] ss:$8 sps:$4 sm:$0xff]  }
 0x1d7   :  { %2160 = vmatpush1.bf16.msra.mxu1 %v13076_v1  ;;  %v13114_v1 = vld [vmem:[%s18698_s1 + $0x3b4] ss:$8 sps:$4 sm:$0xff]  }
 0x1d8   :  { %7496 = vmatpush1.bf16.msra.mxu0 %v13079_v45  ;;  %2161 = vmatprep.subr.bf16.mxu1 %v13084_v52  ;;  %v13117_v45 = vld [vmem:[%s18698_s1 + $0x19b4] ss:$8 sps:$4 sm:$0xff]   ;;  %v13112_v52 = vld [vmem:[%s18698_s1 + $0x3b0] ss:$8 sps:$4 sm:$0xff]  }
 0x1d9   :  { %7497 = vmatprep.subr.bf16.mxu0 %v13087_v56  ;;  %v13115_v56 = vld [vmem:[%s18698_s1 + $0x19b0] ss:$8 sps:$4 sm:$0xff]  }
 0x1db   :  { %2162 = vmatpush1.bf16.msra.mxu1 %v13082_v50  ;;  %v13120_v50 = vld [vmem:[%s18698_s1 + $0x3c4] ss:$8 sps:$4 sm:$0xff]  }
 0x1dc   :  { %7498 = vmatpush1.bf16.msra.mxu0 %v13085_v34  ;;  %2163 = vmatprep.subr.bf16.mxu1 %v13090_v32  ;;  %v13123_v34 = vld [vmem:[%s18698_s1 + $0x19c4] ss:$8 sps:$4 sm:$0xff]   ;;  %v13118_v32 = vld [vmem:[%s18698_s1 + $0x3c0] ss:$8 sps:$4 sm:$0xff]  }
 0x1dd   :  { %7499 = vmatprep.subr.bf16.mxu0 %v13093_v23  ;;  %v1313_v24 = vpop.f32.mrb[16].mxu1  ;;  %v13121_v23 = vld [vmem:[%s18698_s1 + $0x19c0] ss:$8 sps:$4 sm:$0xff]  }
 0x1de   :  { %v6485_v35 = vpop.f32.mrb[16].mxu0  ;;  %v16059_v27 = vadd.f32 %v1313_v24, %v15832_v38  ;;  %v1315_v21 = vpop.f32.mrb[17].mxu1  ;;  %v13097_v38 = vld [vmem:[%s18698_s1 + $0x1980] ss:$8 sps:$4 sm:$0xff]   ;;  %v13132_v24 = vld [vmem:[%s18698_s1 + $0x3e4] ss:$8 sps:$4 sm:$0xff]  }
 0x1df   :  { %v16062_v62 = vadd.f32 %v6485_v35, %v15829_v43  ;;  %v6487_v0 = vpop.f32.mrb[17].mxu0  ;;  %v16065_v36 = vadd.f32 %v1315_v21, %v15837_v18  ;;  %2164 = vmatpush1.bf16.msra.mxu1 %v13088_v48  ;;  %v1317_v43 = vpop.f32.mrb[18].mxu1  ;;  %v13102_v18 = vld [vmem:[%s18698_s1 + $0x394] ss:$8 sps:$4 sm:$0xff]   ;;  %v13135_v35 = vld [vmem:[%s18698_s1 + $0x19e4] ss:$8 sps:$4 sm:$0xff]  }
 0x1e0   :  { %v16068_v39 = vadd.f32 %v6487_v0, %v15834_v20  ;;  %7500 = vmatpush1.bf16.msra.mxu0 %v13091_v63  ;;  %v6489_v30 = vpop.f32.mrb[18].mxu0  ;;  %2165 = vmatprep.subr.bf16.mxu1 %v13096_v8  ;;  %v13105_v20 = vld [vmem:[%s18698_s1 + $0x1994] ss:$8 sps:$4 sm:$0xff]   ;;  %v1318_v40 = vpop.f32.mrb[19].mxu1  ;;  %v13124_v8 = vld [vmem:[%s18698_s1 + $0x3d0] ss:$8 sps:$4 sm:$0xff]  }
 0x1e1   :  { %7501 = vmatprep.subr.bf16.mxu0 %v13099_v51  ;;  %v6490_v7 = vpop.f32.mrb[19].mxu0  ;;  %v13126_v48 = vld [vmem:[%s18698_s1 + $0x3d4] ss:$8 sps:$4 sm:$0xff]   ;;  %v13127_v51 = vld [vmem:[%s18698_s1 + $0x19d0] ss:$8 sps:$4 sm:$0xff]  }
 0x1e2   :  { %v13129_v63 = vld [vmem:[%s18698_s1 + $0x19d4] ss:$8 sps:$4 sm:$0xff]   ;;  %v13130_v21 = vld [vmem:[%s18698_s1 + $0x3e0] ss:$8 sps:$4 sm:$0xff]   ;;  %v13136_v30 = vld [vmem:[%s18698_s1 + $0x3f0] ss:$8 sps:$4 sm:$0xff]  }
 0x1e3   :  { %2166 = vmatpush1.bf16.msra.mxu1 %v13094_v9  ;;  %v13133_v0 = vld [vmem:[%s18698_s1 + $0x19e0] ss:$8 sps:$4 sm:$0xff]   ;;  %v11524_v9 = vcombine.low %v15951_v31, %v15963_v4  ;;  %v13141_v43 = vld [vmem:[%s18698_s1 + $0x19f4] ss:$8 sps:$4 sm:$0xff]   ;;  %v13139_v31 = vld [vmem:[%s18698_s1 + $0x19f0] ss:$8 sps:$4 sm:$0xff]  }
 0x1e4   :  { %7502 = vmatpush1.bf16.msra.mxu0 %v13097_v38  ;;  %2167 = vmatprep.subr.bf16.mxu1 %v13102_v18  ;;  %v13138_v38 = vld [vmem:[%s18698_s1 + $0x3f4] ss:$8 sps:$4 sm:$0xff]   ;;  %v13144_v18 = vld [vmem:[%s18698_s1 + $0x804] ss:$8 sps:$4 sm:$0xff]  }
 0x1e5   :  { %7503 = vmatprep.subr.bf16.mxu0 %v13105_v20  ;;  %v6760_v4 = vrot.slane %v11524_v9, 3  ;;  %v6761_v20 = vrot.slane %v15192_v3, 3  ;;  %v13147_v40 = vld [vmem:[%s18698_s1 + $0x1a04] ss:$8 sps:$4 sm:$0xff]   ;;  %v25_v7 = vld [vmem:[%s18699_s0 + $0x58] sm:$0x11] }
 0x1e6   :  { %v13145_v3 = vld [vmem:[%s18698_s1 + $0x1a00] ss:$8 sps:$4 sm:$0xff]  }
 0x1e7   :  { %2168 = vmatpush1.bf16.msra.mxu1 %v13100_v53  ;;  %v16175_v53 = vld [vmem:[%s18699_s0 + $0x10] sm:$0x88] }
 0x1e8   :  { %7504 = vmatpush1.bf16.msra.mxu0 %v13103_v15  ;;  %2169 = vmatprep.subr.bf16.mxu1 %v13108_v29  ;;  %v13142_v15 = vld [vmem:[%s18698_s1 + $0x800] ss:$8 sps:$4 sm:$0xff]   ;;  %v6762_v29 = vsel %vm6753_vm3, %v6760_v4, %v6761_v20 }
 0x1e9   :  { %7505 = vmatprep.subr.bf16.mxu0 %v13111_v57  ;;  %v16187_v57 = vld [vmem:[%s18699_s0] sm:$0xee] }
 0x1ea   :  { %v13168_v4 = vld [vmem:[%s18698_s1 + $0x840] ss:$8 sps:$4 sm:$0xff]  }
 0x1eb   :  { %2170 = vmatpush1.bf16.msra.mxu1 %v13106_v60  ;;  %v13150_v60 = vld [vmem:[%s18698_s1 + $0x814] ss:$8 sps:$4 sm:$0xff]  }
 0x1ec   :  { %7506 = vmatpush1.bf16.msra.mxu0 %v13109_v16  ;;  %2171 = vmatprep.subr.bf16.mxu1 %v13114_v1  ;;  %v13153_v16 = vld [vmem:[%s18698_s1 + $0x1a14] ss:$8 sps:$4 sm:$0xff]   ;;  %v10209_v1 = vcombine.high %v25_v7, %v25_v7 }
 0x1ed   :  { %7507 = vmatprep.subr.bf16.mxu0 %v13117_v45  ;;  %v16198_v45 = vld [vmem:[%s18699_s0 + $0x30] sm:$0xff] }
 0x1ef   :  { %2172 = vmatpush1.bf16.msra.mxu1 %v13112_v52  ;;  %v11527_v52 = vcombine.high %v16175_v53, %v16198_v45 }
 0x1f0   :  { %7508 = vmatpush1.bf16.msra.mxu0 %v13115_v56  ;;  %2173 = vmatprep.subr.bf16.mxu1 %v13120_v50  ;;  %v16206_v56 = vld [vmem:[%s18699_s0 + $0x20] sm:$0xff] }
 0x1f1   :  { %7509 = vmatprep.subr.bf16.mxu0 %v13123_v34  ;;  %v16210_v50 = vcombine.high %v16187_v57, %v16206_v56  ;;  %v13148_v34 = vld [vmem:[%s18698_s1 + $0x810] ss:$8 sps:$4 sm:$0xff]  }
 0x1f3   :  { %2174 = vmatpush1.bf16.msra.mxu1 %v13118_v32  ;;  %v13158_v32 = vld [vmem:[%s18698_s1 + $0x824] ss:$8 sps:$4 sm:$0xff]  }
 0x1f4   :  { %7510 = vmatpush1.bf16.msra.mxu0 %v13121_v23  ;;  %2175 = vmatprep.subr.bf16.mxu1 %v13126_v48  ;;  %v13161_v23 = vld [vmem:[%s18698_s1 + $0x1a24] ss:$8 sps:$4 sm:$0xff]   ;;  %v13156_v48 = vld [vmem:[%s18698_s1 + $0x820] ss:$8 sps:$4 sm:$0xff]  }
 0x1f5   :  { %7511 = vmatprep.subr.bf16.mxu0 %v13129_v63  ;;  %v13159_v63 = vld [vmem:[%s18698_s1 + $0x1a20] ss:$8 sps:$4 sm:$0xff]  }
 0x1f7   :  { %2176 = vmatpush1.bf16.msra.mxu1 %v13124_v8  ;;  %v6769_v8 = vrot.slane %v11527_v52, 3  ;;  %v13191_v52 = vld [vmem:[%s18698_s1 + $0x1a74] ss:$8 sps:$4 sm:$0xff]  }
 0x1f8   :  { %7512 = vmatpush1.bf16.msra.mxu0 %v13127_v51  ;;  %2177 = vmatprep.subr.bf16.mxu1 %v13132_v24  ;;  %v10208_v51 = vcombine.low %v25_v7, %v25_v7  ;;  %v6770_v24 = vrot.slane %v15245_v47, 3  ;;  %v13174_v7 = vld [vmem:[%s18698_s1 + $0x850] ss:$8 sps:$4 sm:$0xff]   ;;  %v13260_v47 = vld [vmem:[%s18698_s1 + $0x934] ss:$8 sps:$4 sm:$0xff]  }
 0x1f9   :  { %7513 = vmatprep.subr.bf16.mxu0 %v13135_v35  ;;  %v2357_v35 = vrot.slane %v16210_v50, 1 }
 0x1fb   :  { %2178 = vmatpush1.bf16.msra.mxu1 %v13130_v21  ;;  %v2358_v21 = vrot.slane %v14324_v54, 1  ;;  %v13263_v54 = vld [vmem:[%s18698_s1 + $0x1b34] ss:$8 sps:$4 sm:$0xff]  }
 0x1fc   :  { %7514 = vmatpush1.bf16.msra.mxu0 %v13133_v0  ;;  %2179 = vmatprep.subr.bf16.mxu1 %v13138_v38  ;;  %v6771_v0 = vsel %vm6753_vm3, %v6769_v8, %v6770_v24  ;;  %v13162_v38 = vld [vmem:[%s18698_s1 + $0x830] ss:$8 sps:$4 sm:$0xff]  }
 0x1fd   :  { %7515 = vmatprep.subr.bf16.mxu0 %v13141_v43  ;;  %v2359_v9 = vsel %vm2353_vm4, %v2357_v35, %v2358_v21  ;;  %v13165_v43 = vld [vmem:[%s18698_s1 + $0x1a30] ss:$8 sps:$4 sm:$0xff]  }
 0x1ff   :  { %2180 = vmatpush1.bf16.msra.mxu1 %v13136_v30  ;;  %v13170_v30 = vld [vmem:[%s18698_s1 + $0x844] ss:$8 sps:$4 sm:$0xff]  }
 0x200   :  { %7516 = vmatpush1.bf16.msra.mxu0 %v13139_v31  ;;  %3034 = vmatprep.subr.bf16.mxu1 %v13144_v18  ;;  %v13173_v31 = vld [vmem:[%s18698_s1 + $0x1a44] ss:$8 sps:$4 sm:$0xff]   ;;  %v13171_v18 = vld [vmem:[%s18698_s1 + $0x1a40] ss:$8 sps:$4 sm:$0xff]  }
 0x201   :  { %7536 = vmatprep.subr.bf16.mxu0 %v13147_v40  ;;  %v13179_v40 = vld [vmem:[%s18698_s1 + $0x1a54] ss:$8 sps:$4 sm:$0xff]  }
 0x202   :  { %2182 = vmatmul.mubr.bf16.vlgmr.msra.gmra.mrb[0].mxu1 %v15179_v33  ;;  %v13151_v33 = vld [vmem:[%s18698_s1 + $0x1a10] ss:$8 sps:$4 sm:$0xff]  }
 0x203   :  { %7518 = vmatmul.mubr.bf16.vlgmr.msra.gmra.mrb[0].mxu0 %v6762_v29  ;;  %3035 = vmatpush1.bf16.msra.mxu1 %v13142_v15  ;;  %v13177_v15 = vld [vmem:[%s18698_s1 + $0x1a50] ss:$8 sps:$4 sm:$0xff]   ;;  %v13185_v29 = vld [vmem:[%s18698_s1 + $0x1a64] ss:$8 sps:$4 sm:$0xff]  }
 0x204   :  { %7537 = vmatpush1.bf16.msra.mxu0 %v13145_v3  ;;  %3036 = vmatprep.subr.bf16.mxu1 %v13150_v60  ;;  %v13182_v3 = vld [vmem:[%s18698_s1 + $0x864] ss:$8 sps:$4 sm:$0xff]   ;;  %v13180_v60 = vld [vmem:[%s18698_s1 + $0x860] ss:$8 sps:$4 sm:$0xff]  }
 0x205   :  { %7538 = vmatprep.subr.bf16.mxu0 %v13153_v16  ;;  %2191 = vmatprep.mubr.bf16.mxu1 %v10209_v1  ;;  %v13183_v16 = vld [vmem:[%s18698_s1 + $0x1a60] ss:$8 sps:$4 sm:$0xff]   ;;  %v13188_v1 = vld [vmem:[%s18698_s1 + $0x874] ss:$8 sps:$4 sm:$0xff]  }
 0x206   :  { %7527 = vmatprep.mubr.bf16.mxu0 %v6764_v11  ;;  %v13167_v11 = vld [vmem:[%s18698_s1 + $0x1a34] ss:$8 sps:$4 sm:$0xff]  }
 0x207   :  { %3037 = vmatpush1.bf16.msra.mxu1 %v13148_v34  ;;  %v13186_v34 = vld [vmem:[%s18698_s1 + $0x870] ss:$8 sps:$4 sm:$0xff]  }
 0x208   :  { %7539 = vmatpush1.bf16.msra.mxu0 %v13151_v33  ;;  %3038 = vmatprep.subr.bf16.mxu1 %v13158_v32  ;;  %v13189_v33 = vld [vmem:[%s18698_s1 + $0x1a70] ss:$8 sps:$4 sm:$0xff]   ;;  %v13194_v32 = vld [vmem:[%s18698_s1 + $0x884] ss:$8 sps:$4 sm:$0xff]  }
 0x209   :  { %7540 = vmatprep.subr.bf16.mxu0 %v13161_v23  ;;  %v13197_v23 = vld [vmem:[%s18698_s1 + $0x1a84] ss:$8 sps:$4 sm:$0xff]  }
 0x20a   :  { %2192 = vmatmul.mubr.bf16.gmra.mrb[32].mxu1 %v10208_v51 }
 0x20b   :  { %7528 = vmatmul.mubr.bf16.gmra.mrb[32].mxu0 %v6761_v20  ;;  %3039 = vmatpush1.bf16.msra.mxu1 %v13156_v48  ;;  %v13176_v20 = vld [vmem:[%s18698_s1 + $0x854] ss:$8 sps:$4 sm:$0xff]  }
 0x20c   :  { %7541 = vmatpush1.bf16.msra.mxu0 %v13159_v63  ;;  %3040 = vmatprep.subr.bf16.mxu1 %v13164_v28 }
 0x20d   :  { %7542 = vmatprep.subr.bf16.mxu0 %v13167_v11  ;;  %7568 = vmatprep.mubr.bf16.mxu0 %v6771_v0 }
 0x20e   :  { %3066 = vmatprep.mubr.bf16.mxu1 %v2359_v9  ;;  %v13192_v9 = vld [vmem:[%s18698_s1 + $0x880] ss:$8 sps:$4 sm:$0xff]  }
 0x20f   :  { %3041 = vmatpush1.bf16.msra.mxu1 %v13162_v38 }
 0x210   :  { %7543 = vmatpush1.bf16.msra.mxu0 %v13165_v43  ;;  %3042 = vmatprep.subr.bf16.mxu1 %v13170_v30 }
 0x211   :  { %7544 = vmatprep.subr.bf16.mxu0 %v13173_v31  ;;  %v13198_v31 = vld [vmem:[%s18698_s1 + $0x890] ss:$8 sps:$4 sm:$0xff]  }
 0x213   :  { %3043 = vmatpush1.bf16.msra.mxu1 %v13168_v4  ;;  %v13201_v4 = vld [vmem:[%s18698_s1 + $0x1a90] ss:$8 sps:$4 sm:$0xff]  }
 0x214   :  { %7545 = vmatpush1.bf16.msra.mxu0 %v13171_v18  ;;  %3044 = vmatprep.subr.bf16.mxu1 %v13176_v20  ;;  %v13206_v18 = vld [vmem:[%s18698_s1 + $0x8a4] ss:$8 sps:$4 sm:$0xff]  }
 0x215   :  { %7546 = vmatprep.subr.bf16.mxu0 %v13179_v40  ;;  %v13209_v20 = vld [vmem:[%s18698_s1 + $0x1aa4] ss:$8 sps:$4 sm:$0xff]   ;;  %v13204_v40 = vld [vmem:[%s18698_s1 + $0x8a0] ss:$8 sps:$4 sm:$0xff]  }
 0x217   :  { %3045 = vmatpush1.bf16.msra.mxu1 %v13174_v7  ;;  %v13207_v7 = vld [vmem:[%s18698_s1 + $0x1aa0] ss:$8 sps:$4 sm:$0xff]  }
 0x218   :  { %7547 = vmatpush1.bf16.msra.mxu0 %v13177_v15  ;;  %3046 = vmatprep.subr.bf16.mxu1 %v13182_v3  ;;  %v13212_v15 = vld [vmem:[%s18698_s1 + $0x8b4] ss:$8 sps:$4 sm:$0xff]  }
 0x219   :  { %7548 = vmatprep.subr.bf16.mxu0 %v13185_v29  ;;  %v13215_v3 = vld [vmem:[%s18698_s1 + $0x1ab4] ss:$8 sps:$4 sm:$0xff]   ;;  %v13210_v29 = vld [vmem:[%s18698_s1 + $0x8b0] ss:$8 sps:$4 sm:$0xff]  }
 0x21b   :  { %3047 = vmatpush1.bf16.msra.mxu1 %v13180_v60  ;;  %v13213_v60 = vld [vmem:[%s18698_s1 + $0x1ab0] ss:$8 sps:$4 sm:$0xff]  }
 0x21c   :  { %7549 = vmatpush1.bf16.msra.mxu0 %v13183_v16  ;;  %3048 = vmatprep.subr.bf16.mxu1 %v13188_v1  ;;  %v13218_v16 = vld [vmem:[%s18698_s1 + $0x8c4] ss:$8 sps:$4 sm:$0xff]  }
 0x21d   :  { %7550 = vmatprep.subr.bf16.mxu0 %v13191_v52  ;;  %v2040_v48 = vpop.f32.mrb[20].mxu1  ;;  %v13221_v1 = vld [vmem:[%s18698_s1 + $0x1ac4] ss:$8 sps:$4 sm:$0xff]   ;;  %v13216_v52 = vld [vmem:[%s18698_s1 + $0x8c0] ss:$8 sps:$4 sm:$0xff]  }
 0x21e   :  { %v6536_v63 = vpop.f32.mrb[20].mxu0  ;;  %v16308_v8 = vadd.f32 %v2040_v48, %v16059_v27  ;;  %v2042_v35 = vpop.f32.mrb[21].mxu1  ;;  %v13195_v27 = vld [vmem:[%s18698_s1 + $0x1a80] ss:$8 sps:$4 sm:$0xff]   ;;  %v13225_v48 = vld [vmem:[%s18698_s1 + $0x1ad0] ss:$8 sps:$4 sm:$0xff]  }
 0x21f   :  { %v16311_v51 = vadd.f32 %v6536_v63, %v16062_v62  ;;  %v6538_v28 = vpop.f32.mrb[21].mxu0  ;;  %v16314_v11 = vadd.f32 %v2042_v35, %v16065_v36  ;;  %3049 = vmatpush1.bf16.msra.mxu1 %v13186_v34  ;;  %v2044_v62 = vpop.f32.mrb[22].mxu1  ;;  %v13200_v36 = vld [vmem:[%s18698_s1 + $0x894] ss:$8 sps:$4 sm:$0xff]   ;;  %v13219_v34 = vld [vmem:[%s18698_s1 + $0x1ac0] ss:$8 sps:$4 sm:$0xff]  }
 0x220   :  { %v16317_v0 = vadd.f32 %v6538_v28, %v16068_v39  ;;  %7551 = vmatpush1.bf16.msra.mxu0 %v13189_v33  ;;  %v6540_v38 = vpop.f32.mrb[22].mxu0  ;;  %3050 = vmatprep.subr.bf16.mxu1 %v13194_v32  ;;  %v13203_v39 = vld [vmem:[%s18698_s1 + $0x1a94] ss:$8 sps:$4 sm:$0xff]   ;;  %v2045_v43 = vpop.f32.mrb[23].mxu1  ;;  %v13230_v63 = vld [vmem:[%s18698_s1 + $0x8e4] ss:$8 sps:$4 sm:$0xff]   ;;  %v16401_v62 = vcombine.low %v16187_v57, %v16206_v56 }
 0x221   :  { %7552 = vmatprep.subr.bf16.mxu0 %v13197_v23  ;;  %v6541_v30 = vpop.f32.mrb[23].mxu0  ;;  %v13224_v33 = vld [vmem:[%s18698_s1 + $0x8d4] ss:$8 sps:$4 sm:$0xff]   ;;  %v13222_v23 = vld [vmem:[%s18698_s1 + $0x8d0] ss:$8 sps:$4 sm:$0xff]   ;;  %v2355_v43 = vrot.slane %v14372_v13, 1 }
 0x222   :  { %v13227_v32 = vld [vmem:[%s18698_s1 + $0x1ad4] ss:$8 sps:$4 sm:$0xff]   ;;  %v13233_v35 = vld [vmem:[%s18698_s1 + $0x1ae4] ss:$8 sps:$4 sm:$0xff]   ;;  %v13228_v28 = vld [vmem:[%s18698_s1 + $0x8e0] ss:$8 sps:$4 sm:$0xff]  }
 0x223   :  { %3051 = vmatpush1.bf16.msra.mxu1 %v13192_v9  ;;  %v13231_v9 = vld [vmem:[%s18698_s1 + $0x1ae0] ss:$8 sps:$4 sm:$0xff]   ;;  %v13236_v38 = vld [vmem:[%s18698_s1 + $0x8f4] ss:$8 sps:$4 sm:$0xff]   ;;  %v2354_v56 = vrot.slane %v16401_v62, 1 }
 0x224   :  { %7553 = vmatpush1.bf16.msra.mxu0 %v13195_v27  ;;  %3052 = vmatprep.subr.bf16.mxu1 %v13200_v36  ;;  %v11526_v27 = vcombine.low %v16175_v53, %v16198_v45  ;;  %v13239_v36 = vld [vmem:[%s18698_s1 + $0x1af4] ss:$8 sps:$4 sm:$0xff]   ;;  %v13237_v53 = vld [vmem:[%s18698_s1 + $0x1af0] ss:$8 sps:$4 sm:$0xff]   ;;  %v6767_v45 = vrot.slane %v15428_v12, 3 }
 0x225   :  { %7554 = vmatprep.subr.bf16.mxu0 %v13203_v39  ;;  %v13234_v39 = vld [vmem:[%s18698_s1 + $0x8f0] ss:$8 sps:$4 sm:$0xff]   ;;  %v13242_v30 = vld [vmem:[%s18698_s1 + $0x904] ss:$8 sps:$4 sm:$0xff]   ;;  %v13243_v12 = vld [vmem:[%s18698_s1 + $0x1b00] ss:$8 sps:$4 sm:$0xff]  }
 0x226   :  { %v6766_v57 = vrot.slane %v11526_v27, 3  ;;  %v16433_v13 = vld [vmem:[%s18699_s0 + $0x8] sm:$0xee]  ;;  %v13261_v27 = vld [vmem:[%s18698_s1 + $0x1b30] ss:$8 sps:$4 sm:$0xff]  }
 0x227   :  { %3053 = vmatpush1.bf16.msra.mxu1 %v13198_v31  ;;  %v13245_v31 = vld [vmem:[%s18698_s1 + $0x1b04] ss:$8 sps:$4 sm:$0xff]  }
 0x228   :  { %7555 = vmatpush1.bf16.msra.mxu0 %v13201_v4  ;;  %3054 = vmatprep.subr.bf16.mxu1 %v13206_v18  ;;  %v13240_v4 = vld [vmem:[%s18698_s1 + $0x900] ss:$8 sps:$4 sm:$0xff]   ;;  %v6768_v18 = vsel %vm6753_vm3, %v6766_v57, %v6767_v45  ;;  %v13272_v57 = vld [vmem:[%s18698_s1 + $0x954] ss:$8 sps:$4 sm:$0xff]  }
 0x229   :  { %7556 = vmatprep.subr.bf16.mxu0 %v13209_v20  ;;  %v2356_v20 = vsel %vm2353_vm4, %v2354_v56, %v2355_v43  ;;  %v13270_v56 = vld [vmem:[%s18698_s1 + $0x950] ss:$8 sps:$4 sm:$0xff]  }
 0x22b   :  { %3055 = vmatpush1.bf16.msra.mxu1 %v13204_v40  ;;  %v16440_v40 = vld [vmem:[%s18699_s0 + $0x18] sm:$0x88] }
 0x22c   :  { %7557 = vmatpush1.bf16.msra.mxu0 %v13207_v7  ;;  %3056 = vmatprep.subr.bf16.mxu1 %v13212_v15  ;;  %v13248_v7 = vld [vmem:[%s18698_s1 + $0x914] ss:$8 sps:$4 sm:$0xff]  }
 0x22d   :  { %7558 = vmatprep.subr.bf16.mxu0 %v13215_v3  ;;  %v13251_v15 = vld [vmem:[%s18698_s1 + $0x1b14] ss:$8 sps:$4 sm:$0xff]   ;;  %v16451_v3 = vld [vmem:[%s18699_s0 + $0x28] sm:$0xff] }
 0x22f   :  { %3057 = vmatpush1.bf16.msra.mxu1 %v13210_v29  ;;  %v16455_v29 = vcombine.high %v16433_v13, %v16451_v3 }
 0x230   :  { %7559 = vmatpush1.bf16.msra.mxu0 %v13213_v60  ;;  %3058 = vmatprep.subr.bf16.mxu1 %v13218_v16  ;;  %v16460_v60 = vld [vmem:[%s18699_s0 + $0x38] sm:$0xff] }
 0x231   :  { %7560 = vmatprep.subr.bf16.mxu0 %v13221_v1  ;;  %v11529_v16 = vcombine.high %v16440_v40, %v16460_v60  ;;  %v13246_v1 = vld [vmem:[%s18698_s1 + $0x910] ss:$8 sps:$4 sm:$0xff]  }
 0x233   :  { %3059 = vmatpush1.bf16.msra.mxu1 %v13216_v52  ;;  %v13249_v52 = vld [vmem:[%s18698_s1 + $0x1b10] ss:$8 sps:$4 sm:$0xff]  }
 0x234   :  { %7561 = vmatpush1.bf16.msra.mxu0 %v13219_v34  ;;  %3060 = vmatprep.subr.bf16.mxu1 %v13224_v33  ;;  %v13254_v34 = vld [vmem:[%s18698_s1 + $0x924] ss:$8 sps:$4 sm:$0xff]  }
 0x235   :  { %7562 = vmatprep.subr.bf16.mxu0 %v13227_v32  ;;  %v13257_v33 = vld [vmem:[%s18698_s1 + $0x1b24] ss:$8 sps:$4 sm:$0xff]   ;;  %v13252_v32 = vld [vmem:[%s18698_s1 + $0x920] ss:$8 sps:$4 sm:$0xff]  }
 0x237   :  { %3061 = vmatpush1.bf16.msra.mxu1 %v13222_v23  ;;  %v13255_v23 = vld [vmem:[%s18698_s1 + $0x1b20] ss:$8 sps:$4 sm:$0xff]  }
 0x238   :  { %7563 = vmatpush1.bf16.msra.mxu0 %v13225_v48  ;;  %3062 = vmatprep.subr.bf16.mxu1 %v13230_v63  ;;  %v2363_v48 = vrot.slane %v16455_v29, 1  ;;  %v2364_v63 = vrot.slane %v14528_v17, 1  ;;  %v13356_v17 = vld [vmem:[%s18698_s1 + $0xa34] ss:$8 sps:$4 sm:$0xff]  }
 0x239   :  { %7564 = vmatprep.subr.bf16.mxu0 %v13233_v35  ;;  %v6775_v35 = vrot.slane %v11529_v16, 3  ;;  %v13290_v16 = vld [vmem:[%s18698_s1 + $0x984] ss:$8 sps:$4 sm:$0xff]  }
 0x23b   :  { %3063 = vmatpush1.bf16.msra.mxu1 %v13228_v28  ;;  %v6776_v28 = vrot.slane %v15471_v14, 3  ;;  %v13359_v14 = vld [vmem:[%s18698_s1 + $0x1c34] ss:$8 sps:$4 sm:$0xff]  }
 0x23c   :  { %7565 = vmatpush1.bf16.msra.mxu0 %v13231_v9  ;;  %3064 = vmatprep.subr.bf16.mxu1 %v13236_v38  ;;  %v13258_v9 = vld [vmem:[%s18698_s1 + $0x930] ss:$8 sps:$4 sm:$0xff]   ;;  %v13266_v38 = vld [vmem:[%s18698_s1 + $0x944] ss:$8 sps:$4 sm:$0xff]  }
 0x23d   :  { %7566 = vmatprep.subr.bf16.mxu0 %v13239_v36  ;;  %v13269_v36 = vld [vmem:[%s18698_s1 + $0x1b44] ss:$8 sps:$4 sm:$0xff]  }
 0x23f   :  { %3065 = vmatpush1.bf16.msra.mxu1 %v13234_v39  ;;  %v13264_v39 = vld [vmem:[%s18698_s1 + $0x940] ss:$8 sps:$4 sm:$0xff]  }
 0x240   :  { %7567 = vmatpush1.bf16.msra.mxu0 %v13237_v53  ;;  %3085 = vmatprep.subr.bf16.mxu1 %v13242_v30  ;;  %v13267_v53 = vld [vmem:[%s18698_s1 + $0x1b40] ss:$8 sps:$4 sm:$0xff]   ;;  %v13278_v30 = vld [vmem:[%s18698_s1 + $0x964] ss:$8 sps:$4 sm:$0xff]  }
 0x241   :  { %7587 = vmatprep.subr.bf16.mxu0 %v13245_v31  ;;  %v13281_v31 = vld [vmem:[%s18698_s1 + $0x1b64] ss:$8 sps:$4 sm:$0xff]  }
 0x242   :  { %3067 = vmatmul.mubr.bf16.vlgmr.msra.gmra.mrb[0].mxu1 %v2356_v20  ;;  %v13287_v20 = vld [vmem:[%s18698_s1 + $0x1b74] ss:$8 sps:$4 sm:$0xff]  }
 0x243   :  { %7569 = vmatmul.mubr.bf16.vlgmr.msra.gmra.mrb[0].mxu0 %v6768_v18  ;;  %3086 = vmatpush1.bf16.msra.mxu1 %v13240_v4  ;;  %v13276_v4 = vld [vmem:[%s18698_s1 + $0x960] ss:$8 sps:$4 sm:$0xff]   ;;  %v13284_v18 = vld [vmem:[%s18698_s1 + $0x974] ss:$8 sps:$4 sm:$0xff]  }
 0x244   :  { %7588 = vmatpush1.bf16.msra.mxu0 %v13243_v12  ;;  %3087 = vmatprep.subr.bf16.mxu1 %v13248_v7  ;;  %v13279_v12 = vld [vmem:[%s18698_s1 + $0x1b60] ss:$8 sps:$4 sm:$0xff]   ;;  %v13282_v7 = vld [vmem:[%s18698_s1 + $0x970] ss:$8 sps:$4 sm:$0xff]  }
 0x245   :  { %7589 = vmatprep.subr.bf16.mxu0 %v13251_v15  ;;  %7578 = vmatprep.mubr.bf16.mxu0 %v6770_v24  ;;  %v2365_v24 = vsel %vm2353_vm4, %v2363_v48, %v2364_v63  ;;  %v13285_v15 = vld [vmem:[%s18698_s1 + $0x1b70] ss:$8 sps:$4 sm:$0xff]  }
 0x246   :  { %3076 = vmatprep.mubr.bf16.mxu1 %v2358_v21  ;;  %v6777_v21 = vsel %vm6753_vm3, %v6775_v35, %v6776_v28 }
 0x247   :  { %3088 = vmatpush1.bf16.msra.mxu1 %v13246_v1  ;;  %v13293_v1 = vld [vmem:[%s18698_s1 + $0x1b84] ss:$8 sps:$4 sm:$0xff]  }
 0x248   :  { %7590 = vmatpush1.bf16.msra.mxu0 %v13249_v52  ;;  %3089 = vmatprep.subr.bf16.mxu1 %v13254_v34 }
 0x249   :  { %7591 = vmatprep.subr.bf16.mxu0 %v13257_v33 }
 0x24a   :  { %3077 = vmatmul.mubr.bf16.gmra.mrb[36].mxu1 %v2355_v43  ;;  %v13273_v43 = vld [vmem:[%s18698_s1 + $0x1b50] ss:$8 sps:$4 sm:$0xff]  }
 0x24b   :  { %7579 = vmatmul.mubr.bf16.gmra.mrb[36].mxu0 %v6767_v45  ;;  %3090 = vmatpush1.bf16.msra.mxu1 %v13252_v32  ;;  %v13275_v45 = vld [vmem:[%s18698_s1 + $0x1b54] ss:$8 sps:$4 sm:$0xff]  }
 0x24c   :  { %7592 = vmatpush1.bf16.msra.mxu0 %v13255_v23  ;;  %3091 = vmatprep.subr.bf16.mxu1 %v13260_v47 }
 0x24d   :  { %7593 = vmatprep.subr.bf16.mxu0 %v13263_v54  ;;  %3117 = vmatprep.mubr.bf16.mxu1 %v2365_v24  ;;  %v13288_v54 = vld [vmem:[%s18698_s1 + $0x980] ss:$8 sps:$4 sm:$0xff]  }
 0x24e   :  { %7619 = vmatprep.mubr.bf16.mxu0 %v6777_v21 }
 0x24f   :  { %3092 = vmatpush1.bf16.msra.mxu1 %v13258_v9 }
 0x250   :  { %7594 = vmatpush1.bf16.msra.mxu0 %v13261_v27  ;;  %3093 = vmatprep.subr.bf16.mxu1 %v13266_v38  ;;  %v13294_v27 = vld [vmem:[%s18698_s1 + $0x990] ss:$8 sps:$4 sm:$0xff]  }
 0x251   :  { %7595 = vmatprep.subr.bf16.mxu0 %v13269_v36  ;;  %v13297_v38 = vld [vmem:[%s18698_s1 + $0x1b90] ss:$8 sps:$4 sm:$0xff]   ;;  %v13302_v36 = vld [vmem:[%s18698_s1 + $0x9a4] ss:$8 sps:$4 sm:$0xff]  }
 0x253   :  { %3094 = vmatpush1.bf16.msra.mxu1 %v13264_v39  ;;  %v13305_v39 = vld [vmem:[%s18698_s1 + $0x1ba4] ss:$8 sps:$4 sm:$0xff]  }
 0x254   :  { %7596 = vmatpush1.bf16.msra.mxu0 %v13267_v53  ;;  %3095 = vmatprep.subr.bf16.mxu1 %v13272_v57  ;;  %v13300_v53 = vld [vmem:[%s18698_s1 + $0x9a0] ss:$8 sps:$4 sm:$0xff]  }
 0x255   :  { %7597 = vmatprep.subr.bf16.mxu0 %v13275_v45  ;;  %v13303_v57 = vld [vmem:[%s18698_s1 + $0x1ba0] ss:$8 sps:$4 sm:$0xff]   ;;  %v13308_v45 = vld [vmem:[%s18698_s1 + $0x9b4] ss:$8 sps:$4 sm:$0xff]  }
 0x257   :  { %3096 = vmatpush1.bf16.msra.mxu1 %v13270_v56  ;;  %v13311_v56 = vld [vmem:[%s18698_s1 + $0x1bb4] ss:$8 sps:$4 sm:$0xff]  }
 0x258   :  { %7598 = vmatpush1.bf16.msra.mxu0 %v13273_v43  ;;  %3097 = vmatprep.subr.bf16.mxu1 %v13278_v30  ;;  %v13306_v43 = vld [vmem:[%s18698_s1 + $0x9b0] ss:$8 sps:$4 sm:$0xff]  }
 0x259   :  { %7599 = vmatprep.subr.bf16.mxu0 %v13281_v31  ;;  %v13309_v30 = vld [vmem:[%s18698_s1 + $0x1bb0] ss:$8 sps:$4 sm:$0xff]   ;;  %v13314_v31 = vld [vmem:[%s18698_s1 + $0x9c4] ss:$8 sps:$4 sm:$0xff]  }
 0x25b   :  { %3098 = vmatpush1.bf16.msra.mxu1 %v13276_v4  ;;  %v13317_v4 = vld [vmem:[%s18698_s1 + $0x1bc4] ss:$8 sps:$4 sm:$0xff]  }
 0x25c   :  { %7600 = vmatpush1.bf16.msra.mxu0 %v13279_v12  ;;  %3099 = vmatprep.subr.bf16.mxu1 %v13284_v18  ;;  %v13312_v12 = vld [vmem:[%s18698_s1 + $0x9c0] ss:$8 sps:$4 sm:$0xff]  }
 0x25d   :  { %7601 = vmatprep.subr.bf16.mxu0 %v13287_v20  ;;  %v2091_v52 = vpop.f32.mrb[24].mxu1  ;;  %v13315_v18 = vld [vmem:[%s18698_s1 + $0x1bc0] ss:$8 sps:$4 sm:$0xff]   ;;  %v13320_v20 = vld [vmem:[%s18698_s1 + $0x9d4] ss:$8 sps:$4 sm:$0xff]  }
 0x25e   :  { %v6587_v34 = vpop.f32.mrb[24].mxu0  ;;  %v16562_v33 = vadd.f32 %v2091_v52, %v16308_v8  ;;  %v2093_v23 = vpop.f32.mrb[25].mxu1  ;;  %v13291_v8 = vld [vmem:[%s18698_s1 + $0x1b80] ss:$8 sps:$4 sm:$0xff]   ;;  %v13329_v52 = vld [vmem:[%s18698_s1 + $0x1be4] ss:$8 sps:$4 sm:$0xff]  }
 0x25f   :  { %v16565_v32 = vadd.f32 %v6587_v34, %v16311_v51  ;;  %v6589_v48 = vpop.f32.mrb[25].mxu0  ;;  %v16568_v35 = vadd.f32 %v2093_v23, %v16314_v11  ;;  %3100 = vmatpush1.bf16.msra.mxu1 %v13282_v7  ;;  %v2095_v51 = vpop.f32.mrb[26].mxu1  ;;  %v13296_v11 = vld [vmem:[%s18698_s1 + $0x994] ss:$8 sps:$4 sm:$0xff]   ;;  %v16648_v34 = vld [vmem:[%s18699_s0] sm:$0x88] }
 0x260   :  { %v16571_v47 = vadd.f32 %v6589_v48, %v16317_v0  ;;  %7602 = vmatpush1.bf16.msra.mxu0 %v13285_v15  ;;  %v6591_v24 = vpop.f32.mrb[26].mxu0  ;;  %3101 = vmatprep.subr.bf16.mxu1 %v13290_v16  ;;  %v13299_v0 = vld [vmem:[%s18698_s1 + $0x1b94] ss:$8 sps:$4 sm:$0xff]   ;;  %v2096_v21 = vpop.f32.mrb[27].mxu1  ;;  %v13318_v15 = vld [vmem:[%s18698_s1 + $0x9d0] ss:$8 sps:$4 sm:$0xff]   ;;  %v11528_v51 = vcombine.low %v16440_v40, %v16460_v60 }
 0x261   :  { %7603 = vmatprep.subr.bf16.mxu0 %v13293_v1  ;;  %v6592_v9 = vpop.f32.mrb[27].mxu0  ;;  %v13323_v7 = vld [vmem:[%s18698_s1 + $0x1bd4] ss:$8 sps:$4 sm:$0xff]   ;;  %v13321_v16 = vld [vmem:[%s18698_s1 + $0x1bd0] ss:$8 sps:$4 sm:$0xff]   ;;  %v16653_v23 = vld [vmem:[%s18699_s0 + $0x20] sm:$0xff] }
 0x262   :  { %v13326_v1 = vld [vmem:[%s18698_s1 + $0x9e4] ss:$8 sps:$4 sm:$0xff]   ;;  %v13324_v48 = vld [vmem:[%s18698_s1 + $0x9e0] ss:$8 sps:$4 sm:$0xff]   ;;  %v13335_v40 = vld [vmem:[%s18698_s1 + $0x1bf4] ss:$8 sps:$4 sm:$0xff]   ;;  %v11787_v60 = vcombine.high %v16648_v34, %v16653_v23 }
 0x263   :  { %3102 = vmatpush1.bf16.msra.mxu1 %v13288_v54  ;;  %v13327_v54 = vld [vmem:[%s18698_s1 + $0x1be0] ss:$8 sps:$4 sm:$0xff]   ;;  %v13333_v21 = vld [vmem:[%s18698_s1 + $0x1bf0] ss:$8 sps:$4 sm:$0xff]   ;;  %v6772_v9 = vrot.slane %v11528_v51, 3 }
 0x264   :  { %7604 = vmatpush1.bf16.msra.mxu0 %v13291_v8  ;;  %3103 = vmatprep.subr.bf16.mxu1 %v13296_v11  ;;  %v16663_v8 = vcombine.low %v16433_v13, %v16451_v3  ;;  %v16670_v24 = vld [vmem:[%s18699_s0 + $0x40] sm:$0xff]  ;;  %v13332_v13 = vld [vmem:[%s18698_s1 + $0x9f4] ss:$8 sps:$4 sm:$0xff]   ;;  %v13330_v3 = vld [vmem:[%s18698_s1 + $0x9f0] ss:$8 sps:$4 sm:$0xff]  }
 0x265   :  { %7605 = vmatprep.subr.bf16.mxu0 %v13299_v0  ;;  %v16675_v11 = vld [vmem:[%s18699_s0 + $0x60] sm:$0x11] }
 0x266   :  { %v11795_v0 = vcombine.high %v16670_v24, %v16675_v11  ;;  %v13350_v51 = vld [vmem:[%s18698_s1 + $0xa24] ss:$8 sps:$4 sm:$0xff]  }
 0x267   :  { %3104 = vmatpush1.bf16.msra.mxu1 %v13294_v27  ;;  %v2360_v27 = vrot.slane %v16663_v8, 1 }
 0x268   :  { %7606 = vmatpush1.bf16.msra.mxu0 %v13297_v38  ;;  %3105 = vmatprep.subr.bf16.mxu1 %v13302_v36  ;;  %v2361_v38 = vrot.slane %v14649_v5, 1  ;;  %v6773_v36 = vrot.slane %v15662_v42, 3  ;;  %v13339_v5 = vld [vmem:[%s18698_s1 + $0x1c00] ss:$8 sps:$4 sm:$0xff]   ;;  %v7875_v42 = vshll.u32 %v11787_v60, 16 }
 0x269   :  { %7607 = vmatprep.subr.bf16.mxu0 %v13305_v39  ;;  %v13338_v39 = vld [vmem:[%s18698_s1 + $0xa04] ss:$8 sps:$4 sm:$0xff]  }
 0x26b   :  { %3106 = vmatpush1.bf16.msra.mxu1 %v13300_v53  ;;  %v13341_v53 = vld [vmem:[%s18698_s1 + $0x1c04] ss:$8 sps:$4 sm:$0xff]  }
 0x26c   :  { %7608 = vmatpush1.bf16.msra.mxu0 %v13303_v57  ;;  %3107 = vmatprep.subr.bf16.mxu1 %v13308_v45  ;;  %v13336_v57 = vld [vmem:[%s18698_s1 + $0xa00] ss:$8 sps:$4 sm:$0xff]   ;;  %v7872_v45 = vshrl.u32 %v11787_v60, 16 }
 0x26d   :  { %7609 = vmatprep.subr.bf16.mxu0 %v13311_v56  ;;  %v7880_v56 = vshrl.u32 %v11795_v0, 16 }
 0x26f   :  { %3108 = vmatpush1.bf16.msra.mxu1 %v13306_v43  ;;  %v7883_v43 = vshll.u32 %v11795_v0, 16  ;;  %v2370_v0 = vrot.slane %v14747_v58, 1  ;;  %v13447_v58 = vld [vmem:[%s18698_s1 + $0x1d20] ss:$8 sps:$4 sm:$0xff]  }
 0x270   :  { %7610 = vmatpush1.bf16.msra.mxu0 %v13309_v30  ;;  %3109 = vmatprep.subr.bf16.mxu1 %v13314_v31  ;;  %v2362_v30 = vsel %vm2353_vm4, %v2360_v27, %v2361_v38  ;;  %v6774_v31 = vsel %vm6753_vm3, %v6772_v9, %v6773_v36  ;;  %v13354_v27 = vld [vmem:[%s18698_s1 + $0xa30] ss:$8 sps:$4 sm:$0xff]  }
 0x271   :  { %7611 = vmatprep.subr.bf16.mxu0 %v13317_v4  ;;  %v16713_v4 = vld [vmem:[%s18699_s0 + $0x10] sm:$0xee] }
 0x273   :  { %3110 = vmatpush1.bf16.msra.mxu1 %v13312_v12  ;;  %v13344_v12 = vld [vmem:[%s18698_s1 + $0xa14] ss:$8 sps:$4 sm:$0xff]  }
 0x274   :  { %7612 = vmatpush1.bf16.msra.mxu0 %v13315_v18  ;;  %3111 = vmatprep.subr.bf16.mxu1 %v13320_v20  ;;  %v13347_v18 = vld [vmem:[%s18698_s1 + $0x1c14] ss:$8 sps:$4 sm:$0xff]   ;;  %v7874_v20 = vrot.slane %v7872_v45, 3 }
 0x275   :  { %7613 = vmatprep.subr.bf16.mxu0 %v13323_v7  ;;  %v16724_v7 = vld [vmem:[%s18699_s0 + $0x30] sm:$0xff] }
 0x276   :  { %v13371_v45 = vld [vmem:[%s18698_s1 + $0x1c54] ss:$8 sps:$4 sm:$0xff]  }
 0x277   :  { %3112 = vmatpush1.bf16.msra.mxu1 %v13318_v15  ;;  %v16728_v15 = vcombine.high %v16713_v4, %v16724_v7 }
 0x278   :  { %7614 = vmatpush1.bf16.msra.mxu0 %v13321_v16  ;;  %3113 = vmatprep.subr.bf16.mxu1 %v13326_v1  ;;  %v7877_v16 = vrot.slane %v7875_v42, 4  ;;  %v7882_v1 = vrot.slane %v7880_v56, 3  ;;  %v13366_v42 = vld [vmem:[%s18698_s1 + $0xa50] ss:$8 sps:$4 sm:$0xff]  }
 0x279   :  { %7615 = vmatprep.subr.bf16.mxu0 %v13329_v52  ;;  %v7885_v52 = vrot.slane %v7883_v43, 4  ;;  %v2369_v60 = vrot.slane %v16728_v15, 1  ;;  %v13369_v56 = vld [vmem:[%s18698_s1 + $0x1c50] ss:$8 sps:$4 sm:$0xff]   ;;  %v13374_v43 = vld [vmem:[%s18698_s1 + $0xa64] ss:$8 sps:$4 sm:$0xff]  }
 0x27b   :  { %3114 = vmatpush1.bf16.msra.mxu1 %v13324_v48  ;;  %v13342_v48 = vld [vmem:[%s18698_s1 + $0xa10] ss:$8 sps:$4 sm:$0xff]   ;;  %v16754_v9 = vor.u32 %v7885_v52, %v7882_v1  ;;  %v13386_v52 = vld [vmem:[%s18698_s1 + $0xa84] ss:$8 sps:$4 sm:$0xff]  }
 0x27c   :  { %7616 = vmatpush1.bf16.msra.mxu0 %v13327_v54  ;;  %3115 = vmatprep.subr.bf16.mxu1 %v13332_v13  ;;  %v13345_v54 = vld [vmem:[%s18698_s1 + $0x1c10] ss:$8 sps:$4 sm:$0xff]   ;;  %v13353_v13 = vld [vmem:[%s18698_s1 + $0x1c24] ss:$8 sps:$4 sm:$0xff]  }
 0x27d   :  { %7617 = vmatprep.subr.bf16.mxu0 %v13335_v40  ;;  %v13348_v40 = vld [vmem:[%s18698_s1 + $0xa20] ss:$8 sps:$4 sm:$0xff]   ;;  %v13381_v1 = vld [vmem:[%s18698_s1 + $0x1c70] ss:$8 sps:$4 sm:$0xff]  }
 0x27f   :  { %3116 = vmatpush1.bf16.msra.mxu1 %v13330_v3  ;;  %v13351_v3 = vld [vmem:[%s18698_s1 + $0x1c20] ss:$8 sps:$4 sm:$0xff]  }
 0x280   :  { %7618 = vmatpush1.bf16.msra.mxu0 %v13333_v21  ;;  %3136 = vmatprep.subr.bf16.mxu1 %v13338_v39  ;;  %v7878_v21 = vor.u32 %v7877_v16, %v7874_v20  ;;  %v13357_v39 = vld [vmem:[%s18698_s1 + $0x1c30] ss:$8 sps:$4 sm:$0xff]   ;;  %v13383_v20 = vld [vmem:[%s18698_s1 + $0x1c74] ss:$8 sps:$4 sm:$0xff]  }
 0x281   :  { %8646 = vmatprep.subr.bf16.mxu0 %v13341_v53  ;;  %v13360_v53 = vld [vmem:[%s18698_s1 + $0xa40] ss:$8 sps:$4 sm:$0xff]   ;;  %v13378_v16 = vld [vmem:[%s18698_s1 + $0xa70] ss:$8 sps:$4 sm:$0xff]  }
 0x282   :  { %3118 = vmatmul.mubr.bf16.vlgmr.msra.gmra.mrb[0].mxu1 %v2362_v30  ;;  %v13377_v30 = vld [vmem:[%s18698_s1 + $0x1c64] ss:$8 sps:$4 sm:$0xff]  }
 0x283   :  { %7620 = vmatmul.mubr.bf16.vlgmr.msra.gmra.mrb[0].mxu0 %v6774_v31  ;;  %3137 = vmatpush1.bf16.msra.mxu1 %v13336_v57  ;;  %v13363_v57 = vld [vmem:[%s18698_s1 + $0x1c40] ss:$8 sps:$4 sm:$0xff]  }
 0x284   :  { %8647 = vmatpush1.bf16.msra.mxu0 %v13339_v5  ;;  %3138 = vmatprep.subr.bf16.mxu1 %v13344_v12  ;;  %v13368_v5 = vld [vmem:[%s18698_s1 + $0xa54] ss:$8 sps:$4 sm:$0xff]   ;;  %v13372_v31 = vld [vmem:[%s18698_s1 + $0xa60] ss:$8 sps:$4 sm:$0xff]  }
 0x285   :  { %8648 = vmatprep.subr.bf16.mxu0 %v13347_v18  ;;  %3127 = vmatprep.mubr.bf16.mxu1 %v2364_v63  ;;  %v2371_v63 = vsel %vm2353_vm4, %v2369_v60, %v2370_v0  ;;  %v13375_v12 = vld [vmem:[%s18698_s1 + $0x1c60] ss:$8 sps:$4 sm:$0xff]   ;;  %v13380_v18 = vld [vmem:[%s18698_s1 + $0xa74] ss:$8 sps:$4 sm:$0xff]  }
 0x286   :  { %7629 = vmatprep.mubr.bf16.mxu0 %v6776_v28  ;;  %v7887_v28 = vsel %vm7853_vm5, %v7878_v21, %v16754_v9  ;;  %v13384_v21 = vld [vmem:[%s18698_s1 + $0xa80] ss:$8 sps:$4 sm:$0xff]  }
 0x287   :  { %3139 = vmatpush1.bf16.msra.mxu1 %v13342_v48  ;;  %v13389_v48 = vld [vmem:[%s18698_s1 + $0x1c84] ss:$8 sps:$4 sm:$0xff]  }
 0x288   :  { %8649 = vmatpush1.bf16.msra.mxu0 %v13345_v54  ;;  %3140 = vmatprep.subr.bf16.mxu1 %v13350_v51 }
 0x289   :  { %8650 = vmatprep.subr.bf16.mxu0 %v13353_v13 }
 0x28a   :  { %3128 = vmatmul.mubr.bf16.gmra.mrb[40].mxu1 %v2361_v38  ;;  %v13362_v38 = vld [vmem:[%s18698_s1 + $0xa44] ss:$8 sps:$4 sm:$0xff]  }
 0x28b   :  { %7630 = vmatmul.mubr.bf16.gmra.mrb[40].mxu0 %v6773_v36  ;;  %3141 = vmatpush1.bf16.msra.mxu1 %v13348_v40  ;;  %v13365_v36 = vld [vmem:[%s18698_s1 + $0x1c44] ss:$8 sps:$4 sm:$0xff]  }
 0x28c   :  { %8651 = vmatpush1.bf16.msra.mxu0 %v13351_v3  ;;  %3142 = vmatprep.subr.bf16.mxu1 %v13356_v17  ;;  %v13387_v17 = vld [vmem:[%s18698_s1 + $0x1c80] ss:$8 sps:$4 sm:$0xff]  }
 0x28d   :  { %8652 = vmatprep.subr.bf16.mxu0 %v13359_v14  ;;  %3168 = vmatprep.mubr.bf16.mxu1 %v2371_v63 }
 0x28e   :  { %8678 = vmatprep.mubr.bf16.mxu0 %v7887_v28 }
 0x28f   :  { %3143 = vmatpush1.bf16.msra.mxu1 %v13354_v27 }
 0x290   :  { %8653 = vmatpush1.bf16.msra.mxu0 %v13357_v39  ;;  %3144 = vmatprep.subr.bf16.mxu1 %v13362_v38  ;;  %v13390_v39 = vld [vmem:[%s18698_s1 + $0xa90] ss:$8 sps:$4 sm:$0xff]  }
 0x291   :  { %8654 = vmatprep.subr.bf16.mxu0 %v13365_v36  ;;  %v13393_v38 = vld [vmem:[%s18698_s1 + $0x1c90] ss:$8 sps:$4 sm:$0xff]   ;;  %v13398_v36 = vld [vmem:[%s18698_s1 + $0xaa4] ss:$8 sps:$4 sm:$0xff]  }
 0x293   :  { %3145 = vmatpush1.bf16.msra.mxu1 %v13360_v53  ;;  %v13401_v53 = vld [vmem:[%s18698_s1 + $0x1ca4] ss:$8 sps:$4 sm:$0xff]  }
 0x294   :  { %8655 = vmatpush1.bf16.msra.mxu0 %v13363_v57  ;;  %3146 = vmatprep.subr.bf16.mxu1 %v13368_v5  ;;  %v13396_v57 = vld [vmem:[%s18698_s1 + $0xaa0] ss:$8 sps:$4 sm:$0xff]  }
 0x295   :  { %8656 = vmatprep.subr.bf16.mxu0 %v13371_v45  ;;  %v13399_v5 = vld [vmem:[%s18698_s1 + $0x1ca0] ss:$8 sps:$4 sm:$0xff]   ;;  %v13404_v45 = vld [vmem:[%s18698_s1 + $0xab4] ss:$8 sps:$4 sm:$0xff]  }
 0x297   :  { %3147 = vmatpush1.bf16.msra.mxu1 %v13366_v42  ;;  %v13407_v42 = vld [vmem:[%s18698_s1 + $0x1cb4] ss:$8 sps:$4 sm:$0xff]  }
 0x298   :  { %8657 = vmatpush1.bf16.msra.mxu0 %v13369_v56  ;;  %3148 = vmatprep.subr.bf16.mxu1 %v13374_v43  ;;  %v13402_v56 = vld [vmem:[%s18698_s1 + $0xab0] ss:$8 sps:$4 sm:$0xff]  }
 0x299   :  { %8658 = vmatprep.subr.bf16.mxu0 %v13377_v30  ;;  %v13405_v43 = vld [vmem:[%s18698_s1 + $0x1cb0] ss:$8 sps:$4 sm:$0xff]   ;;  %v13410_v30 = vld [vmem:[%s18698_s1 + $0xac4] ss:$8 sps:$4 sm:$0xff]  }
 0x29b   :  { %3149 = vmatpush1.bf16.msra.mxu1 %v13372_v31  ;;  %v13413_v31 = vld [vmem:[%s18698_s1 + $0x1cc4] ss:$8 sps:$4 sm:$0xff]  }
 0x29c   :  { %8659 = vmatpush1.bf16.msra.mxu0 %v13375_v12  ;;  %3150 = vmatprep.subr.bf16.mxu1 %v13380_v18  ;;  %v11786_v12 = vcombine.low %v16648_v34, %v16653_v23  ;;  %v13408_v18 = vld [vmem:[%s18698_s1 + $0xac0] ss:$8 sps:$4 sm:$0xff]   ;;  %v13419_v34 = vld [vmem:[%s18698_s1 + $0x1cd4] ss:$8 sps:$4 sm:$0xff]   ;;  %v13414_v23 = vld [vmem:[%s18698_s1 + $0xad0] ss:$8 sps:$4 sm:$0xff]  }
 0x29d   :  { %8660 = vmatprep.subr.bf16.mxu0 %v13383_v20  ;;  %v2142_v54 = vpop.f32.mrb[28].mxu1  ;;  %v13411_v20 = vld [vmem:[%s18698_s1 + $0x1cc0] ss:$8 sps:$4 sm:$0xff]  }
 0x29e   :  { %v16827_v51 = vpop.f32.mrb[28].mxu0  ;;  %v16830_v13 = vadd.f32 %v2142_v54, %v16562_v33  ;;  %v2144_v40 = vpop.f32.mrb[29].mxu1  ;;  %v13392_v33 = vld [vmem:[%s18698_s1 + $0xa94] ss:$8 sps:$4 sm:$0xff]  }
 0x29f   :  { %v16832_v3 = vpop.f32.mrb[29].mxu0  ;;  %v16835_v60 = vadd.f32 %v2144_v40, %v16568_v35  ;;  %3151 = vmatpush1.bf16.msra.mxu1 %v13378_v16  ;;  %v2146_v14 = vpop.f32.mrb[30].mxu1  ;;  %v13395_v35 = vld [vmem:[%s18698_s1 + $0x1c94] ss:$8 sps:$4 sm:$0xff]   ;;  %v11794_v16 = vcombine.low %v16670_v24, %v16675_v11  ;;  %v13417_v24 = vld [vmem:[%s18698_s1 + $0x1cd0] ss:$8 sps:$4 sm:$0xff]  }
 0x2a0   :  { %8661 = vmatpush1.bf16.msra.mxu0 %v13381_v1  ;;  %v7482_v63 = vpop.f32.mrb[30].mxu0  ;;  %3152 = vmatprep.subr.bf16.mxu1 %v13386_v52  ;;  %v2147_v28 = vpop.f32.mrb[31].mxu1  ;;  %v13416_v1 = vld [vmem:[%s18698_s1 + $0xad4] ss:$8 sps:$4 sm:$0xff]   ;;  %v7855_v52 = vshrl.u32 %v11786_v12, 16 }
 0x2a1   :  { %8662 = vmatprep.subr.bf16.mxu0 %v13389_v48  ;;  %v7483_v27 = vpop.f32.mrb[31].mxu0  ;;  %v7858_v48 = vshll.u32 %v11786_v12, 16  ;;  %v7863_v11 = vshrl.u32 %v11794_v16, 16  ;;  %v7866_v54 = vshll.u32 %v11794_v16, 16  ;;  %v13422_v40 = vld [vmem:[%s18698_s1 + $0xae4] ss:$8 sps:$4 sm:$0xff]   ;;  %v16926_v28 = vcombine.low %v16713_v4, %v16724_v7 }
 0x2a2   :  { %v13423_v14 = vld [vmem:[%s18698_s1 + $0x1ce0] ss:$8 sps:$4 sm:$0xff]   ;;  %v7857_v63 = vrot.slane %v7855_v52, 3  ;;  %v13428_v4 = vld [vmem:[%s18698_s1 + $0xaf4] ss:$8 sps:$4 sm:$0xff]  }
 0x2a3   :  { %3153 = vmatpush1.bf16.msra.mxu1 %v13384_v21  ;;  %v13425_v21 = vld [vmem:[%s18698_s1 + $0x1ce4] ss:$8 sps:$4 sm:$0xff]   ;;  %v7865_v27 = vrot.slane %v7863_v11, 3  ;;  %v13431_v7 = vld [vmem:[%s18698_s1 + $0x1cf4] ss:$8 sps:$4 sm:$0xff]  }
 0x2a4   :  { %8663 = vmatpush1.bf16.msra.mxu0 %v13387_v17  ;;  %3154 = vmatprep.subr.bf16.mxu1 %v13392_v33  ;;  %v13420_v17 = vld [vmem:[%s18698_s1 + $0xae0] ss:$8 sps:$4 sm:$0xff]   ;;  %v7860_v33 = vrot.slane %v7858_v48, 4  ;;  %v13434_v12 = vld [vmem:[%s18698_s1 + $0xb04] ss:$8 sps:$4 sm:$0xff]  }
 0x2a5   :  { %8664 = vmatprep.subr.bf16.mxu0 %v13395_v35  ;;  %v16922_v35 = vld [vmem:[%s18699_s0 + $0x8] sm:$0x88]  ;;  %v13440_v11 = vld [vmem:[%s18698_s1 + $0xb14] ss:$8 sps:$4 sm:$0xff]  }
 0x2a6   :  { %v13432_v52 = vld [vmem:[%s18698_s1 + $0xb00] ss:$8 sps:$4 sm:$0xff]  }
 0x2a7   :  { %3155 = vmatpush1.bf16.msra.mxu1 %v13390_v39  ;;  %v7868_v39 = vrot.slane %v7866_v54, 4  ;;  %v13435_v48 = vld [vmem:[%s18698_s1 + $0x1d00] ss:$8 sps:$4 sm:$0xff]   ;;  %v13443_v54 = vld [vmem:[%s18698_s1 + $0x1d14] ss:$8 sps:$4 sm:$0xff]  }
 0x2a8   :  { %8665 = vmatpush1.bf16.msra.mxu0 %v13393_v38  ;;  %3156 = vmatprep.subr.bf16.mxu1 %v13398_v36  ;;  %v16931_v38 = vld [vmem:[%s18699_s0 + $0x28] sm:$0xff] }
 0x2a9   :  { %8666 = vmatprep.subr.bf16.mxu0 %v13401_v53  ;;  %v16936_v36 = vld [vmem:[%s18699_s0 + $0x48] sm:$0xff] }
 0x2aa   :  { %v16941_v53 = vld [vmem:[%s18699_s0 + $0x68] sm:$0x11] }
 0x2ab   :  { %3157 = vmatpush1.bf16.msra.mxu1 %v13396_v57  ;;  %v11789_v57 = vcombine.high %v16922_v35, %v16931_v38 }
 0x2ac   :  { %8667 = vmatpush1.bf16.msra.mxu0 %v13399_v5  ;;  %3158 = vmatprep.subr.bf16.mxu1 %v13404_v45  ;;  %v11797_v5 = vcombine.high %v16936_v36, %v16941_v53  ;;  %v13426_v45 = vld [vmem:[%s18698_s1 + $0xaf0] ss:$8 sps:$4 sm:$0xff]  }
 0x2ad   :  { %8668 = vmatprep.subr.bf16.mxu0 %v13407_v42  ;;  %v13429_v42 = vld [vmem:[%s18698_s1 + $0x1cf0] ss:$8 sps:$4 sm:$0xff]   ;;  %v7906_v16 = vshrl.u32 %v11789_v57, 16 }
 0x2af   :  { %3159 = vmatpush1.bf16.msra.mxu1 %v13402_v56  ;;  %v2366_v56 = vrot.slane %v16926_v28, 1 }
 0x2b0   :  { %8669 = vmatpush1.bf16.msra.mxu0 %v13405_v43  ;;  %3160 = vmatprep.subr.bf16.mxu1 %v13410_v30  ;;  %v2367_v43 = vrot.slane %v14923_v41, 1  ;;  %v7861_v30 = vor.u32 %v7860_v33, %v7857_v63  ;;  %v7914_v41 = vshrl.u32 %v11797_v5, 16 }
 0x2b1   :  { %8670 = vmatprep.subr.bf16.mxu0 %v13413_v31  ;;  %v7869_v31 = vor.u32 %v7868_v39, %v7865_v27  ;;  %v13438_v27 = vld [vmem:[%s18698_s1 + $0xb10] ss:$8 sps:$4 sm:$0xff]  }
 0x2b2   :  { %v7916_v63 = vrot.slane %v7914_v41, 3  ;;  %v13441_v39 = vld [vmem:[%s18698_s1 + $0x1d10] ss:$8 sps:$4 sm:$0xff]   ;;  %v13459_v41 = vld [vmem:[%s18698_s1 + $0x1d40] ss:$8 sps:$4 sm:$0xff]  }
 0x2b3   :  { %3161 = vmatpush1.bf16.msra.mxu1 %v13408_v18  ;;  %v13437_v18 = vld [vmem:[%s18698_s1 + $0x1d04] ss:$8 sps:$4 sm:$0xff]  }
 0x2b4   :  { %8671 = vmatpush1.bf16.msra.mxu0 %v13411_v20  ;;  %3162 = vmatprep.subr.bf16.mxu1 %v13416_v1  ;;  %v16970_v20 = vld [vmem:[%s18699_s0 + $0x18] sm:$0xee]  ;;  %v7909_v1 = vshll.u32 %v11789_v57, 16 }
 0x2b5   :  { %8672 = vmatprep.subr.bf16.mxu0 %v13419_v34  ;;  %v7917_v34 = vshll.u32 %v11797_v5, 16  ;;  %v2376_v5 = vrot.slane %v15006_v59, 1  ;;  %v13548_v59 = vld [vmem:[%s18698_s1 + $0xc34] ss:$8 sps:$4 sm:$0xff]  }
 0x2b7   :  { %3163 = vmatpush1.bf16.msra.mxu1 %v13414_v23  ;;  %v2368_v23 = vsel %vm2353_vm4, %v2366_v56, %v2367_v43  ;;  %v7919_v33 = vrot.slane %v7917_v34, 4  ;;  %v13444_v56 = vld [vmem:[%s18698_s1 + $0xb20] ss:$8 sps:$4 sm:$0xff]   ;;  %v13464_v34 = vld [vmem:[%s18698_s1 + $0xb54] ss:$8 sps:$4 sm:$0xff]  }
 0x2b8   :  { %8673 = vmatpush1.bf16.msra.mxu0 %v13417_v24  ;;  %3164 = vmatprep.subr.bf16.mxu1 %v13422_v40  ;;  %v7870_v24 = vsel %vm7853_vm5, %v7861_v30, %v7869_v31  ;;  %v16989_v40 = vld [vmem:[%s18699_s0 + $0x38] sm:$0xff] }
 0x2b9   :  { %8674 = vmatprep.subr.bf16.mxu0 %v13425_v21  ;;  %v16993_v21 = vcombine.high %v16970_v20, %v16989_v40 }
 0x2bb   :  { %3165 = vmatpush1.bf16.msra.mxu1 %v13420_v17  ;;  %v7908_v17 = vrot.slane %v7906_v16, 3  ;;  %v2375_v57 = vrot.slane %v16993_v21, 1  ;;  %v13453_v16 = vld [vmem:[%s18698_s1 + $0x1d30] ss:$8 sps:$4 sm:$0xff]  }
 0x2bc   :  { %8675 = vmatpush1.bf16.msra.mxu0 %v13423_v14  ;;  %3166 = vmatprep.subr.bf16.mxu1 %v13428_v4  ;;  %v7911_v14 = vrot.slane %v7909_v1, 4  ;;  %v13446_v4 = vld [vmem:[%s18698_s1 + $0xb24] ss:$8 sps:$4 sm:$0xff]   ;;  %v13456_v1 = vld [vmem:[%s18698_s1 + $0xb40] ss:$8 sps:$4 sm:$0xff]  }
 0x2bd   :  { %8676 = vmatprep.subr.bf16.mxu0 %v13431_v7  ;;  %v13449_v7 = vld [vmem:[%s18698_s1 + $0x1d24] ss:$8 sps:$4 sm:$0xff]   ;;  %v2377_v30 = vsel %vm2353_vm4, %v2375_v57, %v2376_v5 }
 0x2bf   :  { %3167 = vmatpush1.bf16.msra.mxu1 %v13426_v45  ;;  %v7912_v45 = vor.u32 %v7911_v14, %v7908_v17  ;;  %v13471_v17 = vld [vmem:[%s18698_s1 + $0x1d60] ss:$8 sps:$4 sm:$0xff]   ;;  %v13476_v14 = vld [vmem:[%s18698_s1 + $0xb74] ss:$8 sps:$4 sm:$0xff]  }
 0x2c0   :  { %8677 = vmatpush1.bf16.msra.mxu0 %v13429_v42  ;;  %3187 = vmatprep.subr.bf16.mxu1 %v13434_v12  ;;  %v17012_v42 = vor.u32 %v7919_v33, %v7916_v63  ;;  %v13479_v63 = vld [vmem:[%s18698_s1 + $0x1d74] ss:$8 sps:$4 sm:$0xff]   ;;  %v13474_v33 = vld [vmem:[%s18698_s1 + $0xb70] ss:$8 sps:$4 sm:$0xff]  }
 0x2c1   :  { %8697 = vmatprep.subr.bf16.mxu0 %v13437_v18  ;;  %v13450_v18 = vld [vmem:[%s18698_s1 + $0xb30] ss:$8 sps:$4 sm:$0xff]  }
 0x2c2   :  { %3169 = vmatmul.mubr.bf16.vlgmr.msra.gmra.mrb[0].mxu1 %v2368_v23  ;;  %v7921_v12 = vsel %vm7853_vm5, %v7912_v45, %v17012_v42  ;;  %v13467_v23 = vld [vmem:[%s18698_s1 + $0x1d54] ss:$8 sps:$4 sm:$0xff]  }
 0x2c3   :  { %8679 = vmatmul.mubr.bf16.vlgmr.msra.gmra.mrb[0].mxu0 %v7870_v24  ;;  %3188 = vmatpush1.bf16.msra.mxu1 %v13432_v52  ;;  %v13462_v52 = vld [vmem:[%s18698_s1 + $0xb50] ss:$8 sps:$4 sm:$0xff]   ;;  %v13470_v24 = vld [vmem:[%s18698_s1 + $0xb64] ss:$8 sps:$4 sm:$0xff]  }
 0x2c4   :  { %8698 = vmatpush1.bf16.msra.mxu0 %v13435_v48  ;;  %3189 = vmatprep.subr.bf16.mxu1 %v13440_v11  ;;  %v13465_v48 = vld [vmem:[%s18698_s1 + $0x1d50] ss:$8 sps:$4 sm:$0xff]   ;;  %v13473_v11 = vld [vmem:[%s18698_s1 + $0x1d64] ss:$8 sps:$4 sm:$0xff]  }
 0x2c5   :  { %8699 = vmatprep.subr.bf16.mxu0 %v13443_v54  ;;  %3178 = vmatprep.mubr.bf16.mxu1 %v2370_v0  ;;  %v13452_v0 = vld [vmem:[%s18698_s1 + $0xb34] ss:$8 sps:$4 sm:$0xff]   ;;  %v13468_v54 = vld [vmem:[%s18698_s1 + $0xb60] ss:$8 sps:$4 sm:$0xff]  }
 0x2c6   :  { %8688 = vmatprep.mubr.bf16.mxu0 %v16754_v9  ;;  %v13455_v9 = vld [vmem:[%s18698_s1 + $0x1d34] ss:$8 sps:$4 sm:$0xff]  }
 0x2c7   :  { %3190 = vmatpush1.bf16.msra.mxu1 %v13438_v27  ;;  %v13477_v27 = vld [vmem:[%s18698_s1 + $0x1d70] ss:$8 sps:$4 sm:$0xff]  }
 0x2c8   :  { %8700 = vmatpush1.bf16.msra.mxu0 %v13441_v39  ;;  %3191 = vmatprep.subr.bf16.mxu1 %v13446_v4  ;;  %v13482_v39 = vld [vmem:[%s18698_s1 + $0xb84] ss:$8 sps:$4 sm:$0xff]  }
 0x2c9   :  { %8701 = vmatprep.subr.bf16.mxu0 %v13449_v7  ;;  %v13485_v4 = vld [vmem:[%s18698_s1 + $0x1d84] ss:$8 sps:$4 sm:$0xff]  }
 0x2ca   :  { %3179 = vmatmul.mubr.bf16.gmra.mrb[44].mxu1 %v2367_v43  ;;  %v13458_v43 = vld [vmem:[%s18698_s1 + $0xb44] ss:$8 sps:$4 sm:$0xff]  }
 0x2cb   :  { %8689 = vmatmul.mubr.bf16.gmra.mrb[44].mxu0 %v7869_v31  ;;  %3192 = vmatpush1.bf16.msra.mxu1 %v13444_v56  ;;  %v13461_v31 = vld [vmem:[%s18698_s1 + $0x1d44] ss:$8 sps:$4 sm:$0xff]  }
 0x2cc   :  { %8702 = vmatpush1.bf16.msra.mxu0 %v13447_v58  ;;  %3193 = vmatprep.subr.bf16.mxu1 %v13452_v0 }
 0x2cd   :  { %8703 = vmatprep.subr.bf16.mxu0 %v13455_v9  ;;  %3219 = vmatprep.mubr.bf16.mxu1 %v2377_v30 }
 0x2ce   :  { %8729 = vmatprep.mubr.bf16.mxu0 %v7921_v12  ;;  %v13480_v12 = vld [vmem:[%s18698_s1 + $0xb80] ss:$8 sps:$4 sm:$0xff]  }
 0x2cf   :  { %3194 = vmatpush1.bf16.msra.mxu1 %v13450_v18 }
 0x2d0   :  { %8704 = vmatpush1.bf16.msra.mxu0 %v13453_v16  ;;  %3195 = vmatprep.subr.bf16.mxu1 %v13458_v43 }
 0x2d1   :  { %8705 = vmatprep.subr.bf16.mxu0 %v13461_v31  ;;  %v13486_v31 = vld [vmem:[%s18698_s1 + $0xb90] ss:$8 sps:$4 sm:$0xff]  }
 0x2d3   :  { %3196 = vmatpush1.bf16.msra.mxu1 %v13456_v1  ;;  %v13489_v1 = vld [vmem:[%s18698_s1 + $0x1d90] ss:$8 sps:$4 sm:$0xff]  }
 0x2d4   :  { %8706 = vmatpush1.bf16.msra.mxu0 %v13459_v41  ;;  %3197 = vmatprep.subr.bf16.mxu1 %v13464_v34  ;;  %v13494_v41 = vld [vmem:[%s18698_s1 + $0xba4] ss:$8 sps:$4 sm:$0xff]  }
 0x2d5   :  { %8707 = vmatprep.subr.bf16.mxu0 %v13467_v23  ;;  %v13497_v34 = vld [vmem:[%s18698_s1 + $0x1da4] ss:$8 sps:$4 sm:$0xff]   ;;  %v13492_v23 = vld [vmem:[%s18698_s1 + $0xba0] ss:$8 sps:$4 sm:$0xff]  }
 0x2d7   :  { %3198 = vmatpush1.bf16.msra.mxu1 %v13462_v52  ;;  %v13495_v52 = vld [vmem:[%s18698_s1 + $0x1da0] ss:$8 sps:$4 sm:$0xff]  }
 0x2d8   :  { %8708 = vmatpush1.bf16.msra.mxu0 %v13465_v48  ;;  %3199 = vmatprep.subr.bf16.mxu1 %v13470_v24  ;;  %v13500_v48 = vld [vmem:[%s18698_s1 + $0xbb4] ss:$8 sps:$4 sm:$0xff]  }
 0x2d9   :  { %8709 = vmatprep.subr.bf16.mxu0 %v13473_v11  ;;  %v13503_v24 = vld [vmem:[%s18698_s1 + $0x1db4] ss:$8 sps:$4 sm:$0xff]   ;;  %v13498_v11 = vld [vmem:[%s18698_s1 + $0xbb0] ss:$8 sps:$4 sm:$0xff]  }
 0x2db   :  { %3200 = vmatpush1.bf16.msra.mxu1 %v13468_v54  ;;  %v13501_v54 = vld [vmem:[%s18698_s1 + $0x1db0] ss:$8 sps:$4 sm:$0xff]  }
 0x2dc   :  { %8710 = vmatpush1.bf16.msra.mxu0 %v13471_v17  ;;  %3201 = vmatprep.subr.bf16.mxu1 %v13476_v14  ;;  %v13506_v17 = vld [vmem:[%s18698_s1 + $0xbc4] ss:$8 sps:$4 sm:$0xff]  }
 0x2dd   :  { %8711 = vmatprep.subr.bf16.mxu0 %v13479_v63  ;;  %v2193_v7 = vpop.f32.mrb[32].mxu1  ;;  %v13509_v14 = vld [vmem:[%s18698_s1 + $0x1dc4] ss:$8 sps:$4 sm:$0xff]   ;;  %v13504_v63 = vld [vmem:[%s18698_s1 + $0xbc0] ss:$8 sps:$4 sm:$0xff]  }
 0x2de   :  { %v7529_v57 = vpop.f32.mrb[32].mxu0  ;;  %v17092_v45 = vadd.f32 %v2193_v7, %v16830_v13  ;;  %v2195_v58 = vpop.f32.mrb[33].mxu1  ;;  %v13483_v13 = vld [vmem:[%s18698_s1 + $0x1d80] ss:$8 sps:$4 sm:$0xff]   ;;  %v13515_v7 = vld [vmem:[%s18698_s1 + $0x1dd4] ss:$8 sps:$4 sm:$0xff]  }
 0x2df   :  { %v17095_v56 = vadd.f32 %v7529_v57, %v16827_v51  ;;  %v7531_v0 = vpop.f32.mrb[33].mxu0  ;;  %v17098_v9 = vadd.f32 %v2195_v58, %v16835_v60  ;;  %3202 = vmatpush1.bf16.msra.mxu1 %v13474_v33  ;;  %v2197_v51 = vpop.f32.mrb[34].mxu1  ;;  %v13488_v60 = vld [vmem:[%s18698_s1 + $0xb94] ss:$8 sps:$4 sm:$0xff]   ;;  %v13507_v33 = vld [vmem:[%s18698_s1 + $0x1dc0] ss:$8 sps:$4 sm:$0xff]  }
 0x2e0   :  { %v17101_v30 = vadd.f32 %v7531_v0, %v16832_v3  ;;  %8712 = vmatpush1.bf16.msra.mxu0 %v13477_v27  ;;  %v7533_v18 = vpop.f32.mrb[34].mxu0  ;;  %3203 = vmatprep.subr.bf16.mxu1 %v13482_v39  ;;  %v13491_v3 = vld [vmem:[%s18698_s1 + $0x1d94] ss:$8 sps:$4 sm:$0xff]   ;;  %v2198_v16 = vpop.f32.mrb[35].mxu1  ;;  %v11788_v27 = vcombine.low %v16922_v35, %v16931_v38  ;;  %v11796_v39 = vcombine.low %v16936_v36, %v16941_v53  ;;  %v13510_v57 = vld [vmem:[%s18698_s1 + $0xbd0] ss:$8 sps:$4 sm:$0xff]  }
 0x2e1   :  { %8713 = vmatprep.subr.bf16.mxu0 %v13485_v4  ;;  %v7534_v43 = vpop.f32.mrb[35].mxu0  ;;  %v13512_v4 = vld [vmem:[%s18698_s1 + $0xbd4] ss:$8 sps:$4 sm:$0xff]   ;;  %v13513_v35 = vld [vmem:[%s18698_s1 + $0x1dd0] ss:$8 sps:$4 sm:$0xff]  }
 0x2e2   :  { %v7889_v38 = vshrl.u32 %v11788_v27, 16  ;;  %v7892_v36 = vshll.u32 %v11788_v27, 16  ;;  %v7897_v53 = vshrl.u32 %v11796_v39, 16  ;;  %v7900_v58 = vshll.u32 %v11796_v39, 16  ;;  %v13518_v0 = vld [vmem:[%s18698_s1 + $0xbe4] ss:$8 sps:$4 sm:$0xff]  }
 0x2e3   :  { %3204 = vmatpush1.bf16.msra.mxu1 %v13480_v12  ;;  %v13521_v12 = vld [vmem:[%s18698_s1 + $0x1de4] ss:$8 sps:$4 sm:$0xff]   ;;  %v13519_v51 = vld [vmem:[%s18698_s1 + $0x1de0] ss:$8 sps:$4 sm:$0xff]   ;;  %v17188_v18 = vld [vmem:[%s18699_s0 + $0x10] sm:$0x88] }
 0x2e4   :  { %8714 = vmatpush1.bf16.msra.mxu0 %v13483_v13  ;;  %3205 = vmatprep.subr.bf16.mxu1 %v13488_v60  ;;  %v13516_v13 = vld [vmem:[%s18698_s1 + $0xbe0] ss:$8 sps:$4 sm:$0xff]   ;;  %v17192_v60 = vcombine.low %v16970_v20, %v16989_v40  ;;  %v17202_v16 = vld [vmem:[%s18699_s0 + $0x50] sm:$0xff]  ;;  %v7894_v20 = vrot.slane %v7892_v36, 4  ;;  %v7899_v40 = vrot.slane %v7897_v53, 3 }
 0x2e5   :  { %8715 = vmatprep.subr.bf16.mxu0 %v13491_v3  ;;  %v17197_v3 = vld [vmem:[%s18699_s0 + $0x30] sm:$0xff]  ;;  %v13530_v27 = vld [vmem:[%s18698_s1 + $0xc04] ss:$8 sps:$4 sm:$0xff]  }
 0x2e6   :  { %v17207_v43 = vld [vmem:[%s18699_s0 + $0x70] sm:$0x11]  ;;  %v13533_v39 = vld [vmem:[%s18698_s1 + $0x1e04] ss:$8 sps:$4 sm:$0xff]  }
 0x2e7   :  { %3206 = vmatpush1.bf16.msra.mxu1 %v13486_v31  ;;  %v7891_v31 = vrot.slane %v7889_v38, 3  ;;  %v3416_v38 = vshrl.u32 %v16210_v50, 16 }
 0x2e8   :  { %8716 = vmatpush1.bf16.msra.mxu0 %v13489_v1  ;;  %3207 = vmatprep.subr.bf16.mxu1 %v13494_v41  ;;  %v7902_v1 = vrot.slane %v7900_v58, 4  ;;  %v17212_v41 = vld [vmem:[%s18699_s0 + $0x40] sm:$0x77] }
 0x2e9   :  { %8717 = vmatprep.subr.bf16.mxu0 %v13497_v34  ;;  %v13524_v34 = vld [vmem:[%s18698_s1 + $0xbf4] ss:$8 sps:$4 sm:$0xff]  }
 0x2eb   :  { %3208 = vmatpush1.bf16.msra.mxu1 %v13492_v23  ;;  %v13527_v23 = vld [vmem:[%s18698_s1 + $0x1df4] ss:$8 sps:$4 sm:$0xff]  }
 0x2ec   :  { %8718 = vmatpush1.bf16.msra.mxu0 %v13495_v52  ;;  %3209 = vmatprep.subr.bf16.mxu1 %v13500_v48  ;;  %v11791_v52 = vcombine.high %v17188_v18, %v17197_v3  ;;  %v11799_v48 = vcombine.high %v17202_v16, %v17207_v43 }
 0x2ed   :  { %8719 = vmatprep.subr.bf16.mxu0 %v13503_v24  ;;  %v17226_v24 = vcombine.high %v17212_v41, %v17212_v41 }
 0x2ef   :  { %3210 = vmatpush1.bf16.msra.mxu1 %v13498_v11  ;;  %v13522_v11 = vld [vmem:[%s18698_s1 + $0xbf0] ss:$8 sps:$4 sm:$0xff]   ;;  %v3424_v36 = vshrl.u32 %v17226_v24, 16  ;;  %v3427_v53 = vshll.u32 %v17226_v24, 16 }
 0x2f0   :  { %8720 = vmatpush1.bf16.msra.mxu0 %v13501_v54  ;;  %3211 = vmatprep.subr.bf16.mxu1 %v13506_v17  ;;  %v13525_v54 = vld [vmem:[%s18698_s1 + $0x1df0] ss:$8 sps:$4 sm:$0xff]   ;;  %v2372_v17 = vrot.slane %v17192_v60, 1 }
 0x2f1   :  { %8721 = vmatprep.subr.bf16.mxu0 %v13509_v14  ;;  %v2373_v14 = vrot.slane %v15208_v10, 1  ;;  %v3419_v10 = vshll.u32 %v16210_v50, 16  ;;  %v13536_v50 = vld [vmem:[%s18698_s1 + $0xc14] ss:$8 sps:$4 sm:$0xff]  }
 0x2f3   :  { %3212 = vmatpush1.bf16.msra.mxu1 %v13504_v63  ;;  %v7895_v63 = vor.u32 %v7894_v20, %v7891_v31  ;;  %v2374_v58 = vsel %vm2353_vm4, %v2372_v17, %v2373_v14  ;;  %v13542_v17 = vld [vmem:[%s18698_s1 + $0xc24] ss:$8 sps:$4 sm:$0xff]  }
 0x2f4   :  { %8722 = vmatpush1.bf16.msra.mxu0 %v13507_v33  ;;  %3213 = vmatprep.subr.bf16.mxu1 %v13512_v4  ;;  %v7903_v33 = vor.u32 %v7902_v1, %v7899_v40  ;;  %v7940_v4 = vshrl.u32 %v11791_v52, 16 }
 0x2f5   :  { %8723 = vmatprep.subr.bf16.mxu0 %v13515_v7  ;;  %v7943_v7 = vshll.u32 %v11791_v52, 16  ;;  %v3426_v52 = vrot.slane %v3424_v36, 1  ;;  %v13549_v36 = vld [vmem:[%s18698_s1 + $0x1e30] ss:$8 sps:$4 sm:$0xff]  }
 0x2f6   :  { %v7942_v31 = vrot.slane %v7940_v4, 3 }
 0x2f7   :  { %3214 = vmatpush1.bf16.msra.mxu1 %v13510_v57  ;;  %v7948_v57 = vshrl.u32 %v11799_v48, 16  ;;  %v7945_v20 = vrot.slane %v7943_v7, 4 }
 0x2f8   :  { %8724 = vmatpush1.bf16.msra.mxu0 %v13513_v35  ;;  %3215 = vmatprep.subr.bf16.mxu1 %v13518_v0  ;;  %v7951_v35 = vshll.u32 %v11799_v48, 16  ;;  %v13528_v0 = vld [vmem:[%s18698_s1 + $0xc00] ss:$8 sps:$4 sm:$0xff]   ;;  %v3429_v48 = vrot.slane %v3427_v53, 2 }
 0x2f9   :  { %8725 = vmatprep.subr.bf16.mxu0 %v13521_v12  ;;  %v7904_v12 = vsel %vm7853_vm5, %v7895_v63, %v7903_v33  ;;  %v7950_v40 = vrot.slane %v7948_v57, 3  ;;  %v13545_v63 = vld [vmem:[%s18698_s1 + $0x1e24] ss:$8 sps:$4 sm:$0xff]   ;;  %v13540_v57 = vld [vmem:[%s18698_s1 + $0xc20] ss:$8 sps:$4 sm:$0xff]  }
 0x2fa   :  { %v7953_v1 = vrot.slane %v7951_v35, 4  ;;  %v17277_v7 = vor.u32 %v3429_v48, %v3426_v52  ;;  %v13543_v35 = vld [vmem:[%s18698_s1 + $0x1e20] ss:$8 sps:$4 sm:$0xff]   ;;  %v13573_v52 = vld [vmem:[%s18698_s1 + $0x1e70] ss:$8 sps:$4 sm:$0xff]  }
 0x2fb   :  { %3216 = vmatpush1.bf16.msra.mxu1 %v13516_v13  ;;  %v13531_v13 = vld [vmem:[%s18698_s1 + $0x1e00] ss:$8 sps:$4 sm:$0xff]   ;;  %v13578_v48 = vld [vmem:[%s18698_s1 + $0xc84] ss:$8 sps:$4 sm:$0xff]  }
 0x2fc   :  { %8726 = vmatpush1.bf16.msra.mxu0 %v13519_v51  ;;  %3217 = vmatprep.subr.bf16.mxu1 %v13524_v34  ;;  %v13539_v51 = vld [vmem:[%s18698_s1 + $0x1e14] ss:$8 sps:$4 sm:$0xff]   ;;  %v3418_v34 = vrot.slane %v3416_v38, 1  ;;  %v13552_v53 = vld [vmem:[%s18698_s1 + $0xc40] ss:$8 sps:$4 sm:$0xff]  }
 0x2fd   :  { %8727 = vmatprep.subr.bf16.mxu0 %v13527_v23  ;;  %v3421_v23 = vrot.slane %v3419_v10, 2  ;;  %v13546_v10 = vld [vmem:[%s18698_s1 + $0xc30] ss:$8 sps:$4 sm:$0xff]  }
 0x2ff   :  { %3218 = vmatpush1.bf16.msra.mxu1 %v13522_v11  ;;  %v13534_v11 = vld [vmem:[%s18698_s1 + $0xc10] ss:$8 sps:$4 sm:$0xff]   ;;  %v3422_v4 = vor.u32 %v3421_v23, %v3418_v34  ;;  %v13575_v34 = vld [vmem:[%s18698_s1 + $0x1e74] ss:$8 sps:$4 sm:$0xff]  }
 0x300   :  { %8728 = vmatpush1.bf16.msra.mxu0 %v13525_v54  ;;  %4190 = vmatprep.subr.bf16.mxu1 %v13530_v27  ;;  %v13537_v54 = vld [vmem:[%s18698_s1 + $0x1e10] ss:$8 sps:$4 sm:$0xff]   ;;  %v7946_v27 = vor.u32 %v7945_v20, %v7942_v31  ;;  %v13569_v31 = vld [vmem:[%s18698_s1 + $0x1e64] ss:$8 sps:$4 sm:$0xff]   ;;  %v13564_v20 = vld [vmem:[%s18698_s1 + $0xc60] ss:$8 sps:$4 sm:$0xff]  }
 0x301   :  { %8748 = vmatprep.subr.bf16.mxu0 %v13533_v39  ;;  %v17275_v39 = vor.u32 %v7953_v1, %v7950_v40  ;;  %v3431_v38 = vsel %vm3397_vm6, %v3422_v4, %v17277_v7  ;;  %v13567_v40 = vld [vmem:[%s18698_s1 + $0x1e60] ss:$8 sps:$4 sm:$0xff]   ;;  %v13572_v1 = vld [vmem:[%s18698_s1 + $0xc74] ss:$8 sps:$4 sm:$0xff]   ;;  %v13570_v23 = vld [vmem:[%s18698_s1 + $0xc70] ss:$8 sps:$4 sm:$0xff]  }
 0x302   :  { %3220 = vmatmul.mubr.bf16.vlgmr.msra.gmra.mrb[0].mxu1 %v2374_v58  ;;  %v13555_v58 = vld [vmem:[%s18698_s1 + $0x1e40] ss:$8 sps:$4 sm:$0xff]  }
 0x303   :  { %8730 = vmatmul.mubr.bf16.vlgmr.msra.gmra.mrb[0].mxu0 %v7904_v12  ;;  %4191 = vmatpush1.bf16.msra.mxu1 %v13528_v0  ;;  %v13560_v0 = vld [vmem:[%s18698_s1 + $0xc54] ss:$8 sps:$4 sm:$0xff]  }
 0x304   :  { %8749 = vmatpush1.bf16.msra.mxu0 %v13531_v13  ;;  %4192 = vmatprep.subr.bf16.mxu1 %v13536_v50  ;;  %v13563_v12 = vld [vmem:[%s18698_s1 + $0x1e54] ss:$8 sps:$4 sm:$0xff]   ;;  %v13558_v13 = vld [vmem:[%s18698_s1 + $0xc50] ss:$8 sps:$4 sm:$0xff]  }
 0x305   :  { %8750 = vmatprep.subr.bf16.mxu0 %v13539_v51  ;;  %3229 = vmatprep.mubr.bf16.mxu1 %v2376_v5  ;;  %v13551_v5 = vld [vmem:[%s18698_s1 + $0x1e34] ss:$8 sps:$4 sm:$0xff]   ;;  %v13561_v50 = vld [vmem:[%s18698_s1 + $0x1e50] ss:$8 sps:$4 sm:$0xff]   ;;  %v13566_v51 = vld [vmem:[%s18698_s1 + $0xc64] ss:$8 sps:$4 sm:$0xff]  }
 0x306   :  { %8739 = vmatprep.mubr.bf16.mxu0 %v17012_v42  ;;  %v7955_v42 = vsel %vm7853_vm5, %v7946_v27, %v17275_v39 }
 0x307   :  { %4193 = vmatpush1.bf16.msra.mxu1 %v13534_v11  ;;  %v13581_v11 = vld [vmem:[%s18698_s1 + $0x1e84] ss:$8 sps:$4 sm:$0xff]  }
 0x308   :  { %8751 = vmatpush1.bf16.msra.mxu0 %v13537_v54  ;;  %4194 = vmatprep.subr.bf16.mxu1 %v13542_v17 }
 0x309   :  { %8752 = vmatprep.subr.bf16.mxu0 %v13545_v63 }
 0x30a   :  { %3230 = vmatmul.mubr.bf16.gmra.mrb[48].mxu1 %v2373_v14  ;;  %v13554_v14 = vld [vmem:[%s18698_s1 + $0xc44] ss:$8 sps:$4 sm:$0xff]  }
 0x30b   :  { %8740 = vmatmul.mubr.bf16.gmra.mrb[48].mxu0 %v7903_v33  ;;  %4195 = vmatpush1.bf16.msra.mxu1 %v13540_v57  ;;  %v13557_v33 = vld [vmem:[%s18698_s1 + $0x1e44] ss:$8 sps:$4 sm:$0xff]  }
 0x30c   :  { %8753 = vmatpush1.bf16.msra.mxu0 %v13543_v35  ;;  %4196 = vmatprep.subr.bf16.mxu1 %v13548_v59  ;;  %v13576_v35 = vld [vmem:[%s18698_s1 + $0xc80] ss:$8 sps:$4 sm:$0xff]  }
 0x30d   :  { %8754 = vmatprep.subr.bf16.mxu0 %v13551_v5  ;;  %8780 = vmatprep.mubr.bf16.mxu0 %v7955_v42  ;;  %v13579_v59 = vld [vmem:[%s18698_s1 + $0x1e80] ss:$8 sps:$4 sm:$0xff]  }
 0x30e   :  { %4222 = vmatprep.mubr.bf16.mxu1 %v3431_v38 }
 0x30f   :  { %4197 = vmatpush1.bf16.msra.mxu1 %v13546_v10 }
 0x310   :  { %8755 = vmatpush1.bf16.msra.mxu0 %v13549_v36  ;;  %4198 = vmatprep.subr.bf16.mxu1 %v13554_v14  ;;  %v13582_v36 = vld [vmem:[%s18698_s1 + $0xc90] ss:$8 sps:$4 sm:$0xff]  }
 0x311   :  { %8756 = vmatprep.subr.bf16.mxu0 %v13557_v33  ;;  %v13585_v14 = vld [vmem:[%s18698_s1 + $0x1e90] ss:$8 sps:$4 sm:$0xff]   ;;  %v13590_v33 = vld [vmem:[%s18698_s1 + $0xca4] ss:$8 sps:$4 sm:$0xff]  }
 0x313   :  { %4199 = vmatpush1.bf16.msra.mxu1 %v13552_v53  ;;  %v13593_v53 = vld [vmem:[%s18698_s1 + $0x1ea4] ss:$8 sps:$4 sm:$0xff]  }
 0x314   :  { %8757 = vmatpush1.bf16.msra.mxu0 %v13555_v58  ;;  %4200 = vmatprep.subr.bf16.mxu1 %v13560_v0  ;;  %v13588_v58 = vld [vmem:[%s18698_s1 + $0xca0] ss:$8 sps:$4 sm:$0xff]  }
 0x315   :  { %8758 = vmatprep.subr.bf16.mxu0 %v13563_v12  ;;  %v13591_v0 = vld [vmem:[%s18698_s1 + $0x1ea0] ss:$8 sps:$4 sm:$0xff]   ;;  %v13596_v12 = vld [vmem:[%s18698_s1 + $0xcb4] ss:$8 sps:$4 sm:$0xff]  }
 0x317   :  { %4201 = vmatpush1.bf16.msra.mxu1 %v13558_v13  ;;  %v13599_v13 = vld [vmem:[%s18698_s1 + $0x1eb4] ss:$8 sps:$4 sm:$0xff]  }
 0x318   :  { %8759 = vmatpush1.bf16.msra.mxu0 %v13561_v50  ;;  %4202 = vmatprep.subr.bf16.mxu1 %v13566_v51  ;;  %v13594_v50 = vld [vmem:[%s18698_s1 + $0xcb0] ss:$8 sps:$4 sm:$0xff]  }
 0x319   :  { %8760 = vmatprep.subr.bf16.mxu0 %v13569_v31  ;;  %v13597_v51 = vld [vmem:[%s18698_s1 + $0x1eb0] ss:$8 sps:$4 sm:$0xff]   ;;  %v13602_v31 = vld [vmem:[%s18698_s1 + $0xcc4] ss:$8 sps:$4 sm:$0xff]  }
 0x31b   :  { %4203 = vmatpush1.bf16.msra.mxu1 %v13564_v20  ;;  %v13605_v20 = vld [vmem:[%s18698_s1 + $0x1ec4] ss:$8 sps:$4 sm:$0xff]  }
 0x31c   :  { %8761 = vmatpush1.bf16.msra.mxu0 %v13567_v40  ;;  %4204 = vmatprep.subr.bf16.mxu1 %v13572_v1  ;;  %v11790_v40 = vcombine.low %v17188_v18, %v17197_v3  ;;  %v11798_v1 = vcombine.low %v17202_v16, %v17207_v43  ;;  %v13608_v18 = vld [vmem:[%s18698_s1 + $0xcd4] ss:$8 sps:$4 sm:$0xff]  }
 0x31d   :  { %8762 = vmatprep.subr.bf16.mxu0 %v13575_v34  ;;  %v17355_v17 = vpop.f32.mrb[36].mxu1  ;;  %v13600_v34 = vld [vmem:[%s18698_s1 + $0xcc0] ss:$8 sps:$4 sm:$0xff]   ;;  %v13611_v3 = vld [vmem:[%s18698_s1 + $0x1ed4] ss:$8 sps:$4 sm:$0xff]  }
 0x31e   :  { %v7580_v54 = vpop.f32.mrb[36].mxu0  ;;  %v17360_v4 = vpop.f32.mrb[37].mxu1  ;;  %v7923_v16 = vshrl.u32 %v11790_v40, 16  ;;  %v7926_v43 = vshll.u32 %v11790_v40, 16  ;;  %v13623_v40 = vld [vmem:[%s18698_s1 + $0x1ef4] ss:$8 sps:$4 sm:$0xff]  }
 0x31f   :  { %v17358_v63 = vadd.f32 %v7580_v54, %v17095_v56  ;;  %v7582_v27 = vpop.f32.mrb[37].mxu0  ;;  %4205 = vmatpush1.bf16.msra.mxu1 %v13570_v23  ;;  %v3082_v5 = vpop.f32.mrb[38].mxu1  ;;  %v13584_v56 = vld [vmem:[%s18698_s1 + $0xc94] ss:$8 sps:$4 sm:$0xff]   ;;  %v13603_v23 = vld [vmem:[%s18698_s1 + $0x1ec0] ss:$8 sps:$4 sm:$0xff]  }
 0x320   :  { %v17363_v57 = vadd.f32 %v7582_v27, %v17101_v30  ;;  %8763 = vmatpush1.bf16.msra.mxu0 %v13573_v52  ;;  %v7584_v42 = vpop.f32.mrb[38].mxu0  ;;  %4206 = vmatprep.subr.bf16.mxu1 %v13578_v48  ;;  %v13587_v30 = vld [vmem:[%s18698_s1 + $0x1e94] ss:$8 sps:$4 sm:$0xff]   ;;  %v3083_v38 = vpop.f32.mrb[39].mxu1  ;;  %v17425_v52 = vcombine.low %v17212_v41, %v17212_v41  ;;  %v7931_v48 = vshrl.u32 %v11798_v1, 16  ;;  %v3399_v54 = vshrl.u32 %v16401_v62, 16 }
 0x321   :  { %8764 = vmatprep.subr.bf16.mxu0 %v13581_v11  ;;  %v7585_v10 = vpop.f32.mrb[39].mxu0  ;;  %v7934_v11 = vshll.u32 %v11798_v1, 16  ;;  %v3402_v27 = vshll.u32 %v16401_v62, 16  ;;  %v13606_v41 = vld [vmem:[%s18698_s1 + $0xcd0] ss:$8 sps:$4 sm:$0xff]   ;;  %v7925_v38 = vrot.slane %v7923_v16, 3 }
 0x322   :  { %v3410_v5 = vshll.u32 %v17425_v52, 16  ;;  %v13614_v62 = vld [vmem:[%s18698_s1 + $0xce4] ss:$8 sps:$4 sm:$0xff]   ;;  %v7928_v10 = vrot.slane %v7926_v43, 4  ;;  %v13621_v16 = vld [vmem:[%s18698_s1 + $0x1ef0] ss:$8 sps:$4 sm:$0xff]  }
 0x323   :  { %4207 = vmatpush1.bf16.msra.mxu1 %v13576_v35  ;;  %v13609_v35 = vld [vmem:[%s18698_s1 + $0x1ed0] ss:$8 sps:$4 sm:$0xff]   ;;  %v13617_v42 = vld [vmem:[%s18698_s1 + $0x1ee4] ss:$8 sps:$4 sm:$0xff]  }
 0x324   :  { %8765 = vmatpush1.bf16.msra.mxu0 %v13579_v59  ;;  %4208 = vmatprep.subr.bf16.mxu1 %v13584_v56  ;;  %v3407_v59 = vshrl.u32 %v17425_v52, 16  ;;  %v13612_v56 = vld [vmem:[%s18698_s1 + $0xce0] ss:$8 sps:$4 sm:$0xff]  }
 0x325   :  { %8766 = vmatprep.subr.bf16.mxu0 %v13587_v30  ;;  %v13615_v30 = vld [vmem:[%s18698_s1 + $0x1ee0] ss:$8 sps:$4 sm:$0xff]  }
 0x327   :  { %4209 = vmatpush1.bf16.msra.mxu1 %v13582_v36  ;;  %v7933_v36 = vrot.slane %v7931_v48, 3 }
 0x328   :  { %8767 = vmatpush1.bf16.msra.mxu0 %v13585_v14  ;;  %4210 = vmatprep.subr.bf16.mxu1 %v13590_v33  ;;  %v7936_v14 = vrot.slane %v7934_v11, 4  ;;  %v3401_v33 = vrot.slane %v3399_v54, 1  ;;  %v13628_v54 = vld [vmem:[%s18698_s1 + $0xd04] ss:$8 sps:$4 sm:$0xff]  }
 0x329   :  { %8768 = vmatprep.subr.bf16.mxu0 %v13593_v53  ;;  %v3404_v53 = vrot.slane %v3402_v27, 2  ;;  %v13631_v27 = vld [vmem:[%s18698_s1 + $0x1f04] ss:$8 sps:$4 sm:$0xff]  }
 0x32a   :  { %v7937_v43 = vor.u32 %v7936_v14, %v7933_v36  ;;  %v13634_v14 = vld [vmem:[%s18698_s1 + $0xd14] ss:$8 sps:$4 sm:$0xff]  }
 0x32b   :  { %4211 = vmatpush1.bf16.msra.mxu1 %v13588_v58  ;;  %v17458_v58 = vld [vmem:[%s18699_s0 + $0x48] sm:$0x77]  ;;  %v3405_v48 = vor.u32 %v3404_v53, %v3401_v33  ;;  %v13637_v33 = vld [vmem:[%s18698_s1 + $0x1f14] ss:$8 sps:$4 sm:$0xff]  }
 0x32c   :  { %8769 = vmatpush1.bf16.msra.mxu0 %v13591_v0  ;;  %4212 = vmatprep.subr.bf16.mxu1 %v13596_v12  ;;  %v17463_v0 = vld [vmem:[%s18699_s0 + $0x18] sm:$0x88]  ;;  %v3409_v12 = vrot.slane %v3407_v59, 1  ;;  %v17488_v1 = vcombine.high %v17458_v58, %v17458_v58 }
 0x32d   :  { %8770 = vmatprep.subr.bf16.mxu0 %v13599_v13  ;;  %v3412_v13 = vrot.slane %v3410_v5, 2 }
 0x32e   :  { %v3458_v59 = vshrl.u32 %v17488_v1, 16  ;;  %v3461_v5 = vshll.u32 %v17488_v1, 16 }
 0x32f   :  { %4213 = vmatpush1.bf16.msra.mxu1 %v13594_v50  ;;  %v17468_v50 = vld [vmem:[%s18699_s0 + $0x38] sm:$0xff]  ;;  %v3413_v11 = vor.u32 %v3412_v13, %v3409_v12 }
 0x330   :  { %8771 = vmatpush1.bf16.msra.mxu0 %v13597_v51  ;;  %4214 = vmatprep.subr.bf16.mxu1 %v13602_v31  ;;  %v17473_v51 = vld [vmem:[%s18699_s0 + $0x58] sm:$0xff]  ;;  %v3460_v13 = vrot.slane %v3458_v59, 1 }
 0x331   :  { %8772 = vmatprep.subr.bf16.mxu0 %v13605_v20  ;;  %v17478_v31 = vld [vmem:[%s18699_s0 + $0x78] sm:$0x11]  ;;  %v3414_v36 = vsel %vm3397_vm6, %v3405_v48, %v3413_v11  ;;  %v13640_v48 = vld [vmem:[%s18698_s1 + $0xd24] ss:$8 sps:$4 sm:$0xff]  }
 0x332   :  { %v13620_v20 = vld [vmem:[%s18698_s1 + $0xcf4] ss:$8 sps:$4 sm:$0xff]  }
 0x333   :  { %4215 = vmatpush1.bf16.msra.mxu1 %v13600_v34  ;;  %v7929_v34 = vor.u32 %v7928_v10, %v7925_v38  ;;  %v13626_v38 = vld [vmem:[%s18698_s1 + $0xd00] ss:$8 sps:$4 sm:$0xff]  }
 0x334   :  { %8773 = vmatpush1.bf16.msra.mxu0 %v13603_v23  ;;  %4216 = vmatprep.subr.bf16.mxu1 %v13608_v18  ;;  %v11793_v23 = vcombine.high %v17463_v0, %v17468_v50  ;;  %v11801_v18 = vcombine.high %v17473_v51, %v17478_v31 }
 0x335   :  { %8774 = vmatprep.subr.bf16.mxu0 %v13611_v3  ;;  %v13618_v3 = vld [vmem:[%s18698_s1 + $0xcf0] ss:$8 sps:$4 sm:$0xff]   ;;  %v7938_v10 = vsel %vm7853_vm5, %v7929_v34, %v7937_v43 }
 0x337   :  { %4217 = vmatpush1.bf16.msra.mxu1 %v13606_v41  ;;  %v3450_v41 = vshrl.u32 %v16455_v29, 16 }
 0x338   :  { %8775 = vmatpush1.bf16.msra.mxu0 %v13609_v35  ;;  %4218 = vmatprep.subr.bf16.mxu1 %v13614_v62  ;;  %v3453_v35 = vshll.u32 %v16455_v29, 16  ;;  %v7974_v62 = vshrl.u32 %v11793_v23, 16  ;;  %v13629_v29 = vld [vmem:[%s18698_s1 + $0x1f00] ss:$8 sps:$4 sm:$0xff]  }
 0x339   :  { %8776 = vmatprep.subr.bf16.mxu0 %v13617_v42  ;;  %v7977_v42 = vshll.u32 %v11793_v23, 16  ;;  %v3452_v53 = vrot.slane %v3450_v41, 1 }
 0x33a   :  { %v3455_v12 = vrot.slane %v3453_v35, 2 }
 0x33b   :  { %4219 = vmatpush1.bf16.msra.mxu1 %v13612_v56  ;;  %v7982_v56 = vshrl.u32 %v11801_v18, 16  ;;  %v7979_v34 = vrot.slane %v7977_v42, 4 }
 0x33c   :  { %8777 = vmatpush1.bf16.msra.mxu0 %v13615_v30  ;;  %4220 = vmatprep.subr.bf16.mxu1 %v13620_v20  ;;  %v7985_v30 = vshll.u32 %v11801_v18, 16  ;;  %v3463_v20 = vrot.slane %v3461_v5, 2  ;;  %v13638_v5 = vld [vmem:[%s18698_s1 + $0xd20] ss:$8 sps:$4 sm:$0xff]  }
 0x33d   :  { %8778 = vmatprep.subr.bf16.mxu0 %v13623_v40  ;;  %v7976_v40 = vrot.slane %v7974_v62, 3  ;;  %v7984_v23 = vrot.slane %v7982_v56, 3  ;;  %v13641_v62 = vld [vmem:[%s18698_s1 + $0x1f20] ss:$8 sps:$4 sm:$0xff]  }
 0x33e   :  { %v7987_v18 = vrot.slane %v7985_v30, 4  ;;  %v17538_v41 = vor.u32 %v3463_v20, %v3460_v13  ;;  %v13644_v30 = vld [vmem:[%s18698_s1 + $0xd30] ss:$8 sps:$4 sm:$0xff]   ;;  %v13667_v13 = vld [vmem:[%s18698_s1 + $0x1f64] ss:$8 sps:$4 sm:$0xff]  }
 0x33f   :  { %4221 = vmatpush1.bf16.msra.mxu1 %v13618_v3  ;;  %v13632_v3 = vld [vmem:[%s18698_s1 + $0xd10] ss:$8 sps:$4 sm:$0xff]   ;;  %v7980_v35 = vor.u32 %v7979_v34, %v7976_v40  ;;  %v13662_v20 = vld [vmem:[%s18698_s1 + $0xd60] ss:$8 sps:$4 sm:$0xff]   ;;  %v13670_v34 = vld [vmem:[%s18698_s1 + $0xd74] ss:$8 sps:$4 sm:$0xff]  }
 0x340   :  { %8779 = vmatpush1.bf16.msra.mxu0 %v13621_v16  ;;  %4241 = vmatprep.subr.bf16.mxu1 %v13628_v54  ;;  %v13635_v16 = vld [vmem:[%s18698_s1 + $0x1f10] ss:$8 sps:$4 sm:$0xff]   ;;  %v13643_v54 = vld [vmem:[%s18698_s1 + $0x1f24] ss:$8 sps:$4 sm:$0xff]   ;;  %v17540_v59 = vor.u32 %v7987_v18, %v7984_v23  ;;  %v13665_v40 = vld [vmem:[%s18698_s1 + $0x1f60] ss:$8 sps:$4 sm:$0xff]  }
 0x341   :  { %8799 = vmatprep.subr.bf16.mxu0 %v13631_v27  ;;  %v3456_v27 = vor.u32 %v3455_v12, %v3452_v53  ;;  %v13659_v53 = vld [vmem:[%s18698_s1 + $0x1f50] ss:$8 sps:$4 sm:$0xff]   ;;  %v13664_v12 = vld [vmem:[%s18698_s1 + $0xd64] ss:$8 sps:$4 sm:$0xff]   ;;  %v13673_v23 = vld [vmem:[%s18698_s1 + $0x1f74] ss:$8 sps:$4 sm:$0xff]  }
 0x342   :  { %4223 = vmatmul.mubr.bf16.vlgmr.msra.gmra.mrb[0].mxu1 %v3414_v36  ;;  %v7989_v56 = vsel %vm7853_vm5, %v7980_v35, %v17540_v59  ;;  %v13658_v36 = vld [vmem:[%s18698_s1 + $0xd54] ss:$8 sps:$4 sm:$0xff]   ;;  %v13668_v18 = vld [vmem:[%s18698_s1 + $0xd70] ss:$8 sps:$4 sm:$0xff]  }
 0x343   :  { %8781 = vmatmul.mubr.bf16.vlgmr.msra.gmra.mrb[0].mxu0 %v7938_v10  ;;  %4242 = vmatpush1.bf16.msra.mxu1 %v13626_v38  ;;  %v3465_v42 = vsel %vm3397_vm6, %v3456_v27, %v17538_v41  ;;  %v13647_v38 = vld [vmem:[%s18698_s1 + $0x1f30] ss:$8 sps:$4 sm:$0xff]   ;;  %v13650_v10 = vld [vmem:[%s18698_s1 + $0xd40] ss:$8 sps:$4 sm:$0xff]  }
 0x344   :  { %8800 = vmatpush1.bf16.msra.mxu0 %v13629_v29  ;;  %4243 = vmatprep.subr.bf16.mxu1 %v13634_v14  ;;  %v13653_v29 = vld [vmem:[%s18698_s1 + $0x1f40] ss:$8 sps:$4 sm:$0xff]   ;;  %v13661_v14 = vld [vmem:[%s18698_s1 + $0x1f54] ss:$8 sps:$4 sm:$0xff]  }
 0x345   :  { %8801 = vmatprep.subr.bf16.mxu0 %v13637_v33  ;;  %8790 = vmatprep.mubr.bf16.mxu0 %v17275_v39  ;;  %v13646_v39 = vld [vmem:[%s18698_s1 + $0xd34] ss:$8 sps:$4 sm:$0xff]   ;;  %v13656_v33 = vld [vmem:[%s18698_s1 + $0xd50] ss:$8 sps:$4 sm:$0xff]  }
 0x346   :  { %4232 = vmatprep.mubr.bf16.mxu1 %v17277_v7  ;;  %v13649_v7 = vld [vmem:[%s18698_s1 + $0x1f34] ss:$8 sps:$4 sm:$0xff]  }
 0x347   :  { %4244 = vmatpush1.bf16.msra.mxu1 %v13632_v3  ;;  %v13671_v3 = vld [vmem:[%s18698_s1 + $0x1f70] ss:$8 sps:$4 sm:$0xff]  }
 0x348   :  { %8802 = vmatpush1.bf16.msra.mxu0 %v13635_v16  ;;  %4245 = vmatprep.subr.bf16.mxu1 %v13640_v48  ;;  %v13676_v16 = vld [vmem:[%s18698_s1 + $0xd84] ss:$8 sps:$4 sm:$0xff]  }
 0x349   :  { %8803 = vmatprep.subr.bf16.mxu0 %v13643_v54  ;;  %v13679_v48 = vld [vmem:[%s18698_s1 + $0x1f84] ss:$8 sps:$4 sm:$0xff]  }
 0x34a   :  { %4233 = vmatmul.mubr.bf16.gmra.mrb[52].mxu1 %v3413_v11  ;;  %v13655_v11 = vld [vmem:[%s18698_s1 + $0x1f44] ss:$8 sps:$4 sm:$0xff]  }
 0x34b   :  { %8791 = vmatmul.mubr.bf16.gmra.mrb[52].mxu0 %v7937_v43  ;;  %4246 = vmatpush1.bf16.msra.mxu1 %v13638_v5  ;;  %v13652_v43 = vld [vmem:[%s18698_s1 + $0xd44] ss:$8 sps:$4 sm:$0xff]  }
 0x34c   :  { %8804 = vmatpush1.bf16.msra.mxu0 %v13641_v62  ;;  %4247 = vmatprep.subr.bf16.mxu1 %v13646_v39 }
 0x34d   :  { %8805 = vmatprep.subr.bf16.mxu0 %v13649_v7  ;;  %4273 = vmatprep.mubr.bf16.mxu1 %v3465_v42 }
 0x34e   :  { %8831 = vmatprep.mubr.bf16.mxu0 %v7989_v56  ;;  %v13674_v56 = vld [vmem:[%s18698_s1 + $0xd80] ss:$8 sps:$4 sm:$0xff]  }
 0x34f   :  { %4248 = vmatpush1.bf16.msra.mxu1 %v13644_v30 }
 0x350   :  { %8806 = vmatpush1.bf16.msra.mxu0 %v13647_v38  ;;  %4249 = vmatprep.subr.bf16.mxu1 %v13652_v43 }
 0x351   :  { %8807 = vmatprep.subr.bf16.mxu0 %v13655_v11  ;;  %v13680_v11 = vld [vmem:[%s18698_s1 + $0xd90] ss:$8 sps:$4 sm:$0xff]  }
 0x353   :  { %4250 = vmatpush1.bf16.msra.mxu1 %v13650_v10  ;;  %v13683_v10 = vld [vmem:[%s18698_s1 + $0x1f90] ss:$8 sps:$4 sm:$0xff]  }
 0x354   :  { %8808 = vmatpush1.bf16.msra.mxu0 %v13653_v29  ;;  %4251 = vmatprep.subr.bf16.mxu1 %v13658_v36  ;;  %v13688_v29 = vld [vmem:[%s18698_s1 + $0xda4] ss:$8 sps:$4 sm:$0xff]  }
 0x355   :  { %8809 = vmatprep.subr.bf16.mxu0 %v13661_v14  ;;  %v13691_v36 = vld [vmem:[%s18698_s1 + $0x1fa4] ss:$8 sps:$4 sm:$0xff]   ;;  %v13686_v14 = vld [vmem:[%s18698_s1 + $0xda0] ss:$8 sps:$4 sm:$0xff]  }
 0x357   :  { %4252 = vmatpush1.bf16.msra.mxu1 %v13656_v33  ;;  %v13689_v33 = vld [vmem:[%s18698_s1 + $0x1fa0] ss:$8 sps:$4 sm:$0xff]  }
 0x358   :  { %8810 = vmatpush1.bf16.msra.mxu0 %v13659_v53  ;;  %4253 = vmatprep.subr.bf16.mxu1 %v13664_v12  ;;  %v13694_v53 = vld [vmem:[%s18698_s1 + $0xdb4] ss:$8 sps:$4 sm:$0xff]  }
 0x359   :  { %8811 = vmatprep.subr.bf16.mxu0 %v13667_v13  ;;  %v13697_v12 = vld [vmem:[%s18698_s1 + $0x1fb4] ss:$8 sps:$4 sm:$0xff]   ;;  %v13692_v13 = vld [vmem:[%s18698_s1 + $0xdb0] ss:$8 sps:$4 sm:$0xff]  }
 0x35b   :  { %4254 = vmatpush1.bf16.msra.mxu1 %v13662_v20  ;;  %v13695_v20 = vld [vmem:[%s18698_s1 + $0x1fb0] ss:$8 sps:$4 sm:$0xff]  }
 0x35c   :  { %8812 = vmatpush1.bf16.msra.mxu0 %v13665_v40  ;;  %4255 = vmatprep.subr.bf16.mxu1 %v13670_v34  ;;  %v13700_v40 = vld [vmem:[%s18698_s1 + $0xdc4] ss:$8 sps:$4 sm:$0xff]  }
 0x35d   :  { %8813 = vmatprep.subr.bf16.mxu0 %v13673_v23  ;;  %v3129_v54 = vpop.f32.mrb[40].mxu1  ;;  %v13703_v34 = vld [vmem:[%s18698_s1 + $0x1fc4] ss:$8 sps:$4 sm:$0xff]   ;;  %v17680_v23 = vcombine.low %v17458_v58, %v17458_v58  ;;  %v13706_v58 = vld [vmem:[%s18698_s1 + $0xdd4] ss:$8 sps:$4 sm:$0xff]  }
 0x35e   :  { %v7631_v27 = vpop.f32.mrb[40].mxu0  ;;  %v17619_v35 = vadd.f32 %v3129_v54, %v17355_v17  ;;  %v3131_v62 = vpop.f32.mrb[41].mxu1  ;;  %v13677_v17 = vld [vmem:[%s18698_s1 + $0x1f80] ss:$8 sps:$4 sm:$0xff]   ;;  %v13709_v54 = vld [vmem:[%s18698_s1 + $0x1fd4] ss:$8 sps:$4 sm:$0xff]  }
 0x35f   :  { %v17622_v5 = vadd.f32 %v7631_v27, %v17358_v63  ;;  %v7633_v39 = vpop.f32.mrb[41].mxu0  ;;  %v17625_v7 = vadd.f32 %v3131_v62, %v17360_v4  ;;  %4256 = vmatpush1.bf16.msra.mxu1 %v13668_v18  ;;  %v3133_v63 = vpop.f32.mrb[42].mxu1  ;;  %v13682_v4 = vld [vmem:[%s18698_s1 + $0xd94] ss:$8 sps:$4 sm:$0xff]   ;;  %v13698_v18 = vld [vmem:[%s18698_s1 + $0xdc0] ss:$8 sps:$4 sm:$0xff]  }
 0x360   :  { %v17628_v42 = vadd.f32 %v7633_v39, %v17363_v57  ;;  %8814 = vmatpush1.bf16.msra.mxu0 %v13671_v3  ;;  %v7635_v30 = vpop.f32.mrb[42].mxu0  ;;  %4257 = vmatprep.subr.bf16.mxu1 %v13676_v16  ;;  %v13685_v57 = vld [vmem:[%s18698_s1 + $0x1f94] ss:$8 sps:$4 sm:$0xff]   ;;  %v3134_v38 = vpop.f32.mrb[43].mxu1  ;;  %v13701_v3 = vld [vmem:[%s18698_s1 + $0x1fc0] ss:$8 sps:$4 sm:$0xff]   ;;  %v11792_v16 = vcombine.low %v17463_v0, %v17468_v50 }
 0x361   :  { %8815 = vmatprep.subr.bf16.mxu0 %v13679_v48  ;;  %v7636_v43 = vpop.f32.mrb[43].mxu0  ;;  %v11800_v48 = vcombine.low %v17473_v51, %v17478_v31  ;;  %v13704_v27 = vld [vmem:[%s18698_s1 + $0xdd0] ss:$8 sps:$4 sm:$0xff]   ;;  %v3433_v62 = vshrl.u32 %v16663_v8, 16  ;;  %v3436_v0 = vshll.u32 %v16663_v8, 16  ;;  %v3441_v50 = vshrl.u32 %v17680_v23, 16 }
 0x362   :  { %v3444_v51 = vshll.u32 %v17680_v23, 16  ;;  %v13707_v31 = vld [vmem:[%s18698_s1 + $0x1fd0] ss:$8 sps:$4 sm:$0xff]   ;;  %v7957_v39 = vshrl.u32 %v11792_v16, 16  ;;  %v13712_v8 = vld [vmem:[%s18698_s1 + $0xde4] ss:$8 sps:$4 sm:$0xff]  }
 0x363   :  { %4258 = vmatpush1.bf16.msra.mxu1 %v13674_v56  ;;  %v7960_v56 = vshll.u32 %v11792_v16, 16  ;;  %v7968_v63 = vshll.u32 %v11800_v48, 16  ;;  %v13715_v30 = vld [vmem:[%s18698_s1 + $0x1fe4] ss:$8 sps:$4 sm:$0xff]   ;;  %v3438_v38 = vrot.slane %v3436_v0, 2  ;;  %v3443_v43 = vrot.slane %v3441_v50, 1 }
 0x364   :  { %8816 = vmatpush1.bf16.msra.mxu0 %v13677_v17  ;;  %4259 = vmatprep.subr.bf16.mxu1 %v13682_v4  ;;  %v7965_v17 = vshrl.u32 %v11800_v48, 16  ;;  %v13710_v4 = vld [vmem:[%s18698_s1 + $0xde0] ss:$8 sps:$4 sm:$0xff]   ;;  %v13726_v16 = vld [vmem:[%s18698_s1 + $0xe04] ss:$8 sps:$4 sm:$0xff]  }
 0x365   :  { %8817 = vmatprep.subr.bf16.mxu0 %v13685_v57  ;;  %v3435_v57 = vrot.slane %v3433_v62, 1  ;;  %v13729_v48 = vld [vmem:[%s18698_s1 + $0x2004] ss:$8 sps:$4 sm:$0xff]   ;;  %v3495_v62 = vshll.u32 %v14340_v61, 16  ;;  %v13724_v50 = vld [vmem:[%s18698_s1 + $0xe00] ss:$8 sps:$4 sm:$0xff]  }
 0x367   :  { %4260 = vmatpush1.bf16.msra.mxu1 %v13680_v11  ;;  %v3446_v11 = vrot.slane %v3444_v51, 2 }
 0x368   :  { %8818 = vmatpush1.bf16.msra.mxu0 %v13683_v10  ;;  %4261 = vmatprep.subr.bf16.mxu1 %v13688_v29  ;;  %v13713_v10 = vld [vmem:[%s18698_s1 + $0x1fe0] ss:$8 sps:$4 sm:$0xff]   ;;  %v7959_v29 = vrot.slane %v7957_v39, 3 }
 0x369   :  { %8819 = vmatprep.subr.bf16.mxu0 %v13691_v36  ;;  %v7962_v36 = vrot.slane %v7960_v56, 4 }
 0x36b   :  { %4262 = vmatpush1.bf16.msra.mxu1 %v13686_v14  ;;  %v7967_v14 = vrot.slane %v7965_v17, 3 }
 0x36c   :  { %8820 = vmatpush1.bf16.msra.mxu0 %v13689_v33  ;;  %4263 = vmatprep.subr.bf16.mxu1 %v13694_v53  ;;  %v7970_v33 = vrot.slane %v7968_v63, 4  ;;  %v13718_v53 = vld [vmem:[%s18698_s1 + $0xdf4] ss:$8 sps:$4 sm:$0xff]   ;;  %v3497_v63 = vrot.slane %v3495_v62, 2  ;;  %v13763_v62 = vld [vmem:[%s18698_s1 + $0x2060] ss:$8 sps:$4 sm:$0xff]  }
 0x36d   :  { %8821 = vmatprep.subr.bf16.mxu0 %v13697_v12  ;;  %v13721_v12 = vld [vmem:[%s18698_s1 + $0x1ff4] ss:$8 sps:$4 sm:$0xff]  }
 0x36f   :  { %4264 = vmatpush1.bf16.msra.mxu1 %v13692_v13  ;;  %v3439_v13 = vor.u32 %v3438_v38, %v3435_v57  ;;  %v13741_v57 = vld [vmem:[%s18698_s1 + $0x2024] ss:$8 sps:$4 sm:$0xff]  }
 0x370   :  { %8822 = vmatpush1.bf16.msra.mxu0 %v13695_v20  ;;  %4265 = vmatprep.subr.bf16.mxu1 %v13700_v40  ;;  %v13716_v20 = vld [vmem:[%s18698_s1 + $0xdf0] ss:$8 sps:$4 sm:$0xff]  }
 0x371   :  { %8823 = vmatprep.subr.bf16.mxu0 %v13703_v34  ;;  %v13719_v40 = vld [vmem:[%s18698_s1 + $0x1ff0] ss:$8 sps:$4 sm:$0xff]   ;;  %v3447_v34 = vor.u32 %v3446_v11, %v3443_v43  ;;  %v13736_v11 = vld [vmem:[%s18698_s1 + $0xe20] ss:$8 sps:$4 sm:$0xff]  }
 0x373   :  { %4266 = vmatpush1.bf16.msra.mxu1 %v13698_v18  ;;  %v7963_v18 = vor.u32 %v7962_v36, %v7959_v29  ;;  %v3448_v0 = vsel %vm3397_vm6, %v3439_v13, %v3447_v34  ;;  %v17787_v29 = vld [vmem:[%s18699_s0 + $0x20] sm:$0xff] }
 0x374   :  { %8824 = vmatpush1.bf16.msra.mxu0 %v13701_v3  ;;  %4267 = vmatprep.subr.bf16.mxu1 %v13706_v58  ;;  %v7971_v3 = vor.u32 %v7970_v33, %v7967_v14  ;;  %v3484_v58 = vshrl.u32 %v16728_v15, 16  ;;  %v17792_v36 = vld [vmem:[%s18699_s0 + $0x40] sm:$0xff] }
 0x375   :  { %8825 = vmatprep.subr.bf16.mxu0 %v13709_v54  ;;  %v3487_v54 = vshll.u32 %v16728_v15, 16  ;;  %v13735_v15 = vld [vmem:[%s18698_s1 + $0x2014] ss:$8 sps:$4 sm:$0xff]   ;;  %v12059_v14 = vcombine.high %v17787_v29, %v17792_v36  ;;  %v13750_v13 = vld [vmem:[%s18698_s1 + $0xe44] ss:$8 sps:$4 sm:$0xff]  }
 0x376   :  { %v7972_v51 = vsel %vm7853_vm5, %v7963_v18, %v7971_v3  ;;  %v3486_v39 = vrot.slane %v3484_v58, 1  ;;  %v13756_v18 = vld [vmem:[%s18698_s1 + $0xe54] ss:$8 sps:$4 sm:$0xff]   ;;  %v13762_v58 = vld [vmem:[%s18698_s1 + $0xe64] ss:$8 sps:$4 sm:$0xff]  }
 0x377   :  { %4268 = vmatpush1.bf16.msra.mxu1 %v13704_v27  ;;  %v3492_v27 = vshrl.u32 %v14340_v61, 16  ;;  %v13732_v61 = vld [vmem:[%s18698_s1 + $0xe14] ss:$8 sps:$4 sm:$0xff]   ;;  %v3489_v56 = vrot.slane %v3487_v54, 2  ;;  %v13765_v54 = vld [vmem:[%s18698_s1 + $0x2064] ss:$8 sps:$4 sm:$0xff]  }
 0x378   :  { %8826 = vmatpush1.bf16.msra.mxu0 %v13707_v31  ;;  %4269 = vmatprep.subr.bf16.mxu1 %v13712_v8  ;;  %v13727_v31 = vld [vmem:[%s18698_s1 + $0x2000] ss:$8 sps:$4 sm:$0xff]   ;;  %v13730_v8 = vld [vmem:[%s18698_s1 + $0xe10] ss:$8 sps:$4 sm:$0xff]  }
 0x379   :  { %8827 = vmatprep.subr.bf16.mxu0 %v13715_v30  ;;  %v3494_v17 = vrot.slane %v3492_v27, 1  ;;  %v13733_v30 = vld [vmem:[%s18698_s1 + $0x2010] ss:$8 sps:$4 sm:$0xff]   ;;  %v3490_v38 = vor.u32 %v3489_v56, %v3486_v39  ;;  %v13760_v27 = vld [vmem:[%s18698_s1 + $0xe60] ss:$8 sps:$4 sm:$0xff]  }
 0x37b   :  { %4270 = vmatpush1.bf16.msra.mxu1 %v13710_v4  ;;  %v13738_v4 = vld [vmem:[%s18698_s1 + $0xe24] ss:$8 sps:$4 sm:$0xff]   ;;  %v17770_v43 = vor.u32 %v3497_v63, %v3494_v17 }
 0x37c   :  { %8828 = vmatpush1.bf16.msra.mxu0 %v13713_v10  ;;  %4271 = vmatprep.subr.bf16.mxu1 %v13718_v53  ;;  %v13739_v10 = vld [vmem:[%s18698_s1 + $0x2020] ss:$8 sps:$4 sm:$0xff]   ;;  %v13742_v53 = vld [vmem:[%s18698_s1 + $0xe30] ss:$8 sps:$4 sm:$0xff]  }
 0x37d   :  { %8829 = vmatprep.subr.bf16.mxu0 %v13721_v12  ;;  %v3499_v33 = vsel %vm3397_vm6, %v3490_v38, %v17770_v43  ;;  %v13745_v12 = vld [vmem:[%s18698_s1 + $0x2030] ss:$8 sps:$4 sm:$0xff]  }
 0x37f   :  { %4272 = vmatpush1.bf16.msra.mxu1 %v13716_v20  ;;  %v13753_v20 = vld [vmem:[%s18698_s1 + $0x2044] ss:$8 sps:$4 sm:$0xff]  }
 0x380   :  { %8830 = vmatpush1.bf16.msra.mxu0 %v13719_v40  ;;  %4292 = vmatprep.subr.bf16.mxu1 %v13726_v16  ;;  %v13748_v40 = vld [vmem:[%s18698_s1 + $0xe40] ss:$8 sps:$4 sm:$0xff]   ;;  %v13754_v16 = vld [vmem:[%s18698_s1 + $0xe50] ss:$8 sps:$4 sm:$0xff]  }
 0x381   :  { %9657 = vmatprep.subr.bf16.mxu0 %v13729_v48  ;;  %v13757_v48 = vld [vmem:[%s18698_s1 + $0x2050] ss:$8 sps:$4 sm:$0xff]  }
 0x382   :  { %4274 = vmatmul.mubr.bf16.vlgmr.msra.gmra.mrb[0].mxu1 %v3448_v0  ;;  %v13768_v0 = vld [vmem:[%s18698_s1 + $0xe74] ss:$8 sps:$4 sm:$0xff]  }
 0x383   :  { %8832 = vmatmul.mubr.bf16.vlgmr.msra.gmra.mrb[0].mxu0 %v7972_v51  ;;  %4293 = vmatpush1.bf16.msra.mxu1 %v13724_v50  ;;  %v13771_v50 = vld [vmem:[%s18698_s1 + $0x2074] ss:$8 sps:$4 sm:$0xff]   ;;  %v13766_v51 = vld [vmem:[%s18698_s1 + $0xe70] ss:$8 sps:$4 sm:$0xff]  }
 0x384   :  { %9658 = vmatpush1.bf16.msra.mxu0 %v13727_v31  ;;  %4294 = vmatprep.subr.bf16.mxu1 %v13732_v61  ;;  %v13769_v31 = vld [vmem:[%s18698_s1 + $0x2070] ss:$8 sps:$4 sm:$0xff]   ;;  %v13774_v61 = vld [vmem:[%s18698_s1 + $0xe84] ss:$8 sps:$4 sm:$0xff]  }
 0x385   :  { %9659 = vmatprep.subr.bf16.mxu0 %v13735_v15  ;;  %4283 = vmatprep.mubr.bf16.mxu1 %v17538_v41  ;;  %v13744_v41 = vld [vmem:[%s18698_s1 + $0xe34] ss:$8 sps:$4 sm:$0xff]   ;;  %v13777_v15 = vld [vmem:[%s18698_s1 + $0x2084] ss:$8 sps:$4 sm:$0xff]  }
 0x386   :  { %8841 = vmatprep.mubr.bf16.mxu0 %v17540_v59  ;;  %v13747_v59 = vld [vmem:[%s18698_s1 + $0x2034] ss:$8 sps:$4 sm:$0xff]  }
 0x387   :  { %4295 = vmatpush1.bf16.msra.mxu1 %v13730_v8 }
 0x388   :  { %9660 = vmatpush1.bf16.msra.mxu0 %v13733_v30  ;;  %4296 = vmatprep.subr.bf16.mxu1 %v13738_v4  ;;  %v13772_v4 = vld [vmem:[%s18698_s1 + $0xe80] ss:$8 sps:$4 sm:$0xff]  }
 0x389   :  { %9661 = vmatprep.subr.bf16.mxu0 %v13741_v57  ;;  %v13775_v57 = vld [vmem:[%s18698_s1 + $0x2080] ss:$8 sps:$4 sm:$0xff]  }
 0x38a   :  { %4284 = vmatmul.mubr.bf16.gmra.mrb[56].mxu1 %v3447_v34  ;;  %v13751_v34 = vld [vmem:[%s18698_s1 + $0x2040] ss:$8 sps:$4 sm:$0xff]  }
 0x38b   :  { %8842 = vmatmul.mubr.bf16.gmra.mrb[56].mxu0 %v7971_v3  ;;  %4297 = vmatpush1.bf16.msra.mxu1 %v13736_v11  ;;  %v13759_v3 = vld [vmem:[%s18698_s1 + $0x2054] ss:$8 sps:$4 sm:$0xff]  }
 0x38c   :  { %9662 = vmatpush1.bf16.msra.mxu0 %v13739_v10  ;;  %4298 = vmatprep.subr.bf16.mxu1 %v13744_v41 }
 0x38d   :  { %9663 = vmatprep.subr.bf16.mxu0 %v13747_v59  ;;  %4324 = vmatprep.mubr.bf16.mxu1 %v3499_v33  ;;  %v13778_v59 = vld [vmem:[%s18698_s1 + $0xe90] ss:$8 sps:$4 sm:$0xff]   ;;  %v13786_v33 = vld [vmem:[%s18698_s1 + $0xea4] ss:$8 sps:$4 sm:$0xff]  }
 0x38e   :  { %9689 = vmatprep.mubr.bf16.mxu0 %v12059_v14  ;;  %v13781_v14 = vld [vmem:[%s18698_s1 + $0x2090] ss:$8 sps:$4 sm:$0xff]  }
 0x38f   :  { %4299 = vmatpush1.bf16.msra.mxu1 %v13742_v53  ;;  %v13789_v53 = vld [vmem:[%s18698_s1 + $0x20a4] ss:$8 sps:$4 sm:$0xff]  }
 0x390   :  { %9664 = vmatpush1.bf16.msra.mxu0 %v13745_v12  ;;  %4300 = vmatprep.subr.bf16.mxu1 %v13750_v13  ;;  %v13784_v12 = vld [vmem:[%s18698_s1 + $0xea0] ss:$8 sps:$4 sm:$0xff]  }
 0x391   :  { %9665 = vmatprep.subr.bf16.mxu0 %v13753_v20  ;;  %v13787_v13 = vld [vmem:[%s18698_s1 + $0x20a0] ss:$8 sps:$4 sm:$0xff]   ;;  %v13792_v20 = vld [vmem:[%s18698_s1 + $0xeb4] ss:$8 sps:$4 sm:$0xff]  }
 0x393   :  { %4301 = vmatpush1.bf16.msra.mxu1 %v13748_v40  ;;  %v13795_v40 = vld [vmem:[%s18698_s1 + $0x20b4] ss:$8 sps:$4 sm:$0xff]  }
 0x394   :  { %9666 = vmatpush1.bf16.msra.mxu0 %v13751_v34  ;;  %4302 = vmatprep.subr.bf16.mxu1 %v13756_v18  ;;  %v13790_v34 = vld [vmem:[%s18698_s1 + $0xeb0] ss:$8 sps:$4 sm:$0xff]  }
 0x395   :  { %9667 = vmatprep.subr.bf16.mxu0 %v13759_v3  ;;  %v13793_v18 = vld [vmem:[%s18698_s1 + $0x20b0] ss:$8 sps:$4 sm:$0xff]   ;;  %v13798_v3 = vld [vmem:[%s18698_s1 + $0xec4] ss:$8 sps:$4 sm:$0xff]  }
 0x397   :  { %4303 = vmatpush1.bf16.msra.mxu1 %v13754_v16  ;;  %v13801_v16 = vld [vmem:[%s18698_s1 + $0x20c4] ss:$8 sps:$4 sm:$0xff]  }
 0x398   :  { %9668 = vmatpush1.bf16.msra.mxu0 %v13757_v48  ;;  %4304 = vmatprep.subr.bf16.mxu1 %v13762_v58  ;;  %v13796_v48 = vld [vmem:[%s18698_s1 + $0xec0] ss:$8 sps:$4 sm:$0xff]  }
 0x399   :  { %9669 = vmatprep.subr.bf16.mxu0 %v13765_v54  ;;  %v13799_v58 = vld [vmem:[%s18698_s1 + $0x20c0] ss:$8 sps:$4 sm:$0xff]   ;;  %v13804_v54 = vld [vmem:[%s18698_s1 + $0xed4] ss:$8 sps:$4 sm:$0xff]  }
 0x39b   :  { %4305 = vmatpush1.bf16.msra.mxu1 %v13760_v27  ;;  %v13807_v27 = vld [vmem:[%s18698_s1 + $0x20d4] ss:$8 sps:$4 sm:$0xff]  }
 0x39c   :  { %9670 = vmatpush1.bf16.msra.mxu0 %v13763_v62  ;;  %4306 = vmatprep.subr.bf16.mxu1 %v13768_v0  ;;  %v13802_v62 = vld [vmem:[%s18698_s1 + $0xed0] ss:$8 sps:$4 sm:$0xff]  }
 0x39d   :  { %9671 = vmatprep.subr.bf16.mxu0 %v13771_v50  ;;  %v3180_v39 = vpop.f32.mrb[44].mxu1  ;;  %v13805_v0 = vld [vmem:[%s18698_s1 + $0x20d0] ss:$8 sps:$4 sm:$0xff]   ;;  %v3467_v50 = vshrl.u32 %v16926_v28, 16 }
 0x39e   :  { %v17858_v56 = vpop.f32.mrb[44].mxu0  ;;  %v17861_v17 = vadd.f32 %v3180_v39, %v17619_v35  ;;  %v3182_v63 = vpop.f32.mrb[45].mxu1  ;;  %v13780_v35 = vld [vmem:[%s18698_s1 + $0xe94] ss:$8 sps:$4 sm:$0xff]   ;;  %v13813_v39 = vld [vmem:[%s18698_s1 + $0x20e4] ss:$8 sps:$4 sm:$0xff]  }
 0x39f   :  { %v17863_v8 = vpop.f32.mrb[45].mxu0  ;;  %v17866_v30 = vadd.f32 %v3182_v63, %v17625_v7  ;;  %4307 = vmatpush1.bf16.msra.mxu1 %v13766_v51  ;;  %v3184_v38 = vpop.f32.mrb[46].mxu1  ;;  %v13783_v7 = vld [vmem:[%s18698_s1 + $0x2094] ss:$8 sps:$4 sm:$0xff]   ;;  %v3470_v51 = vshll.u32 %v16926_v28, 16  ;;  %v3469_v28 = vrot.slane %v3467_v50, 1 }
 0x3a0   :  { %9672 = vmatpush1.bf16.msra.mxu0 %v13769_v31  ;;  %v8694_v11 = vpop.f32.mrb[46].mxu0  ;;  %4308 = vmatprep.subr.bf16.mxu1 %v13774_v61  ;;  %v3185_v10 = vpop.f32.mrb[47].mxu1  ;;  %v3475_v31 = vshrl.u32 %v14389_v22, 16  ;;  %v3478_v61 = vshll.u32 %v14389_v22, 16  ;;  %v13808_v63 = vld [vmem:[%s18698_s1 + $0xee0] ss:$8 sps:$4 sm:$0xff]  }
 0x3a1   :  { %9673 = vmatprep.subr.bf16.mxu0 %v13777_v15  ;;  %v8695_v41 = vpop.f32.mrb[47].mxu0  ;;  %v13810_v15 = vld [vmem:[%s18698_s1 + $0xee4] ss:$8 sps:$4 sm:$0xff]   ;;  %v13811_v22 = vld [vmem:[%s18698_s1 + $0x20e0] ss:$8 sps:$4 sm:$0xff]  }
 0x3a2   :  { %v3480_v38 = vrot.slane %v3478_v61, 2  ;;  %v13816_v11 = vld [vmem:[%s18698_s1 + $0xef4] ss:$8 sps:$4 sm:$0xff]   ;;  %v13817_v10 = vld [vmem:[%s18698_s1 + $0x20f0] ss:$8 sps:$4 sm:$0xff]  }
 0x3a3   :  { %4309 = vmatpush1.bf16.msra.mxu1 %v13772_v4  ;;  %v3472_v4 = vrot.slane %v3470_v51, 2  ;;  %v13837_v50 = vld [vmem:[%s18698_s1 + $0x2124] ss:$8 sps:$4 sm:$0xff]  }
 0x3a4   :  { %9674 = vmatpush1.bf16.msra.mxu0 %v13775_v57  ;;  %4310 = vmatprep.subr.bf16.mxu1 %v13780_v35  ;;  %v3477_v57 = vrot.slane %v3475_v31, 1  ;;  %v13819_v35 = vld [vmem:[%s18698_s1 + $0x20f4] ss:$8 sps:$4 sm:$0xff]  }
 0x3a5   :  { %9675 = vmatprep.subr.bf16.mxu0 %v13783_v7  ;;  %v13814_v7 = vld [vmem:[%s18698_s1 + $0xef0] ss:$8 sps:$4 sm:$0xff]   ;;  %v3473_v41 = vor.u32 %v3472_v4, %v3469_v28  ;;  %v18025_v28 = vld [vmem:[%s18699_s0 + $0x48] sm:$0xff] }
 0x3a7   :  { %4311 = vmatpush1.bf16.msra.mxu1 %v13778_v59  ;;  %v3481_v59 = vor.u32 %v3480_v38, %v3477_v57  ;;  %v13838_v38 = vld [vmem:[%s18698_s1 + $0xf30] ss:$8 sps:$4 sm:$0xff]  }
 0x3a8   :  { %9676 = vmatpush1.bf16.msra.mxu0 %v13781_v14  ;;  %4312 = vmatprep.subr.bf16.mxu1 %v13786_v33  ;;  %v13822_v14 = vld [vmem:[%s18698_s1 + $0xf04] ss:$8 sps:$4 sm:$0xff]  }
 0x3a9   :  { %9677 = vmatprep.subr.bf16.mxu0 %v13789_v53  ;;  %v13825_v33 = vld [vmem:[%s18698_s1 + $0x2104] ss:$8 sps:$4 sm:$0xff]   ;;  %v12058_v53 = vcombine.low %v17787_v29, %v17792_v36  ;;  %v13823_v29 = vld [vmem:[%s18698_s1 + $0x2100] ss:$8 sps:$4 sm:$0xff]  }
 0x3aa   :  { %v14130_v36 = vld [vmem:[%s18699_s0 + $0x60] sm:$0x11] }
 0x3ab   :  { %4313 = vmatpush1.bf16.msra.mxu1 %v13784_v12  ;;  %v3518_v12 = vshrl.u32 %v16993_v21, 16  ;;  %v12066_v51 = vcombine.low %v14130_v36, %v14130_v36 }
 0x3ac   :  { %9678 = vmatpush1.bf16.msra.mxu0 %v13787_v13  ;;  %4314 = vmatprep.subr.bf16.mxu1 %v13792_v20  ;;  %v3521_v13 = vshll.u32 %v16993_v21, 16  ;;  %v3526_v20 = vshrl.u32 %v14548_v26, 16  ;;  %v13828_v21 = vld [vmem:[%s18698_s1 + $0xf14] ss:$8 sps:$4 sm:$0xff]  }
 0x3ad   :  { %9679 = vmatprep.subr.bf16.mxu0 %v13795_v40  ;;  %v3529_v40 = vshll.u32 %v14548_v26, 16  ;;  %v13831_v26 = vld [vmem:[%s18698_s1 + $0x2114] ss:$8 sps:$4 sm:$0xff]  }
 0x3af   :  { %4315 = vmatpush1.bf16.msra.mxu1 %v13790_v34  ;;  %v3482_v34 = vsel %vm3397_vm6, %v3473_v41, %v3481_v59  ;;  %v13847_v41 = vld [vmem:[%s18698_s1 + $0x2140] ss:$8 sps:$4 sm:$0xff]  }
 0x3b0   :  { %9680 = vmatpush1.bf16.msra.mxu0 %v13793_v18  ;;  %4316 = vmatprep.subr.bf16.mxu1 %v13798_v3  ;;  %v13820_v18 = vld [vmem:[%s18698_s1 + $0xf00] ss:$8 sps:$4 sm:$0xff]   ;;  %v12067_v3 = vcombine.high %v14130_v36, %v14130_v36  ;;  %v13873_v36 = vld [vmem:[%s18698_s1 + $0x2184] ss:$8 sps:$4 sm:$0xff]  }
 0x3b1   :  { %9681 = vmatprep.subr.bf16.mxu0 %v13801_v16  ;;  %v3520_v16 = vrot.slane %v3518_v12, 1  ;;  %v13858_v12 = vld [vmem:[%s18698_s1 + $0xf64] ss:$8 sps:$4 sm:$0xff]  }
 0x3b3   :  { %4317 = vmatpush1.bf16.msra.mxu1 %v13796_v48  ;;  %v3523_v48 = vrot.slane %v3521_v13, 2  ;;  %v13861_v13 = vld [vmem:[%s18698_s1 + $0x2164] ss:$8 sps:$4 sm:$0xff]  }
 0x3b4   :  { %9682 = vmatpush1.bf16.msra.mxu0 %v13799_v58  ;;  %4318 = vmatprep.subr.bf16.mxu1 %v13804_v54  ;;  %v3528_v58 = vrot.slane %v3526_v20, 1  ;;  %v3531_v54 = vrot.slane %v3529_v40, 2  ;;  %v13856_v20 = vld [vmem:[%s18698_s1 + $0xf60] ss:$8 sps:$4 sm:$0xff]  }
 0x3b5   :  { %9683 = vmatprep.subr.bf16.mxu0 %v13807_v27  ;;  %v13826_v27 = vld [vmem:[%s18698_s1 + $0xf10] ss:$8 sps:$4 sm:$0xff]   ;;  %v3524_v31 = vor.u32 %v3523_v48, %v3520_v16  ;;  %v13859_v40 = vld [vmem:[%s18698_s1 + $0x2160] ss:$8 sps:$4 sm:$0xff]  }
 0x3b6   :  { %v18003_v61 = vor.u32 %v3531_v54, %v3528_v58 }
 0x3b7   :  { %4319 = vmatpush1.bf16.msra.mxu1 %v13802_v62  ;;  %v13829_v62 = vld [vmem:[%s18698_s1 + $0x2110] ss:$8 sps:$4 sm:$0xff]  }
 0x3b8   :  { %9684 = vmatpush1.bf16.msra.mxu0 %v13805_v0  ;;  %4320 = vmatprep.subr.bf16.mxu1 %v13810_v15  ;;  %v13834_v0 = vld [vmem:[%s18698_s1 + $0xf24] ss:$8 sps:$4 sm:$0xff]   ;;  %v13832_v15 = vld [vmem:[%s18698_s1 + $0xf20] ss:$8 sps:$4 sm:$0xff]   ;;  %v3533_v57 = vsel %vm3397_vm6, %v3524_v31, %v18003_v61 }
 0x3b9   :  { %9685 = vmatprep.subr.bf16.mxu0 %v13813_v39  ;;  %v13835_v39 = vld [vmem:[%s18698_s1 + $0x2120] ss:$8 sps:$4 sm:$0xff]  }
 0x3bb   :  { %4321 = vmatpush1.bf16.msra.mxu1 %v13808_v63  ;;  %v13843_v63 = vld [vmem:[%s18698_s1 + $0x2134] ss:$8 sps:$4 sm:$0xff]  }
 0x3bc   :  { %9686 = vmatpush1.bf16.msra.mxu0 %v13811_v22  ;;  %4322 = vmatprep.subr.bf16.mxu1 %v13816_v11  ;;  %v18020_v22 = vld [vmem:[%s18699_s0 + $0x28] sm:$0xff]  ;;  %v13841_v11 = vld [vmem:[%s18698_s1 + $0x2130] ss:$8 sps:$4 sm:$0xff]  }
 0x3bd   :  { %9687 = vmatprep.subr.bf16.mxu0 %v13819_v35  ;;  %v12061_v4 = vcombine.high %v18020_v22, %v18025_v28  ;;  %v13846_v35 = vld [vmem:[%s18698_s1 + $0xf44] ss:$8 sps:$4 sm:$0xff]  }
 0x3bf   :  { %4323 = vmatpush1.bf16.msra.mxu1 %v13814_v7  ;;  %v13849_v7 = vld [vmem:[%s18698_s1 + $0x2144] ss:$8 sps:$4 sm:$0xff]  }
 0x3c0   :  { %9688 = vmatpush1.bf16.msra.mxu0 %v13817_v10  ;;  %4343 = vmatprep.subr.bf16.mxu1 %v13822_v14  ;;  %v13844_v10 = vld [vmem:[%s18698_s1 + $0xf40] ss:$8 sps:$4 sm:$0xff]   ;;  %v13855_v14 = vld [vmem:[%s18698_s1 + $0x2154] ss:$8 sps:$4 sm:$0xff]  }
 0x3c1   :  { %9708 = vmatprep.subr.bf16.mxu0 %v13825_v33  ;;  %v13850_v33 = vld [vmem:[%s18698_s1 + $0xf50] ss:$8 sps:$4 sm:$0xff]  }
 0x3c2   :  { %4325 = vmatmul.mubr.bf16.vlgmr.msra.gmra.mrb[0].mxu1 %v3482_v34  ;;  %v13864_v34 = vld [vmem:[%s18698_s1 + $0xf74] ss:$8 sps:$4 sm:$0xff]  }
 0x3c3   :  { %9690 = vmatmul.mubr.bf16.vlgmr.msra.gmra.mrb[0].mxu0 %v12058_v53  ;;  %4344 = vmatpush1.bf16.msra.mxu1 %v13820_v18  ;;  %v13853_v53 = vld [vmem:[%s18698_s1 + $0x2150] ss:$8 sps:$4 sm:$0xff]   ;;  %v13867_v18 = vld [vmem:[%s18698_s1 + $0x2174] ss:$8 sps:$4 sm:$0xff]  }
 0x3c4   :  { %9709 = vmatpush1.bf16.msra.mxu0 %v13823_v29  ;;  %4345 = vmatprep.subr.bf16.mxu1 %v13828_v21  ;;  %v13862_v29 = vld [vmem:[%s18698_s1 + $0xf70] ss:$8 sps:$4 sm:$0xff]  }
 0x3c5   :  { %9710 = vmatprep.subr.bf16.mxu0 %v13831_v26  ;;  %4334 = vmatprep.mubr.bf16.mxu1 %v17770_v43  ;;  %v13840_v43 = vld [vmem:[%s18698_s1 + $0xf34] ss:$8 sps:$4 sm:$0xff]   ;;  %v13865_v21 = vld [vmem:[%s18698_s1 + $0x2170] ss:$8 sps:$4 sm:$0xff]   ;;  %v13870_v26 = vld [vmem:[%s18698_s1 + $0xf84] ss:$8 sps:$4 sm:$0xff]  }
 0x3c6   :  { %9699 = vmatprep.mubr.bf16.mxu0 %v12067_v3 }
 0x3c7   :  { %4346 = vmatpush1.bf16.msra.mxu1 %v13826_v27 }
 0x3c8   :  { %9711 = vmatpush1.bf16.msra.mxu0 %v13829_v62  ;;  %4347 = vmatprep.subr.bf16.mxu1 %v13834_v0 }
 0x3c9   :  { %9712 = vmatprep.subr.bf16.mxu0 %v13837_v50  ;;  %v13868_v50 = vld [vmem:[%s18698_s1 + $0xf80] ss:$8 sps:$4 sm:$0xff]  }
 0x3ca   :  { %4335 = vmatmul.mubr.bf16.gmra.mrb[60].mxu1 %v3481_v59  ;;  %v13852_v59 = vld [vmem:[%s18698_s1 + $0xf54] ss:$8 sps:$4 sm:$0xff]  }
 0x3cb   :  { %9700 = vmatmul.mubr.bf16.gmra.mrb[60].mxu0 %v12066_v51  ;;  %4348 = vmatpush1.bf16.msra.mxu1 %v13832_v15 }
 0x3cc   :  { %9713 = vmatpush1.bf16.msra.mxu0 %v13835_v39  ;;  %4349 = vmatprep.subr.bf16.mxu1 %v13840_v43 }
 0x3cd   :  { %9714 = vmatprep.subr.bf16.mxu0 %v13843_v63  ;;  %4375 = vmatprep.mubr.bf16.mxu1 %v3533_v57  ;;  %v13877_v63 = vld [vmem:[%s18698_s1 + $0x2190] ss:$8 sps:$4 sm:$0xff]   ;;  %v13880_v57 = vld [vmem:[%s18698_s1 + $0xfa0] ss:$8 sps:$4 sm:$0xff]  }
 0x3ce   :  { %9740 = vmatprep.mubr.bf16.mxu0 %v12061_v4  ;;  %v13882_v4 = vld [vmem:[%s18698_s1 + $0xfa4] ss:$8 sps:$4 sm:$0xff]  }
 0x3cf   :  { %4350 = vmatpush1.bf16.msra.mxu1 %v13838_v38  ;;  %v13883_v38 = vld [vmem:[%s18698_s1 + $0x21a0] ss:$8 sps:$4 sm:$0xff]  }
 0x3d0   :  { %9715 = vmatpush1.bf16.msra.mxu0 %v13841_v11  ;;  %4351 = vmatprep.subr.bf16.mxu1 %v13846_v35  ;;  %v13888_v11 = vld [vmem:[%s18698_s1 + $0xfb4] ss:$8 sps:$4 sm:$0xff]  }
 0x3d1   :  { %9716 = vmatprep.subr.bf16.mxu0 %v13849_v7  ;;  %v13891_v35 = vld [vmem:[%s18698_s1 + $0x21b4] ss:$8 sps:$4 sm:$0xff]   ;;  %v13886_v7 = vld [vmem:[%s18698_s1 + $0xfb0] ss:$8 sps:$4 sm:$0xff]  }
 0x3d3   :  { %4352 = vmatpush1.bf16.msra.mxu1 %v13844_v10  ;;  %v13889_v10 = vld [vmem:[%s18698_s1 + $0x21b0] ss:$8 sps:$4 sm:$0xff]  }
 0x3d4   :  { %9717 = vmatpush1.bf16.msra.mxu0 %v13847_v41  ;;  %4353 = vmatprep.subr.bf16.mxu1 %v13852_v59  ;;  %v13894_v41 = vld [vmem:[%s18698_s1 + $0xfc4] ss:$8 sps:$4 sm:$0xff]  }
 0x3d5   :  { %9718 = vmatprep.subr.bf16.mxu0 %v13855_v14  ;;  %v13897_v59 = vld [vmem:[%s18698_s1 + $0x21c4] ss:$8 sps:$4 sm:$0xff]   ;;  %v13892_v14 = vld [vmem:[%s18698_s1 + $0xfc0] ss:$8 sps:$4 sm:$0xff]  }
 0x3d7   :  { %4354 = vmatpush1.bf16.msra.mxu1 %v13850_v33  ;;  %v13895_v33 = vld [vmem:[%s18698_s1 + $0x21c0] ss:$8 sps:$4 sm:$0xff]  }
 0x3d8   :  { %9719 = vmatpush1.bf16.msra.mxu0 %v13853_v53  ;;  %4355 = vmatprep.subr.bf16.mxu1 %v13858_v12  ;;  %v13900_v53 = vld [vmem:[%s18698_s1 + $0xfd4] ss:$8 sps:$4 sm:$0xff]  }
 0x3d9   :  { %9720 = vmatprep.subr.bf16.mxu0 %v13861_v13  ;;  %v13903_v12 = vld [vmem:[%s18698_s1 + $0x21d4] ss:$8 sps:$4 sm:$0xff]   ;;  %v13898_v13 = vld [vmem:[%s18698_s1 + $0xfd0] ss:$8 sps:$4 sm:$0xff]  }
 0x3db   :  { %4356 = vmatpush1.bf16.msra.mxu1 %v13856_v20  ;;  %v13901_v20 = vld [vmem:[%s18698_s1 + $0x21d0] ss:$8 sps:$4 sm:$0xff]  }
 0x3dc   :  { %9721 = vmatpush1.bf16.msra.mxu0 %v13859_v40  ;;  %4357 = vmatprep.subr.bf16.mxu1 %v13864_v34  ;;  %v3501_v40 = vshrl.u32 %v17192_v60, 16  ;;  %v3504_v34 = vshll.u32 %v17192_v60, 16 }
 0x3dd   :  { %9722 = vmatprep.subr.bf16.mxu0 %v13867_v18  ;;  %v3231_v3 = vpop.f32.mrb[48].mxu1  ;;  %v3509_v18 = vshrl.u32 %v14668_v19, 16 }
 0x3de   :  { %v8741_v16 = vpop.f32.mrb[48].mxu0  ;;  %v3232_v48 = vadd.f32 %v3231_v3, %v17861_v17  ;;  %v3233_v54 = vpop.f32.mrb[49].mxu1  ;;  %v13871_v17 = vld [vmem:[%s18698_s1 + $0x2180] ss:$8 sps:$4 sm:$0xff]   ;;  %v3503_v60 = vrot.slane %v3501_v40, 1  ;;  %v3506_v3 = vrot.slane %v3504_v34, 2 }
 0x3df   :  { %v18093_v58 = vadd.f32 %v8741_v16, %v17858_v56  ;;  %v8743_v27 = vpop.f32.mrb[49].mxu0  ;;  %v3234_v62 = vadd.f32 %v3233_v54, %v17866_v30  ;;  %4358 = vmatpush1.bf16.msra.mxu1 %v13862_v29  ;;  %v3235_v51 = vpop.f32.mrb[50].mxu1  ;;  %v13879_v30 = vld [vmem:[%s18698_s1 + $0x2194] ss:$8 sps:$4 sm:$0xff]   ;;  %v3512_v29 = vshll.u32 %v14668_v19, 16  ;;  %v3511_v16 = vrot.slane %v3509_v18, 1 }
 0x3e0   :  { %v18097_v0 = vadd.f32 %v8743_v27, %v17863_v8  ;;  %9723 = vmatpush1.bf16.msra.mxu0 %v13865_v21  ;;  %v8745_v56 = vpop.f32.mrb[50].mxu0  ;;  %v18106_v31 = vadd.f32 %v3232_v48, %v17092_v45  ;;  %4359 = vmatprep.subr.bf16.mxu1 %v13870_v26  ;;  %v13876_v8 = vld [vmem:[%s18698_s1 + $0xf94] ss:$8 sps:$4 sm:$0xff]   ;;  %v3236_v15 = vpop.f32.mrb[51].mxu1  ;;  %v13874_v45 = vld [vmem:[%s18698_s1 + $0xf90] ss:$8 sps:$4 sm:$0xff]  }
 0x3e1   :  { %9724 = vmatprep.subr.bf16.mxu0 %v13873_v36  ;;  %v8746_v39 = vpop.f32.mrb[51].mxu0  ;;  %v18115_v43 = vadd.f32 %v3234_v62, %v17098_v9  ;;  %v13885_v9 = vld [vmem:[%s18698_s1 + $0x21a4] ss:$8 sps:$4 sm:$0xff]   ;;  %v13905_v36 = vld [vmem:[%s18698_s1 + $0xfe0] ss:$8 sps:$4 sm:$0xff]   ;;  %v3514_v48 = vrot.slane %v3512_v29, 2 }
 0x3e2   :  { %v13907_v21 = vld [vmem:[%s18698_s1 + $0xfe4] ss:$8 sps:$4 sm:$0xff]   ;;  %v13909_v19 = vld [vmem:[%s18698_s1 + $0x21e0] ss:$8 sps:$4 sm:$0xff]   ;;  %v13914_v54 = vld [vmem:[%s18698_s1 + $0xff4] ss:$8 sps:$4 sm:$0xff]  }
 0x3e3   :  { %4360 = vmatpush1.bf16.msra.mxu1 %v13868_v50  ;;  %v13911_v26 = vld [vmem:[%s18698_s1 + $0x21e4] ss:$8 sps:$4 sm:$0xff]   ;;  %v13917_v27 = vld [vmem:[%s18698_s1 + $0x21f4] ss:$8 sps:$4 sm:$0xff]   ;;  %v13912_v62 = vld [vmem:[%s18698_s1 + $0xff0] ss:$8 sps:$4 sm:$0xff]   ;;  %v3515_v51 = vor.u32 %v3514_v48, %v3511_v16 }
 0x3e4   :  { %9725 = vmatpush1.bf16.msra.mxu0 %v13871_v17  ;;  %4361 = vmatprep.subr.bf16.mxu1 %v13876_v8  ;;  %v13915_v50 = vld [vmem:[%s18698_s1 + $0x21f0] ss:$8 sps:$4 sm:$0xff]   ;;  %v3507_v17 = vor.u32 %v3506_v3, %v3503_v60  ;;  %v13920_v56 = vld [vmem:[%s18698_s1 + $0x1004] ss:$8 sps:$4 sm:$0xff]   ;;  %v13918_v39 = vld [vmem:[%s18698_s1 + $0x1000] ss:$8 sps:$4 sm:$0xff]  }
 0x3e5   :  { %9726 = vmatprep.subr.bf16.mxu0 %v13879_v30  ;;  %v13923_v8 = vld [vmem:[%s18698_s1 + $0x2204] ss:$8 sps:$4 sm:$0xff]   ;;  %v12060_v30 = vcombine.low %v18020_v22, %v18025_v28  ;;  %v13929_v22 = vld [vmem:[%s18698_s1 + $0x2214] ss:$8 sps:$4 sm:$0xff]   ;;  %v13944_v18 = vld [vmem:[%s18698_s1 + $0x1040] ss:$8 sps:$4 sm:$0xff]  }
 0x3e6   :  { %v3516_v15 = vsel %vm3397_vm6, %v3507_v17, %v3515_v51  ;;  %v14133_v28 = vld [vmem:[%s18699_s0 + $0x68] sm:$0x11] }
 0x3e7   :  { %4362 = vmatpush1.bf16.msra.mxu1 %v13874_v45  ;;  %v13921_v45 = vld [vmem:[%s18698_s1 + $0x2200] ss:$8 sps:$4 sm:$0xff]   ;;  %v13946_v40 = vld [vmem:[%s18698_s1 + $0x1044] ss:$8 sps:$4 sm:$0xff]  }
 0x3e8   :  { %9727 = vmatpush1.bf16.msra.mxu0 %v13877_v63  ;;  %4363 = vmatprep.subr.bf16.mxu1 %v13882_v4  ;;  %v13926_v63 = vld [vmem:[%s18698_s1 + $0x1014] ss:$8 sps:$4 sm:$0xff]   ;;  %v12069_v4 = vcombine.high %v14133_v28, %v14133_v28  ;;  %v13949_v34 = vld [vmem:[%s18698_s1 + $0x2244] ss:$8 sps:$4 sm:$0xff]   ;;  %v13947_v29 = vld [vmem:[%s18698_s1 + $0x2240] ss:$8 sps:$4 sm:$0xff]  }
 0x3e9   :  { %9728 = vmatprep.subr.bf16.mxu0 %v13885_v9  ;;  %v13924_v9 = vld [vmem:[%s18698_s1 + $0x1010] ss:$8 sps:$4 sm:$0xff]   ;;  %v13958_v60 = vld [vmem:[%s18698_s1 + $0x1064] ss:$8 sps:$4 sm:$0xff]   ;;  %v13956_v16 = vld [vmem:[%s18698_s1 + $0x1060] ss:$8 sps:$4 sm:$0xff]  }
 0x3ea   :  { %v13961_v3 = vld [vmem:[%s18698_s1 + $0x2264] ss:$8 sps:$4 sm:$0xff]   ;;  %v13959_v48 = vld [vmem:[%s18698_s1 + $0x2260] ss:$8 sps:$4 sm:$0xff]  }
 0x3eb   :  { %4364 = vmatpush1.bf16.msra.mxu1 %v13880_v57  ;;  %v13927_v57 = vld [vmem:[%s18698_s1 + $0x2210] ss:$8 sps:$4 sm:$0xff]   ;;  %v13970_v17 = vld [vmem:[%s18698_s1 + $0x1084] ss:$8 sps:$4 sm:$0xff]  }
 0x3ec   :  { %9729 = vmatpush1.bf16.msra.mxu0 %v13883_v38  ;;  %4365 = vmatprep.subr.bf16.mxu1 %v13888_v11  ;;  %v13933_v38 = vld [vmem:[%s18698_s1 + $0x1024] ss:$8 sps:$4 sm:$0xff]  }
 0x3ed   :  { %9730 = vmatprep.subr.bf16.mxu0 %v13891_v35  ;;  %v13937_v11 = vld [vmem:[%s18698_s1 + $0x2224] ss:$8 sps:$4 sm:$0xff]   ;;  %v12068_v35 = vcombine.low %v14133_v28, %v14133_v28 }
 0x3ef   :  { %4366 = vmatpush1.bf16.msra.mxu1 %v13886_v7  ;;  %v4557_v7 = vrot.slane %v14770_v6, 2  ;;  %v13943_v6 = vld [vmem:[%s18698_s1 + $0x2234] ss:$8 sps:$4 sm:$0xff]  }
 0x3f0   :  { %9731 = vmatpush1.bf16.msra.mxu0 %v13889_v10  ;;  %4367 = vmatprep.subr.bf16.mxu1 %v13894_v41  ;;  %v4558_v10 = vrot.slane %v17226_v24, 2  ;;  %v13931_v41 = vld [vmem:[%s18698_s1 + $0x1020] ss:$8 sps:$4 sm:$0xff]   ;;  %v14038_v24 = vld [vmem:[%s18698_s1 + $0x1134] ss:$8 sps:$4 sm:$0xff]  }
 0x3f1   :  { %9732 = vmatprep.subr.bf16.mxu0 %v13897_v59  ;;  %v13935_v59 = vld [vmem:[%s18698_s1 + $0x2220] ss:$8 sps:$4 sm:$0xff]  }
 0x3f3   :  { %4368 = vmatpush1.bf16.msra.mxu1 %v13892_v14  ;;  %v18253_v14 = vld [vmem:[%s18699_s0 + $0x30] sm:$0xff] }
 0x3f4   :  { %9733 = vmatpush1.bf16.msra.mxu0 %v13895_v33  ;;  %4369 = vmatprep.subr.bf16.mxu1 %v13900_v53  ;;  %v18258_v33 = vld [vmem:[%s18699_s0 + $0x50] sm:$0xff] }
 0x3f5   :  { %9734 = vmatprep.subr.bf16.mxu0 %v13903_v12  ;;  %v12063_v53 = vcombine.high %v18253_v14, %v18258_v33  ;;  %v4559_v12 = vsel %vm4553_vm1, %v4557_v7, %v4558_v10  ;;  %v13985_v7 = vld [vmem:[%s18698_s1 + $0x22a4] ss:$8 sps:$4 sm:$0xff]  }
 0x3f7   :  { %4370 = vmatpush1.bf16.msra.mxu1 %v13898_v13  ;;  %v13938_v13 = vld [vmem:[%s18698_s1 + $0x1030] ss:$8 sps:$4 sm:$0xff]  }
 0x3f8   :  { %9735 = vmatpush1.bf16.msra.mxu0 %v13901_v20  ;;  %4371 = vmatprep.subr.bf16.mxu1 %v13907_v21  ;;  %v13941_v20 = vld [vmem:[%s18698_s1 + $0x2230] ss:$8 sps:$4 sm:$0xff]   ;;  %v13952_v21 = vld [vmem:[%s18698_s1 + $0x1054] ss:$8 sps:$4 sm:$0xff]  }
 0x3f9   :  { %9736 = vmatprep.subr.bf16.mxu0 %v13911_v26  ;;  %v13955_v26 = vld [vmem:[%s18698_s1 + $0x2254] ss:$8 sps:$4 sm:$0xff]  }
 0x3fb   :  { %4372 = vmatpush1.bf16.msra.mxu1 %v13905_v36  ;;  %v13950_v36 = vld [vmem:[%s18698_s1 + $0x1050] ss:$8 sps:$4 sm:$0xff]  }
 0x3fc   :  { %9737 = vmatpush1.bf16.msra.mxu0 %v13909_v19  ;;  %4373 = vmatprep.subr.bf16.mxu1 %v13914_v54  ;;  %v13953_v19 = vld [vmem:[%s18698_s1 + $0x2250] ss:$8 sps:$4 sm:$0xff]   ;;  %v13964_v54 = vld [vmem:[%s18698_s1 + $0x1074] ss:$8 sps:$4 sm:$0xff]  }
 0x3fd   :  { %9738 = vmatprep.subr.bf16.mxu0 %v13917_v27  ;;  %v13967_v27 = vld [vmem:[%s18698_s1 + $0x2274] ss:$8 sps:$4 sm:$0xff]  }
 0x3ff   :  { %4374 = vmatpush1.bf16.msra.mxu1 %v13912_v62  ;;  %v13962_v62 = vld [vmem:[%s18698_s1 + $0x1070] ss:$8 sps:$4 sm:$0xff]  }
 0x400   :  { %9739 = vmatpush1.bf16.msra.mxu0 %v13915_v50  ;;  %5234 = vmatprep.subr.bf16.mxu1 %v13920_v56  ;;  %v13965_v50 = vld [vmem:[%s18698_s1 + $0x2270] ss:$8 sps:$4 sm:$0xff]  }
 0x401   :  { %9759 = vmatprep.subr.bf16.mxu0 %v13923_v8 }
 0x402   :  { %4376 = vmatmul.mubr.bf16.vlgmr.msra.gmra.mrb[0].mxu1 %v3516_v15 }
 0x403   :  { %9741 = vmatmul.mubr.bf16.vlgmr.msra.gmra.mrb[0].mxu0 %v12060_v30  ;;  %5235 = vmatpush1.bf16.msra.mxu1 %v13918_v39 }
 0x404   :  { %9760 = vmatpush1.bf16.msra.mxu0 %v13921_v45  ;;  %5236 = vmatprep.subr.bf16.mxu1 %v13926_v63  ;;  %v13968_v63 = vld [vmem:[%s18698_s1 + $0x1080] ss:$8 sps:$4 sm:$0xff]  }
 0x405   :  { %9761 = vmatprep.subr.bf16.mxu0 %v13929_v22  ;;  %4385 = vmatprep.mubr.bf16.mxu1 %v18003_v61  ;;  %v13940_v61 = vld [vmem:[%s18698_s1 + $0x1034] ss:$8 sps:$4 sm:$0xff]   ;;  %v13971_v22 = vld [vmem:[%s18698_s1 + $0x2280] ss:$8 sps:$4 sm:$0xff]  }
 0x406   :  { %9750 = vmatprep.mubr.bf16.mxu0 %v12069_v4 }
 0x407   :  { %5237 = vmatpush1.bf16.msra.mxu1 %v13924_v9 }
 0x408   :  { %9762 = vmatpush1.bf16.msra.mxu0 %v13927_v57  ;;  %5238 = vmatprep.subr.bf16.mxu1 %v13933_v38  ;;  %v13974_v38 = vld [vmem:[%s18698_s1 + $0x1090] ss:$8 sps:$4 sm:$0xff]  }
 0x409   :  { %9763 = vmatprep.subr.bf16.mxu0 %v13937_v11  ;;  %v13977_v11 = vld [vmem:[%s18698_s1 + $0x2290] ss:$8 sps:$4 sm:$0xff]  }
 0x40a   :  { %4386 = vmatmul.mubr.bf16.gmra.mrb[64].mxu1 %v3515_v51  ;;  %v13973_v51 = vld [vmem:[%s18698_s1 + $0x2284] ss:$8 sps:$4 sm:$0xff]  }
 0x40b   :  { %9751 = vmatmul.mubr.bf16.gmra.mrb[64].mxu0 %v12068_v35  ;;  %5239 = vmatpush1.bf16.msra.mxu1 %v13931_v41  ;;  %v13982_v35 = vld [vmem:[%s18698_s1 + $0x10a4] ss:$8 sps:$4 sm:$0xff]   ;;  %v13980_v41 = vld [vmem:[%s18698_s1 + $0x10a0] ss:$8 sps:$4 sm:$0xff]  }
 0x40c   :  { %9764 = vmatpush1.bf16.msra.mxu0 %v13935_v59  ;;  %5240 = vmatprep.subr.bf16.mxu1 %v13940_v61  ;;  %v13983_v59 = vld [vmem:[%s18698_s1 + $0x22a0] ss:$8 sps:$4 sm:$0xff]   ;;  %v13988_v61 = vld [vmem:[%s18698_s1 + $0x10b4] ss:$8 sps:$4 sm:$0xff]  }
 0x40d   :  { %9765 = vmatprep.subr.bf16.mxu0 %v13943_v6  ;;  %9791 = vmatprep.mubr.bf16.mxu0 %v12063_v53  ;;  %v13991_v6 = vld [vmem:[%s18698_s1 + $0x22b4] ss:$8 sps:$4 sm:$0xff]   ;;  %v13986_v53 = vld [vmem:[%s18698_s1 + $0x10b0] ss:$8 sps:$4 sm:$0xff]  }
 0x40e   :  { %5266 = vmatprep.mubr.bf16.mxu1 %v4559_v12  ;;  %v13989_v12 = vld [vmem:[%s18698_s1 + $0x22b0] ss:$8 sps:$4 sm:$0xff]  }
 0x40f   :  { %5241 = vmatpush1.bf16.msra.mxu1 %v13938_v13  ;;  %v13994_v13 = vld [vmem:[%s18698_s1 + $0x10c4] ss:$8 sps:$4 sm:$0xff]  }
 0x410   :  { %9766 = vmatpush1.bf16.msra.mxu0 %v13941_v20  ;;  %5242 = vmatprep.subr.bf16.mxu1 %v13946_v40  ;;  %v13997_v20 = vld [vmem:[%s18698_s1 + $0x22c4] ss:$8 sps:$4 sm:$0xff]   ;;  %v13992_v40 = vld [vmem:[%s18698_s1 + $0x10c0] ss:$8 sps:$4 sm:$0xff]  }
 0x411   :  { %9767 = vmatprep.subr.bf16.mxu0 %v13949_v34  ;;  %v13995_v34 = vld [vmem:[%s18698_s1 + $0x22c0] ss:$8 sps:$4 sm:$0xff]  }
 0x413   :  { %5243 = vmatpush1.bf16.msra.mxu1 %v13944_v18  ;;  %v14000_v18 = vld [vmem:[%s18698_s1 + $0x10d4] ss:$8 sps:$4 sm:$0xff]  }
 0x414   :  { %9768 = vmatpush1.bf16.msra.mxu0 %v13947_v29  ;;  %5244 = vmatprep.subr.bf16.mxu1 %v13952_v21  ;;  %v14003_v29 = vld [vmem:[%s18698_s1 + $0x22d4] ss:$8 sps:$4 sm:$0xff]   ;;  %v13998_v21 = vld [vmem:[%s18698_s1 + $0x10d0] ss:$8 sps:$4 sm:$0xff]  }
 0x415   :  { %9769 = vmatprep.subr.bf16.mxu0 %v13955_v26  ;;  %v14001_v26 = vld [vmem:[%s18698_s1 + $0x22d0] ss:$8 sps:$4 sm:$0xff]  }
 0x417   :  { %5245 = vmatpush1.bf16.msra.mxu1 %v13950_v36  ;;  %v14006_v36 = vld [vmem:[%s18698_s1 + $0x10e4] ss:$8 sps:$4 sm:$0xff]  }
 0x418   :  { %9770 = vmatpush1.bf16.msra.mxu0 %v13953_v19  ;;  %5246 = vmatprep.subr.bf16.mxu1 %v13958_v60  ;;  %v14009_v19 = vld [vmem:[%s18698_s1 + $0x22e4] ss:$8 sps:$4 sm:$0xff]   ;;  %v14004_v60 = vld [vmem:[%s18698_s1 + $0x10e0] ss:$8 sps:$4 sm:$0xff]  }
 0x419   :  { %9771 = vmatprep.subr.bf16.mxu0 %v13961_v3  ;;  %v14007_v3 = vld [vmem:[%s18698_s1 + $0x22e0] ss:$8 sps:$4 sm:$0xff]  }
 0x41b   :  { %5247 = vmatpush1.bf16.msra.mxu1 %v13956_v16  ;;  %v14012_v16 = vld [vmem:[%s18698_s1 + $0x10f4] ss:$8 sps:$4 sm:$0xff]  }
 0x41c   :  { %9772 = vmatpush1.bf16.msra.mxu0 %v13959_v48  ;;  %5248 = vmatprep.subr.bf16.mxu1 %v13964_v54  ;;  %v14015_v48 = vld [vmem:[%s18698_s1 + $0x22f4] ss:$8 sps:$4 sm:$0xff]   ;;  %v14010_v54 = vld [vmem:[%s18698_s1 + $0x10f0] ss:$8 sps:$4 sm:$0xff]  }
 0x41d   :  { %9773 = vmatprep.subr.bf16.mxu0 %v13967_v27  ;;  %v18325_v8 = vpop.f32.mrb[52].mxu1  ;;  %v14013_v27 = vld [vmem:[%s18698_s1 + $0x22f0] ss:$8 sps:$4 sm:$0xff]  }
 0x41e   :  { %v8792_v56 = vpop.f32.mrb[52].mxu0  ;;  %v18330_v39 = vpop.f32.mrb[53].mxu1 }
 0x41f   :  { %v18328_v30 = vadd.f32 %v8792_v56, %v18093_v58  ;;  %v8794_v15 = vpop.f32.mrb[53].mxu0  ;;  %5249 = vmatpush1.bf16.msra.mxu1 %v13962_v62  ;;  %v4238_v28 = vpop.f32.mrb[54].mxu1  ;;  %v13976_v58 = vld [vmem:[%s18698_s1 + $0x1094] ss:$8 sps:$4 sm:$0xff]   ;;  %v4554_v62 = vrot.slane %v14906_v37, 2  ;;  %v12062_v56 = vcombine.low %v18253_v14, %v18258_v33 }
 0x420   :  { %v18333_v45 = vadd.f32 %v8794_v15, %v18097_v0  ;;  %9774 = vmatpush1.bf16.msra.mxu0 %v13965_v50  ;;  %v8796_v4 = vpop.f32.mrb[54].mxu0  ;;  %5250 = vmatprep.subr.bf16.mxu1 %v13970_v17  ;;  %v13979_v0 = vld [vmem:[%s18698_s1 + $0x2294] ss:$8 sps:$4 sm:$0xff]   ;;  %v4239_v9 = vpop.f32.mrb[55].mxu1  ;;  %v4555_v50 = vrot.slane %v17425_v52, 2 }
 0x421   :  { %9775 = vmatprep.subr.bf16.mxu0 %v13973_v51  ;;  %v8797_v57 = vpop.f32.mrb[55].mxu0  ;;  %v14018_v17 = vld [vmem:[%s18698_s1 + $0x1104] ss:$8 sps:$4 sm:$0xff]   ;;  %v14016_v37 = vld [vmem:[%s18698_s1 + $0x1100] ss:$8 sps:$4 sm:$0xff]  }
 0x422   :  { %v14021_v51 = vld [vmem:[%s18698_s1 + $0x2304] ss:$8 sps:$4 sm:$0xff]   ;;  %v14019_v52 = vld [vmem:[%s18698_s1 + $0x2300] ss:$8 sps:$4 sm:$0xff]   ;;  %v4556_v15 = vsel %vm4553_vm1, %v4554_v62, %v4555_v50  ;;  %v14027_v14 = vld [vmem:[%s18698_s1 + $0x2314] ss:$8 sps:$4 sm:$0xff]  }
 0x423   :  { %5251 = vmatpush1.bf16.msra.mxu1 %v13968_v63  ;;  %v14024_v63 = vld [vmem:[%s18698_s1 + $0x1114] ss:$8 sps:$4 sm:$0xff]   ;;  %v14022_v28 = vld [vmem:[%s18698_s1 + $0x1110] ss:$8 sps:$4 sm:$0xff]   ;;  %v4563_v57 = vrot.slane %v14982_v25, 2 }
 0x424   :  { %9776 = vmatpush1.bf16.msra.mxu0 %v13971_v22  ;;  %5252 = vmatprep.subr.bf16.mxu1 %v13976_v58  ;;  %v14136_v33 = vld [vmem:[%s18699_s0 + $0x70] sm:$0x11]  ;;  %v14031_v58 = vld [vmem:[%s18698_s1 + $0x1124] ss:$8 sps:$4 sm:$0xff]  }
 0x425   :  { %9777 = vmatprep.subr.bf16.mxu0 %v13979_v0  ;;  %v12071_v22 = vcombine.high %v14136_v33, %v14136_v33  ;;  %v14025_v4 = vld [vmem:[%s18698_s1 + $0x2310] ss:$8 sps:$4 sm:$0xff]   ;;  %v14035_v0 = vld [vmem:[%s18698_s1 + $0x2324] ss:$8 sps:$4 sm:$0xff]   ;;  %v12070_v9 = vcombine.low %v14136_v33, %v14136_v33  ;;  %v14041_v25 = vld [vmem:[%s18698_s1 + $0x2334] ss:$8 sps:$4 sm:$0xff]  }
 0x427   :  { %5253 = vmatpush1.bf16.msra.mxu1 %v13974_v38  ;;  %v4564_v38 = vrot.slane %v17488_v1, 2 }
 0x428   :  { %9778 = vmatpush1.bf16.msra.mxu0 %v13977_v11  ;;  %5254 = vmatprep.subr.bf16.mxu1 %v13982_v35  ;;  %v14029_v11 = vld [vmem:[%s18698_s1 + $0x1120] ss:$8 sps:$4 sm:$0xff]  }
 0x429   :  { %9779 = vmatprep.subr.bf16.mxu0 %v13985_v7  ;;  %v14033_v35 = vld [vmem:[%s18698_s1 + $0x2320] ss:$8 sps:$4 sm:$0xff]   ;;  %v18487_v7 = vld [vmem:[%s18699_s0 + $0x58] sm:$0xff] }
 0x42b   :  { %5255 = vmatpush1.bf16.msra.mxu1 %v13980_v41 }
 0x42c   :  { %9780 = vmatpush1.bf16.msra.mxu0 %v13983_v59  ;;  %5256 = vmatprep.subr.bf16.mxu1 %v13988_v61  ;;  %v4565_v59 = vsel %vm4553_vm1, %v4563_v57, %v4564_v38  ;;  %v14036_v61 = vld [vmem:[%s18698_s1 + $0x1130] ss:$8 sps:$4 sm:$0xff]   ;;  %v14081_v57 = vld [vmem:[%s18698_s1 + $0x23a0] ss:$8 sps:$4 sm:$0xff]  }
 0x42d   :  { %9781 = vmatprep.subr.bf16.mxu0 %v13991_v6  ;;  %v14039_v6 = vld [vmem:[%s18698_s1 + $0x2330] ss:$8 sps:$4 sm:$0xff]  }
 0x42f   :  { %5257 = vmatpush1.bf16.msra.mxu1 %v13986_v53  ;;  %v14044_v53 = vld [vmem:[%s18698_s1 + $0x1144] ss:$8 sps:$4 sm:$0xff]  }
 0x430   :  { %9782 = vmatpush1.bf16.msra.mxu0 %v13989_v12  ;;  %5258 = vmatprep.subr.bf16.mxu1 %v13994_v13  ;;  %v14047_v12 = vld [vmem:[%s18698_s1 + $0x2344] ss:$8 sps:$4 sm:$0xff]   ;;  %v14042_v13 = vld [vmem:[%s18698_s1 + $0x1140] ss:$8 sps:$4 sm:$0xff]  }
 0x431   :  { %9783 = vmatprep.subr.bf16.mxu0 %v13997_v20  ;;  %v14045_v20 = vld [vmem:[%s18698_s1 + $0x2340] ss:$8 sps:$4 sm:$0xff]  }
 0x433   :  { %5259 = vmatpush1.bf16.msra.mxu1 %v13992_v40  ;;  %v14050_v40 = vld [vmem:[%s18698_s1 + $0x1154] ss:$8 sps:$4 sm:$0xff]  }
 0x434   :  { %9784 = vmatpush1.bf16.msra.mxu0 %v13995_v34  ;;  %5260 = vmatprep.subr.bf16.mxu1 %v14000_v18  ;;  %v14053_v34 = vld [vmem:[%s18698_s1 + $0x2354] ss:$8 sps:$4 sm:$0xff]   ;;  %v14048_v18 = vld [vmem:[%s18698_s1 + $0x1150] ss:$8 sps:$4 sm:$0xff]  }
 0x435   :  { %9785 = vmatprep.subr.bf16.mxu0 %v14003_v29  ;;  %v14051_v29 = vld [vmem:[%s18698_s1 + $0x2350] ss:$8 sps:$4 sm:$0xff]  }
 0x437   :  { %5261 = vmatpush1.bf16.msra.mxu1 %v13998_v21  ;;  %v14056_v21 = vld [vmem:[%s18698_s1 + $0x1164] ss:$8 sps:$4 sm:$0xff]  }
 0x438   :  { %9786 = vmatpush1.bf16.msra.mxu0 %v14001_v26  ;;  %5262 = vmatprep.subr.bf16.mxu1 %v14006_v36  ;;  %v14059_v26 = vld [vmem:[%s18698_s1 + $0x2364] ss:$8 sps:$4 sm:$0xff]   ;;  %v14054_v36 = vld [vmem:[%s18698_s1 + $0x1160] ss:$8 sps:$4 sm:$0xff]  }
 0x439   :  { %9787 = vmatprep.subr.bf16.mxu0 %v14009_v19  ;;  %v14057_v19 = vld [vmem:[%s18698_s1 + $0x2360] ss:$8 sps:$4 sm:$0xff]  }
 0x43b   :  { %5263 = vmatpush1.bf16.msra.mxu1 %v14004_v60  ;;  %v14062_v60 = vld [vmem:[%s18698_s1 + $0x1174] ss:$8 sps:$4 sm:$0xff]  }
 0x43c   :  { %9788 = vmatpush1.bf16.msra.mxu0 %v14007_v3  ;;  %5264 = vmatprep.subr.bf16.mxu1 %v14012_v16  ;;  %v14065_v3 = vld [vmem:[%s18698_s1 + $0x2374] ss:$8 sps:$4 sm:$0xff]   ;;  %v14060_v16 = vld [vmem:[%s18698_s1 + $0x1170] ss:$8 sps:$4 sm:$0xff]  }
 0x43d   :  { %9789 = vmatprep.subr.bf16.mxu0 %v14015_v48  ;;  %v14063_v48 = vld [vmem:[%s18698_s1 + $0x2370] ss:$8 sps:$4 sm:$0xff]  }
 0x43f   :  { %5265 = vmatpush1.bf16.msra.mxu1 %v14010_v54  ;;  %v14068_v54 = vld [vmem:[%s18698_s1 + $0x1184] ss:$8 sps:$4 sm:$0xff]  }
 0x440   :  { %9790 = vmatpush1.bf16.msra.mxu0 %v14013_v27  ;;  %5285 = vmatprep.subr.bf16.mxu1 %v14018_v17  ;;  %v14071_v27 = vld [vmem:[%s18698_s1 + $0x2384] ss:$8 sps:$4 sm:$0xff]  }
 0x441   :  { %9810 = vmatprep.subr.bf16.mxu0 %v14021_v51 }
 0x442   :  { %5267 = vmatmul.mubr.bf16.vlgmr.msra.gmra.mrb[0].mxu1 %v4556_v15 }
 0x443   :  { %9792 = vmatmul.mubr.bf16.vlgmr.msra.gmra.mrb[0].mxu0 %v12062_v56  ;;  %5286 = vmatpush1.bf16.msra.mxu1 %v14016_v37 }
 0x444   :  { %9811 = vmatpush1.bf16.msra.mxu0 %v14019_v52  ;;  %5287 = vmatprep.subr.bf16.mxu1 %v14024_v63  ;;  %v14066_v63 = vld [vmem:[%s18698_s1 + $0x1180] ss:$8 sps:$4 sm:$0xff]  }
 0x445   :  { %9812 = vmatprep.subr.bf16.mxu0 %v14027_v14  ;;  %9801 = vmatprep.mubr.bf16.mxu0 %v12071_v22 }
 0x446   :  { %5276 = vmatprep.mubr.bf16.mxu1 %v4558_v10  ;;  %v18482_v10 = vld [vmem:[%s18699_s0 + $0x38] sm:$0xff] }
 0x447   :  { %5288 = vmatpush1.bf16.msra.mxu1 %v14022_v28  ;;  %v12065_v41 = vcombine.high %v18482_v10, %v18487_v7  ;;  %v14072_v28 = vld [vmem:[%s18698_s1 + $0x1190] ss:$8 sps:$4 sm:$0xff]  }
 0x448   :  { %9813 = vmatpush1.bf16.msra.mxu0 %v14025_v4  ;;  %5289 = vmatprep.subr.bf16.mxu1 %v14031_v58  ;;  %v14075_v4 = vld [vmem:[%s18698_s1 + $0x2390] ss:$8 sps:$4 sm:$0xff]   ;;  %v14080_v58 = vld [vmem:[%s18698_s1 + $0x11a4] ss:$8 sps:$4 sm:$0xff]  }
 0x449   :  { %9814 = vmatprep.subr.bf16.mxu0 %v14035_v0  ;;  %v14083_v0 = vld [vmem:[%s18698_s1 + $0x23a4] ss:$8 sps:$4 sm:$0xff]  }
 0x44a   :  { %5277 = vmatmul.mubr.bf16.gmra.mrb[68].mxu1 %v4555_v50 }
 0x44b   :  { %9802 = vmatmul.mubr.bf16.gmra.mrb[68].mxu0 %v12070_v9  ;;  %5290 = vmatpush1.bf16.msra.mxu1 %v14029_v11  ;;  %v14078_v9 = vld [vmem:[%s18698_s1 + $0x11a0] ss:$8 sps:$4 sm:$0xff]   ;;  %v14086_v11 = vld [vmem:[%s18698_s1 + $0x11b4] ss:$8 sps:$4 sm:$0xff]  }
 0x44c   :  { %9815 = vmatpush1.bf16.msra.mxu0 %v14033_v35  ;;  %5291 = vmatprep.subr.bf16.mxu1 %v14038_v24  ;;  %v14089_v35 = vld [vmem:[%s18698_s1 + $0x23b4] ss:$8 sps:$4 sm:$0xff]   ;;  %v14084_v24 = vld [vmem:[%s18698_s1 + $0x11b0] ss:$8 sps:$4 sm:$0xff]  }
 0x44d   :  { %9816 = vmatprep.subr.bf16.mxu0 %v14041_v25  ;;  %5317 = vmatprep.mubr.bf16.mxu1 %v4565_v59  ;;  %v14087_v25 = vld [vmem:[%s18698_s1 + $0x23b0] ss:$8 sps:$4 sm:$0xff]   ;;  %v14095_v59 = vld [vmem:[%s18698_s1 + $0x23c4] ss:$8 sps:$4 sm:$0xff]  }
 0x44e   :  { %9842 = vmatprep.mubr.bf16.mxu0 %v12065_v41  ;;  %v14092_v41 = vld [vmem:[%s18698_s1 + $0x11c4] ss:$8 sps:$4 sm:$0xff]  }
 0x44f   :  { %5292 = vmatpush1.bf16.msra.mxu1 %v14036_v61  ;;  %v14090_v61 = vld [vmem:[%s18698_s1 + $0x11c0] ss:$8 sps:$4 sm:$0xff]  }
 0x450   :  { %9817 = vmatpush1.bf16.msra.mxu0 %v14039_v6  ;;  %5293 = vmatprep.subr.bf16.mxu1 %v14044_v53  ;;  %v14093_v6 = vld [vmem:[%s18698_s1 + $0x23c0] ss:$8 sps:$4 sm:$0xff]   ;;  %v14098_v53 = vld [vmem:[%s18698_s1 + $0x11d4] ss:$8 sps:$4 sm:$0xff]  }
 0x451   :  { %9818 = vmatprep.subr.bf16.mxu0 %v14047_v12  ;;  %v14101_v12 = vld [vmem:[%s18698_s1 + $0x23d4] ss:$8 sps:$4 sm:$0xff]  }
 0x453   :  { %5294 = vmatpush1.bf16.msra.mxu1 %v14042_v13  ;;  %v14096_v13 = vld [vmem:[%s18698_s1 + $0x11d0] ss:$8 sps:$4 sm:$0xff]  }
 0x454   :  { %9819 = vmatpush1.bf16.msra.mxu0 %v14045_v20  ;;  %5295 = vmatprep.subr.bf16.mxu1 %v14050_v40  ;;  %v14099_v20 = vld [vmem:[%s18698_s1 + $0x23d0] ss:$8 sps:$4 sm:$0xff]   ;;  %v14104_v40 = vld [vmem:[%s18698_s1 + $0x11e4] ss:$8 sps:$4 sm:$0xff]  }
 0x455   :  { %9820 = vmatprep.subr.bf16.mxu0 %v14053_v34  ;;  %v14107_v34 = vld [vmem:[%s18698_s1 + $0x23e4] ss:$8 sps:$4 sm:$0xff]  }
 0x457   :  { %5296 = vmatpush1.bf16.msra.mxu1 %v14048_v18  ;;  %v14102_v18 = vld [vmem:[%s18698_s1 + $0x11e0] ss:$8 sps:$4 sm:$0xff]  }
 0x458   :  { %9821 = vmatpush1.bf16.msra.mxu0 %v14051_v29  ;;  %5297 = vmatprep.subr.bf16.mxu1 %v14056_v21  ;;  %v14105_v29 = vld [vmem:[%s18698_s1 + $0x23e0] ss:$8 sps:$4 sm:$0xff]   ;;  %v14110_v21 = vld [vmem:[%s18698_s1 + $0x11f4] ss:$8 sps:$4 sm:$0xff]  }
 0x459   :  { %9822 = vmatprep.subr.bf16.mxu0 %v14059_v26  ;;  %v14113_v26 = vld [vmem:[%s18698_s1 + $0x23f4] ss:$8 sps:$4 sm:$0xff]  }
 0x45b   :  { %5298 = vmatpush1.bf16.msra.mxu1 %v14054_v36  ;;  %v14108_v36 = vld [vmem:[%s18698_s1 + $0x11f0] ss:$8 sps:$4 sm:$0xff]  }
 0x45c   :  { %9823 = vmatpush1.bf16.msra.mxu0 %v14057_v19  ;;  %5299 = vmatprep.subr.bf16.mxu1 %v14062_v60  ;;  %v14111_v19 = vld [vmem:[%s18698_s1 + $0x23f0] ss:$8 sps:$4 sm:$0xff]   ;;  %v4560_v60 = vrot.slane %v15185_v55, 2 }
 0x45d   :  { %9824 = vmatprep.subr.bf16.mxu0 %v14065_v3  ;;  %v4285_v62 = vpop.f32.mrb[56].mxu1  ;;  %v4561_v3 = vrot.slane %v17680_v23, 2 }
 0x45e   :  { %v8843_v50 = vpop.f32.mrb[56].mxu0  ;;  %v18555_v17 = vadd.f32 %v4285_v62, %v18325_v8  ;;  %v4287_v56 = vpop.f32.mrb[57].mxu1  ;;  %v14069_v8 = vld [vmem:[%s18698_s1 + $0x2380] ss:$8 sps:$4 sm:$0xff]  }
 0x45f   :  { %v18558_v51 = vadd.f32 %v8843_v50, %v18328_v30  ;;  %v8845_v37 = vpop.f32.mrb[57].mxu0  ;;  %v18561_v52 = vadd.f32 %v4287_v56, %v18330_v39  ;;  %5300 = vmatpush1.bf16.msra.mxu1 %v14060_v16  ;;  %v4289_v30 = vpop.f32.mrb[58].mxu1  ;;  %v14074_v39 = vld [vmem:[%s18698_s1 + $0x1194] ss:$8 sps:$4 sm:$0xff]   ;;  %v12064_v16 = vcombine.low %v18482_v10, %v18487_v7 }
 0x460   :  { %v18564_v15 = vadd.f32 %v8845_v37, %v18333_v45  ;;  %9825 = vmatpush1.bf16.msra.mxu0 %v14063_v48  ;;  %v8847_v14 = vpop.f32.mrb[58].mxu0  ;;  %5301 = vmatprep.subr.bf16.mxu1 %v14068_v54  ;;  %v14077_v45 = vld [vmem:[%s18698_s1 + $0x2394] ss:$8 sps:$4 sm:$0xff]   ;;  %v4290_v33 = vpop.f32.mrb[59].mxu1  ;;  %v4562_v48 = vsel %vm4553_vm1, %v4560_v60, %v4561_v3 }
 0x461   :  { %9826 = vmatprep.subr.bf16.mxu0 %v14071_v27  ;;  %v8848_v22 = vpop.f32.mrb[59].mxu0  ;;  %v14139_v54 = vld [vmem:[%s18699_s0 + $0x78] sm:$0x11] }
 0x462   :  { %v12073_v27 = vcombine.high %v14139_v54, %v14139_v54  ;;  %v12072_v55 = vcombine.low %v14139_v54, %v14139_v54 }
 0x463   :  { %5302 = vmatpush1.bf16.msra.mxu1 %v14066_v63 }
 0x464   :  { %9827 = vmatpush1.bf16.msra.mxu0 %v14069_v8  ;;  %5303 = vmatprep.subr.bf16.mxu1 %v14074_v39 }
 0x465   :  { %9828 = vmatprep.subr.bf16.mxu0 %v14077_v45 }
 0x467   :  { %5304 = vmatpush1.bf16.msra.mxu1 %v14072_v28 }
 0x468   :  { %9829 = vmatpush1.bf16.msra.mxu0 %v14075_v4  ;;  %5305 = vmatprep.subr.bf16.mxu1 %v14080_v58 }
 0x469   :  { %9830 = vmatprep.subr.bf16.mxu0 %v14083_v0 }
 0x46b   :  { %5306 = vmatpush1.bf16.msra.mxu1 %v14078_v9 }
 0x46c   :  { %9831 = vmatpush1.bf16.msra.mxu0 %v14081_v57  ;;  %5307 = vmatprep.subr.bf16.mxu1 %v14086_v11 }
 0x46d   :  { %9832 = vmatprep.subr.bf16.mxu0 %v14089_v35 }
 0x46f   :  { %5308 = vmatpush1.bf16.msra.mxu1 %v14084_v24 }
 0x470   :  { %9833 = vmatpush1.bf16.msra.mxu0 %v14087_v25  ;;  %5309 = vmatprep.subr.bf16.mxu1 %v14092_v41 }
 0x471   :  { %9834 = vmatprep.subr.bf16.mxu0 %v14095_v59 }
 0x473   :  { %5310 = vmatpush1.bf16.msra.mxu1 %v14090_v61 }
 0x474   :  { %9835 = vmatpush1.bf16.msra.mxu0 %v14093_v6  ;;  %5311 = vmatprep.subr.bf16.mxu1 %v14098_v53 }
 0x475   :  { %9836 = vmatprep.subr.bf16.mxu0 %v14101_v12  ;;  %v9869_v12 = vlaneseq }
 0x477   :  { %5312 = vmatpush1.bf16.msra.mxu1 %v14096_v13  ;;  %v9870_v13 = vshrl.u32 %v9869_v12, 7 }
 0x478   :  { %9837 = vmatpush1.bf16.msra.mxu0 %v14099_v20  ;;  %5313 = vmatprep.subr.bf16.mxu1 %v14104_v40 }
 0x479   :  { %9838 = vmatprep.subr.bf16.mxu0 %v14107_v34  ;;  %v9871_v20 = vsub.s32 0, %v9870_v13  ;;  %v9875_v40 = vsub.s32 1, %v9870_v13 }
 0x47b   :  { %5314 = vmatpush1.bf16.msra.mxu1 %v14102_v18 }
 0x47c   :  { %9839 = vmatpush1.bf16.msra.mxu0 %v14105_v29  ;;  %5315 = vmatprep.subr.bf16.mxu1 %v14110_v21 }
 0x47d   :  { %9840 = vmatprep.subr.bf16.mxu0 %v14113_v26 }
 0x47f   :  { %5316 = vmatpush1.bf16.msra.mxu1 %v14108_v36 }
 0x480   :  { %9841 = vmatpush1.bf16.msra.mxu0 %v14111_v19 }
 0x482   :  { %5318 = vmatmul.mubr.bf16.vlgmr.msra.gmra.mrb[0].mxu1 %v4562_v48 }
 0x483   :  { %9843 = vmatmul.mubr.bf16.vlgmr.msra.gmra.mrb[0].mxu0 %v12064_v16  ;;  %5327 = vmatprep.mubr.bf16.mxu1 %v4564_v38 }
 0x484   :  { %9852 = vmatprep.mubr.bf16.mxu0 %v12073_v27 }
 0x48a   :  { %5328 = vmatmul.mubr.bf16.gmra.mrb[72].mxu1 %v4561_v3 }
 0x48b   :  { %9853 = vmatmul.mubr.bf16.gmra.mrb[72].mxu0 %v12072_v55 }
 0x49d   :  { %v4336_v23 = vpop.f32.mrb[60].mxu1 }
 0x49e   :  { %v9701_v10 = vpop.f32.mrb[60].mxu0  ;;  %v4337_v7 = vadd.f32 %v4336_v23, %v18555_v17  ;;  %v4338_v62 = vpop.f32.mrb[61].mxu1 }
 0x49f   :  { %v9703_v50 = vpop.f32.mrb[61].mxu0  ;;  %v4339_v56 = vadd.f32 %v4338_v62, %v18561_v52  ;;  %v4340_v37 = vpop.f32.mrb[62].mxu1 }
 0x4a0   :  { %v9705_v63 = vpop.f32.mrb[62].mxu0  ;;  %v4341_v8 = vpop.f32.mrb[63].mxu1 }
 0x4a1   :  { %v9706_v30 = vpop.f32.mrb[63].mxu0 }
 0x4dd   :  { %v4387_v14 = vpop.f32.mrb[64].mxu1 }
 0x4de   :  { %v9752_v39 = vpop.f32.mrb[64].mxu0  ;;  %v4388_v1 = vadd.f32 %v4387_v14, %v4337_v7  ;;  %v4389_v45 = vpop.f32.mrb[65].mxu1 }
 0x4df   :  { %v9753_v38 = vadd.f32 %v9752_v39, %v9701_v10  ;;  %v9754_v33 = vpop.f32.mrb[65].mxu0  ;;  %v4390_v22 = vadd.f32 %v4389_v45, %v4339_v56  ;;  %v4391_v4 = vpop.f32.mrb[66].mxu1 }
 0x4e0   :  { %v9755_v28 = vadd.f32 %v9754_v33, %v9703_v50  ;;  %v9756_v58 = vpop.f32.mrb[66].mxu0  ;;  %v18669_v17 = vadd.f32 %v4388_v1, %v18106_v31  ;;  %v4392_v0 = vpop.f32.mrb[67].mxu1  ;;  %v9867_v31 = vld [vmem:[%s18700_s2] sm:$0x3] }
 0x4e1   :  { %v9757_v9 = vpop.f32.mrb[67].mxu0  ;;  %v18672_v52 = vadd.f32 %v4390_v22, %v18115_v43  ;;  %v9872_v43 = vrot.slane %v9867_v31, %v9871_v20  ;;  %v9876_v29 = vrot.slane %v9867_v31, %v9875_v40 }
 0x51d   :  { %v5278_v11 = vpop.f32.mrb[68].mxu1 }
 0x51e   :  { %v9803_v57 = vpop.f32.mrb[68].mxu0  ;;  %v5280_v25 = vpop.f32.mrb[69].mxu1 }
 0x51f   :  { %v9804_v35 = vadd.f32 %v9803_v57, %v9753_v38  ;;  %v9805_v24 = vpop.f32.mrb[69].mxu0  ;;  %v5282_v59 = vpop.f32.mrb[70].mxu1 }
 0x520   :  { %v9806_v41 = vadd.f32 %v9805_v24, %v9755_v28  ;;  %v9807_v61 = vpop.f32.mrb[70].mxu0  ;;  %v5283_v6 = vpop.f32.mrb[71].mxu1 }
 0x521   :  { %v9808_v53 = vpop.f32.mrb[71].mxu0 }
 0x555   :  { %v5319_v34 = vpop.f32.mrb[0].mxu1 }
 0x556   :  { %v9844_v18 = vpop.f32.mrb[0].mxu0  ;;  %v5321_v26 = vpop.f32.mrb[1].mxu1 }
 0x557   :  { %v12208_v21 = vadd.f32 %v9844_v18, %v5319_v34  ;;  %v9846_v36 = vpop.f32.mrb[1].mxu0  ;;  %v5323_v60 = vpop.f32.mrb[2].mxu1 }
 0x558   :  { %v12209_v19 = vadd.f32 %v9846_v36, %v5321_v26  ;;  %v9848_v3 = vpop.f32.mrb[2].mxu0  ;;  %v5325_v54 = vpop.f32.mrb[3].mxu1 }
 0x559   :  { %v9879_v16 = vadd.f32 %v12208_v21, %v9872_v43  ;;  %v12210_v48 = vadd.f32 %v9848_v3, %v5323_v60  ;;  %v9850_v27 = vpop.f32.mrb[3].mxu0 }
 0x55a   :  { %v9880_v55 = vadd.f32 %v12209_v19, %v9876_v29  ;;  %v12211_v23 = vadd.f32 %v9850_v27, %v5325_v54 }
 0x55b   :  { %vm9885_vm7 = vcmp.ge.f32.partialorder %v9879_v16, 0.0  ;;  %v9891_v10 = vmul.f32 0.01, %v9879_v16  ;;  %v9881_v7 = vadd.f32 %v12210_v48, %v9872_v43 }
 0x55c   :  { %vm9886_vm8 = vcmp.ge.f32.partialorder %v9880_v55, 0.0  ;;  %v9892_v62 = vmul.f32 0.01, %v9880_v55  ;;  %v9882_v50 = vadd.f32 %v12211_v23, %v9876_v29 }
 0x55d   :  { %v9897_v56 = vsel %vm9885_vm7, %v9879_v16, %v9891_v10  ;;  %vm9887_vm9 = vcmp.ge.f32.partialorder %v9881_v7, 0.0  ;;  %v9893_v37 = vmul.f32 0.01, %v9881_v7  ;;  %v5329_v30 = vpop.f32.mrb[72].mxu1 }
 0x55e   :  { %v9898_v63 = vsel %vm9886_vm8, %v9880_v55, %v9892_v62  ;;  %vm9888_vm10 = vcmp.ge.f32.partialorder %v9882_v50, 0.0  ;;  %v9894_v8 = vmul.f32 0.01, %v9882_v50  ;;  %v9854_v14 = vpop.f32.mrb[72].mxu0  ;;  %v5330_v38 = vadd.f32 %v5329_v30, %v5278_v11  ;;  %v5331_v33 = vpop.f32.mrb[73].mxu1 }
 0x55f   :  { %v12205_v39 = vpack.c.bf16 %v9898_v63, %v9897_v56  ;;  %v9899_v1 = vsel %vm9887_vm9, %v9881_v7, %v9893_v37  ;;  %v9855_v45 = vadd.f32 %v9854_v14, %v9804_v35  ;;  %v9856_v22 = vpop.f32.mrb[73].mxu0  ;;  %v5332_v4 = vadd.f32 %v5331_v33, %v5280_v25  ;;  %v5333_v0 = vpop.f32.mrb[74].mxu1 }
 0x560   :  { %v9900_v28 = vsel %vm9888_vm10, %v9882_v50, %v9894_v8  ;;  %v9857_v58 = vadd.f32 %v9856_v22, %v9806_v41  ;;  %v9858_v9 = vpop.f32.mrb[74].mxu0  ;;  %v5381_v24 = vadd.f32 %v15366_v44, %v5330_v38  ;;  %v5334_v59 = vpop.f32.mrb[75].mxu1 }
 0x561   :  { %9923 = vst [vmem:[%s18701_s3] sm:$0xff] %v12205_v39  ;;  %v12206_v57 = vpack.c.bf16 %v9900_v28, %v9899_v1  ;;  %v9859_v61 = vpop.f32.mrb[75].mxu0  ;;  %v5383_v6 = vadd.f32 %v15373_v46, %v5332_v4 }
 0x562   :  { %v5432_v11 = vadd.f32 %v15596_v2, %v5381_v24 }
 0x563   :  { %9924 = vst [vmem:[%s18701_s3 + $0x8] sm:$0xff] %v12206_v57  ;;  %v5434_v35 = vadd.f32 %v15601_v49, %v5383_v6 }
 0x564   :  { %v5442_v25 = vadd.f32 %v5432_v11, %v18669_v17 }
 0x565   :  { %v5443_v41 = vadd.f32 %v5434_v35, %v18672_v52 }
 0x566   :  { %v6598_v53 = vadd.f32 %v16565_v32, %v5442_v25 }
 0x567   :  { %v6599_v44 = vadd.f32 %v16571_v47, %v5443_v41 }
 0x568   :  { %v7642_v12 = vadd.f32 %v17622_v5, %v6598_v53 }
 0x569   :  { %v7643_v46 = vadd.f32 %v17628_v42, %v6599_v44 }
 0x56a   :  { %v8854_v13 = vadd.f32 %v18558_v51, %v7642_v12 }
 0x56b   :  { %v8855_v20 = vadd.f32 %v18564_v15, %v7643_v46 }
 0x56c   :  { %v9865_v31 = vadd.f32 %v9855_v45, %v8854_v13 }
 0x56d   :  { %v9866_v2 = vadd.f32 %v9857_v58, %v8855_v20 }
 0x56e   :  { %v9883_v40 = vadd.f32 %v9872_v43, %v9865_v31 }
 0x56f   :  { %v9884_v49 = vadd.f32 %v9876_v29, %v9866_v2 }
 0x570   :  { %vm9889_vm11 = vcmp.ge.f32.partialorder %v9883_v40, 0.0  ;;  %v9895_v17 = vmul.f32 0.01, %v9883_v40 }
 0x571   :  { %vm9890_vm12 = vcmp.ge.f32.partialorder %v9884_v49, 0.0  ;;  %v9896_v52 = vmul.f32 0.01, %v9884_v49 }
 0x572   :  { %v9901_v34 = vsel %vm9889_vm11, %v9883_v40, %v9895_v17 }
 0x573   :  { %v9902_v32 = vsel %vm9890_vm12, %v9884_v49, %v9896_v52 }
 0x574   :  { %v12207_v18 = vpack.c.bf16 %v9902_v32, %v9901_v34 }
 0x576   :  { %9925 = vst [vmem:[%s18701_s3 + $0x10] sm:$0x11] %v12207_v18 }

</bundles_post_ra>
